<compile_context>
chip_gen: v7x
topology: tpu7x:2x2x1
jax: 0.10.0
libtpu: 0.0.40
codegen_flags: <defaults>
</compile_context>

<pallas_src>
import jax
import jax.numpy as jnp
from jax import lax
from jax.experimental import pallas as pl
from jax.experimental.pallas import tpu as pltpu

_INV_SQRT2 = 0.7071067811865476


def _erf(x):
    # Abramowitz & Stegun 7.1.26, |abs err| < 1.5e-7 (~f32 precision).
    a1, a2, a3, a4, a5 = 0.254829592, -0.284496736, 1.421413741, -1.453152027, 1.061405429
    p = 0.3275911
    sgn = jnp.where(x >= 0.0, 1.0, -1.0)
    ax = jnp.abs(x)
    t = pl.reciprocal(1.0 + p * ax, approx=True)      # EUP reciprocal instead of VALU divide
    poly = ((((a5 * t + a4) * t + a3) * t + a2) * t + a1) * t
    return sgn * (1.0 - poly * jnp.exp(-ax * ax))


def _gelu_exact(x):
    # PyTorch nn.GELU() default (approximate='none'): 0.5*x*(1+erf(x/sqrt(2)))
    return 0.5 * x * (1.0 + _erf(x * _INV_SQRT2))


# ------------------------------ fused Pallas kernel ------------------------------

def _conv_block_kernel(x_ref, wdw_ref, w1_ref, b1_ref, w2_ref, b2_ref, o_ref):
    x_f32 = x_ref[...]                                           # [B, C*H*W] NCHW-flat f32
    # (1) ZeroPad2d(3) + depthwise 7x7 + pointwise 1x1, folded into ONE matmul against the
    #     pre-unrolled conv matrix (rows already in NCHW-flat input order, padding folded in):
    #     [B, C*H*W] @ [C*H*W, Hm*Wm*C] -> y [B, 784] f32.
    y = jnp.dot(x_f32.astype(wdw_ref.dtype), wdw_ref[...],
                preferred_element_type=jnp.float32)

    # (2) LayerNorm with normalized_shape == full tensor shape: single mean/var over ALL
    #     elements (eps=1e-5, no affine).  Single-pass stats with an explicit element count.
    inv_n = 1.0 / float(y.shape[0] * y.shape[1])                 # = 1 / (B*Hm*Wm*C), static
    s1 = jnp.sum(y)
    s2 = jnp.sum(y * y)
    mu = s1 * inv_n
    var = s2 * inv_n - mu * mu
    y = (y - mu) * lax.rsqrt(var + 1e-5)

    # (3) linear_1 (7x7 valid conv) + bias + exact GELU on a lane-dense [B, H*W*4C] slab.
    h = jnp.dot(y.astype(w1_ref.dtype), w1_ref[...],
                preferred_element_type=jnp.float32) + b1_ref[...]
    h = _gelu_exact(h)

    # (4) linear_2 (1x1 conv) + bias + residual; w2's columns (and b2) are already permuted to
    #     NCHW-flat order, so the [64, 256] output needs only a free reshape in the wrapper.
    o_ref[...] = (jnp.dot(h.astype(w2_ref.dtype), w2_ref[...],
                          preferred_element_type=jnp.float32)
                  + b2_ref[...] + x_f32)


# ------------------------- one-time weight folding (pure JAX) -------------------------

def fold_conv_block_params(params, H, W, weight_dtype=jnp.bfloat16):
    """Fold the PyTorch-layout conv weights into dense unrolled-conv matrices.

    Run once (outside the jitted forward).  Row/column orderings:
      * wdw rows  : NCHW-flat input index  c*H*W + h*W + w   (no input padding needed)
      * wdw cols / w1 rows : (i*Wm + j)*C + c   over the Hm x Wm post-pad grid
      * w1 cols / w2 rows  : (p*W + q)*4C + o   over the H x W output grid
      * w2 cols   : NCHW-flat output index co*H*W + p*W + q  (so no output transpose)
    Weight matrices are returned in `weight_dtype` (bf16 for production); biases stay f32.
    """
    dw_w, pw_w = params["dw_w"], params["pw_w"]
    l1_w, l1_b = params["l1_w"], params["l1_b"]
    l2_w, l2_b = params["l2_w"], params["l2_b"]
    C = dw_w.shape[0]
    K = 7
    Hm, Wm = H + 6, W + 6          # grid after ZeroPad2d(3) (= depthwise output grid)
    HW = H * W
    f32 = jnp.float32

    # Fused depthwise*pointwise per-tap weight:  dwpw[c_in, c_out, dy, dx]
    dwpw = jnp.einsum("cij,oc->coij", dw_w[:, 0].astype(f32), pw_w[:, :, 0, 0].astype(f32))

    # Stage-1 unrolled conv matrix, built directly against the UNPADDED input:
    # combined ZeroPad2d(3) + 'same'(3) means the conv reads x[i + dy - 6]; the 6-dy offset in
    # the shift matrices supplies that, and out-of-range taps simply contribute nothing (zero).
    sh_h1 = jnp.stack([jnp.eye(H, Hm, k=6 - d, dtype=f32) for d in range(K)])   # [7, H, Hm]
    sh_w1 = jnp.stack([jnp.eye(W, Wm, k=6 - d, dtype=f32) for d in range(K)])   # [7, W, Wm]
    wdw = jnp.einsum("aYy,bXx,coab->cYXyxo", sh_h1, sh_w1, dwpw)
    wdw = wdw.reshape(C * H * W, Hm * Wm * C)                                   # [256, 784]

    # linear_1 (7x7 valid, C -> 4C): [Hm*Wm*C, H*W*4C]
    sh_h2 = jnp.stack([jnp.eye(Hm, H, k=-d, dtype=f32) for d in range(K)])      # [7, Hm, H]
    sh_w2 = jnp.stack([jnp.eye(Wm, W, k=-d, dtype=f32) for d in range(K)])      # [7, Wm, W]
    w1 = jnp.einsum("aYy,bXx,ocab->YXcyxo", sh_h2, sh_w2, l1_w.astype(f32))
    w1 = w1.reshape(Hm * Wm * C, HW * 4 * C)                                    # [784, 1024]
    b1 = jnp.tile(l1_b.astype(f32), HW).reshape(1, HW * 4 * C)

    # linear_2 (1x1, 4C -> C) block-diagonal over pixels, with the NCHW-flat output ordering
    # folded into its columns (and into b2), so the wrapper's final transpose disappears.
    w2s = l2_w[:, :, 0, 0].astype(f32)                                          # [co, ci]
    w2 = jnp.einsum("pq,co->pocq", jnp.eye(HW, dtype=f32), w2s)
    w2 = w2.reshape(HW * 4 * C, C * HW)                                         # [1024, 256]
    b2 = jnp.repeat(l2_b.astype(f32), HW).reshape(1, C * HW)

    return dict(wdw=wdw.astype(weight_dtype), w1=w1.astype(weight_dtype),
                w2=w2.astype(weight_dtype), b1=b1, b2=b2)


# ------------------------------------ forward ------------------------------------

def conv_block_forward(x, folded):
    """x: [B, C, H, W] NCHW (B must be 64, as required by the module's LayerNorm; H == W)."""
    B, C, H, W = x.shape
    x_flat = x.reshape(B, C * H * W)          # pure reshape (NCHW-flat); no transpose, no pad

    # Single fused kernel, no grid: every operand is a whole-array VMEM block (~2.6 MB of
    # operands with bf16 weights), output [64, 256] lane-dense.  x_flat serves as both the
    # stage-1 matmul input and the residual.
    out_flat = pl.pallas_call(
        _conv_block_kernel,
        out_shape=jax.ShapeDtypeStruct((B, C * H * W), jnp.float32),
        compiler_params=pltpu.CompilerParams(vmem_limit_bytes=32 * 1024 * 1024),
    )(x_flat, folded["wdw"], folded["w1"], folded["b1"], folded["w2"], folded["b2"])

    return out_flat.reshape(B, C, H, W)       # columns are already NCHW-flat: reshape only


# --------------------------- reference (pure JAX, no Pallas) ---------------------------

def ref_forward(x, params):
    C = x.shape[1]
    dn = ("NCHW", "OIHW", "NCHW")
    hi = lax.Precision.HIGHEST
    residual = x
    h = jnp.pad(x, ((0, 0), (0, 0), (3, 3), (3, 3)))
    h = lax.conv_general_dilated(h, params["dw_w"], (1, 1), "SAME",
                                 feature_group_count=C, dimension_numbers=dn, precision=hi)
    h = lax.conv_general_dilated(h, params["pw_w"], (1, 1), "VALID",
                                 dimension_numbers=dn, precision=hi)
    mu = jnp.mean(h)
    var = jnp.mean((h - mu) ** 2)
    h = (h - mu) / jnp.sqrt(var + 1e-5)
    h = lax.conv_general_dilated(h, params["l1_w"], (1, 1), "VALID",
                                 dimension_numbers=dn, precision=hi)
    h = h + params["l1_b"][None, :, None, None]
    h = jax.nn.gelu(h, approximate=False)
    h = lax.conv_general_dilated(h, params["l2_w"], (1, 1), "VALID",
                                 dimension_numbers=dn, precision=hi)
    h = h + params["l2_b"][None, :, None, None]
    return h + residual


def init_params(key, C):
    ks = jax.random.split(key, 6)

    def u(k, shape, fan_in):
        bound = 1.0 / (fan_in ** 0.5)
        return jax.random.uniform(k, shape, jnp.float32, -bound, bound)

    return dict(
        dw_w=u(ks[0], (C, 1, 7, 7), 49),          # depthwise, bias=False
        pw_w=u(ks[1], (C, C, 1, 1), C),           # pointwise, bias=False
        l1_w=u(ks[2], (4 * C, C, 7, 7), C * 49),  # linear_1 (Conv2d default bias=True)
        l1_b=u(ks[3], (4 * C,), C * 49),
        l2_w=u(ks[4], (C, 4 * C, 1, 1), 4 * C),   # linear_2 (Conv2d default bias=True)
        l2_b=u(ks[5], (C,), 4 * C),
    )


if __name__ == "__main__":
    # Batch is forced to 64 by LayerNorm normalized_shape=[64, C, W+6, H+6]; H == W avoids the
    # module's width/height swap; channels & spatial kept small.
    B, C, H, W = 64, 4, 8, 8
    key = jax.random.PRNGKey(0)
    kx, kp = jax.random.split(key)
    x = jax.random.normal(kx, (B, C, H, W), jnp.float32)
    params = init_params(kp, C)

    ref = ref_forward(x, params)
    fwd = jax.jit(conv_block_forward)

    # f32-folded run: tight validation of the weight folding / index plumbing.
    folded_f32 = fold_conv_block_params(params, H, W, weight_dtype=jnp.float32)
    out_f32 = jax.block_until_ready(fwd(x, folded_f32))
    assert out_f32.shape == (B, C, H, W), out_f32.shape
    err_f32 = float(jnp.max(jnp.abs(out_f32 - ref)))
    # Budget: approximate erf/reciprocal only (folding is exact in f32).
    assert err_f32 < 1e-2, f"f32-folded max abs err = {err_f32}"

    # bf16-folded run: the production configuration (halves the dominant weight DMA).
    folded_bf16 = fold_conv_block_params(params, H, W, weight_dtype=jnp.bfloat16)
    out = jax.block_until_ready(fwd(x, folded_bf16))
    assert out.shape == (B, C, H, W), out.shape
    err_bf16 = float(jnp.max(jnp.abs(out - ref)))
    # Budget: bf16 weight/activation quantization (~2^-9 relative) through two 196/16-tap
    # matmuls on O(1) activations -> max |err| ~ few e-3; assert with margin.
    assert err_bf16 < 3e-2, f"bf16-folded max abs err = {err_bf16}"

    print("KERNEL_OK")
</pallas_src>

<mosaic_0001>
module attributes {stable_mosaic.version = 11 : i64} {
  func.func @_conv_block_kernel(%arg0: memref<64x256xf32, #tpu.memory_space<vmem>>, %arg1: memref<256x784xf32, #tpu.memory_space<vmem>>, %arg2: memref<784x1024xf32, #tpu.memory_space<vmem>>, %arg3: memref<1x1024xf32, #tpu.memory_space<vmem>>, %arg4: memref<1024x256xf32, #tpu.memory_space<vmem>>, %arg5: memref<1x256xf32, #tpu.memory_space<vmem>>, %arg6: memref<64x256xf32, #tpu.memory_space<vmem>>) attributes {dimension_semantics = [], scalar_prefetch = 0 : i64, scratch_operands = 0 : i64, tpu.core_type = #tpu.core_type<tc>} {
    %c0 = arith.constant 0 : index
    %c0_0 = arith.constant 0 : index
    %0 = vector.load %arg0[%c0, %c0_0] : memref<64x256xf32, #tpu.memory_space<vmem>>, vector<64x256xf32>
    %c0_1 = arith.constant 0 : index
    %c0_2 = arith.constant 0 : index
    %1 = vector.load %arg1[%c0_1, %c0_2] : memref<256x784xf32, #tpu.memory_space<vmem>>, vector<256x784xf32>
    %cst = arith.constant dense<0.000000e+00> : vector<64x784xf32>
    %2 = tpu.matmul %0, %1, %cst {dimension_numbers = #tpu.dot_dimension_numbers<[1], [0], [0], [1], [0, 0, 1, 1], [], []>} : vector<64x256xf32>, vector<256x784xf32>, vector<64x784xf32> -> vector<64x784xf32>
    %3 = vector.shape_cast %2 : vector<64x784xf32> to vector<1x64x784xf32>
    %cst_3 = arith.constant dense<0.000000e+00> : vector<1xf32>
    %4 = vector.multi_reduction <add>, %3, %cst_3 [1, 2] : vector<1x64x784xf32> to vector<1xf32>
    %5 = vector.shape_cast %4 : vector<1xf32> to vector<1x1x1xf32>
    %6 = vector.extract %5[0, 0, 0] : f32 from vector<1x1x1xf32>
    %7 = arith.mulf %2, %2 : vector<64x784xf32>
    %8 = vector.shape_cast %7 : vector<64x784xf32> to vector<1x64x784xf32>
    %cst_4 = arith.constant dense<0.000000e+00> : vector<1xf32>
    %9 = vector.multi_reduction <add>, %8, %cst_4 [1, 2] : vector<1x64x784xf32> to vector<1xf32>
    %10 = vector.shape_cast %9 : vector<1xf32> to vector<1x1x1xf32>
    %11 = vector.extract %10[0, 0, 0] : f32 from vector<1x1x1xf32>
    %cst_5 = arith.constant 1.99298465E-5 : f32
    %12 = arith.mulf %6, %cst_5 : f32
    %cst_6 = arith.constant 1.99298465E-5 : f32
    %13 = arith.mulf %11, %cst_6 : f32
    %14 = arith.mulf %12, %12 : f32
    %15 = arith.subf %13, %14 : f32
    %16 = vector.broadcast %12 : f32 to vector<64x784xf32>
    %17 = arith.subf %2, %16 : vector<64x784xf32>
    %cst_7 = arith.constant 9.99999974E-6 : f32
    %18 = arith.addf %15, %cst_7 : f32
    %19 = math.rsqrt %18 : f32
    %20 = vector.broadcast %19 : f32 to vector<64x784xf32>
    %21 = arith.mulf %17, %20 : vector<64x784xf32>
    %c0_8 = arith.constant 0 : index
    %c0_9 = arith.constant 0 : index
    %22 = vector.load %arg2[%c0_8, %c0_9] : memref<784x1024xf32, #tpu.memory_space<vmem>>, vector<784x1024xf32>
    %cst_10 = arith.constant dense<0.000000e+00> : vector<64x1024xf32>
    %23 = tpu.matmul %21, %22, %cst_10 {dimension_numbers = #tpu.dot_dimension_numbers<[1], [0], [0], [1], [0, 0, 1, 1], [], []>} : vector<64x784xf32>, vector<784x1024xf32>, vector<64x1024xf32> -> vector<64x1024xf32>
    %c0_11 = arith.constant 0 : index
    %c0_12 = arith.constant 0 : index
    %24 = vector.load %arg3[%c0_11, %c0_12] : memref<1x1024xf32, #tpu.memory_space<vmem>>, vector<1x1024xf32>
    %25 = vector.broadcast %24 : vector<1x1024xf32> to vector<64x1024xf32>
    %26 = arith.addf %23, %25 : vector<64x1024xf32>
    %cst_13 = arith.constant 5.000000e-01 : f32
    %27 = vector.broadcast %cst_13 : f32 to vector<64x1024xf32>
    %28 = arith.mulf %27, %26 : vector<64x1024xf32>
    %cst_14 = arith.constant 0.707106769 : f32
    %29 = vector.broadcast %cst_14 : f32 to vector<64x1024xf32>
    %30 = arith.mulf %26, %29 : vector<64x1024xf32>
    %cst_15 = arith.constant 0.000000e+00 : f32
    %31 = vector.broadcast %cst_15 : f32 to vector<64x1024xf32>
    %32 = arith.cmpf oge, %30, %31 : vector<64x1024xf32>
    %cst_16 = arith.constant 1.000000e+00 : f32
    %cst_17 = arith.constant -1.000000e+00 : f32
    %33 = vector.broadcast %cst_16 : f32 to vector<64x1024xf32>
    %34 = vector.broadcast %cst_17 : f32 to vector<64x1024xf32>
    %35 = arith.select %32, %33, %34 : vector<64x1024xi1>, vector<64x1024xf32>
    %36 = math.absf %30 : vector<64x1024xf32>
    %cst_18 = arith.constant 0.327591091 : f32
    %37 = vector.broadcast %cst_18 : f32 to vector<64x1024xf32>
    %38 = arith.mulf %37, %36 : vector<64x1024xf32>
    %cst_19 = arith.constant 1.000000e+00 : f32
    %39 = vector.broadcast %cst_19 : f32 to vector<64x1024xf32>
    %40 = arith.addf %39, %38 : vector<64x1024xf32>
    %41 = tpu.reciprocal %40 {approx = true} : vector<64x1024xf32> -> vector<64x1024xf32>
    %cst_20 = arith.constant 1.06140542 : f32
    %42 = vector.broadcast %cst_20 : f32 to vector<64x1024xf32>
    %43 = arith.mulf %42, %41 : vector<64x1024xf32>
    %cst_21 = arith.constant -1.45315206 : f32
    %44 = vector.broadcast %cst_21 : f32 to vector<64x1024xf32>
    %45 = arith.addf %43, %44 : vector<64x1024xf32>
    %46 = arith.mulf %45, %41 : vector<64x1024xf32>
    %cst_22 = arith.constant 1.42141378 : f32
    %47 = vector.broadcast %cst_22 : f32 to vector<64x1024xf32>
    %48 = arith.addf %46, %47 : vector<64x1024xf32>
    %49 = arith.mulf %48, %41 : vector<64x1024xf32>
    %cst_23 = arith.constant -0.284496725 : f32
    %50 = vector.broadcast %cst_23 : f32 to vector<64x1024xf32>
    %51 = arith.addf %49, %50 : vector<64x1024xf32>
    %52 = arith.mulf %51, %41 : vector<64x1024xf32>
    %cst_24 = arith.constant 0.254829586 : f32
    %53 = vector.broadcast %cst_24 : f32 to vector<64x1024xf32>
    %54 = arith.addf %52, %53 : vector<64x1024xf32>
    %55 = arith.mulf %54, %41 : vector<64x1024xf32>
    %cst_25 = arith.constant 0.000000e+00 : f32
    %56 = vector.broadcast %cst_25 : f32 to vector<64x1024xf32>
    %57 = arith.subf %56, %36 : vector<64x1024xf32>
    %58 = arith.mulf %57, %36 : vector<64x1024xf32>
    %59 = math.exp %58 : vector<64x1024xf32>
    %60 = arith.mulf %55, %59 : vector<64x1024xf32>
    %cst_26 = arith.constant 1.000000e+00 : f32
    %61 = vector.broadcast %cst_26 : f32 to vector<64x1024xf32>
    %62 = arith.subf %61, %60 : vector<64x1024xf32>
    %63 = arith.mulf %35, %62 : vector<64x1024xf32>
    %cst_27 = arith.constant 1.000000e+00 : f32
    %64 = vector.broadcast %cst_27 : f32 to vector<64x1024xf32>
    %65 = arith.addf %64, %63 : vector<64x1024xf32>
    %66 = arith.mulf %28, %65 : vector<64x1024xf32>
    %c0_28 = arith.constant 0 : index
    %c0_29 = arith.constant 0 : index
    %67 = vector.load %arg4[%c0_28, %c0_29] : memref<1024x256xf32, #tpu.memory_space<vmem>>, vector<1024x256xf32>
    %cst_30 = arith.constant dense<0.000000e+00> : vector<64x256xf32>
    %68 = tpu.matmul %66, %67, %cst_30 {dimension_numbers = #tpu.dot_dimension_numbers<[1], [0], [0], [1], [0, 0, 1, 1], [], []>} : vector<64x1024xf32>, vector<1024x256xf32>, vector<64x256xf32> -> vector<64x256xf32>
    %c0_31 = arith.constant 0 : index
    %c0_32 = arith.constant 0 : index
    %69 = vector.load %arg5[%c0_31, %c0_32] : memref<1x256xf32, #tpu.memory_space<vmem>>, vector<1x256xf32>
    %70 = vector.broadcast %69 : vector<1x256xf32> to vector<64x256xf32>
    %71 = arith.addf %68, %70 : vector<64x256xf32>
    %72 = arith.addf %71, %0 : vector<64x256xf32>
    %c0_33 = arith.constant 0 : index
    %c0_34 = arith.constant 0 : index
    %73 = vector.load %arg6[%c0_33, %c0_34] : memref<64x256xf32, #tpu.memory_space<vmem>>, vector<64x256xf32>
    tpu.vector_store %arg6[%c0_33, %c0_34], %72 {strides = array<i32>} : memref<64x256xf32, #tpu.memory_space<vmem>>, vector<64x256xf32>,
    return
  }
}

</mosaic_0001>

<bundles_post_ra>
// kernel: conv_block_forward.1
= control target key start
LH: loop header
LB: loop body
LE: loop exit
PB: predicated region body
PF: predicated region fallthrough
CT: control target
= control target key end

     0   :  { %11 = vsyncpa [#allocation3], 0  ;;  %s12688_s0 = inlined_call_operand.vmem [shape: f32[64,256], index: 0, kind: input, shape index: {}]   ;;  %s12689_s1 = inlined_call_operand.vmem [shape: f32[256,784], index: 1, kind: input, shape index: {}]   ;;  %s12690_s2 = inlined_call_operand.hbm [shape: f32[784,1024], index: 2, kind: input, shape index: {}]   ;;  %s12691_s3 = inlined_call_operand.hbm [shape: f32[1,1024], index: 3, kind: input, shape index: {}]   ;;  %s12692_s4 = inlined_call_operand.hbm [shape: f32[1024,256], index: 4, kind: input, shape index: {}]   ;;  %s12693_s5 = inlined_call_operand.hbm [shape: f32[1,256], index: 5, kind: input, shape index: {}]   ;;  %s12694_s6 = inlined_call_operand.vmem [shape: f32[64,256], index: 6, kind: output, shape index: {}]  }
   0x1   :  { %12 = vsyncpa [#allocation5], 0 }
   0x2   :  { %13 = vsyncpa [#allocation8], 0  ;;  %s8219_s21 = smov [#allocation4]   ;;  %s8220_s23 = smov [#allocation2]  }
   0x3   :  { %s36_s22 = sshll.u32 %s8219_s21, 4  ;;  %s23_s24 = sshll.u32 %s8220_s23, 4  ;;  %s37_s22 = int_to_ptr.vmem [resolvable:$true] %s36_s22  ;;  %s8264_s24 = int_to_ptr.vmem [resolvable:$true] %s23_s24 }
   0x4   :  { %s8125_s27 = scalar_lea.hbm %s12691_s3, 128 }
   0x5   :  { %p8126_p0 = scmp.ne.s32.totalorder %s12691_s3, %s8125_s27  ;;  %p8129_p1 = scmp.lt.u32.totalorder %s8125_s27, %s12691_s3 }
   0x7   :  { %p8131_p2 = pnand %p8129_p1, %p8126_p0 }
   0x9   :  { %8134 = shalt.err (!%p8131_p2)
}
   0xa   :  { %s8135_s8 = scalar_lea.vmem %s37_s22, 128  ;;  %p8140_p4 = scmp.lt.s32.totalorder %s37_s22, %s37_s22 }
   0xb   :  { %p8136_p3 = scmp.ne.s32.totalorder %s37_s22, %s8135_s8  ;;  %p8141_p5 = scmp.lt.s32.totalorder %s8135_s8, %s8135_s8 }
   0xd   :  { %p8142_p6 = por %p8141_p5, %p8140_p4 }
   0xf   :  { %p8143_p7 = pnand %p8142_p6, %p8136_p3 }
  0x11   :  { %8146 = shalt.err (!%p8143_p7)
}
  0x12   :  { %39 = dma.hbm_to_vmem [thread:$0]  %s12691_s3, 128, %s37_s22, [#allocation5]  }
  0x13   :  { %s8147_s13 = scalar_lea.hbm %s12690_s2, 100352 }
  0x14   :  { %p8148_p8 = scmp.ne.s32.totalorder %s12690_s2, %s8147_s13  ;;  %p8151_p9 = scmp.lt.u32.totalorder %s8147_s13, %s12690_s2 }
  0x16   :  { %p8153_p10 = pnand %p8151_p9, %p8148_p8 }
  0x18   :  { %8156 = shalt.err (!%p8153_p10)
}
  0x19   :  { %s8157_s18 = scalar_lea.vmem %s8264_s24, 100352  ;;  %p8162_p12 = scmp.lt.s32.totalorder %s8264_s24, %s8264_s24 }
  0x1a   :  { %p8158_p11 = scmp.ne.s32.totalorder %s8264_s24, %s8157_s18  ;;  %p8163_p13 = scmp.lt.s32.totalorder %s8157_s18, %s8157_s18 }
  0x1c   :  { %p8164_p0 = por %p8163_p13, %p8162_p12 }
  0x1e   :  { %p8165_p1 = pnand %p8164_p0, %p8158_p11 }
  0x20   :  { %8168 = shalt.err (!%p8165_p1)
}
  0x21   :  { %s8221_s3 = smov 1024   ;;  %s8222_s19 = smov 64  }
  0x22   :  { %29 = dma.hbm_to_vmem [thread:$0]  %s12690_s2, 100352, %s8264_s24, [#allocation3], %s8221_s3, %s8221_s3, %s8222_s19  }
  0x23   :  { %s8223_s22 = smov [#allocation6]   ;;  %s8169_s27 = scalar_lea.hbm %s12692_s4, 32768 }
  0x24   :  { %s45_s23 = sshll.u32 %s8223_s22, 4  ;;  %p8170_p2 = scmp.ne.s32.totalorder %s12692_s4, %s8169_s27  ;;  %s46_s23 = int_to_ptr.vmem [resolvable:$true] %s45_s23 }
  0x25   :  { %p8173_p3 = scmp.lt.u32.totalorder %s8169_s27, %s12692_s4 }
  0x27   :  { %p8175_p4 = pnand %p8173_p3, %p8170_p2 }
  0x29   :  { %8178 = shalt.err (!%p8175_p4)
}
  0x2a   :  { %s8179_s8 = scalar_lea.vmem %s46_s23, 32768  ;;  %p8184_p6 = scmp.lt.s32.totalorder %s46_s23, %s46_s23 }
  0x2b   :  { %p8180_p5 = scmp.ne.s32.totalorder %s46_s23, %s8179_s8  ;;  %p8185_p7 = scmp.lt.s32.totalorder %s8179_s8, %s8179_s8 }
  0x2d   :  { %p8186_p8 = por %p8185_p7, %p8184_p6 }
  0x2f   :  { %p8187_p9 = pnand %p8186_p8, %p8180_p5 }
  0x31   :  { %8190 = shalt.err (!%p8187_p9)
}
  0x32   :  { %s8224_s2 = smov 256   ;;  %s8225_s24 = smov 16  }
  0x33   :  { %51 = dma.hbm_to_vmem [thread:$0]  %s12692_s4, 32768, %s46_s23, [#allocation5], %s8224_s2, %s8224_s2, %s8225_s24  }
  0x34   :  { %s8226_s11 = smov [#allocation7]   ;;  %s8191_s15 = scalar_lea.hbm %s12693_s5, 32 }
  0x35   :  { %s58_s12 = sshll.u32 %s8226_s11, 4  ;;  %p8192_p10 = scmp.ne.s32.totalorder %s12693_s5, %s8191_s15  ;;  %s59_s12 = int_to_ptr.vmem [resolvable:$true] %s58_s12 }
  0x36   :  { %p8195_p11 = scmp.lt.u32.totalorder %s8191_s15, %s12693_s5 }
  0x38   :  { %p8197_p12 = pnand %p8195_p11, %p8192_p10 }
  0x3a   :  { %8200 = shalt.err (!%p8197_p12)
}
  0x3b   :  { %s8201_s19 = scalar_lea.vmem %s59_s12, 32  ;;  %p8206_p0 = scmp.lt.s32.totalorder %s59_s12, %s59_s12 }
  0x3c   :  { %p8202_p13 = scmp.ne.s32.totalorder %s59_s12, %s8201_s19  ;;  %p8207_p1 = scmp.lt.s32.totalorder %s8201_s19, %s8201_s19 }
  0x3e   :  { %p8208_p2 = por %p8207_p1, %p8206_p0 }
  0x40   :  { %p8209_p3 = pnand %p8208_p2, %p8202_p13 }
  0x42   :  { %8212 = shalt.err (!%p8209_p3)
}
  0x43   :  { %61 = dma.hbm_to_vmem [thread:$0]  %s12693_s5, 32, %s59_s12, [#allocation8]  }
  0x44   :  { %8213 = dma.done.wait [#allocation3], 100352  }
  0x45   :  { %8214 = vsyncadd [#allocation3], 4294866944 }
  0x46   :  { %8215 = dma.done.wait [#allocation5], 32896  }
  0x47   :  { %8216 = vsyncadd [#allocation5], 4294934400 }
  0x48   :  { %8217 = dma.done.wait [#allocation8], 32  }
  0x49   :  { %8218 = vsyncadd [#allocation8], 4294967264  ;;  %v91_v0 = vld [vmem:[%s12689_s1 + $0x8] sm:$0xff]  ;;  %v98_v1 = vld [vmem:[%s12689_s1 + $0x40] sm:$0xff]  ;;  %vm763_vm0 = vcmask 130048  }
  0x4a   :  { %v90_v2 = vld [vmem:[%s12689_s1] sm:$0xff]  ;;  %v6250_v3 = vpack.c.bf16 %v98_v1, %v91_v0  ;;  %v97_v4 = vld [vmem:[%s12689_s1 + $0x38] sm:$0xff]  ;;  %v112_v6 = vld [vmem:[%s12689_s1 + $0xb0] sm:$0xff] }
  0x4b   :  { %v105_v5 = vld [vmem:[%s12689_s1 + $0x78] sm:$0xff]  ;;  %v6252_v7 = vpack.c.bf16 %v97_v4, %v90_v2  ;;  %v104_v9 = vld [vmem:[%s12689_s1 + $0x70] sm:$0xff]  ;;  %v111_v10 = vld [vmem:[%s12689_s1 + $0xa8] sm:$0xff] }
  0x4c   :  { %v6254_v8 = vpack.c.bf16 %v112_v6, %v105_v5  ;;  %v119_v11 = vld [vmem:[%s12689_s1 + $0xe8] sm:$0xff]  ;;  %6251 = vmatprep.subr.bf16.mxu0 %v6250_v3  ;;  %v126_v12 = vld [vmem:[%s12689_s1 + $0x120] sm:$0xff]  ;;  %v6256_v13 = vpack.c.bf16 %v111_v10, %v104_v9  ;;  %v125_v16 = vld [vmem:[%s12689_s1 + $0x118] sm:$0xff] }
  0x4d   :  { %6253 = vmatpush1.bf16.msra.mxu0 %v6252_v7  ;;  %v6258_v14 = vpack.c.bf16 %v126_v12, %v119_v11  ;;  %v118_v15 = vld [vmem:[%s12689_s1 + $0xe0] sm:$0xff]  ;;  %v133_v17 = vld [vmem:[%s12689_s1 + $0x158] sm:$0xff]  ;;  %v140_v18 = vld [vmem:[%s12689_s1 + $0x190] sm:$0xff] }
  0x4e   :  { %6255 = vmatprep.subr.bf16.mxu0 %v6254_v8  ;;  %v6260_v19 = vpack.c.bf16 %v125_v16, %v118_v15  ;;  %v6262_v20 = vpack.c.bf16 %v140_v18, %v133_v17  ;;  %v132_v21 = vld [vmem:[%s12689_s1 + $0x150] sm:$0xff]  ;;  %v139_v22 = vld [vmem:[%s12689_s1 + $0x188] sm:$0xff]  ;;  %v154_v24 = vld [vmem:[%s12689_s1 + $0x200] sm:$0xff] }
  0x4f   :  { %v147_v23 = vld [vmem:[%s12689_s1 + $0x1c8] sm:$0xff]  ;;  %v6264_v25 = vpack.c.bf16 %v139_v22, %v132_v21  ;;  %v146_v27 = vld [vmem:[%s12689_s1 + $0x1c0] sm:$0xff]  ;;  %v153_v28 = vld [vmem:[%s12689_s1 + $0x1f8] sm:$0xff] }
  0x50   :  { %v6266_v26 = vpack.c.bf16 %v154_v24, %v147_v23  ;;  %v161_v29 = vld [vmem:[%s12689_s1 + $0x238] sm:$0xff]  ;;  %v168_v30 = vld [vmem:[%s12689_s1 + $0x270] sm:$0xff]  ;;  %v6268_v31 = vpack.c.bf16 %v153_v28, %v146_v27  ;;  %v167_v34 = vld [vmem:[%s12689_s1 + $0x268] sm:$0xff] }
  0x51   :  { %6257 = vmatpush1.bf16.msra.mxu0 %v6256_v13  ;;  %v6270_v32 = vpack.c.bf16 %v168_v30, %v161_v29  ;;  %v160_v33 = vld [vmem:[%s12689_s1 + $0x230] sm:$0xff]  ;;  %v175_v35 = vld [vmem:[%s12689_s1 + $0x2a8] sm:$0xff]  ;;  %v182_v36 = vld [vmem:[%s12689_s1 + $0x2e0] sm:$0xff] }
  0x52   :  { %6259 = vmatprep.subr.bf16.mxu0 %v6258_v14  ;;  %v6272_v37 = vpack.c.bf16 %v167_v34, %v160_v33  ;;  %v6274_v38 = vpack.c.bf16 %v182_v36, %v175_v35  ;;  %v174_v39 = vld [vmem:[%s12689_s1 + $0x2a0] sm:$0xff]  ;;  %v181_v40 = vld [vmem:[%s12689_s1 + $0x2d8] sm:$0xff]  ;;  %v8406_v41 = vld [vmem:[%s12688_s0 + $0x8] sm:$0xff] }
  0x53   :  { %v189_v42 = vld [vmem:[%s12689_s1 + $0x318] sm:$0xff]  ;;  %v196_v43 = vld [vmem:[%s12689_s1 + $0x350] sm:$0xff]  ;;  %378 = vmatprep.mubr.f32.mxu0 %v8406_v41  ;;  %v6276_v44 = vpack.c.bf16 %v181_v40, %v174_v39  ;;  %v195_v47 = vld [vmem:[%s12689_s1 + $0x348] sm:$0xff] }
  0x54   :  { %v6278_v45 = vpack.c.bf16 %v196_v43, %v189_v42  ;;  %v188_v46 = vld [vmem:[%s12689_s1 + $0x310] sm:$0xff]  ;;  %v203_v48 = vld [vmem:[%s12689_s1 + $0x388] sm:$0xff]  ;;  %v210_v49 = vld [vmem:[%s12689_s1 + $0x3c0] sm:$0xff] }
  0x55   :  { %6261 = vmatpush1.bf16.msra.mxu0 %v6260_v19  ;;  %v6280_v50 = vpack.c.bf16 %v195_v47, %v188_v46  ;;  %v6282_v51 = vpack.c.bf16 %v210_v49, %v203_v48  ;;  %v202_v52 = vld [vmem:[%s12689_s1 + $0x380] sm:$0xff]  ;;  %v209_v53 = vld [vmem:[%s12689_s1 + $0x3b8] sm:$0xff]  ;;  %v224_v55 = vld [vmem:[%s12689_s1 + $0x430] sm:$0xff] }
  0x56   :  { %6263 = vmatprep.subr.bf16.mxu0 %v6262_v20  ;;  %v217_v54 = vld [vmem:[%s12689_s1 + $0x3f8] sm:$0xff]  ;;  %v6284_v56 = vpack.c.bf16 %v209_v53, %v202_v52  ;;  %v216_v58 = vld [vmem:[%s12689_s1 + $0x3f0] sm:$0xff]  ;;  %v223_v59 = vld [vmem:[%s12689_s1 + $0x428] sm:$0xff] }
  0x57   :  { %v6286_v57 = vpack.c.bf16 %v224_v55, %v217_v54  ;;  %v231_v60 = vld [vmem:[%s12689_s1 + $0x468] sm:$0xff]  ;;  %v238_v61 = vld [vmem:[%s12689_s1 + $0x4a0] sm:$0xff]  ;;  %v6288_v62 = vpack.c.bf16 %v223_v59, %v216_v58  ;;  %v237_v1 = vld [vmem:[%s12689_s1 + $0x498] sm:$0xff] }
  0x58   :  { %v6290_v63 = vpack.c.bf16 %v238_v61, %v231_v60  ;;  %v230_v0 = vld [vmem:[%s12689_s1 + $0x460] sm:$0xff]  ;;  %v245_v2 = vld [vmem:[%s12689_s1 + $0x4d8] sm:$0xff]  ;;  %v252_v3 = vld [vmem:[%s12689_s1 + $0x510] sm:$0xff] }
  0x59   :  { %6265 = vmatpush1.bf16.msra.mxu0 %v6264_v25  ;;  %v6292_v4 = vpack.c.bf16 %v237_v1, %v230_v0  ;;  %v6294_v5 = vpack.c.bf16 %v252_v3, %v245_v2  ;;  %v244_v6 = vld [vmem:[%s12689_s1 + $0x4d0] sm:$0xff]  ;;  %v251_v7 = vld [vmem:[%s12689_s1 + $0x508] sm:$0xff]  ;;  %v266_v9 = vld [vmem:[%s12689_s1 + $0x580] sm:$0xff] }
  0x5a   :  { %6267 = vmatprep.subr.bf16.mxu0 %v6266_v26  ;;  %v259_v8 = vld [vmem:[%s12689_s1 + $0x548] sm:$0xff]  ;;  %v6296_v10 = vpack.c.bf16 %v251_v7, %v244_v6  ;;  %v258_v12 = vld [vmem:[%s12689_s1 + $0x540] sm:$0xff]  ;;  %v265_v13 = vld [vmem:[%s12689_s1 + $0x578] sm:$0xff] }
  0x5b   :  { %v6298_v11 = vpack.c.bf16 %v266_v9, %v259_v8  ;;  %v273_v14 = vld [vmem:[%s12689_s1 + $0x5b8] sm:$0xff]  ;;  %v280_v15 = vld [vmem:[%s12689_s1 + $0x5f0] sm:$0xff]  ;;  %v6300_v16 = vpack.c.bf16 %v265_v13, %v258_v12  ;;  %v279_v19 = vld [vmem:[%s12689_s1 + $0x5e8] sm:$0xff] }
  0x5c   :  { %v6302_v17 = vpack.c.bf16 %v280_v15, %v273_v14  ;;  %v272_v18 = vld [vmem:[%s12689_s1 + $0x5b0] sm:$0xff]  ;;  %v287_v20 = vld [vmem:[%s12689_s1 + $0x628] sm:$0xff]  ;;  %v294_v21 = vld [vmem:[%s12689_s1 + $0x660] sm:$0xff] }
  0x5d   :  { %6269 = vmatpush1.bf16.msra.mxu0 %v6268_v31  ;;  %v6304_v22 = vpack.c.bf16 %v279_v19, %v272_v18  ;;  %v6306_v23 = vpack.c.bf16 %v294_v21, %v287_v20  ;;  %v286_v24 = vld [vmem:[%s12689_s1 + $0x620] sm:$0xff]  ;;  %v293_v25 = vld [vmem:[%s12689_s1 + $0x658] sm:$0xff]  ;;  %v308_v27 = vld [vmem:[%s12689_s1 + $0x6d0] sm:$0xff] }
  0x5e   :  { %6271 = vmatprep.subr.bf16.mxu0 %v6270_v32  ;;  %v301_v26 = vld [vmem:[%s12689_s1 + $0x698] sm:$0xff]  ;;  %v6308_v28 = vpack.c.bf16 %v293_v25, %v286_v24  ;;  %v300_v30 = vld [vmem:[%s12689_s1 + $0x690] sm:$0xff]  ;;  %v307_v31 = vld [vmem:[%s12689_s1 + $0x6c8] sm:$0xff] }
  0x5f   :  { %v6310_v29 = vpack.c.bf16 %v308_v27, %v301_v26  ;;  %v93_v32 = vld [vmem:[%s12689_s1 + $0x18] sm:$0xff]  ;;  %v100_v33 = vld [vmem:[%s12689_s1 + $0x50] sm:$0xff]  ;;  %v6312_v34 = vpack.c.bf16 %v307_v31, %v300_v30  ;;  %v114_v39 = vld [vmem:[%s12689_s1 + $0xc0] sm:$0xff] }
  0x60   :  { %v6314_v35 = vpack.c.bf16 %v100_v33, %v93_v32  ;;  %v92_v36 = vld [vmem:[%s12689_s1 + $0x10] sm:$0xff]  ;;  %v8538_v40 = vld [vmem:[%s12688_s0] sm:$0xff]  ;;  %v8549_v46 = vld [vmem:[%s12688_s0 + $0x18] sm:$0xff] }
  0x61   :  { %6273 = vmatpush1.bf16.msra.mxu0 %v6272_v37  ;;  %v99_v37 = vld [vmem:[%s12689_s1 + $0x48] sm:$0xff]  ;;  %v121_v47 = vld [vmem:[%s12689_s1 + $0xf8] sm:$0xff]  ;;  %v128_v48 = vld [vmem:[%s12689_s1 + $0x130] sm:$0xff] }
  0x62   :  { %6275 = vmatprep.subr.bf16.mxu0 %v6274_v38  ;;  %v107_v38 = vld [vmem:[%s12689_s1 + $0x88] sm:$0xff]  ;;  %v6316_v42 = vpack.c.bf16 %v99_v37, %v92_v36  ;;  %v120_v52 = vld [vmem:[%s12689_s1 + $0xf0] sm:$0xff]  ;;  %v8586_v58 = vld [vmem:[%s12688_s0 + $0x20] sm:$0xff] }
  0x63   :  { %v6318_v43 = vpack.c.bf16 %v114_v39, %v107_v38  ;;  %v127_v53 = vld [vmem:[%s12689_s1 + $0x128] sm:$0xff]  ;;  %v134_v60 = vld [vmem:[%s12689_s1 + $0x160] sm:$0xff]  ;;  %v141_v61 = vld [vmem:[%s12689_s1 + $0x198] sm:$0xff] }
  0x64   :  { %v8573_v54 = vld [vmem:[%s12688_s0 + $0x28] sm:$0xff]  ;;  %v156_v0 = vld [vmem:[%s12689_s1 + $0x210] sm:$0xff]  ;;  %v6328_v1 = vpack.c.bf16 %v141_v61, %v134_v60  ;;  %v170_v8 = vld [vmem:[%s12689_s1 + $0x280] sm:$0xff] }
  0x65   :  { %6277 = vmatpush1.bf16.msra.mxu0 %v6276_v44  ;;  %v106_v44 = vld [vmem:[%s12689_s1 + $0x80] sm:$0xff]  ;;  %v135_v55 = vld [vmem:[%s12689_s1 + $0x168] sm:$0xff]  ;;  %v8610_v2 = vld [vmem:[%s12688_s0 + $0x30] sm:$0xff] }
  0x66   :  { %6279 = vmatprep.subr.bf16.mxu0 %v6278_v45  ;;  %v113_v45 = vld [vmem:[%s12689_s1 + $0xb8] sm:$0xff]  ;;  %v8621_v6 = vld [vmem:[%s12688_s0 + $0x48] sm:$0xff]  ;;  %v162_v12 = vld [vmem:[%s12689_s1 + $0x240] sm:$0xff] }
  0x67   :  { %v6320_v49 = vpack.c.bf16 %v113_v45, %v106_v44  ;;  %v163_v7 = vld [vmem:[%s12689_s1 + $0x248] sm:$0xff]  ;;  %v169_v13 = vld [vmem:[%s12689_s1 + $0x278] sm:$0xff]  ;;  %v8658_v18 = vld [vmem:[%s12688_s0 + $0x50] sm:$0xff] }
  0x68   :  { %v8645_v14 = vld [vmem:[%s12688_s0 + $0x58] sm:$0xff]  ;;  %v176_v20 = vld [vmem:[%s12689_s1 + $0x2b0] sm:$0xff]  ;;  %v183_v21 = vld [vmem:[%s12689_s1 + $0x2e8] sm:$0xff] }
  0x69   :  { %6281 = vmatpush1.bf16.msra.mxu0 %v6280_v50  ;;  %v8562_v50 = vld [vmem:[%s12688_s0 + $0x10] sm:$0xff]  ;;  %v177_v15 = vld [vmem:[%s12689_s1 + $0x2b8] sm:$0xff]  ;;  %v198_v24 = vld [vmem:[%s12689_s1 + $0x360] sm:$0xff]  ;;  %v6340_v25 = vpack.c.bf16 %v183_v21, %v176_v20 }
  0x6a   :  { %6283 = vmatprep.subr.bf16.mxu0 %v6282_v51  ;;  %v6322_v51 = vpack.c.bf16 %v128_v48, %v121_v47  ;;  %v8682_v26 = vld [vmem:[%s12688_s0 + $0x60] sm:$0xff]  ;;  %v8693_v30 = vld [vmem:[%s12688_s0 + $0x78] sm:$0xff]  ;;  %v212_v32 = vld [vmem:[%s12689_s1 + $0x3d0] sm:$0xff] }
  0x6b   :  { %v205_v31 = vld [vmem:[%s12689_s1 + $0x398] sm:$0xff]  ;;  %v204_v36 = vld [vmem:[%s12689_s1 + $0x390] sm:$0xff]  ;;  %v211_v37 = vld [vmem:[%s12689_s1 + $0x3c8] sm:$0xff] }
  0x6c   :  { %v219_v38 = vld [vmem:[%s12689_s1 + $0x408] sm:$0xff]  ;;  %v226_v39 = vld [vmem:[%s12689_s1 + $0x440] sm:$0xff]  ;;  %v225_v45 = vld [vmem:[%s12689_s1 + $0x438] sm:$0xff] }
  0x6d   :  { %6285 = vmatpush1.bf16.msra.mxu0 %v6284_v56  ;;  %v142_v56 = vld [vmem:[%s12689_s1 + $0x1a0] sm:$0xff]  ;;  %v233_v47 = vld [vmem:[%s12689_s1 + $0x478] sm:$0xff]  ;;  %v240_v48 = vld [vmem:[%s12689_s1 + $0x4b0] sm:$0xff] }
  0x6e   :  { %6287 = vmatprep.subr.bf16.mxu0 %v6286_v57  ;;  %v6324_v57 = vpack.c.bf16 %v127_v53, %v120_v52  ;;  %v6326_v59 = vpack.c.bf16 %v142_v56, %v135_v55  ;;  %v218_v44 = vld [vmem:[%s12689_s1 + $0x400] sm:$0xff]  ;;  %v232_v52 = vld [vmem:[%s12689_s1 + $0x470] sm:$0xff]  ;;  %v239_v53 = vld [vmem:[%s12689_s1 + $0x4a8] sm:$0xff] }
  0x6f   :  { %v247_v55 = vld [vmem:[%s12689_s1 + $0x4e8] sm:$0xff]  ;;  %v254_v56 = vld [vmem:[%s12689_s1 + $0x520] sm:$0xff]  ;;  %v253_v61 = vld [vmem:[%s12689_s1 + $0x518] sm:$0xff] }
  0x70   :  { %v246_v60 = vld [vmem:[%s12689_s1 + $0x4e0] sm:$0xff]  ;;  %v288_v20 = vld [vmem:[%s12689_s1 + $0x630] sm:$0xff]  ;;  %v295_v21 = vld [vmem:[%s12689_s1 + $0x668] sm:$0xff] }
  0x71   :  { %6289 = vmatpush1.bf16.msra.mxu0 %v6288_v62  ;;  %v8597_v62 = vld [vmem:[%s12688_s0 + $0x38] sm:$0xff] }
  0x72   :  { %6291 = vmatprep.subr.bf16.mxu0 %v6290_v63  ;;  %v149_v63 = vld [vmem:[%s12689_s1 + $0x1d8] sm:$0xff] }
  0x73   :  { %v6330_v3 = vpack.c.bf16 %v156_v0, %v149_v63  ;;  %v261_v63 = vld [vmem:[%s12689_s1 + $0x558] sm:$0xff]  ;;  %v268_v0 = vld [vmem:[%s12689_s1 + $0x590] sm:$0xff] }
  0x75   :  { %6293 = vmatpush1.bf16.msra.mxu0 %v6292_v4  ;;  %v148_v4 = vld [vmem:[%s12689_s1 + $0x1d0] sm:$0xff] }
  0x76   :  { %6295 = vmatprep.subr.bf16.mxu0 %v6294_v5  ;;  %v155_v5 = vld [vmem:[%s12689_s1 + $0x208] sm:$0xff] }
  0x77   :  { %v6332_v9 = vpack.c.bf16 %v155_v5, %v148_v4  ;;  %v260_v4 = vld [vmem:[%s12689_s1 + $0x550] sm:$0xff]  ;;  %v267_v5 = vld [vmem:[%s12689_s1 + $0x588] sm:$0xff] }
  0x79   :  { %6297 = vmatpush1.bf16.msra.mxu0 %v6296_v10  ;;  %v8634_v10 = vld [vmem:[%s12688_s0 + $0x40] sm:$0xff] }
  0x7a   :  { %6299 = vmatprep.subr.bf16.mxu0 %v6298_v11  ;;  %v6334_v11 = vpack.c.bf16 %v170_v8, %v163_v7  ;;  %v275_v7 = vld [vmem:[%s12689_s1 + $0x5c8] sm:$0xff]  ;;  %v282_v8 = vld [vmem:[%s12689_s1 + $0x600] sm:$0xff] }
  0x7d   :  { %6301 = vmatpush1.bf16.msra.mxu0 %v6300_v16  ;;  %v184_v16 = vld [vmem:[%s12689_s1 + $0x2f0] sm:$0xff] }
  0x7e   :  { %6303 = vmatprep.subr.bf16.mxu0 %v6302_v17  ;;  %v6336_v17 = vpack.c.bf16 %v169_v13, %v162_v12  ;;  %v6338_v19 = vpack.c.bf16 %v184_v16, %v177_v15  ;;  %v274_v12 = vld [vmem:[%s12689_s1 + $0x5c0] sm:$0xff]  ;;  %v281_v13 = vld [vmem:[%s12689_s1 + $0x5f8] sm:$0xff]  ;;  %v296_v16 = vld [vmem:[%s12689_s1 + $0x670] sm:$0xff] }
  0x7f   :  { %v289_v15 = vld [vmem:[%s12689_s1 + $0x638] sm:$0xff] }
  0x81   :  { %6305 = vmatpush1.bf16.msra.mxu0 %v6304_v22  ;;  %v8669_v22 = vld [vmem:[%s12688_s0 + $0x68] sm:$0xff] }
  0x82   :  { %6307 = vmatprep.subr.bf16.mxu0 %v6306_v23  ;;  %v191_v23 = vld [vmem:[%s12689_s1 + $0x328] sm:$0xff] }
  0x83   :  { %v6342_v27 = vpack.c.bf16 %v198_v24, %v191_v23  ;;  %v303_v23 = vld [vmem:[%s12689_s1 + $0x6a8] sm:$0xff]  ;;  %v310_v24 = vld [vmem:[%s12689_s1 + $0x6e0] sm:$0xff] }
  0x85   :  { %6309 = vmatpush1.bf16.msra.mxu0 %v6308_v28  ;;  %v190_v28 = vld [vmem:[%s12689_s1 + $0x320] sm:$0xff] }
  0x86   :  { %6311 = vmatprep.subr.bf16.mxu0 %v6310_v29  ;;  %v197_v29 = vld [vmem:[%s12689_s1 + $0x358] sm:$0xff] }
  0x87   :  { %v6344_v33 = vpack.c.bf16 %v197_v29, %v190_v28  ;;  %v302_v28 = vld [vmem:[%s12689_s1 + $0x6a0] sm:$0xff]  ;;  %v309_v29 = vld [vmem:[%s12689_s1 + $0x6d8] sm:$0xff] }
  0x89   :  { %6313 = vmatpush1.bf16.msra.mxu0 %v6312_v34  ;;  %v8706_v34 = vld [vmem:[%s12688_s0 + $0x70] sm:$0xff] }
  0x8a   :  { %6315 = vmatprep.subr.bf16.mxu0 %v6314_v35  ;;  %v6346_v35 = vpack.c.bf16 %v212_v32, %v205_v31  ;;  %v95_v31 = vld [vmem:[%s12689_s1 + $0x28] sm:$0xff]  ;;  %v102_v32 = vld [vmem:[%s12689_s1 + $0x60] sm:$0xff] }
  0x8c   :  { %379 = vmatmul.mubr.f32.vlgmr.msra.gmra.mrb[0].mxu0 %v8538_v40 }
  0x8d   :  { %6317 = vmatpush1.bf16.msra.mxu0 %v6316_v42  ;;  %384 = vmatprep.mubr.f32.mxu0 %v8549_v46  ;;  %v6348_v42 = vpack.c.bf16 %v211_v37, %v204_v36  ;;  %v94_v36 = vld [vmem:[%s12689_s1 + $0x20] sm:$0xff]  ;;  %v101_v37 = vld [vmem:[%s12689_s1 + $0x58] sm:$0xff] }
  0x8e   :  { %6319 = vmatprep.subr.bf16.mxu0 %v6318_v43  ;;  %v6350_v43 = vpack.c.bf16 %v226_v39, %v219_v38  ;;  %v109_v38 = vld [vmem:[%s12689_s1 + $0x98] sm:$0xff]  ;;  %v116_v39 = vld [vmem:[%s12689_s1 + $0xd0] sm:$0xff] }
  0x90   :  { %385 = vmatmul.mubr.f32.gmra.mrb[2].mxu0 %v8562_v50 }
  0x91   :  { %6321 = vmatpush1.bf16.msra.mxu0 %v6320_v49  ;;  %390 = vmatprep.mubr.f32.mxu0 %v8573_v54  ;;  %v6352_v49 = vpack.c.bf16 %v225_v45, %v218_v44  ;;  %v108_v44 = vld [vmem:[%s12689_s1 + $0x90] sm:$0xff]  ;;  %v115_v45 = vld [vmem:[%s12689_s1 + $0xc8] sm:$0xff] }
  0x92   :  { %6323 = vmatprep.subr.bf16.mxu0 %v6322_v51  ;;  %v6354_v51 = vpack.c.bf16 %v240_v48, %v233_v47  ;;  %v123_v47 = vld [vmem:[%s12689_s1 + $0x108] sm:$0xff]  ;;  %v130_v48 = vld [vmem:[%s12689_s1 + $0x140] sm:$0xff] }
  0x94   :  { %391 = vmatmul.mubr.f32.gmra.mrb[4].mxu0 %v8586_v58 }
  0x95   :  { %6325 = vmatpush1.bf16.msra.mxu0 %v6324_v57  ;;  %396 = vmatprep.mubr.f32.mxu0 %v8597_v62  ;;  %v6356_v57 = vpack.c.bf16 %v239_v53, %v232_v52  ;;  %v122_v52 = vld [vmem:[%s12689_s1 + $0x100] sm:$0xff]  ;;  %v129_v53 = vld [vmem:[%s12689_s1 + $0x138] sm:$0xff] }
  0x96   :  { %6327 = vmatprep.subr.bf16.mxu0 %v6326_v59  ;;  %v6358_v59 = vpack.c.bf16 %v254_v56, %v247_v55  ;;  %v137_v55 = vld [vmem:[%s12689_s1 + $0x178] sm:$0xff]  ;;  %v144_v56 = vld [vmem:[%s12689_s1 + $0x1b0] sm:$0xff] }
  0x98   :  { %397 = vmatmul.mubr.f32.gmra.mrb[6].mxu0 %v8610_v2 }
  0x99   :  { %6329 = vmatpush1.bf16.msra.mxu0 %v6328_v1  ;;  %402 = vmatprep.mubr.f32.mxu0 %v8621_v6  ;;  %v6360_v1 = vpack.c.bf16 %v253_v61, %v246_v60  ;;  %v136_v60 = vld [vmem:[%s12689_s1 + $0x170] sm:$0xff]  ;;  %v143_v61 = vld [vmem:[%s12689_s1 + $0x1a8] sm:$0xff] }
  0x9a   :  { %6331 = vmatprep.subr.bf16.mxu0 %v6330_v3  ;;  %v6362_v3 = vpack.c.bf16 %v268_v0, %v261_v63  ;;  %v151_v63 = vld [vmem:[%s12689_s1 + $0x1e8] sm:$0xff]  ;;  %v158_v0 = vld [vmem:[%s12689_s1 + $0x220] sm:$0xff] }
  0x9c   :  { %403 = vmatmul.mubr.f32.gmra.mrb[8].mxu0 %v8634_v10 }
  0x9d   :  { %6333 = vmatpush1.bf16.msra.mxu0 %v6332_v9  ;;  %408 = vmatprep.mubr.f32.mxu0 %v8645_v14  ;;  %v6364_v9 = vpack.c.bf16 %v267_v5, %v260_v4  ;;  %v150_v4 = vld [vmem:[%s12689_s1 + $0x1e0] sm:$0xff]  ;;  %v157_v5 = vld [vmem:[%s12689_s1 + $0x218] sm:$0xff] }
  0x9e   :  { %6335 = vmatprep.subr.bf16.mxu0 %v6334_v11  ;;  %v6366_v11 = vpack.c.bf16 %v282_v8, %v275_v7  ;;  %v165_v7 = vld [vmem:[%s12689_s1 + $0x258] sm:$0xff]  ;;  %v172_v8 = vld [vmem:[%s12689_s1 + $0x290] sm:$0xff] }
  0xa0   :  { %409 = vmatmul.mubr.f32.gmra.mrb[10].mxu0 %v8658_v18 }
  0xa1   :  { %6337 = vmatpush1.bf16.msra.mxu0 %v6336_v17  ;;  %414 = vmatprep.mubr.f32.mxu0 %v8669_v22  ;;  %v6368_v17 = vpack.c.bf16 %v281_v13, %v274_v12  ;;  %v164_v12 = vld [vmem:[%s12689_s1 + $0x250] sm:$0xff]  ;;  %v171_v13 = vld [vmem:[%s12689_s1 + $0x288] sm:$0xff] }
  0xa2   :  { %6339 = vmatprep.subr.bf16.mxu0 %v6338_v19  ;;  %v6370_v19 = vpack.c.bf16 %v296_v16, %v289_v15  ;;  %v179_v15 = vld [vmem:[%s12689_s1 + $0x2c8] sm:$0xff]  ;;  %v186_v16 = vld [vmem:[%s12689_s1 + $0x300] sm:$0xff] }
  0xa4   :  { %415 = vmatmul.mubr.f32.gmra.mrb[12].mxu0 %v8682_v26 }
  0xa5   :  { %6341 = vmatpush1.bf16.msra.mxu0 %v6340_v25  ;;  %420 = vmatprep.mubr.f32.mxu0 %v8693_v30  ;;  %v6372_v25 = vpack.c.bf16 %v295_v21, %v288_v20  ;;  %v178_v20 = vld [vmem:[%s12689_s1 + $0x2c0] sm:$0xff]  ;;  %v185_v21 = vld [vmem:[%s12689_s1 + $0x2f8] sm:$0xff] }
  0xa6   :  { %6343 = vmatprep.subr.bf16.mxu0 %v6342_v27  ;;  %v6374_v27 = vpack.c.bf16 %v310_v24, %v303_v23  ;;  %v193_v23 = vld [vmem:[%s12689_s1 + $0x338] sm:$0xff]  ;;  %v200_v24 = vld [vmem:[%s12689_s1 + $0x370] sm:$0xff] }
  0xa8   :  { %421 = vmatmul.mubr.f32.gmra.mrb[14].mxu0 %v8706_v34 }
  0xa9   :  { %6345 = vmatpush1.bf16.msra.mxu0 %v6344_v33  ;;  %491 = vmatprep.mubr.f32.mxu0 %v8406_v41  ;;  %v6376_v33 = vpack.c.bf16 %v309_v29, %v302_v28  ;;  %v192_v28 = vld [vmem:[%s12689_s1 + $0x330] sm:$0xff]  ;;  %v199_v29 = vld [vmem:[%s12689_s1 + $0x368] sm:$0xff] }
  0xaa   :  { %6347 = vmatprep.subr.bf16.mxu0 %v6346_v35  ;;  %v6378_v35 = vpack.c.bf16 %v102_v32, %v95_v31  ;;  %v207_v31 = vld [vmem:[%s12689_s1 + $0x3a8] sm:$0xff]  ;;  %v214_v32 = vld [vmem:[%s12689_s1 + $0x3e0] sm:$0xff] }
  0xad   :  { %6349 = vmatpush1.bf16.msra.mxu0 %v6348_v42  ;;  %v6380_v42 = vpack.c.bf16 %v101_v37, %v94_v36  ;;  %v206_v36 = vld [vmem:[%s12689_s1 + $0x3a0] sm:$0xff]  ;;  %v213_v37 = vld [vmem:[%s12689_s1 + $0x3d8] sm:$0xff] }
  0xae   :  { %6351 = vmatprep.subr.bf16.mxu0 %v6350_v43  ;;  %v6382_v43 = vpack.c.bf16 %v116_v39, %v109_v38  ;;  %v221_v38 = vld [vmem:[%s12689_s1 + $0x418] sm:$0xff]  ;;  %v228_v39 = vld [vmem:[%s12689_s1 + $0x450] sm:$0xff] }
  0xb1   :  { %6353 = vmatpush1.bf16.msra.mxu0 %v6352_v49  ;;  %v6384_v49 = vpack.c.bf16 %v115_v45, %v108_v44  ;;  %v220_v44 = vld [vmem:[%s12689_s1 + $0x410] sm:$0xff]  ;;  %v227_v45 = vld [vmem:[%s12689_s1 + $0x448] sm:$0xff] }
  0xb2   :  { %6355 = vmatprep.subr.bf16.mxu0 %v6354_v51  ;;  %v6386_v51 = vpack.c.bf16 %v130_v48, %v123_v47  ;;  %v235_v47 = vld [vmem:[%s12689_s1 + $0x488] sm:$0xff]  ;;  %v242_v48 = vld [vmem:[%s12689_s1 + $0x4c0] sm:$0xff] }
  0xb5   :  { %6357 = vmatpush1.bf16.msra.mxu0 %v6356_v57  ;;  %v6388_v57 = vpack.c.bf16 %v129_v53, %v122_v52  ;;  %v234_v52 = vld [vmem:[%s12689_s1 + $0x480] sm:$0xff]  ;;  %v241_v53 = vld [vmem:[%s12689_s1 + $0x4b8] sm:$0xff] }
  0xb6   :  { %6359 = vmatprep.subr.bf16.mxu0 %v6358_v59  ;;  %v6390_v59 = vpack.c.bf16 %v144_v56, %v137_v55  ;;  %v249_v55 = vld [vmem:[%s12689_s1 + $0x4f8] sm:$0xff]  ;;  %v256_v56 = vld [vmem:[%s12689_s1 + $0x530] sm:$0xff] }
  0xb9   :  { %6361 = vmatpush1.bf16.msra.mxu0 %v6360_v1  ;;  %v6392_v1 = vpack.c.bf16 %v143_v61, %v136_v60  ;;  %v248_v60 = vld [vmem:[%s12689_s1 + $0x4f0] sm:$0xff]  ;;  %v255_v61 = vld [vmem:[%s12689_s1 + $0x528] sm:$0xff] }
  0xba   :  { %6363 = vmatprep.subr.bf16.mxu0 %v6362_v3  ;;  %v6394_v3 = vpack.c.bf16 %v158_v0, %v151_v63  ;;  %v263_v63 = vld [vmem:[%s12689_s1 + $0x568] sm:$0xff]  ;;  %v270_v0 = vld [vmem:[%s12689_s1 + $0x5a0] sm:$0xff] }
  0xbd   :  { %6365 = vmatpush1.bf16.msra.mxu0 %v6364_v9  ;;  %v6396_v9 = vpack.c.bf16 %v157_v5, %v150_v4  ;;  %v262_v4 = vld [vmem:[%s12689_s1 + $0x560] sm:$0xff]  ;;  %v269_v5 = vld [vmem:[%s12689_s1 + $0x598] sm:$0xff] }
  0xbe   :  { %6367 = vmatprep.subr.bf16.mxu0 %v6366_v11  ;;  %v6398_v11 = vpack.c.bf16 %v172_v8, %v165_v7  ;;  %v277_v7 = vld [vmem:[%s12689_s1 + $0x5d8] sm:$0xff]  ;;  %v284_v8 = vld [vmem:[%s12689_s1 + $0x610] sm:$0xff] }
  0xc1   :  { %6369 = vmatpush1.bf16.msra.mxu0 %v6368_v17  ;;  %v6400_v17 = vpack.c.bf16 %v171_v13, %v164_v12  ;;  %v276_v12 = vld [vmem:[%s12689_s1 + $0x5d0] sm:$0xff]  ;;  %v283_v13 = vld [vmem:[%s12689_s1 + $0x608] sm:$0xff] }
  0xc2   :  { %6371 = vmatprep.subr.bf16.mxu0 %v6370_v19  ;;  %v6402_v19 = vpack.c.bf16 %v186_v16, %v179_v15  ;;  %v291_v15 = vld [vmem:[%s12689_s1 + $0x648] sm:$0xff]  ;;  %v298_v16 = vld [vmem:[%s12689_s1 + $0x680] sm:$0xff] }
  0xc5   :  { %6373 = vmatpush1.bf16.msra.mxu0 %v6372_v25  ;;  %v6404_v25 = vpack.c.bf16 %v185_v21, %v178_v20  ;;  %v290_v20 = vld [vmem:[%s12689_s1 + $0x640] sm:$0xff]  ;;  %v297_v21 = vld [vmem:[%s12689_s1 + $0x678] sm:$0xff] }
  0xc6   :  { %6375 = vmatprep.subr.bf16.mxu0 %v6374_v27  ;;  %v6406_v27 = vpack.c.bf16 %v200_v24, %v193_v23  ;;  %v305_v23 = vld [vmem:[%s12689_s1 + $0x6b8] sm:$0xff]  ;;  %v312_v24 = vld [vmem:[%s12689_s1 + $0x6f0] sm:$0xff] }
  0xc9   :  { %6377 = vmatpush1.bf16.msra.mxu0 %v6376_v33  ;;  %v6408_v33 = vpack.c.bf16 %v199_v29, %v192_v28  ;;  %v304_v28 = vld [vmem:[%s12689_s1 + $0x6b0] sm:$0xff]  ;;  %v311_v29 = vld [vmem:[%s12689_s1 + $0x6e8] sm:$0xff] }
  0xca   :  { %6379 = vmatprep.subr.bf16.mxu0 %v6378_v35  ;;  %v6410_v35 = vpack.c.bf16 %v214_v32, %v207_v31  ;;  %v208_v31 = vld [vmem:[%s12689_s1 + $0x3b0] sm:$0xff]  ;;  %v215_v32 = vld [vmem:[%s12689_s1 + $0x3e8] sm:$0xff] }
  0xcc   :  { %492 = vmatmul.mubr.f32.vlgmr.msra.gmra.mrb[16].mxu0 %v8538_v40 }
  0xcd   :  { %6381 = vmatpush1.bf16.msra.mxu0 %v6380_v42  ;;  %497 = vmatprep.mubr.f32.mxu0 %v8549_v46  ;;  %v6412_v42 = vpack.c.bf16 %v213_v37, %v206_v36  ;;  %v96_v36 = vld [vmem:[%s12689_s1 + $0x30] sm:$0xff]  ;;  %v103_v37 = vld [vmem:[%s12689_s1 + $0x68] sm:$0xff] }
  0xce   :  { %6383 = vmatprep.subr.bf16.mxu0 %v6382_v43  ;;  %v6414_v43 = vpack.c.bf16 %v228_v39, %v221_v38  ;;  %v222_v38 = vld [vmem:[%s12689_s1 + $0x420] sm:$0xff]  ;;  %v229_v39 = vld [vmem:[%s12689_s1 + $0x458] sm:$0xff] }
  0xd0   :  { %498 = vmatmul.mubr.f32.gmra.mrb[18].mxu0 %v8562_v50 }
  0xd1   :  { %6385 = vmatpush1.bf16.msra.mxu0 %v6384_v49  ;;  %503 = vmatprep.mubr.f32.mxu0 %v8573_v54  ;;  %v6416_v49 = vpack.c.bf16 %v227_v45, %v220_v44  ;;  %v110_v44 = vld [vmem:[%s12689_s1 + $0xa0] sm:$0xff]  ;;  %v117_v45 = vld [vmem:[%s12689_s1 + $0xd8] sm:$0xff] }
  0xd2   :  { %6387 = vmatprep.subr.bf16.mxu0 %v6386_v51  ;;  %v6418_v51 = vpack.c.bf16 %v242_v48, %v235_v47  ;;  %v236_v47 = vld [vmem:[%s12689_s1 + $0x490] sm:$0xff]  ;;  %v243_v48 = vld [vmem:[%s12689_s1 + $0x4c8] sm:$0xff] }
  0xd4   :  { %504 = vmatmul.mubr.f32.gmra.mrb[20].mxu0 %v8586_v58 }
  0xd5   :  { %6389 = vmatpush1.bf16.msra.mxu0 %v6388_v57  ;;  %509 = vmatprep.mubr.f32.mxu0 %v8597_v62  ;;  %v6420_v57 = vpack.c.bf16 %v241_v53, %v234_v52  ;;  %v124_v52 = vld [vmem:[%s12689_s1 + $0x110] sm:$0xff]  ;;  %v131_v53 = vld [vmem:[%s12689_s1 + $0x148] sm:$0xff] }
  0xd6   :  { %6391 = vmatprep.subr.bf16.mxu0 %v6390_v59  ;;  %v6422_v59 = vpack.c.bf16 %v256_v56, %v249_v55  ;;  %v250_v55 = vld [vmem:[%s12689_s1 + $0x500] sm:$0xff]  ;;  %v257_v56 = vld [vmem:[%s12689_s1 + $0x538] sm:$0xff] }
  0xd8   :  { %510 = vmatmul.mubr.f32.gmra.mrb[22].mxu0 %v8610_v2 }
  0xd9   :  { %6393 = vmatpush1.bf16.msra.mxu0 %v6392_v1  ;;  %515 = vmatprep.mubr.f32.mxu0 %v8621_v6  ;;  %v6424_v1 = vpack.c.bf16 %v255_v61, %v248_v60  ;;  %v138_v60 = vld [vmem:[%s12689_s1 + $0x180] sm:$0xff]  ;;  %v145_v61 = vld [vmem:[%s12689_s1 + $0x1b8] sm:$0xff] }
  0xda   :  { %6395 = vmatprep.subr.bf16.mxu0 %v6394_v3  ;;  %v6426_v3 = vpack.c.bf16 %v270_v0, %v263_v63  ;;  %v264_v63 = vld [vmem:[%s12689_s1 + $0x570] sm:$0xff]  ;;  %v271_v0 = vld [vmem:[%s12689_s1 + $0x5a8] sm:$0xff] }
  0xdc   :  { %516 = vmatmul.mubr.f32.gmra.mrb[24].mxu0 %v8634_v10 }
  0xdd   :  { %6397 = vmatpush1.bf16.msra.mxu0 %v6396_v9  ;;  %521 = vmatprep.mubr.f32.mxu0 %v8645_v14  ;;  %v6428_v9 = vpack.c.bf16 %v269_v5, %v262_v4  ;;  %v152_v4 = vld [vmem:[%s12689_s1 + $0x1f0] sm:$0xff]  ;;  %v159_v5 = vld [vmem:[%s12689_s1 + $0x228] sm:$0xff] }
  0xde   :  { %6399 = vmatprep.subr.bf16.mxu0 %v6398_v11  ;;  %v6430_v11 = vpack.c.bf16 %v284_v8, %v277_v7  ;;  %v278_v7 = vld [vmem:[%s12689_s1 + $0x5e0] sm:$0xff]  ;;  %v285_v8 = vld [vmem:[%s12689_s1 + $0x618] sm:$0xff] }
  0xe0   :  { %522 = vmatmul.mubr.f32.gmra.mrb[26].mxu0 %v8658_v18 }
  0xe1   :  { %6401 = vmatpush1.bf16.msra.mxu0 %v6400_v17  ;;  %527 = vmatprep.mubr.f32.mxu0 %v8669_v22  ;;  %v6432_v17 = vpack.c.bf16 %v283_v13, %v276_v12  ;;  %v166_v12 = vld [vmem:[%s12689_s1 + $0x260] sm:$0xff]  ;;  %v173_v13 = vld [vmem:[%s12689_s1 + $0x298] sm:$0xff] }
  0xe2   :  { %6403 = vmatprep.subr.bf16.mxu0 %v6402_v19  ;;  %v6434_v19 = vpack.c.bf16 %v298_v16, %v291_v15  ;;  %v292_v15 = vld [vmem:[%s12689_s1 + $0x650] sm:$0xff]  ;;  %v299_v16 = vld [vmem:[%s12689_s1 + $0x688] sm:$0xff] }
  0xe4   :  { %528 = vmatmul.mubr.f32.gmra.mrb[28].mxu0 %v8682_v26 }
  0xe5   :  { %6405 = vmatpush1.bf16.msra.mxu0 %v6404_v25  ;;  %533 = vmatprep.mubr.f32.mxu0 %v8693_v30  ;;  %v6436_v25 = vpack.c.bf16 %v297_v21, %v290_v20  ;;  %v180_v20 = vld [vmem:[%s12689_s1 + $0x2d0] sm:$0xff]  ;;  %v187_v21 = vld [vmem:[%s12689_s1 + $0x308] sm:$0xff] }
  0xe6   :  { %6407 = vmatprep.subr.bf16.mxu0 %v6406_v27  ;;  %v6438_v27 = vpack.c.bf16 %v312_v24, %v305_v23  ;;  %v306_v23 = vld [vmem:[%s12689_s1 + $0x6c0] sm:$0xff]  ;;  %v313_v24 = vld [vmem:[%s12689_s1 + $0x6f8] sm:$0xff] }
  0xe8   :  { %534 = vmatmul.mubr.f32.gmra.mrb[30].mxu0 %v8706_v34 }
  0xe9   :  { %6409 = vmatpush1.bf16.msra.mxu0 %v6408_v33  ;;  %604 = vmatprep.mubr.f32.mxu0 %v8406_v41  ;;  %v6440_v33 = vpack.c.bf16 %v311_v29, %v304_v28  ;;  %v194_v28 = vld [vmem:[%s12689_s1 + $0x340] sm:$0xff]  ;;  %v201_v29 = vld [vmem:[%s12689_s1 + $0x378] sm:$0xff] }
  0xea   :  { %6411 = vmatprep.subr.bf16.mxu0 %v6410_v35  ;;  %v6442_v35 = vpack.c.bf16 %v215_v32, %v208_v31  ;;  %v6472_v31 = vpack.c.bf16 %v201_v29, %v194_v28 }
  0xed   :  { %6413 = vmatpush1.bf16.msra.mxu0 %v6412_v42  ;;  %v6444_v42 = vpack.c.bf16 %v103_v37, %v96_v36 }
  0xee   :  { %6415 = vmatprep.subr.bf16.mxu0 %v6414_v43  ;;  %v6446_v43 = vpack.c.bf16 %v229_v39, %v222_v38 }
  0xf1   :  { %6417 = vmatpush1.bf16.msra.mxu0 %v6416_v49  ;;  %v6448_v49 = vpack.c.bf16 %v117_v45, %v110_v44 }
  0xf2   :  { %6419 = vmatprep.subr.bf16.mxu0 %v6418_v51  ;;  %v6450_v51 = vpack.c.bf16 %v243_v48, %v236_v47 }
  0xf5   :  { %6421 = vmatpush1.bf16.msra.mxu0 %v6420_v57  ;;  %v6452_v57 = vpack.c.bf16 %v131_v53, %v124_v52 }
  0xf6   :  { %6423 = vmatprep.subr.bf16.mxu0 %v6422_v59  ;;  %v6454_v59 = vpack.c.bf16 %v257_v56, %v250_v55 }
  0xf9   :  { %6425 = vmatpush1.bf16.msra.mxu0 %v6424_v1  ;;  %v6456_v1 = vpack.c.bf16 %v145_v61, %v138_v60 }
  0xfa   :  { %6427 = vmatprep.subr.bf16.mxu0 %v6426_v3  ;;  %v6458_v3 = vpack.c.bf16 %v271_v0, %v264_v63 }
  0xfd   :  { %6429 = vmatpush1.bf16.msra.mxu0 %v6428_v9  ;;  %v6460_v9 = vpack.c.bf16 %v159_v5, %v152_v4 }
  0xfe   :  { %6431 = vmatprep.subr.bf16.mxu0 %v6430_v11  ;;  %v6462_v11 = vpack.c.bf16 %v285_v8, %v278_v7 }
 0x101   :  { %6433 = vmatpush1.bf16.msra.mxu0 %v6432_v17  ;;  %v6464_v17 = vpack.c.bf16 %v173_v13, %v166_v12 }
 0x102   :  { %6435 = vmatprep.subr.bf16.mxu0 %v6434_v19  ;;  %v6466_v19 = vpack.c.bf16 %v299_v16, %v292_v15 }
 0x105   :  { %6437 = vmatpush1.bf16.msra.mxu0 %v6436_v25  ;;  %v6468_v25 = vpack.c.bf16 %v187_v21, %v180_v20 }
 0x106   :  { %6439 = vmatprep.subr.bf16.mxu0 %v6438_v27  ;;  %v6470_v27 = vpack.c.bf16 %v313_v24, %v306_v23 }
 0x109   :  { %6441 = vmatpush1.bf16.msra.mxu0 %v6440_v33 }
 0x10a   :  { %6443 = vmatprep.subr.bf16.mxu0 %v6442_v35 }
 0x10c   :  { %605 = vmatmul.mubr.f32.vlgmr.msra.gmra.mrb[32].mxu0 %v8538_v40 }
 0x10d   :  { %6445 = vmatpush3.bf16.msra.mxu0 %v6444_v42  ;;  %610 = vmatprep.mubr.f32.mxu0 %v8549_v46 }
 0x10e   :  { %6447 = vmatprep.subr.bf16.mxu0 %v6446_v43 }
 0x110   :  { %611 = vmatmul.mubr.f32.gmra.mrb[34].mxu0 %v8562_v50 }
 0x111   :  { %6449 = vmatpush3.bf16.msra.mxu0 %v6448_v49  ;;  %616 = vmatprep.mubr.f32.mxu0 %v8573_v54 }
 0x112   :  { %6451 = vmatprep.subr.bf16.mxu0 %v6450_v51 }
 0x114   :  { %617 = vmatmul.mubr.f32.gmra.mrb[36].mxu0 %v8586_v58 }
 0x115   :  { %6453 = vmatpush3.bf16.msra.mxu0 %v6452_v57  ;;  %622 = vmatprep.mubr.f32.mxu0 %v8597_v62 }
 0x116   :  { %6455 = vmatprep.subr.bf16.mxu0 %v6454_v59 }
 0x118   :  { %623 = vmatmul.mubr.f32.gmra.mrb[38].mxu0 %v8610_v2 }
 0x119   :  { %6457 = vmatpush3.bf16.msra.mxu0 %v6456_v1  ;;  %628 = vmatprep.mubr.f32.mxu0 %v8621_v6 }
 0x11a   :  { %6459 = vmatprep.subr.bf16.mxu0 %v6458_v3 }
 0x11c   :  { %629 = vmatmul.mubr.f32.gmra.mrb[40].mxu0 %v8634_v10 }
 0x11d   :  { %6461 = vmatpush3.bf16.msra.mxu0 %v6460_v9  ;;  %634 = vmatprep.mubr.f32.mxu0 %v8645_v14 }
 0x11e   :  { %6463 = vmatprep.subr.bf16.mxu0 %v6462_v11 }
 0x120   :  { %635 = vmatmul.mubr.f32.gmra.mrb[42].mxu0 %v8658_v18 }
 0x121   :  { %6465 = vmatpush3.bf16.msra.mxu0 %v6464_v17  ;;  %640 = vmatprep.mubr.f32.mxu0 %v8669_v22 }
 0x122   :  { %6467 = vmatprep.subr.bf16.mxu0 %v6466_v19 }
 0x124   :  { %641 = vmatmul.mubr.f32.gmra.mrb[44].mxu0 %v8682_v26 }
 0x125   :  { %6469 = vmatpush3.bf16.msra.mxu0 %v6468_v25  ;;  %646 = vmatprep.mubr.f32.mxu0 %v8693_v30 }
 0x126   :  { %6471 = vmatprep.subr.bf16.mxu0 %v6470_v27 }
 0x128   :  { %647 = vmatmul.mubr.f32.gmra.mrb[46].mxu0 %v8706_v34 }
 0x129   :  { %6473 = vmatpush3.bf16.msra.mxu0 %v6472_v31  ;;  %717 = vmatprep.mubr.f32.mxu0 %v8406_v41 }
 0x12c   :  { %718 = vmatmul.mubr.f32.vlgmr.msra.gmra.mrb[48].mxu0 %v8538_v40 }
 0x12d   :  { %722 = vmatprep.mubr.f32.mxu0 %v8549_v46 }
 0x130   :  { %723 = vmatmul.mubr.f32.gmra.mrb[50].mxu0 %v8562_v50 }
 0x131   :  { %727 = vmatprep.mubr.f32.mxu0 %v8573_v54 }
 0x134   :  { %728 = vmatmul.mubr.f32.gmra.mrb[52].mxu0 %v8586_v58 }
 0x135   :  { %732 = vmatprep.mubr.f32.mxu0 %v8597_v62 }
 0x138   :  { %733 = vmatmul.mubr.f32.gmra.mrb[54].mxu0 %v8610_v2 }
 0x139   :  { %737 = vmatprep.mubr.f32.mxu0 %v8621_v6 }
 0x13c   :  { %738 = vmatmul.mubr.f32.gmra.mrb[56].mxu0 %v8634_v10 }
 0x13d   :  { %742 = vmatprep.mubr.f32.mxu0 %v8645_v14 }
 0x140   :  { %743 = vmatmul.mubr.f32.gmra.mrb[58].mxu0 %v8658_v18 }
 0x141   :  { %747 = vmatprep.mubr.f32.mxu0 %v8669_v22 }
 0x144   :  { %748 = vmatmul.mubr.f32.gmra.mrb[60].mxu0 %v8682_v26 }
 0x145   :  { %752 = vmatprep.mubr.f32.mxu0 %v8693_v30 }
 0x148   :  { %753 = vmatmul.mubr.f32.gmra.mrb[62].mxu0 %v8706_v34 }
 0x15f   :  { %v9135_v41 = vpop.f32.mrb[0].mxu0 }
 0x160   :  { %v831_v40 = vmul.f32 %v9135_v41, %v9135_v41  ;;  %v9139_v46 = vpop.f32.mrb[1].mxu0 }
 0x161   :  { %v758_v50 = vadd.f32 %v9139_v46, %v9135_v41  ;;  %v832_v54 = vmul.f32 %v9139_v46, %v9139_v46 }
 0x163   :  { %v887_v58 = vadd.f32 %v832_v54, %v831_v40  ;;  %v9145_v62 = vpop.f32.mrb[2].mxu0 }
 0x164   :  { %12864 = vst [vmem:[#allocation12_spill] sm:$0xff] %v9145_v62  ;;  %v9147_v2 = vpop.f32.mrb[3].mxu0 }
 0x165   :  { %12865 = vst [vmem:[#allocation13_spill] sm:$0xff] %v9147_v2 }
 0x167   :  { %v9149_v6 = vpop.f32.mrb[4].mxu0 }
 0x168   :  { %v9151_v10 = vpop.f32.mrb[5].mxu0 }
 0x16b   :  { %v9153_v14 = vpop.f32.mrb[6].mxu0 }
 0x16c   :  { %v9155_v18 = vpop.f32.mrb[7].mxu0 }
 0x16f   :  { %v9157_v22 = vpop.f32.mrb[8].mxu0 }
 0x170   :  { %v9159_v26 = vpop.f32.mrb[9].mxu0 }
 0x173   :  { %v9161_v30 = vpop.f32.mrb[10].mxu0 }
 0x174   :  { %v9163_v34 = vpop.f32.mrb[11].mxu0 }
 0x177   :  { %v9165_v32 = vpop.f32.mrb[12].mxu0 }
 0x178   :  { %v9167_v33 = vpop.f32.mrb[13].mxu0 }
 0x17b   :  { %v9169_v35 = vpop.f32.mrb[14].mxu0 }
 0x17c   :  { %12866 = vst [vmem:[#allocation14_spill] sm:$0xff] %v9169_v35  ;;  %v9171_v36 = vpop.f32.mrb[15].mxu0 }
 0x17d   :  { %12867 = vst [vmem:[#allocation15_spill] sm:$0xff] %v9171_v36 }
 0x19f   :  { %v9173_v37 = vpop.f32.mrb[16].mxu0 }
 0x1a0   :  { %v759_v38 = vadd.f32 %v758_v50, %v9173_v37  ;;  %v833_v39 = vmul.f32 %v9173_v37, %v9173_v37  ;;  %v9178_v42 = vpop.f32.mrb[17].mxu0 }
 0x1a1   :  { %12868 = vst [vmem:[#allocation16_spill] sm:$0xff] %v9178_v42  ;;  %v834_v43 = vmul.f32 %v9178_v42, %v9178_v42 }
 0x1a2   :  { %v888_v44 = vadd.f32 %v887_v58, %v833_v39  ;;  %v760_v45 = vadd.f32 %v759_v38, %v9178_v42  ;;  %v9550_v42 = vld [vmem:[#allocation2 + $0x8c0] sm:$0xff] }
 0x1a3   :  { %v9183_v47 = vpop.f32.mrb[18].mxu0 }
 0x1a4   :  { %12869 = vst [vmem:[#allocation17_spill] sm:$0xff] %v9183_v47  ;;  %v889_v48 = vadd.f32 %v888_v44, %v834_v43  ;;  %v9185_v49 = vpop.f32.mrb[19].mxu0 }
 0x1a5   :  { %12870 = vst [vmem:[#allocation18_spill] sm:$0xff] %v9185_v49 }
 0x1a7   :  { %v9187_v51 = vpop.f32.mrb[20].mxu0 }
 0x1a8   :  { %v9189_v52 = vpop.f32.mrb[21].mxu0 }
 0x1ab   :  { %v9191_v53 = vpop.f32.mrb[22].mxu0 }
 0x1ac   :  { %v9193_v55 = vpop.f32.mrb[23].mxu0 }
 0x1af   :  { %v9195_v56 = vpop.f32.mrb[24].mxu0 }
 0x1b0   :  { %v9197_v57 = vpop.f32.mrb[25].mxu0 }
 0x1b3   :  { %v9199_v59 = vpop.f32.mrb[26].mxu0 }
 0x1b4   :  { %v9201_v60 = vpop.f32.mrb[27].mxu0 }
 0x1b7   :  { %v9203_v61 = vpop.f32.mrb[28].mxu0 }
 0x1b8   :  { %v9205_v63 = vpop.f32.mrb[29].mxu0 }
 0x1bb   :  { %v9207_v0 = vpop.f32.mrb[30].mxu0 }
 0x1bc   :  { %12871 = vst [vmem:[#allocation19_spill] sm:$0xff] %v9207_v0  ;;  %v9209_v1 = vpop.f32.mrb[31].mxu0 }
 0x1bd   :  { %12872 = vst [vmem:[#allocation20_spill] sm:$0xff] %v9209_v1 }
 0x1df   :  { %v9211_v3 = vpop.f32.mrb[32].mxu0 }
 0x1e0   :  { %v761_v4 = vadd.f32 %v760_v45, %v9211_v3  ;;  %v835_v5 = vmul.f32 %v9211_v3, %v9211_v3  ;;  %v9216_v7 = vpop.f32.mrb[33].mxu0 }
 0x1e1   :  { %12873 = vst [vmem:[#allocation21_spill] sm:$0xff] %v9216_v7  ;;  %v836_v8 = vmul.f32 %v9216_v7, %v9216_v7 }
 0x1e2   :  { %v890_v9 = vadd.f32 %v889_v48, %v835_v5  ;;  %v762_v11 = vadd.f32 %v761_v4, %v9216_v7  ;;  %v838_v4 = vmul.f32 %v9145_v62, %v9145_v62 }
 0x1e3   :  { %v9221_v12 = vpop.f32.mrb[34].mxu0 }
 0x1e4   :  { %12874 = vst [vmem:[#allocation22_spill] sm:$0xff] %v9221_v12  ;;  %v891_v13 = vadd.f32 %v890_v9, %v836_v8  ;;  %v9223_v15 = vpop.f32.mrb[35].mxu0 }
 0x1e7   :  { %v9225_v16 = vpop.f32.mrb[36].mxu0 }
 0x1e8   :  { %v9227_v17 = vpop.f32.mrb[37].mxu0 }
 0x1eb   :  { %v9229_v19 = vpop.f32.mrb[38].mxu0 }
 0x1ec   :  { %v9231_v20 = vpop.f32.mrb[39].mxu0 }
 0x1ef   :  { %v9233_v21 = vpop.f32.mrb[40].mxu0 }
 0x1f0   :  { %v9235_v23 = vpop.f32.mrb[41].mxu0 }
 0x1f3   :  { %v9237_v24 = vpop.f32.mrb[42].mxu0 }
 0x1f4   :  { %v9239_v25 = vpop.f32.mrb[43].mxu0 }
 0x1f7   :  { %v9241_v27 = vpop.f32.mrb[44].mxu0 }
 0x1f8   :  { %12875 = vst [vmem:[#allocation23_spill] sm:$0xff] %v9241_v27  ;;  %v9243_v28 = vpop.f32.mrb[45].mxu0 }
 0x1f9   :  { %12876 = vst [vmem:[#allocation24_spill] sm:$0xff] %v9243_v28 }
 0x1fb   :  { %v9245_v29 = vpop.f32.mrb[46].mxu0 }
 0x1fc   :  { %12877 = vst [vmem:[#allocation25_spill] sm:$0xff] %v9245_v29  ;;  %v9247_v31 = vpop.f32.mrb[47].mxu0 }
 0x1fd   :  { %12878 = vst [vmem:[#allocation26_spill] sm:$0xff] %v9247_v31 }
 0x1ff   :  { %v6226_v40 = vpop.f32.mrb[48].mxu0 }
 0x200   :  { %v6227_v50 = vpop.f32.mrb[49].mxu0 }
 0x201   :  { %v9249_v54 = vadd.f32 %v6227_v50, %v6226_v40  ;;  %v839_v40 = vmul.f32 %v9147_v2, %v9147_v2 }
 0x203   :  { %12879 = vst [vmem:[#allocation27_spill] sm:$0xff] %v9249_v54  ;;  %v764_v58 = vsel %vm763_vm0, %v9249_v54, 0.0  ;;  %v837_v38 = vmul.f32 %v9249_v54, %v9249_v54  ;;  %v6229_v39 = vpop.f32.mrb[50].mxu0 }
 0x204   :  { %v765_v43 = vadd.f32 %v764_v58, %v762_v11  ;;  %v6230_v44 = vpop.f32.mrb[51].mxu0  ;;  %v840_v58 = vmul.f32 %v9183_v47, %v9183_v47 }
 0x205   :  { %v892_v45 = vsel %vm763_vm0, %v837_v38, 0.0  ;;  %v9256_v48 = vadd.f32 %v6230_v44, %v6229_v39 }
 0x206   :  { %v766_v5 = vadd.f32 %v765_v43, %v9145_v62  ;;  %v893_v8 = vadd.f32 %v892_v45, %v891_v13  ;;  %v841_v13 = vmul.f32 %v9185_v49, %v9185_v49 }
 0x207   :  { %12880 = vst [vmem:[#allocation28_spill] sm:$0xff] %v9256_v48  ;;  %v6232_v9 = vpop.f32.mrb[52].mxu0 }
 0x208   :  { %v767_v50 = vadd.f32 %v766_v5, %v9147_v2  ;;  %v894_v54 = vadd.f32 %v893_v8, %v838_v4  ;;  %v6233_v7 = vpop.f32.mrb[53].mxu0  ;;  %v844_v4 = vmul.f32 %v9256_v48, %v9256_v48 }
 0x209   :  { %v9264_v11 = vadd.f32 %v6233_v7, %v6232_v9  ;;  %v842_v7 = vmul.f32 %v9221_v12, %v9221_v12 }
 0x20a   :  { %v768_v38 = vadd.f32 %v767_v50, %v9183_v47  ;;  %v895_v39 = vadd.f32 %v894_v54, %v839_v40  ;;  %v772_v54 = vsel %vm763_vm0, %v9256_v48, 0.0  ;;  %v843_v50 = vmul.f32 %v9223_v15, %v9223_v15 }
 0x20b   :  { %12881 = vst [vmem:[#allocation29_spill] sm:$0xff] %v9264_v11  ;;  %v6235_v44 = vpop.f32.mrb[54].mxu0 }
 0x20c   :  { %v896_v43 = vadd.f32 %v895_v39, %v840_v58  ;;  %v769_v45 = vadd.f32 %v768_v38, %v9185_v49  ;;  %v6236_v62 = vpop.f32.mrb[55].mxu0 }
 0x20d   :  { %v9274_v5 = vadd.f32 %v6236_v62, %v6235_v44  ;;  %v900_v62 = vsel %vm763_vm0, %v844_v4, 0.0 }
 0x20e   :  { %v770_v8 = vadd.f32 %v769_v45, %v9221_v12  ;;  %v897_v9 = vadd.f32 %v896_v43, %v841_v13  ;;  %v845_v13 = vmul.f32 %v9149_v6, %v9149_v6 }
 0x20f   :  { %12882 = vst [vmem:[#allocation30_spill] sm:$0xff] %v9274_v5  ;;  %v6238_v40 = vpop.f32.mrb[56].mxu0 }
 0x210   :  { %v771_v58 = vadd.f32 %v770_v8, %v9223_v15  ;;  %v898_v38 = vadd.f32 %v897_v9, %v842_v7  ;;  %v6239_v39 = vpop.f32.mrb[57].mxu0  ;;  %v846_v7 = vmul.f32 %v9151_v10, %v9151_v10 }
 0x211   :  { %v9285_v44 = vadd.f32 %v6239_v39, %v6238_v40 }
 0x212   :  { %v773_v49 = vadd.f32 %v772_v54, %v771_v58  ;;  %v899_v47 = vadd.f32 %v898_v38, %v843_v50  ;;  %v847_v54 = vmul.f32 %v9187_v51, %v9187_v51 }
 0x213   :  { %12883 = vst [vmem:[#allocation31_spill] sm:$0xff] %v9285_v44  ;;  %v6241_v2 = vpop.f32.mrb[58].mxu0 }
 0x214   :  { %v774_v43 = vadd.f32 %v773_v49, %v9149_v6  ;;  %v901_v45 = vadd.f32 %v900_v62, %v899_v47  ;;  %v6242_v48 = vpop.f32.mrb[59].mxu0  ;;  %v849_v62 = vmul.f32 %v9225_v16, %v9225_v16 }
 0x215   :  { %v9290_v12 = vadd.f32 %v6242_v48, %v6241_v2  ;;  %v848_v2 = vmul.f32 %v9189_v52, %v9189_v52  ;;  %v851_v48 = vmul.f32 %v9264_v11, %v9264_v11 }
 0x216   :  { %v775_v8 = vadd.f32 %v774_v43, %v9151_v10  ;;  %v902_v4 = vadd.f32 %v901_v45, %v845_v13 }
 0x217   :  { %12884 = vst [vmem:[#allocation32_spill] sm:$0xff] %v9290_v12  ;;  %v6244_v9 = vpop.f32.mrb[60].mxu0 }
 0x218   :  { %v776_v40 = vadd.f32 %v775_v8, %v9187_v51  ;;  %v903_v50 = vadd.f32 %v902_v4, %v846_v7  ;;  %v6245_v58 = vpop.f32.mrb[61].mxu0  ;;  %v780_v7 = vsel %vm763_vm0, %v9264_v11, 0.0  ;;  %v850_v4 = vmul.f32 %v9227_v17, %v9227_v17 }
 0x219   :  { %v9298_v38 = vadd.f32 %v6245_v58, %v6244_v9 }
 0x21a   :  { %v904_v47 = vadd.f32 %v903_v50, %v847_v54  ;;  %v777_v49 = vadd.f32 %v776_v40, %v9189_v52  ;;  %v908_v40 = vsel %vm763_vm0, %v851_v48, 0.0 }
 0x21b   :  { %12885 = vst [vmem:[#allocation33_spill] sm:$0xff] %v9298_v38  ;;  %v6247_v39 = vpop.f32.mrb[62].mxu0 }
 0x21c   :  { %v778_v13 = vadd.f32 %v777_v49, %v9225_v16  ;;  %v905_v43 = vadd.f32 %v904_v47, %v848_v2  ;;  %v6248_v45 = vpop.f32.mrb[63].mxu0  ;;  %v852_v49 = vmul.f32 %v9153_v14, %v9153_v14 }
 0x21d   :  { %v9310_v8 = vadd.f32 %v6248_v45, %v6247_v39  ;;  %v853_v39 = vmul.f32 %v9155_v18, %v9155_v18 }
 0x21e   :  { %v779_v9 = vadd.f32 %v778_v13, %v9227_v17  ;;  %v906_v54 = vadd.f32 %v905_v43, %v849_v62  ;;  %v854_v13 = vmul.f32 %v9191_v53, %v9191_v53  ;;  %v855_v43 = vmul.f32 %v9193_v55, %v9193_v55 }
 0x21f   :  { %12886 = vst [vmem:[#allocation34_spill] sm:$0xff] %v9310_v8 }
 0x220   :  { %v781_v50 = vadd.f32 %v780_v7, %v779_v9  ;;  %v907_v58 = vadd.f32 %v906_v54, %v850_v4  ;;  %v858_v9 = vmul.f32 %v9274_v5, %v9274_v5  ;;  %v856_v54 = vmul.f32 %v9229_v19, %v9229_v19 }
 0x222   :  { %v782_v2 = vadd.f32 %v781_v50, %v9153_v14  ;;  %v909_v47 = vadd.f32 %v908_v40, %v907_v58  ;;  %v788_v58 = vsel %vm763_vm0, %v9274_v5, 0.0  ;;  %v1083_v5 = vld [vmem:[#allocation2 + $0x10] sm:$0xff] }
 0x224   :  { %v783_v45 = vadd.f32 %v782_v2, %v9155_v18  ;;  %v910_v11 = vadd.f32 %v909_v47, %v852_v49  ;;  %v916_v47 = vsel %vm763_vm0, %v858_v9, 0.0 }
 0x226   :  { %v784_v62 = vadd.f32 %v783_v45, %v9191_v53  ;;  %v911_v48 = vadd.f32 %v910_v11, %v853_v39  ;;  %v857_v11 = vmul.f32 %v9231_v20, %v9231_v20 }
 0x228   :  { %v912_v7 = vadd.f32 %v911_v48, %v854_v13  ;;  %v785_v4 = vadd.f32 %v784_v62, %v9193_v55  ;;  %v859_v13 = vmul.f32 %v9157_v22, %v9157_v22 }
 0x22a   :  { %v786_v40 = vadd.f32 %v785_v4, %v9229_v19  ;;  %v913_v50 = vadd.f32 %v912_v7, %v855_v43  ;;  %v860_v43 = vmul.f32 %v9159_v26, %v9159_v26 }
 0x22c   :  { %v787_v49 = vadd.f32 %v786_v40, %v9231_v20  ;;  %v914_v2 = vadd.f32 %v913_v50, %v856_v54  ;;  %v861_v40 = vmul.f32 %v9195_v56, %v9195_v56  ;;  %v862_v50 = vmul.f32 %v9197_v57, %v9197_v57 }
 0x22e   :  { %v789_v39 = vadd.f32 %v788_v58, %v787_v49  ;;  %v915_v45 = vadd.f32 %v914_v2, %v857_v11  ;;  %v865_v49 = vmul.f32 %v9285_v44, %v9285_v44  ;;  %v863_v2 = vmul.f32 %v9233_v21, %v9233_v21 }
 0x230   :  { %v790_v62 = vadd.f32 %v789_v39, %v9157_v22  ;;  %v917_v48 = vadd.f32 %v916_v47, %v915_v45  ;;  %v796_v45 = vsel %vm763_vm0, %v9285_v44, 0.0 }
 0x232   :  { %v791_v7 = vadd.f32 %v790_v62, %v9159_v26  ;;  %v918_v4 = vadd.f32 %v917_v48, %v859_v13  ;;  %v864_v13 = vmul.f32 %v9235_v23, %v9235_v23 }
 0x234   :  { %v792_v54 = vadd.f32 %v791_v7, %v9195_v56  ;;  %v919_v9 = vadd.f32 %v918_v4, %v860_v43  ;;  %v924_v43 = vsel %vm763_vm0, %v865_v49, 0.0 }
 0x236   :  { %v920_v58 = vadd.f32 %v919_v9, %v861_v40  ;;  %v793_v11 = vadd.f32 %v792_v54, %v9197_v57  ;;  %v866_v40 = vmul.f32 %v9161_v30, %v9161_v30 }
 0x238   :  { %v794_v47 = vadd.f32 %v793_v11, %v9233_v21  ;;  %v921_v39 = vadd.f32 %v920_v58, %v862_v50  ;;  %v867_v50 = vmul.f32 %v9163_v34, %v9163_v34 }
 0x23a   :  { %v795_v62 = vadd.f32 %v794_v47, %v9235_v23  ;;  %v922_v48 = vadd.f32 %v921_v39, %v863_v2  ;;  %v868_v47 = vmul.f32 %v9199_v59, %v9199_v59  ;;  %v869_v39 = vmul.f32 %v9201_v60, %v9201_v60 }
 0x23c   :  { %v797_v7 = vadd.f32 %v796_v45, %v795_v62  ;;  %v923_v4 = vadd.f32 %v922_v48, %v864_v13  ;;  %v872_v62 = vmul.f32 %v9290_v12, %v9290_v12  ;;  %v870_v48 = vmul.f32 %v9237_v24, %v9237_v24 }
 0x23e   :  { %v798_v54 = vadd.f32 %v797_v7, %v9161_v30  ;;  %v925_v9 = vadd.f32 %v924_v43, %v923_v4  ;;  %v804_v4 = vsel %vm763_vm0, %v9290_v12, 0.0 }
 0x240   :  { %v799_v58 = vadd.f32 %v798_v54, %v9163_v34  ;;  %v926_v11 = vadd.f32 %v925_v9, %v866_v40  ;;  %v871_v40 = vmul.f32 %v9239_v25, %v9239_v25 }
 0x242   :  { %v800_v2 = vadd.f32 %v799_v58, %v9199_v59  ;;  %v927_v49 = vadd.f32 %v926_v11, %v867_v50  ;;  %v932_v50 = vsel %vm763_vm0, %v872_v62, 0.0 }
 0x244   :  { %v928_v45 = vadd.f32 %v927_v49, %v868_v47  ;;  %v801_v13 = vadd.f32 %v800_v2, %v9201_v60  ;;  %v873_v47 = vmul.f32 %v9165_v32, %v9165_v32 }
 0x246   :  { %v802_v43 = vadd.f32 %v801_v13, %v9237_v24  ;;  %v929_v7 = vadd.f32 %v928_v45, %v869_v39  ;;  %v874_v39 = vmul.f32 %v9167_v33, %v9167_v33 }
 0x248   :  { %v803_v54 = vadd.f32 %v802_v43, %v9239_v25  ;;  %v930_v9 = vadd.f32 %v929_v7, %v870_v48  ;;  %v875_v43 = vmul.f32 %v9203_v61, %v9203_v61  ;;  %v876_v7 = vmul.f32 %v9205_v63, %v9205_v63 }
 0x24a   :  { %v805_v58 = vadd.f32 %v804_v4, %v803_v54  ;;  %v931_v11 = vadd.f32 %v930_v9, %v871_v40  ;;  %v879_v54 = vmul.f32 %v9298_v38, %v9298_v38  ;;  %v877_v9 = vmul.f32 %v9241_v27, %v9241_v27 }
 0x24c   :  { %v806_v2 = vadd.f32 %v805_v58, %v9165_v32  ;;  %v933_v49 = vadd.f32 %v932_v50, %v931_v11  ;;  %v812_v11 = vsel %vm763_vm0, %v9298_v38, 0.0  ;;  %v1081_v38 = vld [vmem:[#allocation2] sm:$0xff] }
 0x24e   :  { %v807_v45 = vadd.f32 %v806_v2, %v9167_v33  ;;  %v934_v13 = vadd.f32 %v933_v49, %v873_v47  ;;  %v878_v47 = vmul.f32 %v9243_v28, %v9243_v28 }
 0x250   :  { %v808_v48 = vadd.f32 %v807_v45, %v9203_v61  ;;  %v935_v62 = vadd.f32 %v934_v13, %v874_v39  ;;  %v940_v39 = vsel %vm763_vm0, %v879_v54, 0.0 }
 0x252   :  { %v936_v4 = vadd.f32 %v935_v62, %v875_v43  ;;  %v809_v40 = vadd.f32 %v808_v48, %v9205_v63  ;;  %v880_v43 = vmul.f32 %v9169_v35, %v9169_v35 }
 0x254   :  { %v810_v50 = vadd.f32 %v809_v40, %v9241_v27  ;;  %v937_v58 = vadd.f32 %v936_v4, %v876_v7  ;;  %v881_v7 = vmul.f32 %v9171_v36, %v9171_v36 }
 0x256   :  { %v811_v2 = vadd.f32 %v810_v50, %v9243_v28  ;;  %v938_v49 = vadd.f32 %v937_v58, %v877_v9  ;;  %v882_v50 = vmul.f32 %v9207_v0, %v9207_v0  ;;  %v883_v58 = vmul.f32 %v9209_v1, %v9209_v1 }
 0x258   :  { %v813_v45 = vadd.f32 %v812_v11, %v811_v2  ;;  %v939_v13 = vadd.f32 %v938_v49, %v878_v47  ;;  %v884_v2 = vmul.f32 %v9245_v29, %v9245_v29 }
 0x25a   :  { %v814_v48 = vadd.f32 %v813_v45, %v9169_v35  ;;  %v941_v62 = vadd.f32 %v940_v39, %v939_v13  ;;  %v820_v45 = vsel %vm763_vm0, %v9310_v8, 0.0  ;;  %v886_v13 = vmul.f32 %v9310_v8, %v9310_v8  ;;  %v1089_v8 = vld [vmem:[#allocation2 + $0x40] sm:$0xff]  ;;  %v1316_v35 = vld [vmem:[#allocation2 + $0x758] sm:$0xff] }
 0x25b   :  { %v6476_v44 = vpack.c.bf16 %v1089_v8, %v1081_v38  ;;  %v1122_v38 = vld [vmem:[#allocation2 + $0x148] sm:$0xff] }
 0x25c   :  { %v942_v4 = vadd.f32 %v941_v62, %v880_v43  ;;  %v815_v40 = vadd.f32 %v814_v48, %v9171_v36  ;;  %v885_v43 = vmul.f32 %v9247_v31, %v9247_v31 }
 0x25e   :  { %v816_v9 = vadd.f32 %v815_v40, %v9207_v0  ;;  %v943_v54 = vadd.f32 %v942_v4, %v881_v7  ;;  %v948_v40 = vsel %vm763_vm0, %v886_v13, 0.0  ;;  %v1108_v13 = vld [vmem:[#allocation2 + $0xd8] sm:$0xff] }
 0x260   :  { %v817_v11 = vadd.f32 %v816_v9, %v9209_v1  ;;  %v944_v47 = vadd.f32 %v943_v54, %v882_v50  ;;  %v1082_v9 = vld [vmem:[#allocation2 + $0x8] sm:$0xff] }
 0x261   :  { %v1090_v54 = vld [vmem:[#allocation2 + $0x48] sm:$0xff] }
 0x262   :  { %v818_v49 = vadd.f32 %v817_v11, %v9245_v29  ;;  %v945_v39 = vadd.f32 %v944_v47, %v883_v58  ;;  %v1084_v58 = vld [vmem:[#allocation2 + $0x18] sm:$0xff]  ;;  %v6474_v11 = vpack.c.bf16 %v1090_v54, %v1082_v9  ;;  %v1091_v29 = vld [vmem:[#allocation2 + $0x50] sm:$0xff]  ;;  %v1114_v9 = vld [vmem:[#allocation2 + $0x108] sm:$0xff] }
 0x263   :  { %v1092_v47 = vld [vmem:[#allocation2 + $0x58] sm:$0xff]  ;;  %v6482_v54 = vpack.c.bf16 %v1122_v38, %v1114_v9  ;;  %v1131_v9 = vld [vmem:[#allocation2 + $0x190] sm:$0xff] }
 0x264   :  { %v819_v48 = vadd.f32 %v818_v49, %v9247_v31  ;;  %v946_v62 = vadd.f32 %v945_v39, %v884_v2  ;;  %v6670_v12 = vpack.c.bf16 %v1092_v47, %v1084_v58  ;;  %v1098_v49 = vld [vmem:[#allocation2 + $0x88] sm:$0xff]  ;;  %6475 = vmatprep.subr.bf16.mxu1 %v6474_v11  ;;  %v6672_v2 = vpack.c.bf16 %v1091_v29, %v1083_v5  ;;  %v1116_v29 = vld [vmem:[#allocation2 + $0x118] sm:$0xff]  ;;  %v1113_v58 = vld [vmem:[#allocation2 + $0x100] sm:$0xff] }
 0x265   :  { %v1106_v39 = vld [vmem:[#allocation2 + $0xc8] sm:$0xff]  ;;  %6477 = vmatpush1.bf16.msra.mxu1 %v6476_v44  ;;  %v1124_v5 = vld [vmem:[#allocation2 + $0x158] sm:$0xff]  ;;  %v1115_v44 = vld [vmem:[#allocation2 + $0x110] sm:$0xff] }
 0x266   :  { %v821_v7 = vadd.f32 %v820_v45, %v819_v48  ;;  %v947_v4 = vadd.f32 %v946_v62, %v885_v43  ;;  %v1100_v45 = vld [vmem:[#allocation2 + $0x98] sm:$0xff]  ;;  %6671 = vmatprep.subr.bf16.mxu0 %v6670_v12  ;;  %v6478_v43 = vpack.c.bf16 %v1106_v39, %v1098_v49  ;;  %v1097_v62 = vld [vmem:[#allocation2 + $0x80] sm:$0xff]  ;;  %v6678_v11 = vpack.c.bf16 %v1124_v5, %v1116_v29  ;;  %v1123_v47 = vld [vmem:[#allocation2 + $0x150] sm:$0xff] }
 0x267   :  { %v6674_v48 = vpack.c.bf16 %v1108_v13, %v1100_v45  ;;  %6673 = vmatpush1.bf16.msra.mxu0 %v6672_v2  ;;  %v1121_v12 = vld [vmem:[#allocation2 + $0x140] sm:$0xff]  ;;  %v6680_v2 = vpack.c.bf16 %v1123_v47, %v1115_v44  ;;  %v1130_v39 = vld [vmem:[#allocation2 + $0x188] sm:$0xff]  ;;  %v1132_v13 = vld [vmem:[#allocation2 + $0x198] sm:$0xff] }
 0x268   :  { %822 = vadd.xlane.f32.xlu0 %v821_v7  ;;  %v949_v50 = vadd.f32 %v948_v40, %v947_v4  ;;  %v1105_v7 = vld [vmem:[#allocation2 + $0xc0] sm:$0xff]  ;;  %v1099_v4 = vld [vmem:[#allocation2 + $0x90] sm:$0xff]  ;;  %6479 = vmatprep.subr.bf16.mxu1 %v6478_v43  ;;  %v6484_v49 = vpack.c.bf16 %v1121_v12, %v1113_v58  ;;  %v1138_v45 = vld [vmem:[#allocation2 + $0x1c8] sm:$0xff] }
 0x269   :  { %v6480_v40 = vpack.c.bf16 %v1105_v7, %v1097_v62  ;;  %6675 = vmatprep.subr.bf16.mxu0 %v6674_v48  ;;  %v6486_v43 = vpack.c.bf16 %v1138_v45, %v1130_v39  ;;  %v1140_v48 = vld [vmem:[#allocation2 + $0x1d8] sm:$0xff]  ;;  %v1129_v62 = vld [vmem:[#allocation2 + $0x180] sm:$0xff]  ;;  %v1139_v38 = vld [vmem:[#allocation2 + $0x1d0] sm:$0xff] }
 0x26a   :  { %v1137_v7 = vld [vmem:[#allocation2 + $0x1c0] sm:$0xff]  ;;  %v1146_v29 = vld [vmem:[#allocation2 + $0x208] sm:$0xff]  ;;  %v1156_v5 = vld [vmem:[#allocation2 + $0x258] sm:$0xff] }
 0x26b   :  { %6481 = vmatpush1.bf16.msra.mxu1 %v6480_v40  ;;  %v6684_v40 = vpack.c.bf16 %v1139_v38, %v1131_v9  ;;  %v1145_v12 = vld [vmem:[#allocation2 + $0x200] sm:$0xff]  ;;  %v1147_v47 = vld [vmem:[#allocation2 + $0x210] sm:$0xff]  ;;  %v1170_v45 = vld [vmem:[#allocation2 + $0x2c8] sm:$0xff] }
 0x26c   :  { %950 = vadd.xlane.f32.xlu0 %v949_v50  ;;  %v1107_v50 = vld [vmem:[#allocation2 + $0xd0] sm:$0xff]  ;;  %6483 = vmatprep.subr.bf16.mxu1 %v6482_v54  ;;  %v1148_v54 = vld [vmem:[#allocation2 + $0x218] sm:$0xff]  ;;  %v1153_v44 = vld [vmem:[#allocation2 + $0x240] sm:$0xff] }
 0x26d   :  { %v6676_v8 = vpack.c.bf16 %v1107_v50, %v1099_v4  ;;  %v6682_v4 = vpack.c.bf16 %v1140_v48, %v1132_v13  ;;  %v6488_v50 = vpack.c.bf16 %v1137_v7, %v1129_v62  ;;  %v1155_v39 = vld [vmem:[#allocation2 + $0x250] sm:$0xff]  ;;  %v1172_v62 = vld [vmem:[#allocation2 + $0x2d8] sm:$0xff]  ;;  %v1161_v7 = vld [vmem:[#allocation2 + $0x280] sm:$0xff] }
 0x26e   :  { %v6688_v13 = vpack.c.bf16 %v1155_v39, %v1147_v47  ;;  %v1163_v38 = vld [vmem:[#allocation2 + $0x290] sm:$0xff]  ;;  %v1185_v47 = vld [vmem:[#allocation2 + $0x340] sm:$0xff]  ;;  %v1204_v31 = vld [vmem:[#allocation2 + $0x3d8] sm:$0xff] }
 0x26f   :  { %6677 = vmatpush1.bf16.msra.mxu0 %v6676_v8  ;;  %6485 = vmatpush1.bf16.msra.mxu1 %v6484_v49  ;;  %v1154_v8 = vld [vmem:[#allocation2 + $0x248] sm:$0xff]  ;;  %v6492_v49 = vpack.c.bf16 %v1153_v44, %v1145_v12  ;;  %v1188_v12 = vld [vmem:[#allocation2 + $0x358] sm:$0xff]  ;;  %v1177_v44 = vld [vmem:[#allocation2 + $0x300] sm:$0xff] }
 0x270   :  { %6679 = vmatprep.subr.bf16.mxu0 %v6678_v11  ;;  %6487 = vmatprep.subr.bf16.mxu1 %v6486_v43  ;;  %v6490_v58 = vpack.c.bf16 %v1154_v8, %v1146_v29  ;;  %v6686_v11 = vpack.c.bf16 %v1156_v5, %v1148_v54  ;;  %v1164_v43 = vld [vmem:[#allocation2 + $0x298] sm:$0xff]  ;;  %v1171_v29 = vld [vmem:[#allocation2 + $0x2d0] sm:$0xff]  ;;  %v1178_v8 = vld [vmem:[#allocation2 + $0x308] sm:$0xff]  ;;  %v6500_v1 = vpack.c.bf16 %v1185_v47, %v1177_v44 }
 0x271   :  { %v6690_v9 = vpack.c.bf16 %v1172_v62, %v1164_v43  ;;  %v1186_v54 = vld [vmem:[#allocation2 + $0x348] sm:$0xff]  ;;  %v1180_v5 = vld [vmem:[#allocation2 + $0x318] sm:$0xff]  ;;  %v1179_v39 = vld [vmem:[#allocation2 + $0x310] sm:$0xff] }
 0x272   :  { %v1202_v43 = vld [vmem:[#allocation2 + $0x3c8] sm:$0xff]  ;;  %v1196_v62 = vld [vmem:[#allocation2 + $0x398] sm:$0xff]  ;;  %v1211_v47 = vld [vmem:[#allocation2 + $0x410] sm:$0xff] }
 0x273   :  { %6681 = vmatpush1.bf16.msra.mxu0 %v6680_v2  ;;  %6489 = vmatpush1.bf16.msra.mxu1 %v6488_v50  ;;  %v1162_v2 = vld [vmem:[#allocation2 + $0x288] sm:$0xff] }
 0x274   :  { %6683 = vmatprep.subr.bf16.mxu0 %v6682_v4  ;;  %6491 = vmatprep.subr.bf16.mxu1 %v6490_v58  ;;  %v6494_v48 = vpack.c.bf16 %v1170_v45, %v1162_v2  ;;  %v1169_v4 = vld [vmem:[#allocation2 + $0x2c0] sm:$0xff]  ;;  %v6498_v58 = vpack.c.bf16 %v1186_v54, %v1178_v8  ;;  %v6694_v2 = vpack.c.bf16 %v1188_v12, %v1180_v5  ;;  %v1194_v45 = vld [vmem:[#allocation2 + $0x388] sm:$0xff]  ;;  %v1212_v54 = vld [vmem:[#allocation2 + $0x418] sm:$0xff] }
 0x275   :  { %v6496_v50 = vpack.c.bf16 %v1169_v4, %v1161_v7  ;;  %v6502_v7 = vpack.c.bf16 %v1202_v43, %v1194_v45  ;;  %v1195_v4 = vld [vmem:[#allocation2 + $0x390] sm:$0xff]  ;;  %v1210_v8 = vld [vmem:[#allocation2 + $0x408] sm:$0xff]  ;;  %v1220_v5 = vld [vmem:[#allocation2 + $0x458] sm:$0xff] }
 0x276   :  { %v1226_v45 = vld [vmem:[#allocation2 + $0x488] sm:$0xff]  ;;  %v1236_v43 = vld [vmem:[#allocation2 + $0x4d8] sm:$0xff] }
 0x277   :  { %6685 = vmatpush1.bf16.msra.mxu0 %v6684_v40  ;;  %6493 = vmatpush1.bf16.msra.mxu1 %v6492_v49  ;;  %v6692_v40 = vpack.c.bf16 %v1171_v29, %v1163_v38  ;;  %v6698_v38 = vpack.c.bf16 %v1204_v31, %v1196_v62  ;;  %v1203_v29 = vld [vmem:[#allocation2 + $0x3d0] sm:$0xff]  ;;  %v1228_v31 = vld [vmem:[#allocation2 + $0x498] sm:$0xff] }
 0x278   :  { %6687 = vmatprep.subr.bf16.mxu0 %v6686_v11  ;;  %6495 = vmatprep.subr.bf16.mxu1 %v6494_v48  ;;  %v1187_v11 = vld [vmem:[#allocation2 + $0x350] sm:$0xff]  ;;  %v1201_v48 = vld [vmem:[#allocation2 + $0x3c0] sm:$0xff] }
 0x279   :  { %v6696_v49 = vpack.c.bf16 %v1187_v11, %v1179_v39  ;;  %v6702_v39 = vpack.c.bf16 %v1220_v5, %v1212_v54  ;;  %v1219_v11 = vld [vmem:[#allocation2 + $0x450] sm:$0xff]  ;;  %v1252_v54 = vld [vmem:[#allocation2 + $0x558] sm:$0xff] }
 0x27b   :  { %6689 = vmatpush1.bf16.msra.mxu0 %v6688_v13  ;;  %6497 = vmatpush1.bf16.msra.mxu1 %v6496_v50  ;;  %v1193_v13 = vld [vmem:[#allocation2 + $0x380] sm:$0xff]  ;;  %v6700_v50 = vpack.c.bf16 %v1203_v29, %v1195_v4  ;;  %v6706_v4 = vpack.c.bf16 %v1236_v43, %v1228_v31  ;;  %v1235_v29 = vld [vmem:[#allocation2 + $0x4d0] sm:$0xff]  ;;  %v1268_v31 = vld [vmem:[#allocation2 + $0x5d8] sm:$0xff] }
 0x27c   :  { %6691 = vmatprep.subr.bf16.mxu0 %v6690_v9  ;;  %6499 = vmatprep.subr.bf16.mxu1 %v6498_v58  ;;  %v1218_v9 = vld [vmem:[#allocation2 + $0x448] sm:$0xff]  ;;  %v6504_v12 = vpack.c.bf16 %v1201_v48, %v1193_v13  ;;  %v1217_v58 = vld [vmem:[#allocation2 + $0x440] sm:$0xff]  ;;  %v1227_v48 = vld [vmem:[#allocation2 + $0x490] sm:$0xff] }
 0x27d   :  { %v6506_v44 = vpack.c.bf16 %v1218_v9, %v1210_v8  ;;  %v1242_v8 = vld [vmem:[#allocation2 + $0x508] sm:$0xff]  ;;  %v1244_v9 = vld [vmem:[#allocation2 + $0x518] sm:$0xff] }
 0x27f   :  { %6693 = vmatpush1.bf16.msra.mxu0 %v6692_v40  ;;  %6501 = vmatpush1.bf16.msra.mxu1 %v6500_v1  ;;  %v1209_v40 = vld [vmem:[#allocation2 + $0x400] sm:$0xff]  ;;  %v6704_v1 = vpack.c.bf16 %v1219_v11, %v1211_v47  ;;  %v6710_v47 = vpack.c.bf16 %v1252_v54, %v1244_v9  ;;  %v1251_v11 = vld [vmem:[#allocation2 + $0x550] sm:$0xff]  ;;  %v1284_v9 = vld [vmem:[#allocation2 + $0x658] sm:$0xff] }
 0x280   :  { %6695 = vmatprep.subr.bf16.mxu0 %v6694_v2  ;;  %6503 = vmatprep.subr.bf16.mxu1 %v6502_v7  ;;  %v1234_v2 = vld [vmem:[#allocation2 + $0x4c8] sm:$0xff]  ;;  %v6508_v62 = vpack.c.bf16 %v1217_v58, %v1209_v40  ;;  %v1233_v7 = vld [vmem:[#allocation2 + $0x4c0] sm:$0xff]  ;;  %v1243_v58 = vld [vmem:[#allocation2 + $0x510] sm:$0xff] }
 0x281   :  { %v6510_v13 = vpack.c.bf16 %v1234_v2, %v1226_v45  ;;  %v1258_v45 = vld [vmem:[#allocation2 + $0x588] sm:$0xff]  ;;  %v1260_v2 = vld [vmem:[#allocation2 + $0x598] sm:$0xff] }
 0x283   :  { %6697 = vmatpush1.bf16.msra.mxu0 %v6696_v49  ;;  %6505 = vmatpush1.bf16.msra.mxu1 %v6504_v12  ;;  %v1225_v49 = vld [vmem:[#allocation2 + $0x480] sm:$0xff]  ;;  %v6708_v12 = vpack.c.bf16 %v1235_v29, %v1227_v48  ;;  %v6714_v48 = vpack.c.bf16 %v1268_v31, %v1260_v2  ;;  %v1267_v29 = vld [vmem:[#allocation2 + $0x5d0] sm:$0xff]  ;;  %v1292_v2 = vld [vmem:[#allocation2 + $0x698] sm:$0xff] }
 0x284   :  { %6699 = vmatprep.subr.bf16.mxu0 %v6698_v38  ;;  %6507 = vmatprep.subr.bf16.mxu1 %v6506_v44  ;;  %v1250_v38 = vld [vmem:[#allocation2 + $0x548] sm:$0xff]  ;;  %v6512_v5 = vpack.c.bf16 %v1233_v7, %v1225_v49  ;;  %v1249_v44 = vld [vmem:[#allocation2 + $0x540] sm:$0xff]  ;;  %v1259_v7 = vld [vmem:[#allocation2 + $0x590] sm:$0xff] }
 0x285   :  { %v6514_v40 = vpack.c.bf16 %v1250_v38, %v1242_v8  ;;  %v1274_v8 = vld [vmem:[#allocation2 + $0x608] sm:$0xff]  ;;  %v1276_v38 = vld [vmem:[#allocation2 + $0x618] sm:$0xff] }
 0x286   :  { %v1300_v31 = vld [vmem:[#allocation2 + $0x6d8] sm:$0xff] }
 0x287   :  { %6701 = vmatpush1.bf16.msra.mxu0 %v6700_v50  ;;  %6509 = vmatpush1.bf16.msra.mxu1 %v6508_v62  ;;  %v1241_v50 = vld [vmem:[#allocation2 + $0x500] sm:$0xff]  ;;  %v6712_v62 = vpack.c.bf16 %v1251_v11, %v1243_v58  ;;  %v6718_v58 = vpack.c.bf16 %v1284_v9, %v1276_v38  ;;  %v1283_v11 = vld [vmem:[#allocation2 + $0x650] sm:$0xff]  ;;  %v1308_v9 = vld [vmem:[#allocation2 + $0x718] sm:$0xff] }
 0x288   :  { %6703 = vmatprep.subr.bf16.mxu0 %v6702_v39  ;;  %6511 = vmatprep.subr.bf16.mxu1 %v6510_v13  ;;  %v1266_v39 = vld [vmem:[#allocation2 + $0x5c8] sm:$0xff]  ;;  %v6516_v43 = vpack.c.bf16 %v1249_v44, %v1241_v50  ;;  %v1265_v13 = vld [vmem:[#allocation2 + $0x5c0] sm:$0xff]  ;;  %v1275_v44 = vld [vmem:[#allocation2 + $0x610] sm:$0xff] }
 0x289   :  { %v6518_v49 = vpack.c.bf16 %v1266_v39, %v1258_v45  ;;  %v1290_v45 = vld [vmem:[#allocation2 + $0x688] sm:$0xff] }
 0x28b   :  { %6705 = vmatpush1.bf16.msra.mxu0 %v6704_v1  ;;  %6513 = vmatpush1.bf16.msra.mxu1 %v6512_v5  ;;  %v1257_v1 = vld [vmem:[#allocation2 + $0x580] sm:$0xff]  ;;  %v6716_v5 = vpack.c.bf16 %v1267_v29, %v1259_v7  ;;  %v1299_v29 = vld [vmem:[#allocation2 + $0x6d0] sm:$0xff] }
 0x28c   :  { %6707 = vmatprep.subr.bf16.mxu0 %v6706_v4  ;;  %6515 = vmatprep.subr.bf16.mxu1 %v6514_v40  ;;  %v1282_v4 = vld [vmem:[#allocation2 + $0x648] sm:$0xff]  ;;  %v6520_v54 = vpack.c.bf16 %v1265_v13, %v1257_v1  ;;  %v1281_v40 = vld [vmem:[#allocation2 + $0x640] sm:$0xff]  ;;  %v1291_v13 = vld [vmem:[#allocation2 + $0x690] sm:$0xff] }
 0x28d   :  { %v6522_v50 = vpack.c.bf16 %v1282_v4, %v1274_v8  ;;  %v1297_v1 = vld [vmem:[#allocation2 + $0x6c0] sm:$0xff]  ;;  %v1306_v8 = vld [vmem:[#allocation2 + $0x708] sm:$0xff] }
 0x28e   :  { %v1314_v4 = vld [vmem:[#allocation2 + $0x748] sm:$0xff] }
 0x28f   :  { %6709 = vmatpush1.bf16.msra.mxu0 %v6708_v12  ;;  %6517 = vmatpush1.bf16.msra.mxu1 %v6516_v43  ;;  %v1273_v12 = vld [vmem:[#allocation2 + $0x600] sm:$0xff]  ;;  %v6720_v43 = vpack.c.bf16 %v1283_v11, %v1275_v44  ;;  %v1307_v11 = vld [vmem:[#allocation2 + $0x710] sm:$0xff] }
 0x290   :  { %6711 = vmatprep.subr.bf16.mxu0 %v6710_v47  ;;  %6519 = vmatprep.subr.bf16.mxu1 %v6518_v49  ;;  %v1298_v47 = vld [vmem:[#allocation2 + $0x6c8] sm:$0xff]  ;;  %v6524_v36 = vpack.c.bf16 %v1281_v40, %v1273_v12  ;;  %v1289_v49 = vld [vmem:[#allocation2 + $0x680] sm:$0xff] }
 0x291   :  { %v1305_v12 = vld [vmem:[#allocation2 + $0x700] sm:$0xff] }
 0x292   :  { %v1313_v40 = vld [vmem:[#allocation2 + $0x740] sm:$0xff] }
 0x293   :  { %6713 = vmatpush1.bf16.msra.mxu0 %v6712_v62  ;;  %6521 = vmatpush1.bf16.msra.mxu1 %v6520_v54  ;;  %v6526_v62 = vpack.c.bf16 %v1298_v47, %v1290_v45  ;;  %v6528_v54 = vpack.c.bf16 %v1297_v1, %v1289_v49  ;;  %v1315_v45 = vld [vmem:[#allocation2 + $0x750] sm:$0xff]  ;;  %v1324_v49 = vld [vmem:[#allocation2 + $0x798] sm:$0xff] }
 0x294   :  { %6715 = vmatprep.subr.bf16.mxu0 %v6714_v48  ;;  %6523 = vmatprep.subr.bf16.mxu1 %v6522_v50  ;;  %v6722_v48 = vpack.c.bf16 %v1300_v31, %v1292_v2  ;;  %v6530_v50 = vpack.c.bf16 %v1314_v4, %v1306_v8  ;;  %v6532_v2 = vpack.c.bf16 %v1313_v40, %v1305_v12  ;;  %v1323_v4 = vld [vmem:[#allocation2 + $0x790] sm:$0xff]  ;;  %v1348_v40 = vld [vmem:[#allocation2 + $0x858] sm:$0xff] }
 0x297   :  { %6717 = vmatpush1.bf16.msra.mxu0 %v6716_v5  ;;  %6525 = vmatpush1.bf16.msra.mxu1 %v6524_v36  ;;  %v6724_v5 = vpack.c.bf16 %v1299_v29, %v1291_v13  ;;  %v6728_v36 = vpack.c.bf16 %v1315_v45, %v1307_v11  ;;  %v1332_v13 = vld [vmem:[#allocation2 + $0x7d8] sm:$0xff] }
 0x298   :  { %6719 = vmatprep.subr.bf16.mxu0 %v6718_v58  ;;  %6527 = vmatprep.subr.bf16.mxu1 %v6526_v62  ;;  %v6726_v58 = vpack.c.bf16 %v1316_v35, %v1308_v9  ;;  %v1330_v35 = vld [vmem:[#allocation2 + $0x7c8] sm:$0xff]  ;;  %v6730_v29 = vpack.c.bf16 %v1332_v13, %v1324_v49  ;;  %v12891_v49 = vld [vmem:[#allocation18_spill] sm:$0xff] }
 0x299   :  { %v12892_v13 = vld [vmem:[#allocation22_spill] sm:$0xff] }
 0x29b   :  { %6721 = vmatpush1.bf16.msra.mxu0 %v6720_v43  ;;  %6529 = vmatpush1.bf16.msra.mxu1 %v6528_v54  ;;  %v1338_v54 = vld [vmem:[#allocation2 + $0x808] sm:$0xff] }
 0x29c   :  { %6723 = vmatprep.subr.bf16.mxu0 %v6722_v48  ;;  %6531 = vmatprep.subr.bf16.mxu1 %v6530_v50  ;;  %v1329_v48 = vld [vmem:[#allocation2 + $0x7c0] sm:$0xff]  ;;  %v1340_v50 = vld [vmem:[#allocation2 + $0x818] sm:$0xff] }
 0x29f   :  { %6725 = vmatpush1.bf16.msra.mxu0 %v6724_v5  ;;  %6533 = vmatpush1.bf16.msra.mxu1 %v6532_v2  ;;  %v1346_v5 = vld [vmem:[#allocation2 + $0x848] sm:$0xff]  ;;  %v12887_v2 = vld [vmem:[#allocation21_spill] sm:$0xff] }
 0x2a0   :  { %6727 = vmatprep.subr.bf16.mxu0 %v6726_v58  ;;  %v6538_v12 = vpack.c.bf16 %v1346_v5, %v1338_v54  ;;  %v12899_v5 = vld [vmem:[#allocation25_spill] sm:$0xff]  ;;  %v9548_v58 = vld [vmem:[#allocation2 + $0x880] sm:$0xff] }
 0x2a1   :  { %v1347_v54 = vld [vmem:[#allocation2 + $0x850] sm:$0xff] }
 0x2a3   :  { %6729 = vmatpush1.bf16.msra.mxu0 %v6728_v36  ;;  %v9534_v36 = vld [vmem:[#allocation2 + $0x888] sm:$0xff] }
 0x2a4   :  { %6731 = vmatprep.subr.bf16.mxu0 %v6730_v29  ;;  %v12898_v29 = vld [vmem:[#allocation20_spill] sm:$0xff] }
 0x2f5   :  { %v823_v39 = vpop.xlane.xlu0 %822 }
 0x2f6   :  { %v824_v0 = vrot.slane %v823_v39, 4 }
 0x2f8   :  { %v825_v7 = vadd.f32 %v824_v0, %v823_v39 }
 0x2f9   :  { %v951_v38 = vpop.xlane.xlu0 %950 }
 0x2fa   :  { %v826_v28 = vrot.slane %v825_v7, 2  ;;  %v952_v27 = vrot.slane %v951_v38, 4 }
 0x2fc   :  { %v953_v44 = vadd.f32 %v952_v27, %v951_v38  ;;  %v827_v0 = vadd.f32 %v826_v28, %v825_v7  ;;  %v1322_v28 = vld [vmem:[#allocation2 + $0x788] sm:$0xff]  ;;  %v1321_v7 = vld [vmem:[#allocation2 + $0x780] sm:$0xff]  ;;  %v1331_v38 = vld [vmem:[#allocation2 + $0x7d0] sm:$0xff] }
 0x2fd   :  { %v6534_v1 = vpack.c.bf16 %v1330_v35, %v1322_v28  ;;  %v6536_v8 = vpack.c.bf16 %v1329_v48, %v1321_v7  ;;  %v6732_v9 = vpack.c.bf16 %v1331_v38, %v1323_v4  ;;  %v12890_v28 = vld [vmem:[#allocation17_spill] sm:$0xff]  ;;  %v12901_v48 = vld [vmem:[#allocation27_spill] sm:$0xff] }
 0x2fe   :  { %v954_v47 = vrot.slane %v953_v44, 2  ;;  %v828_v39 = vrot.slane %v827_v0, 1  ;;  %v1339_v35 = vld [vmem:[#allocation2 + $0x810] sm:$0xff]  ;;  %v9540_v38 = vld [vmem:[#allocation2 + $0x8d8] sm:$0xff] }
 0x2ff   :  { %6535 = vmatprep.subr.bf16.mxu1 %v6534_v1  ;;  %6733 = vmatpush1.bf16.msra.mxu0 %v6732_v9  ;;  %v1345_v1 = vld [vmem:[#allocation2 + $0x840] sm:$0xff]  ;;  %v9536_v9 = vld [vmem:[#allocation2 + $0x8c8] sm:$0xff] }
 0x300   :  { %v955_v31 = vadd.f32 %v954_v47, %v953_v44  ;;  %v829_v43 = vadd.f32 %v828_v39, %v827_v0  ;;  %6537 = vmatpush1.bf16.msra.mxu1 %v6536_v8  ;;  %v6734_v44 = vpack.c.bf16 %v1348_v40, %v1340_v50  ;;  %v12893_v50 = vld [vmem:[#allocation23_spill] sm:$0xff]  ;;  %v12894_v8 = vld [vmem:[#allocation24_spill] sm:$0xff]  ;;  %v12900_v40 = vld [vmem:[#allocation26_spill] sm:$0xff]  ;;  %v6542_v11 = vpack.c.bf16 %v9536_v9, %v9534_v36 }
 0x301   :  { %6539 = vmatprep.subr.bf16.mxu1 %v6538_v12  ;;  %v12897_v47 = vld [vmem:[#allocation19_spill] sm:$0xff]  ;;  %v9538_v39 = vld [vmem:[#allocation2 + $0x898] sm:$0xff] }
 0x302   :  { %7834 = vpush %v829_v43  ;;  %v956_v62 = vrot.slane %v955_v31, 1  ;;  %6735 = vmatprep.subr.bf16.mxu0 %v6734_v44 }
 0x304   :  { %v957_v27 = vadd.f32 %v956_v62, %v955_v31  ;;  %v12888_v31 = vld [vmem:[#allocation12_spill] sm:$0xff]  ;;  %v12889_v62 = vld [vmem:[#allocation13_spill] sm:$0xff] }
 0x306   :  { %7836 = vpush %v957_v27  ;;  %v1337_v27 = vld [vmem:[#allocation2 + $0x800] sm:$0xff] }
 0x307   :  { %v6540_v4 = vpack.c.bf16 %v1345_v1, %v1337_v27 }
 0x333   :  { %s7835_s1 = spop %7834 }
 0x334   :  { %s9431_s26 = smul.f32 1.9929847e-05, %s7835_s1 }
 0x336   :  { %v9434_v0 = vstv %s9431_s26  ;;  %s961_s28 = smul.f32 %s9431_s26, %s9431_s26 }
 0x337   :  { %s7837_s27 = spop %7836  ;;  %v970_v45 = vsub.f32 %v12901_v48, %v9434_v0  ;;  %v12902_v43 = vsub.f32 %v9135_v41, %v9434_v0  ;;  %v12904_v27 = vsub.f32 %v9139_v46, %v9434_v0  ;;  %v6738_v48 = vpack.c.bf16 %v9540_v38, %v9538_v39  ;;  %v12907_v41 = vld [vmem:[#allocation28_spill] sm:$0xff] }
 0x338   :  { %s960_s5 = smul.f32 1.9929847e-05, %s7837_s27  ;;  %v977_v9 = vsub.f32 %v12907_v41, %v9434_v0  ;;  %v12911_v39 = vsub.f32 %v12890_v28, %v9434_v0  ;;  %v12914_v28 = vld [vmem:[#allocation29_spill] sm:$0xff] }
 0x33a   :  { %s962_s29 = ssub.f32 %s960_s5, %s961_s28 }
 0x33c   :  { %s1020_s30 = sadd.f32 1e-05, %s962_s29 }
 0x33e   :  { %v1021_v7 = vstv %s1020_s30 }
 0x33f   :  { %7850 = vrsqrt.f32 %v1021_v7 }
 0x349   :  { %v7851_v12 = vpop.eup %7850 }
 0x34a   :  { %7838 = vpush %v7851_v12  ;;  %v6736_v12 = vpack.c.bf16 %v1347_v54, %v1339_v35  ;;  %v12906_v35 = vsub.f32 %v9173_v37, %v9434_v0  ;;  %v12909_v54 = vsub.f32 %v12887_v2, %v9434_v0  ;;  %v12913_v2 = vsub.f32 %v12892_v13, %v9434_v0 }
 0x37b   :  { %s7839_s7 = spop %7838 }
 0x37c   :  { %v9544_v7 = vstv %s7839_s7 }
 0x37d   :  { %v9556_v44 = vmul.f32 %v9544_v7, %v12902_v43  ;;  %v9562_v1 = vmul.f32 %v9544_v7, %v12904_v27  ;;  %v9568_v36 = vmul.f32 %v9544_v7, %v12906_v35  ;;  %v12908_v43 = vsub.f32 %v9211_v3, %v9434_v0 }
 0x37e   :  { %v9584_v37 = vmul.f32 %v9544_v7, %v12909_v54  ;;  %v9587_v27 = vmul.f32 %v9544_v7, %v970_v45  ;;  %v9593_v38 = vmul.f32 %v9544_v7, %v12911_v39  ;;  %v12912_v3 = vsub.f32 %v12891_v49, %v9434_v0  ;;  %v12915_v54 = vld [vmem:[#allocation30_spill] sm:$0xff] }
 0x37f   :  { %12903 = vst [vmem:[#allocation21_spill] sm:$0xff] %v9556_v44  ;;  %12905 = vst [vmem:[#allocation12_spill] sm:$0xff] %v9562_v1  ;;  %v9578_v46 = vmul.f32 %v9544_v7, %v12908_v43  ;;  %v9605_v41 = vmul.f32 %v9544_v7, %v12913_v2  ;;  %1995 = vmatprep.mubr.f32.mxu1 %v9562_v1  ;;  %v984_v43 = vsub.f32 %v12914_v28, %v9434_v0  ;;  %v9624_v2 = vld [vmem:[#allocation2 + $0x890] sm:$0xff] }
 0x380   :  { %12910 = vst [vmem:[#allocation13_spill] sm:$0xff] %v9587_v27  ;;  %v9599_v35 = vmul.f32 %v9544_v7, %v12912_v3  ;;  %v991_v49 = vsub.f32 %v12915_v54, %v9434_v0  ;;  %v12916_v39 = vsub.f32 %v9223_v15, %v9434_v0  ;;  %v9621_v13 = vmul.f32 %v9544_v7, %v977_v9 }
 0x381   :  { %2447 = vmatprep.mubr.f32.mxu0 %v9562_v1  ;;  %v12918_v45 = vsub.f32 %v9187_v51, %v9434_v0  ;;  %v12919_v54 = vsub.f32 %v9189_v52, %v9434_v0  ;;  %v12920_v9 = vsub.f32 %v9225_v16, %v9434_v0  ;;  %v12922_v1 = vsub.f32 %v9227_v17, %v9434_v0  ;;  %v9653_v52 = vld [vmem:[#allocation2 + $0x948] sm:$0xff] }
 0x382   :  { %v9618_v3 = vmul.f32 %v9544_v7, %v12916_v39  ;;  %12917 = vst [vmem:[#allocation17_spill] sm:$0xff] %v9621_v13  ;;  %1996 = vmatmul.mubr.f32.vlgmr.msra.gmra.mrb[0].mxu1 %v9556_v44  ;;  %v9651_v13 = vld [vmem:[#allocation2 + $0x908] sm:$0xff]  ;;  %v12925_v16 = vsub.f32 %v12889_v62, %v9434_v0  ;;  %v9664_v17 = vmul.f32 %v9544_v7, %v984_v43 }
 0x383   :  { %v9630_v28 = vmul.f32 %v9544_v7, %v12918_v45  ;;  %v9636_v15 = vmul.f32 %v9544_v7, %v12919_v54  ;;  %v9642_v39 = vmul.f32 %v9544_v7, %v12920_v9  ;;  %v9648_v51 = vmul.f32 %v9544_v7, %v12922_v1  ;;  %v1363_v45 = vld [vmem:[#allocation2 + $0x8d0] sm:$0xff]  ;;  %v12924_v54 = vld [vmem:[#allocation31_spill] sm:$0xff]  ;;  %6541 = vmatpush1.bf16.msra.mxu1 %v6540_v4 }
 0x384   :  { %v998_v27 = vsub.f32 %v12924_v54, %v9434_v0  ;;  %v9661_v9 = vmul.f32 %v9544_v7, %v12925_v16  ;;  %12927 = vst [vmem:[#allocation24_spill] sm:$0xff] %v9664_v17  ;;  %v12928_v1 = vsub.f32 %v9191_v53, %v9434_v0  ;;  %v12930_v62 = vsub.f32 %v9229_v19, %v9434_v0 }
 0x385   :  { %12921 = vst [vmem:[#allocation18_spill] sm:$0xff] %v9642_v39  ;;  %12923 = vst [vmem:[#allocation22_spill] sm:$0xff] %v9648_v51  ;;  %v12929_v51 = vsub.f32 %v9193_v55, %v9434_v0  ;;  %v12931_v43 = vsub.f32 %v9231_v20, %v9434_v0  ;;  %v9691_v4 = vmul.f32 %v9544_v7, %v991_v49  ;;  %2448 = vmatmul.mubr.f32.vlgmr.msra.gmra.mrb[64].mxu0 %v9556_v44  ;;  %v1379_v44 = vld [vmem:[#allocation2 + $0x950] sm:$0xff] }
 0x386   :  { %12926 = vst [vmem:[#allocation23_spill] sm:$0xff] %v9661_v9  ;;  %v9670_v39 = vmul.f32 %v9544_v7, %v12928_v1  ;;  %v9682_v16 = vmul.f32 %v9544_v7, %v12930_v62  ;;  %v12933_v55 = vsub.f32 %v9195_v56, %v9434_v0  ;;  %v12934_v19 = vsub.f32 %v9197_v57, %v9434_v0  ;;  %v12935_v62 = vld [vmem:[#allocation32_spill] sm:$0xff] }
 0x387   :  { %v9676_v54 = vmul.f32 %v9544_v7, %v12929_v51  ;;  %v9688_v53 = vmul.f32 %v9544_v7, %v12931_v43  ;;  %12932 = vst [vmem:[#allocation19_spill] sm:$0xff] %v9691_v4  ;;  %6737 = vmatpush1.bf16.msra.mxu0 %v6736_v12  ;;  %v6740_v20 = vpack.c.bf16 %v1363_v45, %v9624_v2 }
 0x388   :  { %v9698_v51 = vmul.f32 %v9544_v7, %v12933_v55  ;;  %v9704_v1 = vmul.f32 %v9544_v7, %v12934_v19  ;;  %v6546_v49 = vpack.c.bf16 %v9653_v52, %v9651_v13  ;;  %v1005_v43 = vsub.f32 %v12935_v62, %v9434_v0  ;;  %2001 = vmatprep.mubr.f32.mxu1 %v9661_v9  ;;  %v12939_v13 = vld [vmem:[#allocation33_spill] sm:$0xff] }
 0x389   :  { %v12936_v56 = vsub.f32 %v9233_v21, %v9434_v0  ;;  %v12937_v57 = vsub.f32 %v9235_v23, %v9434_v0  ;;  %v9724_v12 = vmul.f32 %v9544_v7, %v998_v27  ;;  %v1012_v2 = vsub.f32 %v12939_v13, %v9434_v0  ;;  %2453 = vmatprep.mubr.f32.mxu0 %v9661_v9 }
 0x38a   :  { %v12940_v21 = vsub.f32 %v9199_v59, %v9434_v0  ;;  %v12941_v23 = vsub.f32 %v9201_v60, %v9434_v0  ;;  %v12942_v27 = vsub.f32 %v9237_v24, %v9434_v0  ;;  %v12943_v59 = vld [vmem:[#allocation34_spill] sm:$0xff]  ;;  %6543 = vmatprep.subr.bf16.mxu1 %v6542_v11  ;;  %v12948_v9 = vsub.f32 %v9203_v61, %v9434_v0 }
 0x38b   :  { %v9715_v55 = vmul.f32 %v9544_v7, %v12936_v56  ;;  %v9721_v19 = vmul.f32 %v9544_v7, %v12937_v57  ;;  %12938 = vst [vmem:[#allocation20_spill] sm:$0xff] %v9724_v12  ;;  %v1372_v56 = vld [vmem:[#allocation2 + $0x918] sm:$0xff]  ;;  %v1019_v13 = vsub.f32 %v12943_v59, %v9434_v0  ;;  %v12951_v11 = vsub.f32 %v12894_v8, %v9434_v0 }
 0x38c   :  { %v9733_v45 = vmul.f32 %v9544_v7, %v12940_v21  ;;  %v9739_v52 = vmul.f32 %v9544_v7, %v12941_v23  ;;  %v9745_v62 = vmul.f32 %v9544_v7, %v12942_v27  ;;  %v1380_v57 = vld [vmem:[#allocation2 + $0x958] sm:$0xff]  ;;  %v12944_v21 = vsub.f32 %v12888_v31, %v9434_v0  ;;  %6739 = vmatprep.subr.bf16.mxu0 %v6738_v48 }
 0x38d   :  { %v12946_v23 = vsub.f32 %v9239_v25, %v9434_v0  ;;  %v9763_v27 = vmul.f32 %v9544_v7, %v1005_v43  ;;  %v9769_v59 = vmul.f32 %v9544_v7, %v12948_v9  ;;  %v12949_v31 = vsub.f32 %v9205_v63, %v9434_v0  ;;  %v1369_v9 = vld [vmem:[#allocation2 + $0x900] sm:$0xff]  ;;  %6741 = vmatpush1.bf16.msra.mxu0 %v6740_v20  ;;  %v1402_v20 = vld [vmem:[#allocation2 + $0xa08] sm:$0xff] }
 0x38e   :  { %v9754_v60 = vmul.f32 %v9544_v7, %v12944_v21  ;;  %v12950_v25 = vsub.f32 %v12893_v50, %v9434_v0  ;;  %v9787_v61 = vmul.f32 %v9544_v7, %v12951_v11  ;;  %v1377_v43 = vld [vmem:[#allocation2 + $0x940] sm:$0xff]  ;;  %v12952_v63 = vsub.f32 %v9151_v10, %v9434_v0  ;;  %v1371_v11 = vld [vmem:[#allocation2 + $0x910] sm:$0xff] }
 0x38f   :  { %v9760_v24 = vmul.f32 %v9544_v7, %v12946_v23  ;;  %12947 = vst [vmem:[#allocation26_spill] sm:$0xff] %v9763_v27  ;;  %v9775_v21 = vmul.f32 %v9544_v7, %v12949_v31  ;;  %v9796_v50 = vmul.f32 %v9544_v7, %v1012_v2  ;;  %v6742_v48 = vpack.c.bf16 %v1380_v57, %v1372_v56  ;;  %v1386_v57 = vld [vmem:[#allocation2 + $0x988] sm:$0xff]  ;;  %v1396_v27 = vld [vmem:[#allocation2 + $0x9d8] sm:$0xff] }
 0x390   :  { %12945 = vst [vmem:[#allocation25_spill] sm:$0xff] %v9754_v60  ;;  %v9781_v23 = vmul.f32 %v9544_v7, %v12950_v25  ;;  %v9793_v31 = vmul.f32 %v9544_v7, %v12952_v63  ;;  %v12954_v25 = vsub.f32 %v12897_v47, %v9434_v0  ;;  %2002 = vmatmul.mubr.f32.gmra.mrb[2].mxu1 %v9754_v60 }
 0x391   :  { %12953 = vst [vmem:[#allocation27_spill] sm:$0xff] %v9796_v50  ;;  %v12955_v10 = vsub.f32 %v12898_v29, %v9434_v0  ;;  %v12956_v2 = vsub.f32 %v12899_v5, %v9434_v0  ;;  %v12957_v47 = vsub.f32 %v12900_v40, %v9434_v0  ;;  %v9824_v56 = vmul.f32 %v9544_v7, %v1019_v13  ;;  %v1393_v13 = vld [vmem:[#allocation2 + $0x9c0] sm:$0xff] }
 0x392   :  { %v9802_v8 = vmul.f32 %v9544_v7, %v12954_v25  ;;  %v12959_v29 = vpack.c.bf16 %v9550_v42, %v9548_v58  ;;  %2454 = vmatmul.mubr.f32.gmra.mrb[66].mxu0 %v9754_v60  ;;  %2007 = vmatprep.mubr.f32.mxu1 %v9793_v31  ;;  %v6548_v5 = vpack.c.bf16 %v1377_v43, %v1369_v9  ;;  %v1385_v58 = vld [vmem:[#allocation2 + $0x980] sm:$0xff]  ;;  %v1387_v60 = vld [vmem:[#allocation2 + $0x990] sm:$0xff] }
 0x393   :  { %v9809_v63 = vmul.f32 %v9544_v7, %v12955_v10  ;;  %v9815_v50 = vmul.f32 %v9544_v7, %v12956_v2  ;;  %v9821_v25 = vmul.f32 %v9544_v7, %v12957_v47  ;;  %12958 = vst [vmem:[#allocation28_spill] sm:$0xff] %v9824_v56  ;;  %v1394_v10 = vld [vmem:[#allocation2 + $0x9c8] sm:$0xff]  ;;  %v1388_v2 = vld [vmem:[#allocation2 + $0x998] sm:$0xff]  ;;  %v12960_v40 = vsub.f32 %v9149_v6, %v9434_v0  ;;  %v1395_v56 = vld [vmem:[#allocation2 + $0x9d0] sm:$0xff] }
 0x394   :  { %6545 = vmatpush1.bf16.msra.mxu1 %v12959_v29  ;;  %2459 = vmatprep.mubr.f32.mxu0 %v9793_v31  ;;  %v6744_v42 = vpack.c.bf16 %v1379_v44, %v1371_v11  ;;  %v6550_v29 = vpack.c.bf16 %v1394_v10, %v1386_v57  ;;  %v12961_v9 = vsub.f32 %v9155_v18, %v9434_v0  ;;  %v1401_v10 = vld [vmem:[#allocation2 + $0xa00] sm:$0xff] }
 0x395   :  { %v9835_v47 = vmul.f32 %v9544_v7, %v12960_v40  ;;  %6547 = vmatprep.subr.bf16.mxu1 %v6546_v49  ;;  %6743 = vmatprep.subr.bf16.mxu0 %v6742_v48  ;;  %v6746_v6 = vpack.c.bf16 %v1396_v27, %v1388_v2  ;;  %v1410_v40 = vld [vmem:[#allocation2 + $0xa48] sm:$0xff]  ;;  %v6552_v44 = vpack.c.bf16 %v1393_v13, %v1385_v58  ;;  %v1404_v49 = vld [vmem:[#allocation2 + $0xa18] sm:$0xff]  ;;  %v1409_v27 = vld [vmem:[#allocation2 + $0xa40] sm:$0xff] }
 0x396   :  { %v9842_v43 = vmul.f32 %v9544_v7, %v12961_v9  ;;  %v1412_v48 = vld [vmem:[#allocation2 + $0xa58] sm:$0xff]  ;;  %v12962_v11 = vsub.f32 %v9153_v14, %v9434_v0  ;;  %6745 = vmatpush1.bf16.msra.mxu0 %v6744_v42  ;;  %v6748_v18 = vpack.c.bf16 %v1395_v56, %v1387_v60  ;;  %v1403_v2 = vld [vmem:[#allocation2 + $0xa10] sm:$0xff]  ;;  %v12963_v13 = vsub.f32 %v9159_v26, %v9434_v0  ;;  %v1418_v9 = vld [vmem:[#allocation2 + $0xa88] sm:$0xff] }
 0x397   :  { %2008 = vmatmul.mubr.f32.gmra.mrb[4].mxu1 %v9835_v47  ;;  %2460 = vmatmul.mubr.f32.gmra.mrb[68].mxu0 %v9835_v47  ;;  %v1411_v58 = vld [vmem:[#allocation2 + $0xa50] sm:$0xff]  ;;  %v6750_v42 = vpack.c.bf16 %v1412_v48, %v1404_v49  ;;  %v1426_v60 = vld [vmem:[#allocation2 + $0xac8] sm:$0xff]  ;;  %v6556_v56 = vpack.c.bf16 %v1409_v27, %v1401_v10  ;;  %v1425_v49 = vld [vmem:[#allocation2 + $0xac0] sm:$0xff]  ;;  %v12965_v27 = vsub.f32 %v9163_v34, %v9434_v0 }
 0x398   :  { %6549 = vmatpush1.bf16.msra.mxu1 %v6548_v5  ;;  %v9850_v57 = vmul.f32 %v9544_v7, %v12962_v11  ;;  %2013 = vmatprep.mubr.f32.mxu1 %v9842_v43  ;;  %v6554_v5 = vpack.c.bf16 %v1410_v40, %v1402_v20  ;;  %v9858_v14 = vmul.f32 %v9544_v7, %v12963_v13  ;;  %v1428_v20 = vld [vmem:[#allocation2 + $0xad8] sm:$0xff]  ;;  %v1417_v11 = vld [vmem:[#allocation2 + $0xa80] sm:$0xff]  ;;  %v1419_v48 = vld [vmem:[#allocation2 + $0xa90] sm:$0xff] }
 0x399   :  { %2465 = vmatprep.mubr.f32.mxu0 %v9842_v43  ;;  %6551 = vmatprep.subr.bf16.mxu1 %v6550_v29  ;;  %v1420_v29 = vld [vmem:[#allocation2 + $0xa98] sm:$0xff]  ;;  %v12964_v40 = vsub.f32 %v9157_v22, %v9434_v0  ;;  %v1427_v10 = vld [vmem:[#allocation2 + $0xad0] sm:$0xff]  ;;  %v9874_v22 = vmul.f32 %v9544_v7, %v12965_v27  ;;  %v1434_v13 = vld [vmem:[#allocation2 + $0xb08] sm:$0xff] }
 0x39a   :  { %6747 = vmatprep.subr.bf16.mxu0 %v6746_v6  ;;  %v6752_v6 = vpack.c.bf16 %v1411_v58, %v1403_v2  ;;  %v1442_v2 = vld [vmem:[#allocation2 + $0xb48] sm:$0xff]  ;;  %v6560_v58 = vpack.c.bf16 %v1425_v49, %v1417_v11  ;;  %v1443_v11 = vld [vmem:[#allocation2 + $0xb50] sm:$0xff]  ;;  %v12968_v49 = vsub.f32 %v9167_v33, %v9434_v0 }
 0x39b   :  { %2014 = vmatmul.mubr.f32.gmra.mrb[6].mxu1 %v9850_v57  ;;  %2466 = vmatmul.mubr.f32.gmra.mrb[70].mxu0 %v9850_v57  ;;  %v9866_v26 = vmul.f32 %v9544_v7, %v12964_v40  ;;  %v1433_v40 = vld [vmem:[#allocation2 + $0xb00] sm:$0xff]  ;;  %v1450_v27 = vld [vmem:[#allocation2 + $0xb88] sm:$0xff] }
 0x39c   :  { %6553 = vmatpush1.bf16.msra.mxu1 %v6552_v44  ;;  %6749 = vmatpush1.bf16.msra.mxu0 %v6748_v18  ;;  %v6558_v44 = vpack.c.bf16 %v1426_v60, %v1418_v9  ;;  %v6754_v18 = vpack.c.bf16 %v1428_v20, %v1420_v29  ;;  %v1444_v9 = vld [vmem:[#allocation2 + $0xb58] sm:$0xff]  ;;  %v12966_v60 = vsub.f32 %v9161_v30, %v9434_v0  ;;  %v1441_v29 = vld [vmem:[#allocation2 + $0xb40] sm:$0xff]  ;;  %v1435_v20 = vld [vmem:[#allocation2 + $0xb10] sm:$0xff] }
 0x39d   :  { %2019 = vmatprep.mubr.f32.mxu1 %v9858_v14  ;;  %2471 = vmatprep.mubr.f32.mxu0 %v9858_v14  ;;  %v9890_v30 = vmul.f32 %v9544_v7, %v12968_v49 }
 0x39e   :  { %6555 = vmatprep.subr.bf16.mxu1 %v6554_v5  ;;  %6751 = vmatprep.subr.bf16.mxu0 %v6750_v42  ;;  %v1436_v5 = vld [vmem:[#allocation2 + $0xb18] sm:$0xff]  ;;  %v9882_v34 = vmul.f32 %v9544_v7, %v12966_v60  ;;  %v6756_v42 = vpack.c.bf16 %v1427_v10, %v1419_v48  ;;  %v1458_v48 = vld [vmem:[#allocation2 + $0xbc8] sm:$0xff]  ;;  %v6564_v10 = vpack.c.bf16 %v1441_v29, %v1433_v40  ;;  %v1449_v60 = vld [vmem:[#allocation2 + $0xb80] sm:$0xff] }
 0x39f   :  { %2020 = vmatmul.mubr.f32.gmra.mrb[8].mxu1 %v9866_v26  ;;  %2472 = vmatmul.mubr.f32.gmra.mrb[72].mxu0 %v9866_v26  ;;  %12969 = vst [vmem:[#allocation30_spill] sm:$0xff] %v9890_v30  ;;  %v1459_v40 = vld [vmem:[#allocation2 + $0xbd0] sm:$0xff]  ;;  %v12972_v29 = vld [vmem:[#allocation15_spill] sm:$0xff] }
 0x3a0   :  { %6557 = vmatpush1.bf16.msra.mxu1 %v6556_v56  ;;  %12967 = vst [vmem:[#allocation29_spill] sm:$0xff] %v9882_v34  ;;  %6753 = vmatpush1.bf16.msra.mxu0 %v6752_v6  ;;  %v6562_v56 = vpack.c.bf16 %v1442_v2, %v1434_v13  ;;  %v6758_v6 = vpack.c.bf16 %v1444_v9, %v1436_v5  ;;  %v1460_v13 = vld [vmem:[#allocation2 + $0xbd8] sm:$0xff]  ;;  %v1457_v5 = vld [vmem:[#allocation2 + $0xbc0] sm:$0xff]  ;;  %v1451_v9 = vld [vmem:[#allocation2 + $0xb90] sm:$0xff] }
 0x3a1   :  { %2025 = vmatprep.mubr.f32.mxu1 %v9874_v22  ;;  %2477 = vmatprep.mubr.f32.mxu0 %v9874_v22  ;;  %v12970_v2 = vsub.f32 %v9165_v32, %v9434_v0  ;;  %v12973_v49 = vsub.f32 %v12972_v29, %v9434_v0 }
 0x3a2   :  { %6559 = vmatprep.subr.bf16.mxu1 %v6558_v44  ;;  %6755 = vmatprep.subr.bf16.mxu0 %v6754_v18  ;;  %v1452_v44 = vld [vmem:[#allocation2 + $0xb98] sm:$0xff]  ;;  %v6760_v18 = vpack.c.bf16 %v1443_v11, %v1435_v20  ;;  %v1474_v20 = vld [vmem:[#allocation2 + $0xc48] sm:$0xff]  ;;  %v6568_v11 = vpack.c.bf16 %v1457_v5, %v1449_v60  ;;  %v1475_v60 = vld [vmem:[#allocation2 + $0xc50] sm:$0xff] }
 0x3a3   :  { %2026 = vmatmul.mubr.f32.gmra.mrb[10].mxu1 %v9882_v34  ;;  %2478 = vmatmul.mubr.f32.gmra.mrb[74].mxu0 %v9882_v34  ;;  %v9898_v33 = vmul.f32 %v9544_v7, %v12970_v2  ;;  %v9906_v32 = vmul.f32 %v9544_v7, %v12973_v49  ;;  %v1466_v2 = vld [vmem:[#allocation2 + $0xc08] sm:$0xff]  ;;  %v1465_v49 = vld [vmem:[#allocation2 + $0xc00] sm:$0xff] }
 0x3a4   :  { %6561 = vmatpush1.bf16.msra.mxu1 %v6560_v58  ;;  %6757 = vmatpush1.bf16.msra.mxu0 %v6756_v42  ;;  %v6566_v58 = vpack.c.bf16 %v1458_v48, %v1450_v27  ;;  %v6762_v42 = vpack.c.bf16 %v1460_v13, %v1452_v44  ;;  %v1476_v27 = vld [vmem:[#allocation2 + $0xc58] sm:$0xff]  ;;  %v1473_v44 = vld [vmem:[#allocation2 + $0xc40] sm:$0xff]  ;;  %v1467_v13 = vld [vmem:[#allocation2 + $0xc10] sm:$0xff] }
 0x3a5   :  { %12971 = vst [vmem:[#allocation31_spill] sm:$0xff] %v9898_v33  ;;  %2031 = vmatprep.mubr.f32.mxu1 %v9890_v30  ;;  %2483 = vmatprep.mubr.f32.mxu0 %v9890_v30  ;;  %12974 = vst [vmem:[#allocation32_spill] sm:$0xff] %v9906_v32  ;;  %v12975_v48 = vld [vmem:[#allocation14_spill] sm:$0xff]  ;;  %v1482_v5 = vld [vmem:[#allocation2 + $0xc88] sm:$0xff] }
 0x3a6   :  { %6563 = vmatprep.subr.bf16.mxu1 %v6562_v56  ;;  %6759 = vmatprep.subr.bf16.mxu0 %v6758_v6  ;;  %v1468_v56 = vld [vmem:[#allocation2 + $0xc18] sm:$0xff]  ;;  %v12976_v30 = vsub.f32 %v12975_v48, %v9434_v0  ;;  %v6764_v6 = vpack.c.bf16 %v1459_v40, %v1451_v9  ;;  %v12978_v34 = vld [vmem:[#allocation16_spill] sm:$0xff] }
 0x3a7   :  { %2032 = vmatmul.mubr.f32.gmra.mrb[12].mxu1 %v9898_v33  ;;  %2484 = vmatmul.mubr.f32.gmra.mrb[76].mxu0 %v9898_v33  ;;  %v1490_v33 = vld [vmem:[#allocation2 + $0xcc8] sm:$0xff]  ;;  %v12979_v48 = vsub.f32 %v12978_v34, %v9434_v0  ;;  %v1484_v9 = vld [vmem:[#allocation2 + $0xc98] sm:$0xff]  ;;  %v1489_v0 = vld [vmem:[#allocation2 + $0xcc0] sm:$0xff] }
 0x3a8   :  { %6565 = vmatpush1.bf16.msra.mxu1 %v6564_v10  ;;  %v9914_v29 = vmul.f32 %v9544_v7, %v12976_v30  ;;  %6761 = vmatpush1.bf16.msra.mxu0 %v6760_v18  ;;  %v6570_v10 = vpack.c.bf16 %v1474_v20, %v1466_v2  ;;  %v6766_v18 = vpack.c.bf16 %v1476_v27, %v1468_v56  ;;  %v1492_v40 = vld [vmem:[#allocation2 + $0xcd8] sm:$0xff]  ;;  %v1483_v34 = vld [vmem:[#allocation2 + $0xc90] sm:$0xff]  ;;  %v1498_v56 = vld [vmem:[#allocation2 + $0xd08] sm:$0xff] }
 0x3a9   :  { %2037 = vmatprep.mubr.f32.mxu1 %v9906_v32  ;;  %2489 = vmatprep.mubr.f32.mxu0 %v9906_v32  ;;  %v9922_v30 = vmul.f32 %v9544_v7, %v12979_v48  ;;  %v6768_v2 = vpack.c.bf16 %v1475_v60, %v1467_v13  ;;  %v6574_v20 = vpack.c.bf16 %v1490_v33, %v1482_v5  ;;  %v1481_v32 = vld [vmem:[#allocation2 + $0xc80] sm:$0xff]  ;;  %v1506_v27 = vld [vmem:[#allocation2 + $0xd48] sm:$0xff]  ;;  %v1508_v48 = vld [vmem:[#allocation2 + $0xd58] sm:$0xff] }
 0x3aa   :  { %12977 = vst [vmem:[#allocation33_spill] sm:$0xff] %v9914_v29  ;;  %6567 = vmatprep.subr.bf16.mxu1 %v6566_v58  ;;  %6763 = vmatprep.subr.bf16.mxu0 %v6762_v42  ;;  %v6572_v58 = vpack.c.bf16 %v1473_v44, %v1465_v49  ;;  %v6770_v7 = vpack.c.bf16 %v1492_v40, %v1484_v9  ;;  %v1491_v42 = vld [vmem:[#allocation2 + $0xcd0] sm:$0xff]  ;;  %v1497_v33 = vld [vmem:[#allocation2 + $0xd00] sm:$0xff]  ;;  %v1522_v9 = vld [vmem:[#allocation2 + $0xdc8] sm:$0xff] }
 0x3ab   :  { %12980 = vst [vmem:[#allocation34_spill] sm:$0xff] %v9922_v30  ;;  %2038 = vmatmul.mubr.f32.gmra.mrb[14].mxu1 %v9914_v29  ;;  %2490 = vmatmul.mubr.f32.gmra.mrb[78].mxu0 %v9914_v29  ;;  %v6576_v49 = vpack.c.bf16 %v1489_v0, %v1481_v32  ;;  %v6578_v44 = vpack.c.bf16 %v1506_v27, %v1498_v56  ;;  %v1505_v13 = vld [vmem:[#allocation2 + $0xd40] sm:$0xff]  ;;  %v1499_v60 = vld [vmem:[#allocation2 + $0xd10] sm:$0xff]  ;;  %v1516_v40 = vld [vmem:[#allocation2 + $0xd98] sm:$0xff] }
 0x3ac   :  { %6569 = vmatpush1.bf16.msra.mxu1 %v6568_v11  ;;  %6765 = vmatpush1.bf16.msra.mxu0 %v6764_v6  ;;  %v1500_v11 = vld [vmem:[#allocation2 + $0xd18] sm:$0xff]  ;;  %v6772_v6 = vpack.c.bf16 %v1491_v42, %v1483_v34  ;;  %v1515_v0 = vld [vmem:[#allocation2 + $0xd90] sm:$0xff]  ;;  %v1530_v56 = vld [vmem:[#allocation2 + $0xe08] sm:$0xff] }
 0x3ad   :  { %2108 = vmatprep.mubr.f32.mxu1 %v9922_v30  ;;  %2560 = vmatprep.mubr.f32.mxu0 %v9922_v30  ;;  %v6774_v5 = vpack.c.bf16 %v1508_v48, %v1500_v11  ;;  %v1507_v30 = vld [vmem:[#allocation2 + $0xd50] sm:$0xff]  ;;  %v1524_v29 = vld [vmem:[#allocation2 + $0xdd8] sm:$0xff] }
 0x3ae   :  { %6571 = vmatprep.subr.bf16.mxu1 %v6570_v10  ;;  %6767 = vmatprep.subr.bf16.mxu0 %v6766_v18  ;;  %v1514_v10 = vld [vmem:[#allocation2 + $0xd88] sm:$0xff]  ;;  %v6580_v18 = vpack.c.bf16 %v1505_v13, %v1497_v33  ;;  %v6778_v34 = vpack.c.bf16 %v1524_v29, %v1516_v40  ;;  %v1523_v42 = vld [vmem:[#allocation2 + $0xdd0] sm:$0xff]  ;;  %v1532_v27 = vld [vmem:[#allocation2 + $0xe18] sm:$0xff] }
 0x3af   :  { %v6582_v32 = vpack.c.bf16 %v1522_v9, %v1514_v10  ;;  %v1540_v11 = vld [vmem:[#allocation2 + $0xe58] sm:$0xff]  ;;  %v1546_v10 = vld [vmem:[#allocation2 + $0xe88] sm:$0xff] }
 0x3b0   :  { %6573 = vmatpush1.bf16.msra.mxu1 %v6572_v58  ;;  %6769 = vmatpush1.bf16.msra.mxu0 %v6768_v2  ;;  %v6776_v58 = vpack.c.bf16 %v1507_v30, %v1499_v60  ;;  %v1513_v2 = vld [vmem:[#allocation2 + $0xd80] sm:$0xff]  ;;  %v1531_v30 = vld [vmem:[#allocation2 + $0xe10] sm:$0xff]  ;;  %v6782_v13 = vpack.c.bf16 %v1540_v11, %v1532_v27  ;;  %v1548_v29 = vld [vmem:[#allocation2 + $0xe98] sm:$0xff] }
 0x3b1   :  { %6575 = vmatprep.subr.bf16.mxu1 %v6574_v20  ;;  %6771 = vmatprep.subr.bf16.mxu0 %v6770_v7  ;;  %v1521_v20 = vld [vmem:[#allocation2 + $0xdc0] sm:$0xff]  ;;  %v1538_v7 = vld [vmem:[#allocation2 + $0xe48] sm:$0xff]  ;;  %v1539_v60 = vld [vmem:[#allocation2 + $0xe50] sm:$0xff] }
 0x3b2   :  { %v6584_v48 = vpack.c.bf16 %v1521_v20, %v1513_v2  ;;  %v6586_v33 = vpack.c.bf16 %v1538_v7, %v1530_v56  ;;  %v1556_v9 = vld [vmem:[#allocation2 + $0xed8] sm:$0xff]  ;;  %v1547_v20 = vld [vmem:[#allocation2 + $0xe90] sm:$0xff]  ;;  %v1562_v56 = vld [vmem:[#allocation2 + $0xf08] sm:$0xff] }
 0x3b3   :  { %v1564_v7 = vld [vmem:[#allocation2 + $0xf18] sm:$0xff] }
 0x3b4   :  { %6577 = vmatpush1.bf16.msra.mxu1 %v6576_v49  ;;  %6773 = vmatpush1.bf16.msra.mxu0 %v6772_v6  ;;  %v6780_v49 = vpack.c.bf16 %v1523_v42, %v1515_v0  ;;  %v1529_v6 = vld [vmem:[#allocation2 + $0xe00] sm:$0xff]  ;;  %v6786_v0 = vpack.c.bf16 %v1556_v9, %v1548_v29  ;;  %v1555_v42 = vld [vmem:[#allocation2 + $0xed0] sm:$0xff]  ;;  %v1572_v27 = vld [vmem:[#allocation2 + $0xf58] sm:$0xff] }
 0x3b5   :  { %6579 = vmatprep.subr.bf16.mxu1 %v6578_v44  ;;  %6775 = vmatprep.subr.bf16.mxu0 %v6774_v5  ;;  %v1537_v44 = vld [vmem:[#allocation2 + $0xe40] sm:$0xff]  ;;  %v1554_v5 = vld [vmem:[#allocation2 + $0xec8] sm:$0xff]  ;;  %v1588_v29 = vld [vmem:[#allocation2 + $0xfd8] sm:$0xff] }
 0x3b6   :  { %v6588_v40 = vpack.c.bf16 %v1537_v44, %v1529_v6  ;;  %v6590_v2 = vpack.c.bf16 %v1554_v5, %v1546_v10  ;;  %v1563_v44 = vld [vmem:[#allocation2 + $0xf10] sm:$0xff]  ;;  %v1578_v10 = vld [vmem:[#allocation2 + $0xf88] sm:$0xff]  ;;  %v1580_v5 = vld [vmem:[#allocation2 + $0xf98] sm:$0xff] }
 0x3b8   :  { %6581 = vmatpush1.bf16.msra.mxu1 %v6580_v18  ;;  %6777 = vmatpush1.bf16.msra.mxu0 %v6776_v58  ;;  %v6784_v18 = vpack.c.bf16 %v1539_v60, %v1531_v30  ;;  %v1545_v58 = vld [vmem:[#allocation2 + $0xe80] sm:$0xff]  ;;  %v6790_v30 = vpack.c.bf16 %v1572_v27, %v1564_v7  ;;  %v1571_v60 = vld [vmem:[#allocation2 + $0xf50] sm:$0xff]  ;;  %v1604_v7 = vld [vmem:[#allocation2 + $0x1058] sm:$0xff] }
 0x3b9   :  { %6583 = vmatprep.subr.bf16.mxu1 %v6582_v32  ;;  %6779 = vmatprep.subr.bf16.mxu0 %v6778_v34  ;;  %v1553_v32 = vld [vmem:[#allocation2 + $0xec0] sm:$0xff]  ;;  %v1570_v34 = vld [vmem:[#allocation2 + $0xf48] sm:$0xff] }
 0x3ba   :  { %v6592_v11 = vpack.c.bf16 %v1553_v32, %v1545_v58  ;;  %v6594_v6 = vpack.c.bf16 %v1570_v34, %v1562_v56  ;;  %v1579_v32 = vld [vmem:[#allocation2 + $0xf90] sm:$0xff]  ;;  %v1594_v56 = vld [vmem:[#allocation2 + $0x1008] sm:$0xff]  ;;  %v1596_v34 = vld [vmem:[#allocation2 + $0x1018] sm:$0xff] }
 0x3bc   :  { %6585 = vmatpush1.bf16.msra.mxu1 %v6584_v48  ;;  %6781 = vmatpush1.bf16.msra.mxu0 %v6780_v49  ;;  %v6788_v48 = vpack.c.bf16 %v1555_v42, %v1547_v20  ;;  %v1561_v49 = vld [vmem:[#allocation2 + $0xf00] sm:$0xff]  ;;  %v6794_v20 = vpack.c.bf16 %v1588_v29, %v1580_v5  ;;  %v1587_v42 = vld [vmem:[#allocation2 + $0xfd0] sm:$0xff]  ;;  %v1620_v5 = vld [vmem:[#allocation2 + $0x10d8] sm:$0xff] }
 0x3bd   :  { %6587 = vmatprep.subr.bf16.mxu1 %v6586_v33  ;;  %6783 = vmatprep.subr.bf16.mxu0 %v6782_v13  ;;  %v1569_v33 = vld [vmem:[#allocation2 + $0xf40] sm:$0xff]  ;;  %v1586_v13 = vld [vmem:[#allocation2 + $0xfc8] sm:$0xff] }
 0x3be   :  { %v6596_v9 = vpack.c.bf16 %v1569_v33, %v1561_v49  ;;  %v6598_v58 = vpack.c.bf16 %v1586_v13, %v1578_v10  ;;  %v1601_v33 = vld [vmem:[#allocation2 + $0x1040] sm:$0xff]  ;;  %v1610_v10 = vld [vmem:[#allocation2 + $0x1088] sm:$0xff]  ;;  %v1612_v13 = vld [vmem:[#allocation2 + $0x1098] sm:$0xff] }
 0x3c0   :  { %6589 = vmatpush1.bf16.msra.mxu1 %v6588_v40  ;;  %6785 = vmatpush1.bf16.msra.mxu0 %v6784_v18  ;;  %v6792_v40 = vpack.c.bf16 %v1571_v60, %v1563_v44  ;;  %v1577_v18 = vld [vmem:[#allocation2 + $0xf80] sm:$0xff]  ;;  %v1595_v44 = vld [vmem:[#allocation2 + $0x1010] sm:$0xff] }
 0x3c1   :  { %6591 = vmatprep.subr.bf16.mxu1 %v6590_v2  ;;  %6787 = vmatprep.subr.bf16.mxu0 %v6786_v0  ;;  %v1585_v2 = vld [vmem:[#allocation2 + $0xfc0] sm:$0xff]  ;;  %v1602_v0 = vld [vmem:[#allocation2 + $0x1048] sm:$0xff]  ;;  %v1603_v60 = vld [vmem:[#allocation2 + $0x1050] sm:$0xff] }
 0x3c2   :  { %v6600_v27 = vpack.c.bf16 %v1585_v2, %v1577_v18  ;;  %v6602_v49 = vpack.c.bf16 %v1602_v0, %v1594_v56  ;;  %v1617_v18 = vld [vmem:[#allocation2 + $0x10c0] sm:$0xff]  ;;  %v1611_v2 = vld [vmem:[#allocation2 + $0x1090] sm:$0xff]  ;;  %v1634_v56 = vld [vmem:[#allocation2 + $0x1148] sm:$0xff] }
 0x3c3   :  { %v1628_v0 = vld [vmem:[#allocation2 + $0x1118] sm:$0xff] }
 0x3c4   :  { %6593 = vmatpush1.bf16.msra.mxu1 %v6592_v11  ;;  %6789 = vmatpush1.bf16.msra.mxu0 %v6788_v48  ;;  %v6796_v11 = vpack.c.bf16 %v1587_v42, %v1579_v32  ;;  %v6798_v48 = vpack.c.bf16 %v1604_v7, %v1596_v34  ;;  %v6802_v32 = vpack.c.bf16 %v1620_v5, %v1612_v13  ;;  %v1626_v42 = vld [vmem:[#allocation2 + $0x1108] sm:$0xff]  ;;  %v1636_v34 = vld [vmem:[#allocation2 + $0x1158] sm:$0xff] }
 0x3c5   :  { %6595 = vmatprep.subr.bf16.mxu1 %v6594_v6  ;;  %6791 = vmatprep.subr.bf16.mxu0 %v6790_v30  ;;  %v1593_v6 = vld [vmem:[#allocation2 + $0x1000] sm:$0xff]  ;;  %v1618_v30 = vld [vmem:[#allocation2 + $0x10c8] sm:$0xff]  ;;  %v1652_v13 = vld [vmem:[#allocation2 + $0x11d8] sm:$0xff] }
 0x3c6   :  { %v6604_v29 = vpack.c.bf16 %v1601_v33, %v1593_v6  ;;  %v1627_v6 = vld [vmem:[#allocation2 + $0x1110] sm:$0xff]  ;;  %v6806_v33 = vpack.c.bf16 %v1636_v34, %v1628_v0  ;;  %v1668_v0 = vld [vmem:[#allocation2 + $0x1258] sm:$0xff] }
 0x3c8   :  { %6597 = vmatpush1.bf16.msra.mxu1 %v6596_v9  ;;  %6793 = vmatpush1.bf16.msra.mxu0 %v6792_v40  ;;  %v6800_v9 = vpack.c.bf16 %v1603_v60, %v1595_v44  ;;  %v6606_v40 = vpack.c.bf16 %v1618_v30, %v1610_v10  ;;  %v1635_v44 = vld [vmem:[#allocation2 + $0x1150] sm:$0xff]  ;;  %v1642_v60 = vld [vmem:[#allocation2 + $0x1188] sm:$0xff]  ;;  %v1644_v30 = vld [vmem:[#allocation2 + $0x1198] sm:$0xff] }
 0x3c9   :  { %6599 = vmatprep.subr.bf16.mxu1 %v6598_v58  ;;  %6795 = vmatprep.subr.bf16.mxu0 %v6794_v20  ;;  %v1609_v58 = vld [vmem:[#allocation2 + $0x1080] sm:$0xff]  ;;  %v1619_v20 = vld [vmem:[#allocation2 + $0x10d0] sm:$0xff]  ;;  %v1650_v10 = vld [vmem:[#allocation2 + $0x11c8] sm:$0xff] }
 0x3ca   :  { %v6608_v7 = vpack.c.bf16 %v1617_v18, %v1609_v58  ;;  %v1649_v58 = vld [vmem:[#allocation2 + $0x11c0] sm:$0xff]  ;;  %v1643_v18 = vld [vmem:[#allocation2 + $0x1190] sm:$0xff] }
 0x3cc   :  { %6601 = vmatpush1.bf16.msra.mxu1 %v6600_v27  ;;  %6797 = vmatpush1.bf16.msra.mxu0 %v6796_v11  ;;  %v6804_v27 = vpack.c.bf16 %v1619_v20, %v1611_v2  ;;  %v6610_v11 = vpack.c.bf16 %v1634_v56, %v1626_v42  ;;  %v6810_v2 = vpack.c.bf16 %v1652_v13, %v1644_v30  ;;  %v1658_v20 = vld [vmem:[#allocation2 + $0x1208] sm:$0xff]  ;;  %v1660_v56 = vld [vmem:[#allocation2 + $0x1218] sm:$0xff] }
 0x3cd   :  { %6603 = vmatprep.subr.bf16.mxu1 %v6602_v49  ;;  %6799 = vmatprep.subr.bf16.mxu0 %v6798_v48  ;;  %v1625_v49 = vld [vmem:[#allocation2 + $0x1100] sm:$0xff]  ;;  %v1666_v42 = vld [vmem:[#allocation2 + $0x1248] sm:$0xff]  ;;  %v1684_v30 = vld [vmem:[#allocation2 + $0x12d8] sm:$0xff] }
 0x3ce   :  { %v1633_v48 = vld [vmem:[#allocation2 + $0x1140] sm:$0xff] }
 0x3cf   :  { %2109 = vmatmul.mubr.f32.vlgmr.msra.gmra.mrb[0].mxu1 %v9568_v36  ;;  %2561 = vmatmul.mubr.f32.vlgmr.msra.gmra.mrb[64].mxu0 %v9568_v36  ;;  %v6612_v5 = vpack.c.bf16 %v1633_v48, %v1625_v49  ;;  %v1665_v49 = vld [vmem:[#allocation2 + $0x1240] sm:$0xff]  ;;  %v1659_v48 = vld [vmem:[#allocation2 + $0x1210] sm:$0xff] }
 0x3d0   :  { %2114 = vmatprep.mubr.f32.mxu1 %v9599_v35  ;;  %6605 = vmatpush1.bf16.msra.mxu1 %v6604_v29  ;;  %v6808_v29 = vpack.c.bf16 %v1635_v44, %v1627_v6  ;;  %v6814_v6 = vpack.c.bf16 %v1668_v0, %v1660_v56  ;;  %v1674_v44 = vld [vmem:[#allocation2 + $0x1288] sm:$0xff]  ;;  %v1700_v56 = vld [vmem:[#allocation2 + $0x1358] sm:$0xff] }
 0x3d1   :  { %2566 = vmatprep.mubr.f32.mxu0 %v9599_v35  ;;  %6801 = vmatpush1.bf16.msra.mxu0 %v6800_v9  ;;  %v6614_v9 = vpack.c.bf16 %v1650_v10, %v1642_v60  ;;  %v1682_v60 = vld [vmem:[#allocation2 + $0x12c8] sm:$0xff]  ;;  %v1676_v10 = vld [vmem:[#allocation2 + $0x1298] sm:$0xff] }
 0x3d2   :  { %6607 = vmatprep.subr.bf16.mxu1 %v6606_v40  ;;  %6803 = vmatprep.subr.bf16.mxu0 %v6802_v32  ;;  %v1641_v40 = vld [vmem:[#allocation2 + $0x1180] sm:$0xff]  ;;  %v1651_v32 = vld [vmem:[#allocation2 + $0x11d0] sm:$0xff] }
 0x3d3   :  { %2115 = vmatmul.mubr.f32.gmra.mrb[2].mxu1 %v9593_v38  ;;  %2567 = vmatmul.mubr.f32.gmra.mrb[66].mxu0 %v9593_v38  ;;  %v6616_v34 = vpack.c.bf16 %v1649_v58, %v1641_v40  ;;  %v1681_v40 = vld [vmem:[#allocation2 + $0x12c0] sm:$0xff]  ;;  %v1675_v58 = vld [vmem:[#allocation2 + $0x1290] sm:$0xff] }
 0x3d4   :  { %2120 = vmatprep.mubr.f32.mxu1 %v9636_v15  ;;  %6609 = vmatpush1.bf16.msra.mxu1 %v6608_v7  ;;  %v6812_v7 = vpack.c.bf16 %v1651_v32, %v1643_v18  ;;  %v6818_v18 = vpack.c.bf16 %v1684_v30, %v1676_v10  ;;  %v1690_v32 = vld [vmem:[#allocation2 + $0x1308] sm:$0xff]  ;;  %v1716_v10 = vld [vmem:[#allocation2 + $0x13d8] sm:$0xff] }
 0x3d5   :  { %2572 = vmatprep.mubr.f32.mxu0 %v9636_v15  ;;  %6805 = vmatpush1.bf16.msra.mxu0 %v6804_v27  ;;  %v6618_v27 = vpack.c.bf16 %v1666_v42, %v1658_v20  ;;  %v1698_v20 = vld [vmem:[#allocation2 + $0x1348] sm:$0xff]  ;;  %v1692_v42 = vld [vmem:[#allocation2 + $0x1318] sm:$0xff] }
 0x3d6   :  { %6611 = vmatprep.subr.bf16.mxu1 %v6610_v11  ;;  %6807 = vmatprep.subr.bf16.mxu0 %v6806_v33  ;;  %v1657_v11 = vld [vmem:[#allocation2 + $0x1200] sm:$0xff]  ;;  %v1667_v33 = vld [vmem:[#allocation2 + $0x1250] sm:$0xff] }
 0x3d7   :  { %2121 = vmatmul.mubr.f32.gmra.mrb[4].mxu1 %v9630_v28  ;;  %2573 = vmatmul.mubr.f32.gmra.mrb[68].mxu0 %v9630_v28  ;;  %v6620_v13 = vpack.c.bf16 %v1665_v49, %v1657_v11  ;;  %v1697_v11 = vld [vmem:[#allocation2 + $0x1340] sm:$0xff]  ;;  %v1691_v49 = vld [vmem:[#allocation2 + $0x1310] sm:$0xff] }
 0x3d8   :  { %2126 = vmatprep.mubr.f32.mxu1 %v9676_v54  ;;  %6613 = vmatpush1.bf16.msra.mxu1 %v6612_v5  ;;  %v6816_v5 = vpack.c.bf16 %v1667_v33, %v1659_v48  ;;  %v6822_v48 = vpack.c.bf16 %v1700_v56, %v1692_v42  ;;  %v1706_v33 = vld [vmem:[#allocation2 + $0x1388] sm:$0xff]  ;;  %v1732_v42 = vld [vmem:[#allocation2 + $0x1458] sm:$0xff] }
 0x3d9   :  { %2578 = vmatprep.mubr.f32.mxu0 %v9676_v54  ;;  %6809 = vmatpush1.bf16.msra.mxu0 %v6808_v29  ;;  %v6622_v29 = vpack.c.bf16 %v1682_v60, %v1674_v44  ;;  %v1714_v44 = vld [vmem:[#allocation2 + $0x13c8] sm:$0xff]  ;;  %v1708_v60 = vld [vmem:[#allocation2 + $0x1398] sm:$0xff] }
 0x3da   :  { %6615 = vmatprep.subr.bf16.mxu1 %v6614_v9  ;;  %6811 = vmatprep.subr.bf16.mxu0 %v6810_v2  ;;  %v1673_v9 = vld [vmem:[#allocation2 + $0x1280] sm:$0xff]  ;;  %v1683_v2 = vld [vmem:[#allocation2 + $0x12d0] sm:$0xff] }
 0x3db   :  { %2127 = vmatmul.mubr.f32.gmra.mrb[6].mxu1 %v9670_v39  ;;  %2579 = vmatmul.mubr.f32.gmra.mrb[70].mxu0 %v9670_v39  ;;  %v6624_v0 = vpack.c.bf16 %v1681_v40, %v1673_v9  ;;  %v1713_v9 = vld [vmem:[#allocation2 + $0x13c0] sm:$0xff]  ;;  %v1707_v40 = vld [vmem:[#allocation2 + $0x1390] sm:$0xff] }
 0x3dc   :  { %2132 = vmatprep.mubr.f32.mxu1 %v9704_v1  ;;  %6617 = vmatpush1.bf16.msra.mxu1 %v6616_v34  ;;  %v6820_v34 = vpack.c.bf16 %v1683_v2, %v1675_v58  ;;  %v6826_v58 = vpack.c.bf16 %v1716_v10, %v1708_v60  ;;  %v1722_v2 = vld [vmem:[#allocation2 + $0x1408] sm:$0xff]  ;;  %v1748_v60 = vld [vmem:[#allocation2 + $0x14d8] sm:$0xff] }
 0x3dd   :  { %2584 = vmatprep.mubr.f32.mxu0 %v9704_v1  ;;  %6813 = vmatpush1.bf16.msra.mxu0 %v6812_v7  ;;  %v6626_v7 = vpack.c.bf16 %v1698_v20, %v1690_v32  ;;  %v1730_v32 = vld [vmem:[#allocation2 + $0x1448] sm:$0xff]  ;;  %v1724_v20 = vld [vmem:[#allocation2 + $0x1418] sm:$0xff] }
 0x3de   :  { %6619 = vmatprep.subr.bf16.mxu1 %v6618_v27  ;;  %6815 = vmatprep.subr.bf16.mxu0 %v6814_v6  ;;  %v1689_v27 = vld [vmem:[#allocation2 + $0x1300] sm:$0xff]  ;;  %v1699_v6 = vld [vmem:[#allocation2 + $0x1350] sm:$0xff] }
 0x3df   :  { %2133 = vmatmul.mubr.f32.gmra.mrb[8].mxu1 %v9698_v51  ;;  %2585 = vmatmul.mubr.f32.gmra.mrb[72].mxu0 %v9698_v51  ;;  %v6628_v30 = vpack.c.bf16 %v1697_v11, %v1689_v27  ;;  %v1729_v27 = vld [vmem:[#allocation2 + $0x1440] sm:$0xff]  ;;  %v1723_v11 = vld [vmem:[#allocation2 + $0x1410] sm:$0xff] }
 0x3e0   :  { %2138 = vmatprep.mubr.f32.mxu1 %v9739_v52  ;;  %6621 = vmatpush1.bf16.msra.mxu1 %v6620_v13  ;;  %v6824_v13 = vpack.c.bf16 %v1699_v6, %v1691_v49  ;;  %v6830_v49 = vpack.c.bf16 %v1732_v42, %v1724_v20  ;;  %v1738_v6 = vld [vmem:[#allocation2 + $0x1488] sm:$0xff]  ;;  %v1764_v20 = vld [vmem:[#allocation2 + $0x1558] sm:$0xff] }
 0x3e1   :  { %2590 = vmatprep.mubr.f32.mxu0 %v9739_v52  ;;  %6817 = vmatpush1.bf16.msra.mxu0 %v6816_v5  ;;  %v6630_v5 = vpack.c.bf16 %v1714_v44, %v1706_v33  ;;  %v1746_v33 = vld [vmem:[#allocation2 + $0x14c8] sm:$0xff]  ;;  %v1740_v44 = vld [vmem:[#allocation2 + $0x1498] sm:$0xff] }
 0x3e2   :  { %6623 = vmatprep.subr.bf16.mxu1 %v6622_v29  ;;  %6819 = vmatprep.subr.bf16.mxu0 %v6818_v18  ;;  %v1705_v29 = vld [vmem:[#allocation2 + $0x1380] sm:$0xff]  ;;  %v1715_v18 = vld [vmem:[#allocation2 + $0x13d0] sm:$0xff] }
 0x3e3   :  { %2139 = vmatmul.mubr.f32.gmra.mrb[10].mxu1 %v9733_v45  ;;  %2591 = vmatmul.mubr.f32.gmra.mrb[74].mxu0 %v9733_v45  ;;  %v6632_v56 = vpack.c.bf16 %v1713_v9, %v1705_v29  ;;  %v1745_v29 = vld [vmem:[#allocation2 + $0x14c0] sm:$0xff]  ;;  %v1739_v9 = vld [vmem:[#allocation2 + $0x1490] sm:$0xff] }
 0x3e4   :  { %2144 = vmatprep.mubr.f32.mxu1 %v9775_v21  ;;  %6625 = vmatpush1.bf16.msra.mxu1 %v6624_v0  ;;  %v6828_v0 = vpack.c.bf16 %v1715_v18, %v1707_v40  ;;  %v6834_v40 = vpack.c.bf16 %v1748_v60, %v1740_v44  ;;  %v1754_v18 = vld [vmem:[#allocation2 + $0x1508] sm:$0xff]  ;;  %v1780_v44 = vld [vmem:[#allocation2 + $0x15d8] sm:$0xff] }
 0x3e5   :  { %2596 = vmatprep.mubr.f32.mxu0 %v9775_v21  ;;  %6821 = vmatpush1.bf16.msra.mxu0 %v6820_v34  ;;  %v6634_v34 = vpack.c.bf16 %v1730_v32, %v1722_v2  ;;  %v1762_v2 = vld [vmem:[#allocation2 + $0x1548] sm:$0xff]  ;;  %v1756_v32 = vld [vmem:[#allocation2 + $0x1518] sm:$0xff] }
 0x3e6   :  { %6627 = vmatprep.subr.bf16.mxu1 %v6626_v7  ;;  %6823 = vmatprep.subr.bf16.mxu0 %v6822_v48  ;;  %v1721_v7 = vld [vmem:[#allocation2 + $0x1400] sm:$0xff]  ;;  %v1731_v48 = vld [vmem:[#allocation2 + $0x1450] sm:$0xff] }
 0x3e7   :  { %2145 = vmatmul.mubr.f32.gmra.mrb[12].mxu1 %v9769_v59  ;;  %2597 = vmatmul.mubr.f32.gmra.mrb[76].mxu0 %v9769_v59  ;;  %v6636_v10 = vpack.c.bf16 %v1729_v27, %v1721_v7  ;;  %v6642_v7 = vpack.c.bf16 %v1762_v2, %v1754_v18  ;;  %v1755_v27 = vld [vmem:[#allocation2 + $0x1510] sm:$0xff]  ;;  %v1786_v18 = vld [vmem:[#allocation2 + $0x1608] sm:$0xff]  ;;  %v1788_v2 = vld [vmem:[#allocation2 + $0x1618] sm:$0xff] }
 0x3e8   :  { %2150 = vmatprep.mubr.f32.mxu1 %v9809_v63  ;;  %6629 = vmatpush1.bf16.msra.mxu1 %v6628_v30  ;;  %v6832_v30 = vpack.c.bf16 %v1731_v48, %v1723_v11  ;;  %v6838_v11 = vpack.c.bf16 %v1764_v20, %v1756_v32  ;;  %v1763_v48 = vld [vmem:[#allocation2 + $0x1550] sm:$0xff]  ;;  %v1796_v32 = vld [vmem:[#allocation2 + $0x1658] sm:$0xff] }
 0x3e9   :  { %2602 = vmatprep.mubr.f32.mxu0 %v9809_v63  ;;  %6825 = vmatpush1.bf16.msra.mxu0 %v6824_v13  ;;  %v6638_v13 = vpack.c.bf16 %v1746_v33, %v1738_v6  ;;  %v1770_v6 = vld [vmem:[#allocation2 + $0x1588] sm:$0xff]  ;;  %v1772_v33 = vld [vmem:[#allocation2 + $0x1598] sm:$0xff] }
 0x3ea   :  { %6631 = vmatprep.subr.bf16.mxu1 %v6630_v5  ;;  %6827 = vmatprep.subr.bf16.mxu0 %v6826_v58  ;;  %v1737_v5 = vld [vmem:[#allocation2 + $0x1480] sm:$0xff]  ;;  %v1747_v58 = vld [vmem:[#allocation2 + $0x14d0] sm:$0xff] }
 0x3eb   :  { %2151 = vmatmul.mubr.f32.gmra.mrb[14].mxu1 %v9802_v8  ;;  %2603 = vmatmul.mubr.f32.gmra.mrb[78].mxu0 %v9802_v8  ;;  %v6640_v42 = vpack.c.bf16 %v1745_v29, %v1737_v5  ;;  %v1771_v29 = vld [vmem:[#allocation2 + $0x1590] sm:$0xff] }
 0x3ec   :  { %2221 = vmatprep.mubr.f32.mxu1 %v9584_v37  ;;  %6633 = vmatpush1.bf16.msra.mxu1 %v6632_v56  ;;  %v6836_v56 = vpack.c.bf16 %v1747_v58, %v1739_v9  ;;  %v6842_v9 = vpack.c.bf16 %v1780_v44, %v1772_v33  ;;  %v1779_v58 = vld [vmem:[#allocation2 + $0x15d0] sm:$0xff]  ;;  %v1812_v33 = vld [vmem:[#allocation2 + $0x16d8] sm:$0xff] }
 0x3ed   :  { %2673 = vmatprep.mubr.f32.mxu0 %v9584_v37  ;;  %6829 = vmatpush1.bf16.msra.mxu0 %v6828_v0  ;;  %v1753_v0 = vld [vmem:[#allocation2 + $0x1500] sm:$0xff] }
 0x3ee   :  { %6635 = vmatprep.subr.bf16.mxu1 %v6634_v34  ;;  %6831 = vmatprep.subr.bf16.mxu0 %v6830_v49  ;;  %v1761_v34 = vld [vmem:[#allocation2 + $0x1540] sm:$0xff]  ;;  %v1778_v49 = vld [vmem:[#allocation2 + $0x15c8] sm:$0xff] }
 0x3ef   :  { %v6644_v60 = vpack.c.bf16 %v1761_v34, %v1753_v0  ;;  %v6646_v5 = vpack.c.bf16 %v1778_v49, %v1770_v6  ;;  %v1787_v34 = vld [vmem:[#allocation2 + $0x1610] sm:$0xff]  ;;  %v1802_v6 = vld [vmem:[#allocation2 + $0x1688] sm:$0xff]  ;;  %v1804_v49 = vld [vmem:[#allocation2 + $0x1698] sm:$0xff] }
 0x3f0   :  { %6637 = vmatpush1.bf16.msra.mxu1 %v6636_v10  ;;  %v6840_v10 = vpack.c.bf16 %v1763_v48, %v1755_v27  ;;  %v6846_v27 = vpack.c.bf16 %v1796_v32, %v1788_v2  ;;  %v1795_v48 = vld [vmem:[#allocation2 + $0x1650] sm:$0xff]  ;;  %v1828_v2 = vld [vmem:[#allocation2 + $0x1758] sm:$0xff] }
 0x3f1   :  { %6833 = vmatpush1.bf16.msra.mxu0 %v6832_v30  ;;  %6639 = vmatprep.subr.bf16.mxu1 %v6638_v13  ;;  %v1769_v30 = vld [vmem:[#allocation2 + $0x1580] sm:$0xff] }
 0x3f2   :  { %6835 = vmatprep.subr.bf16.mxu0 %v6834_v40  ;;  %v1777_v13 = vld [vmem:[#allocation2 + $0x15c0] sm:$0xff]  ;;  %v1794_v40 = vld [vmem:[#allocation2 + $0x1648] sm:$0xff] }
 0x3f3   :  { %v6648_v20 = vpack.c.bf16 %v1777_v13, %v1769_v30  ;;  %v6650_v0 = vpack.c.bf16 %v1794_v40, %v1786_v18  ;;  %v1803_v13 = vld [vmem:[#allocation2 + $0x1690] sm:$0xff]  ;;  %v1818_v18 = vld [vmem:[#allocation2 + $0x1708] sm:$0xff]  ;;  %v1820_v40 = vld [vmem:[#allocation2 + $0x1718] sm:$0xff] }
 0x3f4   :  { %6641 = vmatpush1.bf16.msra.mxu1 %v6640_v42  ;;  %v6844_v42 = vpack.c.bf16 %v1779_v58, %v1771_v29  ;;  %v6850_v29 = vpack.c.bf16 %v1812_v33, %v1804_v49  ;;  %v1811_v58 = vld [vmem:[#allocation2 + $0x16d0] sm:$0xff]  ;;  %v1844_v49 = vld [vmem:[#allocation2 + $0x17d8] sm:$0xff] }
 0x3f5   :  { %6837 = vmatpush1.bf16.msra.mxu0 %v6836_v56  ;;  %6643 = vmatprep.subr.bf16.mxu1 %v6642_v7  ;;  %v1785_v56 = vld [vmem:[#allocation2 + $0x1600] sm:$0xff] }
 0x3f6   :  { %6839 = vmatprep.subr.bf16.mxu0 %v6838_v11  ;;  %v1793_v7 = vld [vmem:[#allocation2 + $0x1640] sm:$0xff]  ;;  %v1810_v11 = vld [vmem:[#allocation2 + $0x16c8] sm:$0xff] }
 0x3f7   :  { %v6652_v44 = vpack.c.bf16 %v1793_v7, %v1785_v56  ;;  %v6654_v30 = vpack.c.bf16 %v1810_v11, %v1802_v6  ;;  %v1819_v7 = vld [vmem:[#allocation2 + $0x1710] sm:$0xff]  ;;  %v1834_v6 = vld [vmem:[#allocation2 + $0x1788] sm:$0xff]  ;;  %v1836_v11 = vld [vmem:[#allocation2 + $0x1798] sm:$0xff] }
 0x3f8   :  { %6645 = vmatpush1.bf16.msra.mxu1 %v6644_v60  ;;  %v6848_v60 = vpack.c.bf16 %v1795_v48, %v1787_v34  ;;  %v6854_v34 = vpack.c.bf16 %v1828_v2, %v1820_v40  ;;  %v1827_v48 = vld [vmem:[#allocation2 + $0x1750] sm:$0xff]  ;;  %v1860_v40 = vld [vmem:[#allocation2 + $0x1858] sm:$0xff] }
 0x3f9   :  { %6841 = vmatpush1.bf16.msra.mxu0 %v6840_v10  ;;  %6647 = vmatprep.subr.bf16.mxu1 %v6646_v5  ;;  %v1801_v10 = vld [vmem:[#allocation2 + $0x1680] sm:$0xff] }
 0x3fa   :  { %6843 = vmatprep.subr.bf16.mxu0 %v6842_v9  ;;  %v1809_v5 = vld [vmem:[#allocation2 + $0x16c0] sm:$0xff]  ;;  %v1826_v9 = vld [vmem:[#allocation2 + $0x1748] sm:$0xff] }
 0x3fb   :  { %v6656_v32 = vpack.c.bf16 %v1809_v5, %v1801_v10  ;;  %v6658_v56 = vpack.c.bf16 %v1826_v9, %v1818_v18  ;;  %v1835_v5 = vld [vmem:[#allocation2 + $0x1790] sm:$0xff]  ;;  %v1850_v18 = vld [vmem:[#allocation2 + $0x1808] sm:$0xff]  ;;  %v1852_v9 = vld [vmem:[#allocation2 + $0x1818] sm:$0xff] }
 0x3fc   :  { %6649 = vmatpush1.bf16.msra.mxu1 %v6648_v20  ;;  %v6852_v20 = vpack.c.bf16 %v1811_v58, %v1803_v13  ;;  %v6858_v13 = vpack.c.bf16 %v1844_v49, %v1836_v11  ;;  %v1843_v58 = vld [vmem:[#allocation2 + $0x17d0] sm:$0xff]  ;;  %v1096_v11 = vld [vmem:[#allocation2 + $0x78] sm:$0xff] }
 0x3fd   :  { %6845 = vmatpush1.bf16.msra.mxu0 %v6844_v42  ;;  %6651 = vmatprep.subr.bf16.mxu1 %v6650_v0  ;;  %v1817_v42 = vld [vmem:[#allocation2 + $0x1700] sm:$0xff] }
 0x3fe   :  { %6847 = vmatprep.subr.bf16.mxu0 %v6846_v27  ;;  %v1825_v0 = vld [vmem:[#allocation2 + $0x1740] sm:$0xff]  ;;  %v1842_v27 = vld [vmem:[#allocation2 + $0x17c8] sm:$0xff] }
 0x3ff   :  { %v6660_v33 = vpack.c.bf16 %v1825_v0, %v1817_v42  ;;  %v6662_v10 = vpack.c.bf16 %v1842_v27, %v1834_v6  ;;  %v6862_v0 = vpack.c.bf16 %v1860_v40, %v1852_v9  ;;  %v1086_v6 = vld [vmem:[#allocation2 + $0x28] sm:$0xff]  ;;  %v1088_v27 = vld [vmem:[#allocation2 + $0x38] sm:$0xff]  ;;  %v12765_v40 = vmov 0.0  }
 0x400   :  { %6653 = vmatpush1.bf16.msra.mxu1 %v6652_v44  ;;  %v6856_v44 = vpack.c.bf16 %v1827_v48, %v1819_v7  ;;  %v1851_v7 = vld [vmem:[#allocation2 + $0x1810] sm:$0xff]  ;;  %v1110_v9 = vld [vmem:[#allocation2 + $0xe8] sm:$0xff] }
 0x401   :  { %6849 = vmatpush1.bf16.msra.mxu0 %v6848_v60  ;;  %6655 = vmatprep.subr.bf16.mxu1 %v6654_v30  ;;  %v1833_v60 = vld [vmem:[#allocation2 + $0x1780] sm:$0xff]  ;;  %v1859_v48 = vld [vmem:[#allocation2 + $0x1850] sm:$0xff] }
 0x402   :  { %6851 = vmatprep.subr.bf16.mxu0 %v6850_v29  ;;  %v1841_v30 = vld [vmem:[#allocation2 + $0x17c0] sm:$0xff]  ;;  %v1858_v29 = vld [vmem:[#allocation2 + $0x1848] sm:$0xff] }
 0x403   :  { %v6664_v2 = vpack.c.bf16 %v1841_v30, %v1833_v60  ;;  %v6666_v42 = vpack.c.bf16 %v1858_v29, %v1850_v18  ;;  %v12981_v60 = vld [vmem:[#allocation22_spill] sm:$0xff]  ;;  %v1095_v18 = vld [vmem:[#allocation2 + $0x70] sm:$0xff]  ;;  %v1102_v29 = vld [vmem:[#allocation2 + $0xa8] sm:$0xff] }
 0x404   :  { %6657 = vmatpush1.bf16.msra.mxu1 %v6656_v32  ;;  %v6860_v32 = vpack.c.bf16 %v1843_v58, %v1835_v5  ;;  %v12982_v30 = vld [vmem:[#allocation18_spill] sm:$0xff]  ;;  %v1087_v58 = vld [vmem:[#allocation2 + $0x30] sm:$0xff] }
 0x405   :  { %6853 = vmatpush1.bf16.msra.mxu0 %v6852_v20  ;;  %6659 = vmatprep.subr.bf16.mxu1 %v6658_v56  ;;  %v1849_v20 = vld [vmem:[#allocation2 + $0x1800] sm:$0xff] }
 0x406   :  { %6855 = vmatprep.subr.bf16.mxu0 %v6854_v34  ;;  %v1857_v56 = vld [vmem:[#allocation2 + $0x1840] sm:$0xff]  ;;  %v1094_v34 = vld [vmem:[#allocation2 + $0x68] sm:$0xff] }
 0x407   :  { %v6668_v49 = vpack.c.bf16 %v1857_v56, %v1849_v20  ;;  %v1085_v5 = vld [vmem:[#allocation2 + $0x20] sm:$0xff]  ;;  %v7064_v20 = vpack.c.bf16 %v1095_v18, %v1087_v58 }
 0x408   :  { %6661 = vmatpush1.bf16.msra.mxu1 %v6660_v33  ;;  %v6864_v33 = vpack.c.bf16 %v1859_v48, %v1851_v7  ;;  %v1101_v56 = vld [vmem:[#allocation2 + $0xa0] sm:$0xff]  ;;  %v6870_v7 = vpack.c.bf16 %v1110_v9, %v1102_v29  ;;  %v1103_v48 = vld [vmem:[#allocation2 + $0xb0] sm:$0xff] }
 0x409   :  { %6857 = vmatpush1.bf16.msra.mxu0 %v6856_v44  ;;  %6663 = vmatprep.subr.bf16.mxu1 %v6662_v10  ;;  %v6866_v44 = vpack.c.bf16 %v1094_v34, %v1086_v6  ;;  %v7062_v10 = vpack.c.bf16 %v1096_v11, %v1088_v27  ;;  %v1111_v6 = vld [vmem:[#allocation2 + $0xf0] sm:$0xff]  ;;  %v1118_v11 = vld [vmem:[#allocation2 + $0x128] sm:$0xff]  ;;  %v1125_v58 = vld [vmem:[#allocation2 + $0x160] sm:$0xff] }
 0x40a   :  { %6859 = vmatprep.subr.bf16.mxu0 %v6858_v13  ;;  %v1093_v13 = vld [vmem:[#allocation2 + $0x60] sm:$0xff]  ;;  %v12983_v34 = vld [vmem:[#allocation13_spill] sm:$0xff] }
 0x40b   :  { %v1119_v29 = vld [vmem:[#allocation2 + $0x130] sm:$0xff] }
 0x40c   :  { %6665 = vmatpush1.bf16.msra.mxu1 %v6664_v2  ;;  %v6868_v2 = vpack.c.bf16 %v1093_v13, %v1085_v5  ;;  %v7068_v5 = vpack.c.bf16 %v1111_v6, %v1103_v48  ;;  %v1117_v13 = vld [vmem:[#allocation2 + $0x120] sm:$0xff]  ;;  %v1127_v9 = vld [vmem:[#allocation2 + $0x170] sm:$0xff]  ;;  %v1144_v48 = vld [vmem:[#allocation2 + $0x1f8] sm:$0xff] }
 0x40d   :  { %6861 = vmatpush1.bf16.msra.mxu0 %v6860_v32  ;;  %6667 = vmatprep.subr.bf16.mxu1 %v6666_v42  ;;  %v1104_v32 = vld [vmem:[#allocation2 + $0xb8] sm:$0xff]  ;;  %v1133_v6 = vld [vmem:[#allocation2 + $0x1a0] sm:$0xff] }
 0x40e   :  { %6863 = vmatprep.subr.bf16.mxu0 %v6862_v0  ;;  %v1112_v42 = vld [vmem:[#allocation2 + $0xf8] sm:$0xff]  ;;  %v1109_v0 = vld [vmem:[#allocation2 + $0xe0] sm:$0xff] }
 0x40f   :  { %2222 = vmatmul.mubr.f32.vlgmr.msra.gmra.mrb[0].mxu1 %v9578_v46  ;;  %v7066_v27 = vpack.c.bf16 %v1112_v42, %v1104_v32  ;;  %v12984_v32 = vld [vmem:[#allocation17_spill] sm:$0xff]  ;;  %v1134_v42 = vld [vmem:[#allocation2 + $0x1a8] sm:$0xff] }
 0x410   :  { %2674 = vmatmul.mubr.f32.vlgmr.msra.gmra.mrb[64].mxu0 %v9578_v46  ;;  %2227 = vmatprep.mubr.f32.mxu1 %v9618_v3 }
 0x411   :  { %6669 = vmatpush1.bf16.msra.mxu1 %v6668_v49  ;;  %2679 = vmatprep.mubr.f32.mxu0 %v9618_v3  ;;  %v1126_v49 = vld [vmem:[#allocation2 + $0x168] sm:$0xff] }
 0x412   :  { %6865 = vmatpush1.bf16.msra.mxu0 %v6864_v33  ;;  %6867 = vmatprep.subr.bf16.mxu1 %v6866_v44  ;;  %v6872_v33 = vpack.c.bf16 %v1109_v0, %v1101_v56  ;;  %v1120_v44 = vld [vmem:[#allocation2 + $0x138] sm:$0xff]  ;;  %v6874_v18 = vpack.c.bf16 %v1126_v49, %v1118_v11  ;;  %v1142_v56 = vld [vmem:[#allocation2 + $0x1e8] sm:$0xff]  ;;  %v1141_v11 = vld [vmem:[#allocation2 + $0x1e0] sm:$0xff] }
 0x413   :  { %2228 = vmatmul.mubr.f32.gmra.mrb[2].mxu1 %v9605_v41  ;;  %7063 = vmatprep.subr.bf16.mxu0 %v7062_v10  ;;  %v1128_v10 = vld [vmem:[#allocation2 + $0x178] sm:$0xff]  ;;  %v1135_v49 = vld [vmem:[#allocation2 + $0x1b0] sm:$0xff] }
 0x414   :  { %2680 = vmatmul.mubr.f32.gmra.mrb[66].mxu0 %v9605_v41  ;;  %2233 = vmatprep.mubr.f32.mxu1 %v12981_v60  ;;  %v1136_v0 = vld [vmem:[#allocation2 + $0x1b8] sm:$0xff] }
 0x415   :  { %2685 = vmatprep.mubr.f32.mxu0 %v12981_v60 }
 0x417   :  { %2234 = vmatmul.mubr.f32.gmra.mrb[4].mxu1 %v12982_v30 }
 0x418   :  { %2686 = vmatmul.mubr.f32.gmra.mrb[68].mxu0 %v12982_v30  ;;  %2239 = vmatprep.mubr.f32.mxu1 %v9688_v53 }
 0x419   :  { %2691 = vmatprep.mubr.f32.mxu0 %v9688_v53 }
 0x41b   :  { %2240 = vmatmul.mubr.f32.gmra.mrb[6].mxu1 %v9682_v16 }
 0x41c   :  { %2692 = vmatmul.mubr.f32.gmra.mrb[70].mxu0 %v9682_v16  ;;  %2245 = vmatprep.mubr.f32.mxu1 %v9721_v19 }
 0x41d   :  { %2697 = vmatprep.mubr.f32.mxu0 %v9721_v19 }
 0x41f   :  { %2246 = vmatmul.mubr.f32.gmra.mrb[8].mxu1 %v9715_v55 }
 0x420   :  { %2698 = vmatmul.mubr.f32.gmra.mrb[72].mxu0 %v9715_v55  ;;  %2251 = vmatprep.mubr.f32.mxu1 %v9760_v24 }
 0x421   :  { %2703 = vmatprep.mubr.f32.mxu0 %v9760_v24 }
 0x423   :  { %2252 = vmatmul.mubr.f32.gmra.mrb[10].mxu1 %v9745_v62 }
 0x424   :  { %2704 = vmatmul.mubr.f32.gmra.mrb[74].mxu0 %v9745_v62  ;;  %2257 = vmatprep.mubr.f32.mxu1 %v9787_v61 }
 0x425   :  { %2709 = vmatprep.mubr.f32.mxu0 %v9787_v61 }
 0x427   :  { %2258 = vmatmul.mubr.f32.gmra.mrb[12].mxu1 %v9781_v23 }
 0x428   :  { %2710 = vmatmul.mubr.f32.gmra.mrb[76].mxu0 %v9781_v23  ;;  %2263 = vmatprep.mubr.f32.mxu1 %v9821_v25 }
 0x429   :  { %2715 = vmatprep.mubr.f32.mxu0 %v9821_v25 }
 0x42b   :  { %2264 = vmatmul.mubr.f32.gmra.mrb[14].mxu1 %v9815_v50 }
 0x42c   :  { %2716 = vmatmul.mubr.f32.gmra.mrb[78].mxu0 %v9815_v50  ;;  %2334 = vmatprep.mubr.f32.mxu1 %v12765_v40 }
 0x42d   :  { %2786 = vmatprep.mubr.f32.mxu0 %v12765_v40 }
 0x42f   :  { %6162 = vmatmul.mubr.msk.f32.vlgmr.msra.gmra.mrb[0].mxu1 %vm763_vm0, %v12983_v34 }
 0x430   :  { %6170 = vmatmul.mubr.msk.f32.vlgmr.msra.gmra.mrb[64].mxu0 %vm763_vm0, %v12983_v34  ;;  %6869 = vmatpush1.bf16.msra.mxu1 %v6868_v2  ;;  %v7070_v2 = vpack.c.bf16 %v1128_v10, %v1120_v44  ;;  %v1143_v44 = vld [vmem:[#allocation2 + $0x1f0] sm:$0xff]  ;;  %v1150_v10 = vld [vmem:[#allocation2 + $0x228] sm:$0xff] }
 0x431   :  { %7065 = vmatpush1.bf16.msra.mxu0 %v7064_v20  ;;  %2340 = vmatprep.mubr.f32.mxu1 %v12765_v40  ;;  %v6876_v20 = vpack.c.bf16 %v1125_v58, %v1117_v13  ;;  %v1158_v13 = vld [vmem:[#allocation2 + $0x268] sm:$0xff]  ;;  %v1152_v58 = vld [vmem:[#allocation2 + $0x238] sm:$0xff] }
 0x432   :  { %2792 = vmatprep.mubr.f32.mxu0 %v12765_v40  ;;  %6871 = vmatprep.subr.bf16.mxu1 %v6870_v7  ;;  %v7072_v7 = vpack.c.bf16 %v1127_v9, %v1119_v29  ;;  %v1160_v29 = vld [vmem:[#allocation2 + $0x278] sm:$0xff]  ;;  %v1149_v9 = vld [vmem:[#allocation2 + $0x220] sm:$0xff] }
 0x433   :  { %7067 = vmatprep.subr.bf16.mxu0 %v7066_v27  ;;  %6163 = vmatmul.mubr.msk.f32.gmra.mrb[2].mxu1 %vm763_vm0, %v12984_v32  ;;  %v6878_v27 = vpack.c.bf16 %v1142_v56, %v1134_v42  ;;  %v1157_v42 = vld [vmem:[#allocation2 + $0x260] sm:$0xff]  ;;  %v1151_v56 = vld [vmem:[#allocation2 + $0x230] sm:$0xff] }
 0x434   :  { %6171 = vmatmul.mubr.msk.f32.gmra.mrb[66].mxu0 %vm763_vm0, %v12984_v32  ;;  %6873 = vmatpush1.bf16.msra.mxu1 %v6872_v33  ;;  %v7074_v33 = vpack.c.bf16 %v1144_v48, %v1136_v0  ;;  %v1159_v0 = vld [vmem:[#allocation2 + $0x270] sm:$0xff]  ;;  %v1166_v48 = vld [vmem:[#allocation2 + $0x2a8] sm:$0xff]  ;;  %v1248_v32 = vld [vmem:[#allocation2 + $0x538] sm:$0xff] }
 0x435   :  { %7069 = vmatpush1.bf16.msra.mxu0 %v7068_v5  ;;  %2346 = vmatprep.mubr.f32.mxu1 %v12765_v40  ;;  %v6880_v5 = vpack.c.bf16 %v1141_v11, %v1133_v6  ;;  %v1174_v6 = vld [vmem:[#allocation2 + $0x2e8] sm:$0xff]  ;;  %v1168_v11 = vld [vmem:[#allocation2 + $0x2b8] sm:$0xff] }
 0x436   :  { %2798 = vmatprep.mubr.f32.mxu0 %v12765_v40  ;;  %6875 = vmatprep.subr.bf16.mxu1 %v6874_v18  ;;  %v7076_v18 = vpack.c.bf16 %v1143_v44, %v1135_v49  ;;  %v1176_v49 = vld [vmem:[#allocation2 + $0x2f8] sm:$0xff]  ;;  %v1165_v44 = vld [vmem:[#allocation2 + $0x2a0] sm:$0xff] }
 0x437   :  { %7071 = vmatprep.subr.bf16.mxu0 %v7070_v2  ;;  %6164 = vmatmul.mubr.msk.f32.gmra.mrb[4].mxu1 %vm763_vm0, %v9664_v17  ;;  %v6882_v2 = vpack.c.bf16 %v1158_v13, %v1150_v10  ;;  %v1173_v10 = vld [vmem:[#allocation2 + $0x2e0] sm:$0xff]  ;;  %v1167_v13 = vld [vmem:[#allocation2 + $0x2b0] sm:$0xff] }
 0x438   :  { %6172 = vmatmul.mubr.msk.f32.gmra.mrb[68].mxu0 %vm763_vm0, %v9664_v17  ;;  %6877 = vmatpush1.bf16.msra.mxu1 %v6876_v20  ;;  %v7078_v20 = vpack.c.bf16 %v1160_v29, %v1152_v58  ;;  %v1175_v58 = vld [vmem:[#allocation2 + $0x2f0] sm:$0xff]  ;;  %v1182_v29 = vld [vmem:[#allocation2 + $0x328] sm:$0xff] }
 0x439   :  { %7073 = vmatpush1.bf16.msra.mxu0 %v7072_v7  ;;  %2352 = vmatprep.mubr.f32.mxu1 %v12765_v40  ;;  %v6884_v7 = vpack.c.bf16 %v1157_v42, %v1149_v9  ;;  %v1190_v9 = vld [vmem:[#allocation2 + $0x368] sm:$0xff]  ;;  %v1184_v42 = vld [vmem:[#allocation2 + $0x338] sm:$0xff] }
 0x43a   :  { %2804 = vmatprep.mubr.f32.mxu0 %v12765_v40  ;;  %6879 = vmatprep.subr.bf16.mxu1 %v6878_v27  ;;  %v7080_v27 = vpack.c.bf16 %v1159_v0, %v1151_v56  ;;  %v1192_v56 = vld [vmem:[#allocation2 + $0x378] sm:$0xff]  ;;  %v1181_v0 = vld [vmem:[#allocation2 + $0x320] sm:$0xff]  ;;  %v1254_v17 = vld [vmem:[#allocation2 + $0x568] sm:$0xff] }
 0x43b   :  { %7075 = vmatprep.subr.bf16.mxu0 %v7074_v33  ;;  %6165 = vmatmul.mubr.msk.f32.gmra.mrb[6].mxu1 %vm763_vm0, %v9691_v4  ;;  %v6886_v33 = vpack.c.bf16 %v1174_v6, %v1166_v48  ;;  %v1189_v48 = vld [vmem:[#allocation2 + $0x360] sm:$0xff]  ;;  %v1183_v6 = vld [vmem:[#allocation2 + $0x330] sm:$0xff] }
 0x43c   :  { %6173 = vmatmul.mubr.msk.f32.gmra.mrb[70].mxu0 %vm763_vm0, %v9691_v4  ;;  %6881 = vmatpush1.bf16.msra.mxu1 %v6880_v5  ;;  %v7082_v5 = vpack.c.bf16 %v1176_v49, %v1168_v11  ;;  %v1191_v11 = vld [vmem:[#allocation2 + $0x370] sm:$0xff]  ;;  %v12985_v49 = vld [vmem:[#allocation26_spill] sm:$0xff]  ;;  %v1238_v4 = vld [vmem:[#allocation2 + $0x4e8] sm:$0xff] }
 0x43d   :  { %7077 = vmatpush1.bf16.msra.mxu0 %v7076_v18  ;;  %2358 = vmatprep.mubr.f32.mxu1 %v12765_v40  ;;  %v6888_v18 = vpack.c.bf16 %v1173_v10, %v1165_v44  ;;  %v1198_v44 = vld [vmem:[#allocation2 + $0x3a8] sm:$0xff] }
 0x43e   :  { %2810 = vmatprep.mubr.f32.mxu0 %v12765_v40  ;;  %6883 = vmatprep.subr.bf16.mxu1 %v6882_v2  ;;  %v7084_v2 = vpack.c.bf16 %v1175_v58, %v1167_v13  ;;  %v1206_v10 = vld [vmem:[#allocation2 + $0x3e8] sm:$0xff]  ;;  %v1200_v13 = vld [vmem:[#allocation2 + $0x3b8] sm:$0xff] }
 0x43f   :  { %7079 = vmatprep.subr.bf16.mxu0 %v7078_v20  ;;  %6166 = vmatmul.mubr.msk.f32.gmra.mrb[8].mxu1 %vm763_vm0, %v9724_v12  ;;  %v6890_v20 = vpack.c.bf16 %v1190_v9, %v1182_v29  ;;  %v1208_v58 = vld [vmem:[#allocation2 + $0x3f8] sm:$0xff]  ;;  %v1197_v29 = vld [vmem:[#allocation2 + $0x3a0] sm:$0xff] }
 0x440   :  { %6174 = vmatmul.mubr.msk.f32.gmra.mrb[72].mxu0 %vm763_vm0, %v9724_v12  ;;  %6885 = vmatpush1.bf16.msra.mxu1 %v6884_v7  ;;  %v7086_v7 = vpack.c.bf16 %v1192_v56, %v1184_v42  ;;  %v1205_v9 = vld [vmem:[#allocation2 + $0x3e0] sm:$0xff]  ;;  %v1199_v42 = vld [vmem:[#allocation2 + $0x3b0] sm:$0xff] }
 0x441   :  { %7081 = vmatpush1.bf16.msra.mxu0 %v7080_v27  ;;  %2364 = vmatprep.mubr.f32.mxu1 %v12765_v40  ;;  %v6892_v27 = vpack.c.bf16 %v1189_v48, %v1181_v0  ;;  %v1207_v56 = vld [vmem:[#allocation2 + $0x3f0] sm:$0xff]  ;;  %v12986_v12 = vld [vmem:[#allocation27_spill] sm:$0xff] }
 0x442   :  { %2816 = vmatprep.mubr.f32.mxu0 %v12765_v40  ;;  %6887 = vmatprep.subr.bf16.mxu1 %v6886_v33  ;;  %v7088_v33 = vpack.c.bf16 %v1191_v11, %v1183_v6  ;;  %v1214_v0 = vld [vmem:[#allocation2 + $0x428] sm:$0xff]  ;;  %v1216_v6 = vld [vmem:[#allocation2 + $0x438] sm:$0xff] }
 0x443   :  { %7083 = vmatprep.subr.bf16.mxu0 %v7082_v5  ;;  %6167 = vmatmul.mubr.msk.f32.gmra.mrb[10].mxu1 %vm763_vm0, %v12985_v49  ;;  %v6894_v5 = vpack.c.bf16 %v1206_v10, %v1198_v44  ;;  %v1222_v48 = vld [vmem:[#allocation2 + $0x468] sm:$0xff]  ;;  %v1224_v11 = vld [vmem:[#allocation2 + $0x478] sm:$0xff]  ;;  %v1213_v44 = vld [vmem:[#allocation2 + $0x420] sm:$0xff] }
 0x444   :  { %6175 = vmatmul.mubr.msk.f32.gmra.mrb[74].mxu0 %vm763_vm0, %v12985_v49  ;;  %6889 = vmatpush1.bf16.msra.mxu1 %v6888_v18  ;;  %v7090_v18 = vpack.c.bf16 %v1208_v58, %v1200_v13  ;;  %v1221_v10 = vld [vmem:[#allocation2 + $0x460] sm:$0xff]  ;;  %v6898_v13 = vpack.c.bf16 %v1222_v48, %v1214_v0  ;;  %v1223_v58 = vld [vmem:[#allocation2 + $0x470] sm:$0xff]  ;;  %v1230_v49 = vld [vmem:[#allocation2 + $0x4a8] sm:$0xff] }
 0x445   :  { %7085 = vmatpush1.bf16.msra.mxu0 %v7084_v2  ;;  %2370 = vmatprep.mubr.f32.mxu1 %v12765_v40  ;;  %v6896_v2 = vpack.c.bf16 %v1205_v9, %v1197_v29  ;;  %v1232_v29 = vld [vmem:[#allocation2 + $0x4b8] sm:$0xff]  ;;  %v6900_v9 = vpack.c.bf16 %v1221_v10, %v1213_v44  ;;  %v1229_v0 = vld [vmem:[#allocation2 + $0x4a0] sm:$0xff]  ;;  %v1247_v10 = vld [vmem:[#allocation2 + $0x530] sm:$0xff] }
 0x446   :  { %2822 = vmatprep.mubr.f32.mxu0 %v12765_v40  ;;  %6891 = vmatprep.subr.bf16.mxu1 %v6890_v20  ;;  %v7092_v20 = vpack.c.bf16 %v1207_v56, %v1199_v42  ;;  %v12988_v42 = vld [vmem:[#allocation12_spill] sm:$0xff]  ;;  %v6902_v56 = vpack.c.bf16 %v1238_v4, %v1230_v49  ;;  %v1237_v48 = vld [vmem:[#allocation2 + $0x4e0] sm:$0xff] }
 0x447   :  { %7087 = vmatprep.subr.bf16.mxu0 %v7086_v7  ;;  %6168 = vmatmul.mubr.msk.f32.gmra.mrb[12].mxu1 %vm763_vm0, %v12986_v12  ;;  %v1215_v7 = vld [vmem:[#allocation2 + $0x430] sm:$0xff]  ;;  %v1245_v4 = vld [vmem:[#allocation2 + $0x520] sm:$0xff] }
 0x448   :  { %6176 = vmatmul.mubr.msk.f32.gmra.mrb[76].mxu0 %vm763_vm0, %v12986_v12  ;;  %6893 = vmatpush1.bf16.msra.mxu1 %v6892_v27  ;;  %v12987_v12 = vld [vmem:[#allocation28_spill] sm:$0xff]  ;;  %v7094_v27 = vpack.c.bf16 %v1224_v11, %v1216_v6  ;;  %v1253_v49 = vld [vmem:[#allocation2 + $0x560] sm:$0xff] }
 0x449   :  { %7089 = vmatpush1.bf16.msra.mxu0 %v7088_v33  ;;  %2376 = vmatprep.mubr.f32.mxu1 %v12765_v40  ;;  %v1240_v33 = vld [vmem:[#allocation2 + $0x4f8] sm:$0xff]  ;;  %v1239_v6 = vld [vmem:[#allocation2 + $0x4f0] sm:$0xff]  ;;  %v1246_v11 = vld [vmem:[#allocation2 + $0x528] sm:$0xff] }
 0x44a   :  { %2828 = vmatprep.mubr.f32.mxu0 %v12765_v40  ;;  %6895 = vmatprep.subr.bf16.mxu1 %v6894_v5  ;;  %v7096_v5 = vpack.c.bf16 %v1223_v58, %v1215_v7  ;;  %v1231_v40 = vld [vmem:[#allocation2 + $0x4b0] sm:$0xff]  ;;  %v6906_v44 = vpack.c.bf16 %v1254_v17, %v1246_v11 }
 0x44b   :  { %7091 = vmatprep.subr.bf16.mxu0 %v7090_v18  ;;  %6169 = vmatmul.mubr.msk.f32.gmra.mrb[14].mxu1 %vm763_vm0, %v12987_v12  ;;  %v7098_v18 = vpack.c.bf16 %v1240_v33, %v1232_v29  ;;  %v1255_v58 = vld [vmem:[#allocation2 + $0x570] sm:$0xff]  ;;  %v1270_v29 = vld [vmem:[#allocation2 + $0x5e8] sm:$0xff]  ;;  %v1264_v33 = vld [vmem:[#allocation2 + $0x5b8] sm:$0xff] }
 0x44c   :  { %6177 = vmatmul.mubr.msk.f32.gmra.mrb[78].mxu0 %vm763_vm0, %v12987_v12  ;;  %6897 = vmatpush1.bf16.msra.mxu1 %v6896_v2  ;;  %v1256_v12 = vld [vmem:[#allocation2 + $0x578] sm:$0xff]  ;;  %v6904_v2 = vpack.c.bf16 %v1237_v48, %v1229_v0  ;;  %v1271_v48 = vld [vmem:[#allocation2 + $0x5f0] sm:$0xff] }
 0x44d   :  { %7093 = vmatpush1.bf16.msra.mxu0 %v7092_v20  ;;  %2899 = vmatprep.mubr.f32.mxu1 %v12988_v42  ;;  %v7100_v20 = vpack.c.bf16 %v1239_v6, %v1231_v40  ;;  %v7102_v7 = vpack.c.bf16 %v1256_v12, %v1248_v32  ;;  %v1263_v40 = vld [vmem:[#allocation2 + $0x5b0] sm:$0xff]  ;;  %v1278_v6 = vld [vmem:[#allocation2 + $0x628] sm:$0xff]  ;;  %v1280_v12 = vld [vmem:[#allocation2 + $0x638] sm:$0xff] }
 0x44e   :  { %3351 = vmatprep.mubr.f32.mxu0 %v12988_v42  ;;  %6899 = vmatprep.subr.bf16.mxu1 %v6898_v13  ;;  %v1262_v13 = vld [vmem:[#allocation2 + $0x5a8] sm:$0xff]  ;;  %v1272_v42 = vld [vmem:[#allocation2 + $0x5f8] sm:$0xff] }
 0x44f   :  { %7095 = vmatprep.subr.bf16.mxu0 %v7094_v27  ;;  %v6908_v27 = vpack.c.bf16 %v1253_v49, %v1245_v4  ;;  %v6910_v0 = vpack.c.bf16 %v1270_v29, %v1262_v13  ;;  %v7106_v17 = vpack.c.bf16 %v1272_v42, %v1264_v33  ;;  %v1288_v32 = vld [vmem:[#allocation2 + $0x678] sm:$0xff]  ;;  %v1279_v49 = vld [vmem:[#allocation2 + $0x630] sm:$0xff]  ;;  %v1294_v13 = vld [vmem:[#allocation2 + $0x6a8] sm:$0xff] }
 0x450   :  { %6901 = vmatpush1.bf16.msra.mxu1 %v6900_v9  ;;  %v7104_v9 = vpack.c.bf16 %v1255_v58, %v1247_v10  ;;  %v7110_v10 = vpack.c.bf16 %v1288_v32, %v1280_v12  ;;  %v1287_v58 = vld [vmem:[#allocation2 + $0x670] sm:$0xff]  ;;  %v1296_v29 = vld [vmem:[#allocation2 + $0x6b8] sm:$0xff] }
 0x451   :  { %7097 = vmatpush1.bf16.msra.mxu0 %v7096_v5  ;;  %6903 = vmatprep.subr.bf16.mxu1 %v6902_v56  ;;  %v1261_v5 = vld [vmem:[#allocation2 + $0x5a0] sm:$0xff]  ;;  %v1304_v33 = vld [vmem:[#allocation2 + $0x6f8] sm:$0xff] }
 0x452   :  { %7099 = vmatprep.subr.bf16.mxu0 %v7098_v18  ;;  %v1269_v56 = vld [vmem:[#allocation2 + $0x5e0] sm:$0xff]  ;;  %v1286_v18 = vld [vmem:[#allocation2 + $0x668] sm:$0xff]  ;;  %v1320_v12 = vld [vmem:[#allocation2 + $0x778] sm:$0xff] }
 0x453   :  { %v6912_v11 = vpack.c.bf16 %v1269_v56, %v1261_v5  ;;  %v6914_v4 = vpack.c.bf16 %v1286_v18, %v1278_v6  ;;  %v1295_v56 = vld [vmem:[#allocation2 + $0x6b0] sm:$0xff]  ;;  %v1310_v6 = vld [vmem:[#allocation2 + $0x728] sm:$0xff]  ;;  %v1312_v18 = vld [vmem:[#allocation2 + $0x738] sm:$0xff] }
 0x454   :  { %6905 = vmatpush1.bf16.msra.mxu1 %v6904_v2  ;;  %v7108_v2 = vpack.c.bf16 %v1271_v48, %v1263_v40  ;;  %v7114_v40 = vpack.c.bf16 %v1304_v33, %v1296_v29  ;;  %v1303_v48 = vld [vmem:[#allocation2 + $0x6f0] sm:$0xff]  ;;  %v1336_v29 = vld [vmem:[#allocation2 + $0x7f8] sm:$0xff] }
 0x455   :  { %7101 = vmatpush1.bf16.msra.mxu0 %v7100_v20  ;;  %6907 = vmatprep.subr.bf16.mxu1 %v6906_v44  ;;  %v1277_v20 = vld [vmem:[#allocation2 + $0x620] sm:$0xff] }
 0x456   :  { %7103 = vmatprep.subr.bf16.mxu0 %v7102_v7  ;;  %v1285_v44 = vld [vmem:[#allocation2 + $0x660] sm:$0xff]  ;;  %v1302_v7 = vld [vmem:[#allocation2 + $0x6e8] sm:$0xff] }
 0x457   :  { %v6916_v42 = vpack.c.bf16 %v1285_v44, %v1277_v20  ;;  %v6918_v5 = vpack.c.bf16 %v1302_v7, %v1294_v13  ;;  %v1311_v44 = vld [vmem:[#allocation2 + $0x730] sm:$0xff]  ;;  %v1326_v13 = vld [vmem:[#allocation2 + $0x7a8] sm:$0xff]  ;;  %v1328_v7 = vld [vmem:[#allocation2 + $0x7b8] sm:$0xff] }
 0x458   :  { %6909 = vmatpush1.bf16.msra.mxu1 %v6908_v27  ;;  %v7112_v27 = vpack.c.bf16 %v1287_v58, %v1279_v49  ;;  %v7118_v49 = vpack.c.bf16 %v1320_v12, %v1312_v18  ;;  %v1319_v58 = vld [vmem:[#allocation2 + $0x770] sm:$0xff]  ;;  %v1352_v18 = vld [vmem:[#allocation2 + $0x878] sm:$0xff] }
 0x459   :  { %7105 = vmatpush1.bf16.msra.mxu0 %v7104_v9  ;;  %6911 = vmatprep.subr.bf16.mxu1 %v6910_v0  ;;  %v1293_v9 = vld [vmem:[#allocation2 + $0x6a0] sm:$0xff] }
 0x45a   :  { %7107 = vmatprep.subr.bf16.mxu0 %v7106_v17  ;;  %v1301_v0 = vld [vmem:[#allocation2 + $0x6e0] sm:$0xff]  ;;  %v1318_v17 = vld [vmem:[#allocation2 + $0x768] sm:$0xff] }
 0x45b   :  { %v6920_v32 = vpack.c.bf16 %v1301_v0, %v1293_v9  ;;  %v6922_v20 = vpack.c.bf16 %v1318_v17, %v1310_v6  ;;  %v1327_v0 = vld [vmem:[#allocation2 + $0x7b0] sm:$0xff]  ;;  %v1342_v6 = vld [vmem:[#allocation2 + $0x828] sm:$0xff]  ;;  %v1344_v17 = vld [vmem:[#allocation2 + $0x838] sm:$0xff] }
 0x45c   :  { %6913 = vmatpush1.bf16.msra.mxu1 %v6912_v11  ;;  %v7116_v11 = vpack.c.bf16 %v1303_v48, %v1295_v56  ;;  %v7122_v56 = vpack.c.bf16 %v1336_v29, %v1328_v7  ;;  %v1335_v48 = vld [vmem:[#allocation2 + $0x7f0] sm:$0xff]  ;;  %v1368_v7 = vld [vmem:[#allocation2 + $0x8f8] sm:$0xff] }
 0x45d   :  { %7109 = vmatpush1.bf16.msra.mxu0 %v7108_v2  ;;  %6915 = vmatprep.subr.bf16.mxu1 %v6914_v4  ;;  %v1309_v2 = vld [vmem:[#allocation2 + $0x720] sm:$0xff] }
 0x45e   :  { %7111 = vmatprep.subr.bf16.mxu0 %v7110_v10  ;;  %v1317_v4 = vld [vmem:[#allocation2 + $0x760] sm:$0xff]  ;;  %v1334_v10 = vld [vmem:[#allocation2 + $0x7e8] sm:$0xff] }
 0x45f   :  { %v6924_v33 = vpack.c.bf16 %v1317_v4, %v1309_v2  ;;  %v6926_v9 = vpack.c.bf16 %v1334_v10, %v1326_v13  ;;  %v1349_v4 = vld [vmem:[#allocation2 + $0x860] sm:$0xff]  ;;  %v1358_v13 = vld [vmem:[#allocation2 + $0x8a8] sm:$0xff]  ;;  %v1360_v10 = vld [vmem:[#allocation2 + $0x8b8] sm:$0xff] }
 0x460   :  { %6917 = vmatpush1.bf16.msra.mxu1 %v6916_v42  ;;  %v7120_v42 = vpack.c.bf16 %v1319_v58, %v1311_v44  ;;  %v1343_v44 = vld [vmem:[#allocation2 + $0x830] sm:$0xff] }
 0x461   :  { %7113 = vmatpush1.bf16.msra.mxu0 %v7112_v27  ;;  %6919 = vmatprep.subr.bf16.mxu1 %v6918_v5  ;;  %v1325_v27 = vld [vmem:[#allocation2 + $0x7a0] sm:$0xff]  ;;  %v1351_v58 = vld [vmem:[#allocation2 + $0x870] sm:$0xff] }
 0x462   :  { %7115 = vmatprep.subr.bf16.mxu0 %v7114_v40  ;;  %v1333_v5 = vld [vmem:[#allocation2 + $0x7e0] sm:$0xff]  ;;  %v1350_v40 = vld [vmem:[#allocation2 + $0x868] sm:$0xff] }
 0x463   :  { %v6928_v12 = vpack.c.bf16 %v1333_v5, %v1325_v27  ;;  %v6930_v2 = vpack.c.bf16 %v1350_v40, %v1342_v6  ;;  %v1365_v27 = vld [vmem:[#allocation2 + $0x8e0] sm:$0xff]  ;;  %v1359_v5 = vld [vmem:[#allocation2 + $0x8b0] sm:$0xff]  ;;  %v1374_v6 = vld [vmem:[#allocation2 + $0x928] sm:$0xff] }
 0x464   :  { %6921 = vmatpush1.bf16.msra.mxu1 %v6920_v32  ;;  %v7124_v32 = vpack.c.bf16 %v1335_v48, %v1327_v0  ;;  %v12989_v0 = vld [vmem:[#allocation21_spill] sm:$0xff]  ;;  %v1382_v40 = vld [vmem:[#allocation2 + $0x968] sm:$0xff] }
 0x465   :  { %7117 = vmatpush1.bf16.msra.mxu0 %v7116_v11  ;;  %6923 = vmatprep.subr.bf16.mxu1 %v6922_v20  ;;  %v7126_v11 = vpack.c.bf16 %v1352_v18, %v1344_v17  ;;  %v1341_v20 = vld [vmem:[#allocation2 + $0x820] sm:$0xff]  ;;  %v1367_v48 = vld [vmem:[#allocation2 + $0x8f0] sm:$0xff]  ;;  %v1376_v18 = vld [vmem:[#allocation2 + $0x938] sm:$0xff] }
 0x466   :  { %7119 = vmatprep.subr.bf16.mxu0 %v7118_v49  ;;  %v1366_v49 = vld [vmem:[#allocation2 + $0x8e8] sm:$0xff]  ;;  %v6932_v29 = vpack.c.bf16 %v1349_v4, %v1341_v20  ;;  %v1373_v20 = vld [vmem:[#allocation2 + $0x920] sm:$0xff] }
 0x467   :  { %v12990_v17 = vld [vmem:[#allocation23_spill] sm:$0xff] }
 0x468   :  { %6925 = vmatpush1.bf16.msra.mxu1 %v6924_v33  ;;  %v7128_v33 = vpack.c.bf16 %v1351_v58, %v1343_v44  ;;  %v1381_v4 = vld [vmem:[#allocation2 + $0x960] sm:$0xff]  ;;  %v1375_v44 = vld [vmem:[#allocation2 + $0x930] sm:$0xff] }
 0x469   :  { %7121 = vmatpush1.bf16.msra.mxu0 %v7120_v42  ;;  %6927 = vmatprep.subr.bf16.mxu1 %v6926_v9  ;;  %v6934_v42 = vpack.c.bf16 %v1366_v49, %v1358_v13  ;;  %v1357_v9 = vld [vmem:[#allocation2 + $0x8a0] sm:$0xff]  ;;  %v12991_v58 = vld [vmem:[#allocation25_spill] sm:$0xff] }
 0x46a   :  { %7123 = vmatprep.subr.bf16.mxu0 %v7122_v56  ;;  %v7130_v56 = vpack.c.bf16 %v1368_v7, %v1360_v10  ;;  %v1383_v49 = vld [vmem:[#allocation2 + $0x970] sm:$0xff]  ;;  %v1390_v10 = vld [vmem:[#allocation2 + $0x9a8] sm:$0xff] }
 0x46b   :  { %v1398_v7 = vld [vmem:[#allocation2 + $0x9e8] sm:$0xff] }
 0x46c   :  { %6929 = vmatpush1.bf16.msra.mxu1 %v6928_v12  ;;  %v1384_v12 = vld [vmem:[#allocation2 + $0x978] sm:$0xff] }
 0x46d   :  { %7125 = vmatpush1.bf16.msra.mxu0 %v7124_v32  ;;  %6931 = vmatprep.subr.bf16.mxu1 %v6930_v2  ;;  %v6936_v32 = vpack.c.bf16 %v1365_v27, %v1357_v9  ;;  %v7132_v2 = vpack.c.bf16 %v1367_v48, %v1359_v5  ;;  %v7134_v13 = vpack.c.bf16 %v1384_v12, %v1376_v18  ;;  %v1400_v9 = vld [vmem:[#allocation2 + $0x9f8] sm:$0xff]  ;;  %v1389_v5 = vld [vmem:[#allocation2 + $0x9a0] sm:$0xff] }
 0x46e   :  { %7127 = vmatprep.subr.bf16.mxu0 %v7126_v11  ;;  %v6938_v11 = vpack.c.bf16 %v1382_v40, %v1374_v6  ;;  %v6942_v27 = vpack.c.bf16 %v1398_v7, %v1390_v10  ;;  %v1399_v6 = vld [vmem:[#allocation2 + $0x9f0] sm:$0xff]  ;;  %v1406_v40 = vld [vmem:[#allocation2 + $0xa28] sm:$0xff]  ;;  %v1416_v18 = vld [vmem:[#allocation2 + $0xa78] sm:$0xff] }
 0x46f   :  { %2900 = vmatmul.mubr.f32.vlgmr.msra.gmra.mrb[16].mxu1 %v12989_v0 }
 0x470   :  { %3352 = vmatmul.mubr.f32.vlgmr.msra.gmra.mrb[80].mxu0 %v12989_v0  ;;  %2905 = vmatprep.mubr.f32.mxu1 %v12990_v17  ;;  %v1397_v0 = vld [vmem:[#allocation2 + $0x9e0] sm:$0xff] }
 0x471   :  { %6933 = vmatpush1.bf16.msra.mxu1 %v6932_v29  ;;  %3357 = vmatprep.mubr.f32.mxu0 %v12990_v17  ;;  %v1392_v29 = vld [vmem:[#allocation2 + $0x9b8] sm:$0xff]  ;;  %v1414_v17 = vld [vmem:[#allocation2 + $0xa68] sm:$0xff]  ;;  %v6944_v12 = vpack.c.bf16 %v1397_v0, %v1389_v5 }
 0x472   :  { %7129 = vmatpush1.bf16.msra.mxu0 %v7128_v33  ;;  %6935 = vmatprep.subr.bf16.mxu1 %v6934_v42  ;;  %v6940_v33 = vpack.c.bf16 %v1381_v4, %v1373_v20  ;;  %v7136_v42 = vpack.c.bf16 %v1383_v49, %v1375_v44  ;;  %v7138_v48 = vpack.c.bf16 %v1400_v9, %v1392_v29  ;;  %v1413_v20 = vld [vmem:[#allocation2 + $0xa60] sm:$0xff]  ;;  %v1407_v4 = vld [vmem:[#allocation2 + $0xa30] sm:$0xff]  ;;  %v1432_v49 = vld [vmem:[#allocation2 + $0xaf8] sm:$0xff] }
 0x473   :  { %2906 = vmatmul.mubr.f32.gmra.mrb[18].mxu1 %v12991_v58  ;;  %7131 = vmatprep.subr.bf16.mxu0 %v7130_v56  ;;  %v1391_v56 = vld [vmem:[#allocation2 + $0x9b0] sm:$0xff]  ;;  %v1421_v9 = vld [vmem:[#allocation2 + $0xaa0] sm:$0xff]  ;;  %v1438_v5 = vld [vmem:[#allocation2 + $0xb28] sm:$0xff] }
 0x474   :  { %3358 = vmatmul.mubr.f32.gmra.mrb[82].mxu0 %v12991_v58  ;;  %2911 = vmatprep.mubr.f32.mxu1 %v9793_v31  ;;  %v1422_v58 = vld [vmem:[#allocation2 + $0xaa8] sm:$0xff] }
 0x475   :  { %6937 = vmatpush1.bf16.msra.mxu1 %v6936_v32  ;;  %3363 = vmatprep.mubr.f32.mxu0 %v9793_v31  ;;  %v1408_v31 = vld [vmem:[#allocation2 + $0xa38] sm:$0xff]  ;;  %v7140_v32 = vpack.c.bf16 %v1399_v6, %v1391_v56  ;;  %v1446_v0 = vld [vmem:[#allocation2 + $0xb68] sm:$0xff] }
 0x476   :  { %7133 = vmatpush1.bf16.msra.mxu0 %v7132_v2  ;;  %6939 = vmatprep.subr.bf16.mxu1 %v6938_v11  ;;  %v6946_v2 = vpack.c.bf16 %v1414_v17, %v1406_v40  ;;  %v1405_v11 = vld [vmem:[#allocation2 + $0xa20] sm:$0xff]  ;;  %v7142_v44 = vpack.c.bf16 %v1416_v18, %v1408_v31  ;;  %v1448_v56 = vld [vmem:[#allocation2 + $0xb78] sm:$0xff]  ;;  %v6954_v40 = vpack.c.bf16 %v1446_v0, %v1438_v5  ;;  %v1439_v18 = vld [vmem:[#allocation2 + $0xb30] sm:$0xff] }
 0x477   :  { %2912 = vmatmul.mubr.f32.gmra.mrb[20].mxu1 %v9835_v47  ;;  %7135 = vmatprep.subr.bf16.mxu0 %v7134_v13  ;;  %v1430_v13 = vld [vmem:[#allocation2 + $0xae8] sm:$0xff]  ;;  %v6948_v10 = vpack.c.bf16 %v1413_v20, %v1405_v11  ;;  %v1437_v17 = vld [vmem:[#allocation2 + $0xb20] sm:$0xff] }
 0x478   :  { %3364 = vmatmul.mubr.f32.gmra.mrb[84].mxu0 %v9835_v47  ;;  %2917 = vmatprep.mubr.f32.mxu1 %v9842_v43  ;;  %v1415_v47 = vld [vmem:[#allocation2 + $0xa70] sm:$0xff]  ;;  %v6950_v29 = vpack.c.bf16 %v1430_v13, %v1422_v58  ;;  %v1445_v31 = vld [vmem:[#allocation2 + $0xb60] sm:$0xff]  ;;  %v1462_v11 = vld [vmem:[#allocation2 + $0xbe8] sm:$0xff] }
 0x479   :  { %6941 = vmatpush1.bf16.msra.mxu1 %v6940_v33  ;;  %3369 = vmatprep.mubr.f32.mxu0 %v9842_v43  ;;  %v1424_v43 = vld [vmem:[#allocation2 + $0xab8] sm:$0xff]  ;;  %v7144_v7 = vpack.c.bf16 %v1415_v47, %v1407_v4  ;;  %v1429_v33 = vld [vmem:[#allocation2 + $0xae0] sm:$0xff] }
 0x47a   :  { %7137 = vmatpush1.bf16.msra.mxu0 %v7136_v42  ;;  %6943 = vmatprep.subr.bf16.mxu1 %v6942_v27  ;;  %v1423_v42 = vld [vmem:[#allocation2 + $0xab0] sm:$0xff]  ;;  %v7146_v27 = vpack.c.bf16 %v1432_v49, %v1424_v43  ;;  %v12993_v20 = vld [vmem:[#allocation30_spill] sm:$0xff] }
 0x47b   :  { %2918 = vmatmul.mubr.f32.gmra.mrb[22].mxu1 %v9850_v57  ;;  %7139 = vmatprep.subr.bf16.mxu0 %v7138_v48  ;;  %v6952_v48 = vpack.c.bf16 %v1429_v33, %v1421_v9  ;;  %v1464_v4 = vld [vmem:[#allocation2 + $0xbf8] sm:$0xff]  ;;  %v1453_v13 = vld [vmem:[#allocation2 + $0xba0] sm:$0xff]  ;;  %v1455_v49 = vld [vmem:[#allocation2 + $0xbb0] sm:$0xff] }
 0x47c   :  { %3370 = vmatmul.mubr.f32.gmra.mrb[86].mxu0 %v9850_v57  ;;  %2923 = vmatprep.mubr.f32.mxu1 %v9858_v14  ;;  %v1431_v57 = vld [vmem:[#allocation2 + $0xaf0] sm:$0xff]  ;;  %v1461_v43 = vld [vmem:[#allocation2 + $0xbe0] sm:$0xff]  ;;  %v1470_v9 = vld [vmem:[#allocation2 + $0xc28] sm:$0xff] }
 0x47d   :  { %6945 = vmatpush1.bf16.msra.mxu1 %v6944_v12  ;;  %3375 = vmatprep.mubr.f32.mxu0 %v9858_v14  ;;  %v1440_v14 = vld [vmem:[#allocation2 + $0xb38] sm:$0xff]  ;;  %v7148_v6 = vpack.c.bf16 %v1431_v57, %v1423_v42  ;;  %v1478_v33 = vld [vmem:[#allocation2 + $0xc68] sm:$0xff]  ;;  %v6960_v5 = vpack.c.bf16 %v1461_v43, %v1453_v13  ;;  %v1495_v13 = vld [vmem:[#allocation2 + $0xcf0] sm:$0xff] }
 0x47e   :  { %7141 = vmatpush1.bf16.msra.mxu0 %v7140_v32  ;;  %6947 = vmatprep.subr.bf16.mxu1 %v6946_v2  ;;  %v12992_v12 = vld [vmem:[#allocation29_spill] sm:$0xff]  ;;  %v7150_v32 = vpack.c.bf16 %v1448_v56, %v1440_v14  ;;  %v1454_v2 = vld [vmem:[#allocation2 + $0xba8] sm:$0xff]  ;;  %v6962_v14 = vpack.c.bf16 %v1478_v33, %v1470_v9  ;;  %v1469_v56 = vld [vmem:[#allocation2 + $0xc20] sm:$0xff] }
 0x47f   :  { %2924 = vmatmul.mubr.f32.gmra.mrb[24].mxu1 %v9866_v26  ;;  %7143 = vmatprep.subr.bf16.mxu0 %v7142_v44  ;;  %v6956_v44 = vpack.c.bf16 %v1445_v31, %v1437_v17  ;;  %v6958_v58 = vpack.c.bf16 %v1462_v11, %v1454_v2  ;;  %v12995_v42 = vld [vmem:[#allocation32_spill] sm:$0xff]  ;;  %v1480_v57 = vld [vmem:[#allocation2 + $0xc78] sm:$0xff] }
 0x480   :  { %3376 = vmatmul.mubr.f32.gmra.mrb[88].mxu0 %v9866_v26  ;;  %2929 = vmatprep.mubr.f32.mxu1 %v9874_v22  ;;  %v1447_v26 = vld [vmem:[#allocation2 + $0xb70] sm:$0xff]  ;;  %v1496_v2 = vld [vmem:[#allocation2 + $0xcf8] sm:$0xff]  ;;  %v1502_v43 = vld [vmem:[#allocation2 + $0xd28] sm:$0xff] }
 0x481   :  { %6949 = vmatpush1.bf16.msra.mxu1 %v6948_v10  ;;  %3381 = vmatprep.mubr.f32.mxu0 %v9874_v22  ;;  %v1456_v22 = vld [vmem:[#allocation2 + $0xbb8] sm:$0xff]  ;;  %v7152_v47 = vpack.c.bf16 %v1447_v26, %v1439_v18  ;;  %v12994_v10 = vld [vmem:[#allocation31_spill] sm:$0xff]  ;;  %v1479_v31 = vld [vmem:[#allocation2 + $0xc70] sm:$0xff] }
 0x482   :  { %7145 = vmatpush1.bf16.msra.mxu0 %v7144_v7  ;;  %6951 = vmatprep.subr.bf16.mxu1 %v6950_v29  ;;  %v7154_v7 = vpack.c.bf16 %v1464_v4, %v1456_v22  ;;  %v1463_v29 = vld [vmem:[#allocation2 + $0xbf0] sm:$0xff]  ;;  %v1486_v18 = vld [vmem:[#allocation2 + $0xca8] sm:$0xff]  ;;  %v1488_v26 = vld [vmem:[#allocation2 + $0xcb8] sm:$0xff] }
 0x483   :  { %2930 = vmatmul.mubr.f32.gmra.mrb[26].mxu1 %v12992_v12  ;;  %7147 = vmatprep.subr.bf16.mxu0 %v7146_v27  ;;  %v1472_v27 = vld [vmem:[#allocation2 + $0xc38] sm:$0xff]  ;;  %v7156_v0 = vpack.c.bf16 %v1463_v29, %v1455_v49  ;;  %v1485_v4 = vld [vmem:[#allocation2 + $0xca0] sm:$0xff]  ;;  %v1510_v49 = vld [vmem:[#allocation2 + $0xd68] sm:$0xff] }
 0x484   :  { %3382 = vmatmul.mubr.f32.gmra.mrb[90].mxu0 %v12992_v12  ;;  %2935 = vmatprep.mubr.f32.mxu1 %v12993_v20  ;;  %v7158_v17 = vpack.c.bf16 %v1480_v57, %v1472_v27  ;;  %v1494_v12 = vld [vmem:[#allocation2 + $0xce8] sm:$0xff]  ;;  %v6970_v33 = vpack.c.bf16 %v1510_v49, %v1502_v43  ;;  %v1509_v27 = vld [vmem:[#allocation2 + $0xd60] sm:$0xff]  ;;  %v1503_v57 = vld [vmem:[#allocation2 + $0xd30] sm:$0xff] }
 0x485   :  { %6953 = vmatpush1.bf16.msra.mxu1 %v6952_v48  ;;  %3387 = vmatprep.mubr.f32.mxu0 %v12993_v20  ;;  %v1477_v48 = vld [vmem:[#allocation2 + $0xc60] sm:$0xff]  ;;  %v6966_v22 = vpack.c.bf16 %v1494_v12, %v1486_v18  ;;  %v1535_v49 = vld [vmem:[#allocation2 + $0xe30] sm:$0xff] }
 0x486   :  { %7149 = vmatpush1.bf16.msra.mxu0 %v7148_v6  ;;  %6955 = vmatprep.subr.bf16.mxu1 %v6954_v40  ;;  %v1471_v6 = vld [vmem:[#allocation2 + $0xc30] sm:$0xff]  ;;  %v6964_v11 = vpack.c.bf16 %v1477_v48, %v1469_v56  ;;  %v1526_v56 = vld [vmem:[#allocation2 + $0xde8] sm:$0xff]  ;;  %v1520_v48 = vld [vmem:[#allocation2 + $0xdb8] sm:$0xff] }
 0x487   :  { %2936 = vmatmul.mubr.f32.gmra.mrb[28].mxu1 %v12994_v10  ;;  %7151 = vmatprep.subr.bf16.mxu0 %v7150_v32  ;;  %v12996_v40 = vld [vmem:[#allocation33_spill] sm:$0xff]  ;;  %v12997_v32 = vld [vmem:[#allocation34_spill] sm:$0xff]  ;;  %v7160_v20 = vpack.c.bf16 %v1479_v31, %v1471_v6 }
 0x488   :  { %3388 = vmatmul.mubr.f32.gmra.mrb[92].mxu0 %v12994_v10  ;;  %2941 = vmatprep.mubr.f32.mxu1 %v12995_v42  ;;  %v1504_v10 = vld [vmem:[#allocation2 + $0xd38] sm:$0xff]  ;;  %v1517_v18 = vld [vmem:[#allocation2 + $0xda0] sm:$0xff] }
 0x489   :  { %6957 = vmatpush1.bf16.msra.mxu1 %v6956_v44  ;;  %3393 = vmatprep.mubr.f32.mxu0 %v12995_v42  ;;  %v1493_v44 = vld [vmem:[#allocation2 + $0xce0] sm:$0xff]  ;;  %v1528_v6 = vld [vmem:[#allocation2 + $0xdf8] sm:$0xff] }
 0x48a   :  { %7153 = vmatpush1.bf16.msra.mxu0 %v7152_v47  ;;  %6959 = vmatprep.subr.bf16.mxu1 %v6958_v58  ;;  %v1487_v47 = vld [vmem:[#allocation2 + $0xcb0] sm:$0xff]  ;;  %v7162_v58 = vpack.c.bf16 %v1496_v2, %v1488_v26  ;;  %v6968_v29 = vpack.c.bf16 %v1493_v44, %v1485_v4  ;;  %v1501_v42 = vld [vmem:[#allocation2 + $0xd20] sm:$0xff]  ;;  %v7170_v26 = vpack.c.bf16 %v1528_v6, %v1520_v48  ;;  %v1544_v4 = vld [vmem:[#allocation2 + $0xe78] sm:$0xff] }
 0x48b   :  { %2942 = vmatmul.mubr.f32.gmra.mrb[30].mxu1 %v12996_v40  ;;  %7155 = vmatprep.subr.bf16.mxu0 %v7154_v7  ;;  %v1512_v7 = vld [vmem:[#allocation2 + $0xd78] sm:$0xff]  ;;  %v7164_v9 = vpack.c.bf16 %v1495_v13, %v1487_v47  ;;  %v1525_v12 = vld [vmem:[#allocation2 + $0xde0] sm:$0xff]  ;;  %v1527_v2 = vld [vmem:[#allocation2 + $0xdf0] sm:$0xff] }
 0x48c   :  { %3394 = vmatmul.mubr.f32.gmra.mrb[94].mxu0 %v12996_v40  ;;  %3012 = vmatprep.mubr.f32.mxu1 %v12997_v32  ;;  %v6972_v40 = vpack.c.bf16 %v1509_v27, %v1501_v42  ;;  %v6976_v44 = vpack.c.bf16 %v1525_v12, %v1517_v18  ;;  %v1533_v13 = vld [vmem:[#allocation2 + $0xe20] sm:$0xff]  ;;  %v1560_v42 = vld [vmem:[#allocation2 + $0xef8] sm:$0xff]  ;;  %v1559_v6 = vld [vmem:[#allocation2 + $0xef0] sm:$0xff] }
 0x48d   :  { %6961 = vmatpush1.bf16.msra.mxu1 %v6960_v5  ;;  %3464 = vmatprep.mubr.f32.mxu0 %v12997_v32  ;;  %v7166_v5 = vpack.c.bf16 %v1512_v7, %v1504_v10  ;;  %v1519_v32 = vld [vmem:[#allocation2 + $0xdb0] sm:$0xff]  ;;  %v1541_v43 = vld [vmem:[#allocation2 + $0xe60] sm:$0xff]  ;;  %v1576_v18 = vld [vmem:[#allocation2 + $0xf78] sm:$0xff] }
 0x48e   :  { %7157 = vmatpush1.bf16.msra.mxu0 %v7156_v0  ;;  %6963 = vmatprep.subr.bf16.mxu1 %v6962_v14  ;;  %v1511_v0 = vld [vmem:[#allocation2 + $0xd70] sm:$0xff]  ;;  %v1518_v14 = vld [vmem:[#allocation2 + $0xda8] sm:$0xff]  ;;  %v7172_v47 = vpack.c.bf16 %v1527_v2, %v1519_v32  ;;  %v6980_v27 = vpack.c.bf16 %v1541_v43, %v1533_v13  ;;  %v1565_v2 = vld [vmem:[#allocation2 + $0xf20] sm:$0xff] }
 0x48f   :  { %7159 = vmatprep.subr.bf16.mxu0 %v7158_v17  ;;  %v7168_v17 = vpack.c.bf16 %v1511_v0, %v1503_v57  ;;  %v6974_v31 = vpack.c.bf16 %v1526_v56, %v1518_v14  ;;  %v1543_v7 = vld [vmem:[#allocation2 + $0xe70] sm:$0xff]  ;;  %v1549_v0 = vld [vmem:[#allocation2 + $0xea0] sm:$0xff]  ;;  %v1592_v13 = vld [vmem:[#allocation2 + $0xff8] sm:$0xff] }
 0x490   :  { %v7176_v57 = vpack.c.bf16 %v1543_v7, %v1535_v49  ;;  %v1557_v14 = vld [vmem:[#allocation2 + $0xee0] sm:$0xff]  ;;  %v1551_v56 = vld [vmem:[#allocation2 + $0xeb0] sm:$0xff] }
 0x491   :  { %6965 = vmatpush1.bf16.msra.mxu1 %v6964_v11  ;;  %v1534_v11 = vld [vmem:[#allocation2 + $0xe28] sm:$0xff]  ;;  %v6984_v12 = vpack.c.bf16 %v1557_v14, %v1549_v0  ;;  %v7180_v32 = vpack.c.bf16 %v1559_v6, %v1551_v56  ;;  %v1581_v7 = vld [vmem:[#allocation2 + $0xfa0] sm:$0xff]  ;;  %v1608_v0 = vld [vmem:[#allocation2 + $0x1078] sm:$0xff] }
 0x492   :  { %7161 = vmatpush1.bf16.msra.mxu0 %v7160_v20  ;;  %6967 = vmatprep.subr.bf16.mxu1 %v6966_v22  ;;  %v1542_v20 = vld [vmem:[#allocation2 + $0xe68] sm:$0xff]  ;;  %v1536_v22 = vld [vmem:[#allocation2 + $0xe38] sm:$0xff] }
 0x493   :  { %7163 = vmatprep.subr.bf16.mxu0 %v7162_v58  ;;  %v6978_v58 = vpack.c.bf16 %v1542_v20, %v1534_v11  ;;  %v7174_v10 = vpack.c.bf16 %v1544_v4, %v1536_v22  ;;  %v1573_v11 = vld [vmem:[#allocation2 + $0xf60] sm:$0xff]  ;;  %v1567_v20 = vld [vmem:[#allocation2 + $0xf30] sm:$0xff] }
 0x494   :  { %v1575_v4 = vld [vmem:[#allocation2 + $0xf70] sm:$0xff]  ;;  %v6988_v43 = vpack.c.bf16 %v1573_v11, %v1565_v2  ;;  %v1624_v2 = vld [vmem:[#allocation2 + $0x10f8] sm:$0xff] }
 0x495   :  { %6969 = vmatpush1.bf16.msra.mxu1 %v6968_v29  ;;  %v1550_v29 = vld [vmem:[#allocation2 + $0xea8] sm:$0xff]  ;;  %v7184_v49 = vpack.c.bf16 %v1575_v4, %v1567_v20  ;;  %v1613_v4 = vld [vmem:[#allocation2 + $0x10a0] sm:$0xff] }
 0x496   :  { %7165 = vmatpush1.bf16.msra.mxu0 %v7164_v9  ;;  %6971 = vmatprep.subr.bf16.mxu1 %v6970_v33  ;;  %v1558_v9 = vld [vmem:[#allocation2 + $0xee8] sm:$0xff]  ;;  %v1552_v33 = vld [vmem:[#allocation2 + $0xeb8] sm:$0xff] }
 0x497   :  { %7167 = vmatprep.subr.bf16.mxu0 %v7166_v5  ;;  %v6982_v5 = vpack.c.bf16 %v1558_v9, %v1550_v29  ;;  %v7178_v48 = vpack.c.bf16 %v1560_v42, %v1552_v33  ;;  %v1589_v29 = vld [vmem:[#allocation2 + $0xfe0] sm:$0xff]  ;;  %v1583_v9 = vld [vmem:[#allocation2 + $0xfb0] sm:$0xff] }
 0x498   :  { %v1591_v42 = vld [vmem:[#allocation2 + $0xff0] sm:$0xff]  ;;  %v6992_v14 = vpack.c.bf16 %v1589_v29, %v1581_v7  ;;  %v1640_v7 = vld [vmem:[#allocation2 + $0x1178] sm:$0xff] }
 0x499   :  { %6973 = vmatpush1.bf16.msra.mxu1 %v6972_v40  ;;  %v1566_v40 = vld [vmem:[#allocation2 + $0xf28] sm:$0xff]  ;;  %v7188_v56 = vpack.c.bf16 %v1591_v42, %v1583_v9  ;;  %v1629_v42 = vld [vmem:[#allocation2 + $0x1120] sm:$0xff] }
 0x49a   :  { %7169 = vmatpush1.bf16.msra.mxu0 %v7168_v17  ;;  %6975 = vmatprep.subr.bf16.mxu1 %v6974_v31  ;;  %v1574_v17 = vld [vmem:[#allocation2 + $0xf68] sm:$0xff]  ;;  %v1568_v31 = vld [vmem:[#allocation2 + $0xf38] sm:$0xff] }
 0x49b   :  { %7171 = vmatprep.subr.bf16.mxu0 %v7170_v26  ;;  %v6986_v26 = vpack.c.bf16 %v1574_v17, %v1566_v40  ;;  %v7182_v22 = vpack.c.bf16 %v1576_v18, %v1568_v31  ;;  %v1597_v40 = vld [vmem:[#allocation2 + $0x1020] sm:$0xff]  ;;  %v1599_v31 = vld [vmem:[#allocation2 + $0x1030] sm:$0xff] }
 0x49c   :  { %v1605_v17 = vld [vmem:[#allocation2 + $0x1060] sm:$0xff]  ;;  %v1607_v18 = vld [vmem:[#allocation2 + $0x1070] sm:$0xff] }
 0x49d   :  { %6977 = vmatpush1.bf16.msra.mxu1 %v6976_v44  ;;  %v1582_v44 = vld [vmem:[#allocation2 + $0xfa8] sm:$0xff]  ;;  %v6996_v11 = vpack.c.bf16 %v1605_v17, %v1597_v40  ;;  %v7192_v20 = vpack.c.bf16 %v1607_v18, %v1599_v31  ;;  %v1645_v17 = vld [vmem:[#allocation2 + $0x11a0] sm:$0xff]  ;;  %v1647_v18 = vld [vmem:[#allocation2 + $0x11b0] sm:$0xff] }
 0x49e   :  { %7173 = vmatpush1.bf16.msra.mxu0 %v7172_v47  ;;  %6979 = vmatprep.subr.bf16.mxu1 %v6978_v58  ;;  %v1590_v47 = vld [vmem:[#allocation2 + $0xfe8] sm:$0xff]  ;;  %v1584_v58 = vld [vmem:[#allocation2 + $0xfb8] sm:$0xff]  ;;  %v1653_v31 = vld [vmem:[#allocation2 + $0x11e0] sm:$0xff] }
 0x49f   :  { %7175 = vmatprep.subr.bf16.mxu0 %v7174_v10  ;;  %v6990_v10 = vpack.c.bf16 %v1590_v47, %v1582_v44  ;;  %v7186_v33 = vpack.c.bf16 %v1592_v13, %v1584_v58  ;;  %v1621_v44 = vld [vmem:[#allocation2 + $0x10e0] sm:$0xff]  ;;  %v1615_v47 = vld [vmem:[#allocation2 + $0x10b0] sm:$0xff] }
 0x4a0   :  { %v1623_v13 = vld [vmem:[#allocation2 + $0x10f0] sm:$0xff]  ;;  %v7000_v29 = vpack.c.bf16 %v1621_v44, %v1613_v4  ;;  %v1661_v4 = vld [vmem:[#allocation2 + $0x1220] sm:$0xff] }
 0x4a1   :  { %6981 = vmatpush1.bf16.msra.mxu1 %v6980_v27  ;;  %v1598_v27 = vld [vmem:[#allocation2 + $0x1028] sm:$0xff]  ;;  %v7196_v9 = vpack.c.bf16 %v1623_v13, %v1615_v47  ;;  %v1669_v44 = vld [vmem:[#allocation2 + $0x1260] sm:$0xff]  ;;  %v1663_v47 = vld [vmem:[#allocation2 + $0x1230] sm:$0xff] }
 0x4a2   :  { %7177 = vmatpush1.bf16.msra.mxu0 %v7176_v57  ;;  %6983 = vmatprep.subr.bf16.mxu1 %v6982_v5  ;;  %v1606_v57 = vld [vmem:[#allocation2 + $0x1068] sm:$0xff]  ;;  %v1600_v5 = vld [vmem:[#allocation2 + $0x1038] sm:$0xff] }
 0x4a3   :  { %7179 = vmatprep.subr.bf16.mxu0 %v7178_v48  ;;  %v6994_v48 = vpack.c.bf16 %v1606_v57, %v1598_v27  ;;  %v7190_v6 = vpack.c.bf16 %v1608_v0, %v1600_v5  ;;  %v1637_v27 = vld [vmem:[#allocation2 + $0x1160] sm:$0xff]  ;;  %v1631_v57 = vld [vmem:[#allocation2 + $0x1130] sm:$0xff]  ;;  %v1646_v0 = vld [vmem:[#allocation2 + $0x11a8] sm:$0xff] }
 0x4a4   :  { %v1678_v13 = vld [vmem:[#allocation2 + $0x12a8] sm:$0xff] }
 0x4a5   :  { %6985 = vmatpush1.bf16.msra.mxu1 %v6984_v12  ;;  %v1614_v12 = vld [vmem:[#allocation2 + $0x10a8] sm:$0xff] }
 0x4a6   :  { %7181 = vmatpush1.bf16.msra.mxu0 %v7180_v32  ;;  %6987 = vmatprep.subr.bf16.mxu1 %v6986_v26  ;;  %v1622_v32 = vld [vmem:[#allocation2 + $0x10e8] sm:$0xff]  ;;  %v1616_v26 = vld [vmem:[#allocation2 + $0x10b8] sm:$0xff] }
 0x4a7   :  { %7183 = vmatprep.subr.bf16.mxu0 %v7182_v22  ;;  %v6998_v22 = vpack.c.bf16 %v1622_v32, %v1614_v12  ;;  %v7194_v58 = vpack.c.bf16 %v1624_v2, %v1616_v26  ;;  %v1662_v32 = vld [vmem:[#allocation2 + $0x1228] sm:$0xff]  ;;  %v1672_v2 = vld [vmem:[#allocation2 + $0x1278] sm:$0xff] }
 0x4a8   :  { %v1670_v26 = vld [vmem:[#allocation2 + $0x1268] sm:$0xff] }
 0x4a9   :  { %6989 = vmatpush1.bf16.msra.mxu1 %v6988_v43  ;;  %v1630_v43 = vld [vmem:[#allocation2 + $0x1128] sm:$0xff] }
 0x4aa   :  { %7185 = vmatpush1.bf16.msra.mxu0 %v7184_v49  ;;  %6991 = vmatprep.subr.bf16.mxu1 %v6990_v10  ;;  %v1638_v49 = vld [vmem:[#allocation2 + $0x1168] sm:$0xff]  ;;  %v1632_v10 = vld [vmem:[#allocation2 + $0x1138] sm:$0xff] }
 0x4ab   :  { %7187 = vmatprep.subr.bf16.mxu0 %v7186_v33  ;;  %v7002_v33 = vpack.c.bf16 %v1638_v49, %v1630_v43  ;;  %v7198_v5 = vpack.c.bf16 %v1640_v7, %v1632_v10  ;;  %v1686_v43 = vld [vmem:[#allocation2 + $0x12e8] sm:$0xff]  ;;  %v1688_v49 = vld [vmem:[#allocation2 + $0x12f8] sm:$0xff]  ;;  %v7012_v10 = vpack.c.bf16 %v1669_v44, %v1661_v4 }
 0x4ac   :  { %v1736_v4 = vld [vmem:[#allocation2 + $0x1478] sm:$0xff] }
 0x4ad   :  { %6993 = vmatpush1.bf16.msra.mxu1 %v6992_v14  ;;  %v1654_v14 = vld [vmem:[#allocation2 + $0x11e8] sm:$0xff] }
 0x4ae   :  { %7189 = vmatpush1.bf16.msra.mxu0 %v7188_v56  ;;  %6995 = vmatprep.subr.bf16.mxu1 %v6994_v48  ;;  %v1656_v56 = vld [vmem:[#allocation2 + $0x11f8] sm:$0xff]  ;;  %v7004_v48 = vpack.c.bf16 %v1637_v27, %v1629_v42  ;;  %v7006_v40 = vpack.c.bf16 %v1654_v14, %v1646_v0  ;;  %v1679_v42 = vld [vmem:[#allocation2 + $0x12b0] sm:$0xff] }
 0x4af   :  { %7191 = vmatprep.subr.bf16.mxu0 %v7190_v6 }
 0x4b0   :  { %3013 = vmatmul.mubr.f32.vlgmr.msra.gmra.mrb[16].mxu1 %v9568_v36 }
 0x4b1   :  { %3465 = vmatmul.mubr.f32.vlgmr.msra.gmra.mrb[80].mxu0 %v9568_v36  ;;  %3018 = vmatprep.mubr.f32.mxu1 %v9599_v35  ;;  %v1639_v36 = vld [vmem:[#allocation2 + $0x1170] sm:$0xff] }
 0x4b2   :  { %6997 = vmatpush1.bf16.msra.mxu1 %v6996_v11  ;;  %3470 = vmatprep.mubr.f32.mxu0 %v9599_v35  ;;  %v1648_v35 = vld [vmem:[#allocation2 + $0x11b8] sm:$0xff]  ;;  %v7200_v6 = vpack.c.bf16 %v1639_v36, %v1631_v57  ;;  %v7008_v11 = vpack.c.bf16 %v1653_v31, %v1645_v17  ;;  %v1694_v57 = vld [vmem:[#allocation2 + $0x1328] sm:$0xff] }
 0x4b3   :  { %7193 = vmatpush1.bf16.msra.mxu0 %v7192_v20  ;;  %6999 = vmatprep.subr.bf16.mxu1 %v6998_v22  ;;  %v7202_v12 = vpack.c.bf16 %v1656_v56, %v1648_v35  ;;  %v7010_v22 = vpack.c.bf16 %v1670_v26, %v1662_v32  ;;  %v1704_v36 = vld [vmem:[#allocation2 + $0x1378] sm:$0xff]  ;;  %v1693_v56 = vld [vmem:[#allocation2 + $0x1320] sm:$0xff]  ;;  %v1710_v17 = vld [vmem:[#allocation2 + $0x13a8] sm:$0xff] }
 0x4b4   :  { %3019 = vmatmul.mubr.f32.gmra.mrb[18].mxu1 %v9593_v38  ;;  %7195 = vmatprep.subr.bf16.mxu0 %v7194_v58  ;;  %v1718_v31 = vld [vmem:[#allocation2 + $0x13e8] sm:$0xff]  ;;  %v1709_v26 = vld [vmem:[#allocation2 + $0x13a0] sm:$0xff] }
 0x4b5   :  { %3471 = vmatmul.mubr.f32.gmra.mrb[82].mxu0 %v9593_v38  ;;  %3024 = vmatprep.mubr.f32.mxu1 %v9636_v15  ;;  %v1655_v38 = vld [vmem:[#allocation2 + $0x11f0] sm:$0xff]  ;;  %v7022_v32 = vpack.c.bf16 %v1718_v31, %v1710_v17  ;;  %v1774_v17 = vld [vmem:[#allocation2 + $0x15a8] sm:$0xff] }
 0x4b6   :  { %7001 = vmatpush1.bf16.msra.mxu1 %v7000_v29  ;;  %3476 = vmatprep.mubr.f32.mxu0 %v9636_v15  ;;  %v1664_v15 = vld [vmem:[#allocation2 + $0x1238] sm:$0xff]  ;;  %v7204_v20 = vpack.c.bf16 %v1655_v38, %v1647_v18  ;;  %v7014_v29 = vpack.c.bf16 %v1686_v43, %v1678_v13  ;;  %v1733_v13 = vld [vmem:[#allocation2 + $0x1460] sm:$0xff]  ;;  %v1727_v43 = vld [vmem:[#allocation2 + $0x1430] sm:$0xff] }
 0x4b7   :  { %7197 = vmatpush1.bf16.msra.mxu0 %v7196_v9  ;;  %7003 = vmatprep.subr.bf16.mxu1 %v7002_v33  ;;  %v7206_v58 = vpack.c.bf16 %v1672_v2, %v1664_v15  ;;  %v1677_v9 = vld [vmem:[#allocation2 + $0x12a0] sm:$0xff]  ;;  %v1720_v18 = vld [vmem:[#allocation2 + $0x13f8] sm:$0xff]  ;;  %v1711_v2 = vld [vmem:[#allocation2 + $0x13b0] sm:$0xff] }
 0x4b8   :  { %3025 = vmatmul.mubr.f32.gmra.mrb[20].mxu1 %v9630_v28  ;;  %7199 = vmatprep.subr.bf16.mxu0 %v7198_v5  ;;  %v1685_v33 = vld [vmem:[#allocation2 + $0x12e0] sm:$0xff]  ;;  %v1702_v5 = vld [vmem:[#allocation2 + $0x1368] sm:$0xff] }
 0x4b9   :  { %3477 = vmatmul.mubr.f32.gmra.mrb[84].mxu0 %v9630_v28  ;;  %3030 = vmatprep.mubr.f32.mxu1 %v9676_v54  ;;  %v1671_v28 = vld [vmem:[#allocation2 + $0x1270] sm:$0xff]  ;;  %v7016_v0 = vpack.c.bf16 %v1685_v33, %v1677_v9  ;;  %v7018_v35 = vpack.c.bf16 %v1702_v5, %v1694_v57  ;;  %v1717_v15 = vld [vmem:[#allocation2 + $0x13e0] sm:$0xff]  ;;  %v1782_v31 = vld [vmem:[#allocation2 + $0x15e8] sm:$0xff] }
 0x4ba   :  { %7005 = vmatpush1.bf16.msra.mxu1 %v7004_v48  ;;  %3482 = vmatprep.mubr.f32.mxu0 %v9676_v54  ;;  %v1680_v54 = vld [vmem:[#allocation2 + $0x12b8] sm:$0xff]  ;;  %v7208_v7 = vpack.c.bf16 %v1671_v28, %v1663_v47  ;;  %v1701_v48 = vld [vmem:[#allocation2 + $0x1360] sm:$0xff]  ;;  %v7024_v44 = vpack.c.bf16 %v1717_v15, %v1709_v26  ;;  %v1751_v5 = vld [vmem:[#allocation2 + $0x14f0] sm:$0xff] }
 0x4bb   :  { %7201 = vmatpush1.bf16.msra.mxu0 %v7200_v6  ;;  %7007 = vmatprep.subr.bf16.mxu1 %v7006_v40  ;;  %v7210_v27 = vpack.c.bf16 %v1688_v49, %v1680_v54  ;;  %v1695_v6 = vld [vmem:[#allocation2 + $0x1330] sm:$0xff]  ;;  %v1725_v28 = vld [vmem:[#allocation2 + $0x1420] sm:$0xff]  ;;  %v1742_v49 = vld [vmem:[#allocation2 + $0x14a8] sm:$0xff] }
 0x4bc   :  { %3031 = vmatmul.mubr.f32.gmra.mrb[22].mxu1 %v9670_v39  ;;  %7203 = vmatprep.subr.bf16.mxu0 %v7202_v12  ;;  %v7020_v12 = vpack.c.bf16 %v1701_v48, %v1693_v56  ;;  %v1757_v56 = vld [vmem:[#allocation2 + $0x1520] sm:$0xff] }
 0x4bd   :  { %3483 = vmatmul.mubr.f32.gmra.mrb[86].mxu0 %v9670_v39  ;;  %3036 = vmatprep.mubr.f32.mxu1 %v9704_v1  ;;  %v1687_v39 = vld [vmem:[#allocation2 + $0x12f0] sm:$0xff]  ;;  %v1765_v48 = vld [vmem:[#allocation2 + $0x1560] sm:$0xff] }
 0x4be   :  { %7009 = vmatpush1.bf16.msra.mxu1 %v7008_v11  ;;  %3488 = vmatprep.mubr.f32.mxu0 %v9704_v1  ;;  %v1696_v1 = vld [vmem:[#allocation2 + $0x1338] sm:$0xff]  ;;  %v7212_v14 = vpack.c.bf16 %v1687_v39, %v1679_v42  ;;  %v1741_v42 = vld [vmem:[#allocation2 + $0x14a0] sm:$0xff]  ;;  %v1743_v39 = vld [vmem:[#allocation2 + $0x14b0] sm:$0xff] }
 0x4bf   :  { %7205 = vmatpush1.bf16.msra.mxu0 %v7204_v20  ;;  %7011 = vmatprep.subr.bf16.mxu1 %v7010_v22  ;;  %v7214_v40 = vpack.c.bf16 %v1704_v36, %v1696_v1  ;;  %v1726_v20 = vld [vmem:[#allocation2 + $0x1428] sm:$0xff]  ;;  %v1760_v36 = vld [vmem:[#allocation2 + $0x1538] sm:$0xff]  ;;  %v1773_v26 = vld [vmem:[#allocation2 + $0x15a0] sm:$0xff] }
 0x4c0   :  { %3037 = vmatmul.mubr.f32.gmra.mrb[24].mxu1 %v9698_v51  ;;  %7207 = vmatprep.subr.bf16.mxu0 %v7206_v58  ;;  %v1734_v22 = vld [vmem:[#allocation2 + $0x1468] sm:$0xff]  ;;  %v1781_v15 = vld [vmem:[#allocation2 + $0x15e0] sm:$0xff] }
 0x4c1   :  { %3489 = vmatmul.mubr.f32.gmra.mrb[88].mxu0 %v9698_v51  ;;  %3042 = vmatprep.mubr.f32.mxu1 %v9739_v52  ;;  %v1703_v51 = vld [vmem:[#allocation2 + $0x1370] sm:$0xff]  ;;  %v7026_v58 = vpack.c.bf16 %v1734_v22, %v1726_v20  ;;  %v1758_v1 = vld [vmem:[#allocation2 + $0x1528] sm:$0xff] }
 0x4c2   :  { %7013 = vmatpush1.bf16.msra.mxu1 %v7012_v10  ;;  %3494 = vmatprep.mubr.f32.mxu0 %v9739_v52  ;;  %v1712_v52 = vld [vmem:[#allocation2 + $0x13b8] sm:$0xff]  ;;  %v7216_v38 = vpack.c.bf16 %v1703_v51, %v1695_v6  ;;  %v1750_v10 = vld [vmem:[#allocation2 + $0x14e8] sm:$0xff]  ;;  %v1759_v6 = vld [vmem:[#allocation2 + $0x1530] sm:$0xff] }
 0x4c3   :  { %7209 = vmatpush1.bf16.msra.mxu0 %v7208_v7  ;;  %7015 = vmatprep.subr.bf16.mxu1 %v7014_v29  ;;  %v7218_v11 = vpack.c.bf16 %v1720_v18, %v1712_v52  ;;  %v1752_v7 = vld [vmem:[#allocation2 + $0x14f8] sm:$0xff]  ;;  %v7028_v29 = vpack.c.bf16 %v1733_v13, %v1725_v28  ;;  %v7030_v33 = vpack.c.bf16 %v1750_v10, %v1742_v49  ;;  %v1767_v51 = vld [vmem:[#allocation2 + $0x1570] sm:$0xff]  ;;  %v1790_v20 = vld [vmem:[#allocation2 + $0x1628] sm:$0xff] }
 0x4c4   :  { %3043 = vmatmul.mubr.f32.gmra.mrb[26].mxu1 %v9733_v45  ;;  %7211 = vmatprep.subr.bf16.mxu0 %v7210_v27  ;;  %v1749_v27 = vld [vmem:[#allocation2 + $0x14e0] sm:$0xff]  ;;  %v1776_v52 = vld [vmem:[#allocation2 + $0x15b8] sm:$0xff]  ;;  %v1798_v22 = vld [vmem:[#allocation2 + $0x1668] sm:$0xff] }
 0x4c5   :  { %3495 = vmatmul.mubr.f32.gmra.mrb[90].mxu0 %v9733_v45  ;;  %3048 = vmatprep.mubr.f32.mxu1 %v9775_v21  ;;  %v1719_v45 = vld [vmem:[#allocation2 + $0x13f0] sm:$0xff]  ;;  %v1784_v18 = vld [vmem:[#allocation2 + $0x15f8] sm:$0xff]  ;;  %v1789_v28 = vld [vmem:[#allocation2 + $0x1620] sm:$0xff] }
 0x4c6   :  { %7017 = vmatpush1.bf16.msra.mxu1 %v7016_v0  ;;  %3500 = vmatprep.mubr.f32.mxu0 %v9775_v21  ;;  %v1728_v21 = vld [vmem:[#allocation2 + $0x1438] sm:$0xff]  ;;  %v7220_v47 = vpack.c.bf16 %v1719_v45, %v1711_v2  ;;  %v1775_v2 = vld [vmem:[#allocation2 + $0x15b0] sm:$0xff]  ;;  %v1797_v13 = vld [vmem:[#allocation2 + $0x1660] sm:$0xff] }
 0x4c7   :  { %7213 = vmatpush1.bf16.msra.mxu0 %v7212_v14  ;;  %7019 = vmatprep.subr.bf16.mxu1 %v7018_v35  ;;  %v7222_v54 = vpack.c.bf16 %v1736_v4, %v1728_v21  ;;  %v1768_v0 = vld [vmem:[#allocation2 + $0x1578] sm:$0xff]  ;;  %v7032_v14 = vpack.c.bf16 %v1749_v27, %v1741_v42  ;;  %v1783_v45 = vld [vmem:[#allocation2 + $0x15f0] sm:$0xff]  ;;  %v1806_v49 = vld [vmem:[#allocation2 + $0x16a8] sm:$0xff] }
 0x4c8   :  { %3049 = vmatmul.mubr.f32.gmra.mrb[28].mxu1 %v9769_v59  ;;  %7215 = vmatprep.subr.bf16.mxu0 %v7214_v40  ;;  %v7230_v40 = vpack.c.bf16 %v1768_v0, %v1760_v36  ;;  %v1792_v21 = vld [vmem:[#allocation2 + $0x1638] sm:$0xff]  ;;  %v1814_v10 = vld [vmem:[#allocation2 + $0x16e8] sm:$0xff]  ;;  %v1805_v42 = vld [vmem:[#allocation2 + $0x16a0] sm:$0xff] }
 0x4c9   :  { %3501 = vmatmul.mubr.f32.gmra.mrb[92].mxu0 %v9769_v59  ;;  %3054 = vmatprep.mubr.f32.mxu1 %v9809_v63  ;;  %v1735_v59 = vld [vmem:[#allocation2 + $0x1470] sm:$0xff]  ;;  %v1800_v4 = vld [vmem:[#allocation2 + $0x1678] sm:$0xff]  ;;  %v1813_v27 = vld [vmem:[#allocation2 + $0x16e0] sm:$0xff] }
 0x4ca   :  { %7021 = vmatpush1.bf16.msra.mxu1 %v7020_v12  ;;  %3506 = vmatprep.mubr.f32.mxu0 %v9809_v63  ;;  %v1744_v63 = vld [vmem:[#allocation2 + $0x14b8] sm:$0xff]  ;;  %v7224_v9 = vpack.c.bf16 %v1735_v59, %v1727_v43  ;;  %v7036_v12 = vpack.c.bf16 %v1765_v48, %v1757_v56  ;;  %v1791_v43 = vld [vmem:[#allocation2 + $0x1630] sm:$0xff]  ;;  %v1821_v56 = vld [vmem:[#allocation2 + $0x1720] sm:$0xff] }
 0x4cb   :  { %7217 = vmatpush1.bf16.msra.mxu0 %v7216_v38  ;;  %7023 = vmatprep.subr.bf16.mxu1 %v7022_v32  ;;  %v7226_v57 = vpack.c.bf16 %v1752_v7, %v1744_v63  ;;  %v7232_v38 = vpack.c.bf16 %v1767_v51, %v1759_v6  ;;  %v7038_v32 = vpack.c.bf16 %v1782_v31, %v1774_v17  ;;  %v1799_v59 = vld [vmem:[#allocation2 + $0x1670] sm:$0xff]  ;;  %v1808_v63 = vld [vmem:[#allocation2 + $0x16b8] sm:$0xff]  ;;  %v1829_v48 = vld [vmem:[#allocation2 + $0x1760] sm:$0xff] }
 0x4cc   :  { %3055 = vmatmul.mubr.f32.gmra.mrb[30].mxu1 %v9802_v8  ;;  %7219 = vmatprep.subr.bf16.mxu0 %v7218_v11  ;;  %v7234_v11 = vpack.c.bf16 %v1784_v18, %v1776_v52  ;;  %v1816_v7 = vld [vmem:[#allocation2 + $0x16f8] sm:$0xff]  ;;  %v1823_v6 = vld [vmem:[#allocation2 + $0x1730] sm:$0xff]  ;;  %v1838_v17 = vld [vmem:[#allocation2 + $0x17a8] sm:$0xff] }
 0x4cd   :  { %3507 = vmatmul.mubr.f32.gmra.mrb[94].mxu0 %v9802_v8  ;;  %3125 = vmatprep.mubr.f32.mxu1 %v9584_v37  ;;  %v1766_v8 = vld [vmem:[#allocation2 + $0x1568] sm:$0xff]  ;;  %v1824_v36 = vld [vmem:[#allocation2 + $0x1738] sm:$0xff]  ;;  %v1831_v51 = vld [vmem:[#allocation2 + $0x1770] sm:$0xff] }
 0x4ce   :  { %7025 = vmatpush1.bf16.msra.mxu1 %v7024_v44  ;;  %3577 = vmatprep.mubr.f32.mxu0 %v9584_v37  ;;  %v7228_v37 = vpack.c.bf16 %v1751_v5, %v1743_v39  ;;  %v7034_v35 = vpack.c.bf16 %v1766_v8, %v1758_v1  ;;  %v7040_v44 = vpack.c.bf16 %v1781_v15, %v1773_v26  ;;  %v1807_v39 = vld [vmem:[#allocation2 + $0x16b0] sm:$0xff]  ;;  %v1822_v1 = vld [vmem:[#allocation2 + $0x1728] sm:$0xff]  ;;  %v1832_v0 = vld [vmem:[#allocation2 + $0x1778] sm:$0xff] }
 0x4cf   :  { %7221 = vmatpush1.bf16.msra.mxu0 %v7220_v47  ;;  %7027 = vmatprep.subr.bf16.mxu1 %v7026_v58  ;;  %v7236_v47 = vpack.c.bf16 %v1783_v45, %v1775_v2  ;;  %v7042_v58 = vpack.c.bf16 %v1798_v22, %v1790_v20  ;;  %v1815_v5 = vld [vmem:[#allocation2 + $0x16f0] sm:$0xff]  ;;  %v1830_v8 = vld [vmem:[#allocation2 + $0x1768] sm:$0xff]  ;;  %v1840_v52 = vld [vmem:[#allocation2 + $0x17b8] sm:$0xff] }
 0x4d0   :  { %7223 = vmatprep.subr.bf16.mxu0 %v7222_v54  ;;  %v7238_v54 = vpack.c.bf16 %v1800_v4, %v1792_v21  ;;  %v1846_v31 = vld [vmem:[#allocation2 + $0x17e8] sm:$0xff]  ;;  %v1848_v18 = vld [vmem:[#allocation2 + $0x17f8] sm:$0xff]  ;;  %v1837_v26 = vld [vmem:[#allocation2 + $0x17a0] sm:$0xff] }
 0x4d1   :  { %v1845_v15 = vld [vmem:[#allocation2 + $0x17e0] sm:$0xff]  ;;  %v1839_v2 = vld [vmem:[#allocation2 + $0x17b0] sm:$0xff]  ;;  %v1854_v20 = vld [vmem:[#allocation2 + $0x1828] sm:$0xff] }
 0x4d2   :  { %7029 = vmatpush1.bf16.msra.mxu1 %v7028_v29  ;;  %v7044_v29 = vpack.c.bf16 %v1797_v13, %v1789_v28  ;;  %v1847_v45 = vld [vmem:[#allocation2 + $0x17f0] sm:$0xff]  ;;  %v1862_v22 = vld [vmem:[#allocation2 + $0x1868] sm:$0xff]  ;;  %v1856_v21 = vld [vmem:[#allocation2 + $0x1838] sm:$0xff] }
 0x4d3   :  { %7225 = vmatpush1.bf16.msra.mxu0 %v7224_v9  ;;  %7031 = vmatprep.subr.bf16.mxu1 %v7030_v33  ;;  %v7240_v9 = vpack.c.bf16 %v1799_v59, %v1791_v43  ;;  %v7046_v33 = vpack.c.bf16 %v1814_v10, %v1806_v49  ;;  %v1864_v4 = vld [vmem:[#allocation2 + $0x1878] sm:$0xff]  ;;  %v1853_v28 = vld [vmem:[#allocation2 + $0x1820] sm:$0xff]  ;;  %v1863_v59 = vld [vmem:[#allocation2 + $0x1870] sm:$0xff] }
 0x4d4   :  { %7227 = vmatprep.subr.bf16.mxu0 %v7226_v57  ;;  %v7242_v57 = vpack.c.bf16 %v1816_v7, %v1808_v63  ;;  %v1861_v13 = vld [vmem:[#allocation2 + $0x1860] sm:$0xff]  ;;  %v7254_v43 = vpack.c.bf16 %v1864_v4, %v1856_v21  ;;  %v5404_v49 = vld [vmem:[#allocation6 + $0x8] sm:$0xff] }
 0x4d5   :  { %v5406_v10 = vld [vmem:[#allocation6 + $0x18] sm:$0xff]  ;;  %v7060_v63 = vpack.c.bf16 %v1861_v13, %v1853_v28  ;;  %v10207_v28 = vld [vmem:[#allocation6 + $0xe8] sm:$0xff] }
 0x4d6   :  { %7033 = vmatpush1.bf16.msra.mxu1 %v7032_v14  ;;  %v7048_v14 = vpack.c.bf16 %v1813_v27, %v1805_v42  ;;  %v10123_v27 = vld [vmem:[#allocation6] sm:$0xff]  ;;  %12999 = vst [vmem:[#allocation14_spill] sm:$0xff] %v10207_v28  ;;  %v10209_v13 = vld [vmem:[#allocation6 + $0xf8] sm:$0xff] }
 0x4d7   :  { %7229 = vmatpush1.bf16.msra.mxu0 %v7228_v37  ;;  %7035 = vmatprep.subr.bf16.mxu1 %v7034_v35  ;;  %v7244_v37 = vpack.c.bf16 %v1815_v5, %v1807_v39  ;;  %v7050_v35 = vpack.c.bf16 %v1830_v8, %v1822_v1  ;;  %v10125_v39 = vld [vmem:[#allocation6 + $0x10] sm:$0xff]  ;;  %v10137_v1 = vld [vmem:[#allocation6 + $0x48] sm:$0xff]  ;;  %v10139_v8 = vld [vmem:[#allocation6 + $0x58] sm:$0xff] }
 0x4d8   :  { %7231 = vmatprep.subr.bf16.mxu0 %v7230_v40  ;;  %v7246_v40 = vpack.c.bf16 %v1832_v0, %v1824_v36  ;;  %v10133_v5 = vld [vmem:[#allocation6 + $0x30] sm:$0xff]  ;;  %v10141_v36 = vld [vmem:[#allocation6 + $0x40] sm:$0xff] }
 0x4d9   :  { %v10143_v0 = vld [vmem:[#allocation6 + $0x50] sm:$0xff] }
 0x4da   :  { %7037 = vmatpush1.bf16.msra.mxu1 %v7036_v12  ;;  %v7052_v12 = vpack.c.bf16 %v1829_v48, %v1821_v56  ;;  %v10156_v56 = vld [vmem:[#allocation6 + $0x70] sm:$0xff]  ;;  %v10158_v48 = vld [vmem:[#allocation6 + $0x88] sm:$0xff] }
 0x4db   :  { %7233 = vmatpush1.bf16.msra.mxu0 %v7232_v38  ;;  %7039 = vmatprep.subr.bf16.mxu1 %v7038_v32  ;;  %v7248_v38 = vpack.c.bf16 %v1831_v51, %v1823_v6  ;;  %v7054_v32 = vpack.c.bf16 %v1846_v31, %v1838_v17  ;;  %v10160_v6 = vld [vmem:[#allocation6 + $0x98] sm:$0xff]  ;;  %v10168_v17 = vld [vmem:[#allocation6 + $0x80] sm:$0xff]  ;;  %v10172_v31 = vld [vmem:[#allocation6 + $0xa8] sm:$0xff] }
 0x4dc   :  { %7235 = vmatprep.subr.bf16.mxu0 %v7234_v11  ;;  %v7250_v11 = vpack.c.bf16 %v1848_v18, %v1840_v52  ;;  %v10177_v18 = vld [vmem:[#allocation6 + $0xb8] sm:$0xff] }
 0x4de   :  { %7041 = vmatpush1.bf16.msra.mxu1 %v7040_v44  ;;  %v7056_v44 = vpack.c.bf16 %v1845_v15, %v1837_v26 }
 0x4df   :  { %7237 = vmatpush1.bf16.msra.mxu0 %v7236_v47  ;;  %7043 = vmatprep.subr.bf16.mxu1 %v7042_v58  ;;  %v7252_v47 = vpack.c.bf16 %v1847_v45, %v1839_v2  ;;  %v7058_v58 = vpack.c.bf16 %v1862_v22, %v1854_v20  ;;  %v10193_v45 = vld [vmem:[#allocation6 + $0xd8] sm:$0xff]  ;;  %v10195_v20 = vld [vmem:[#allocation6 + $0xc0] sm:$0xff]  ;;  %v10278_v2 = vld [vmem:[#allocation6 + $0x130] sm:$0xff] }
 0x4e0   :  { %7239 = vmatprep.subr.bf16.mxu0 %v7238_v54  ;;  %v1855_v54 = vld [vmem:[#allocation2 + $0x1830] sm:$0xff] }
 0x4e1   :  { %v7256_v7 = vpack.c.bf16 %v1863_v59, %v1855_v54 }
 0x4e2   :  { %7045 = vmatpush1.bf16.msra.mxu1 %v7044_v29  ;;  %v7258_v29 = vpack.c.bf16 %v5406_v10, %v5404_v49  ;;  %v10217_v10 = vld [vmem:[#allocation6 + $0xe0] sm:$0xff] }
 0x4e3   :  { %7241 = vmatpush1.bf16.msra.mxu0 %v7240_v9  ;;  %7047 = vmatprep.subr.bf16.mxu1 %v7046_v33  ;;  %v1867_v9 = vlaneseq  ;;  %13000 = vst [vmem:[#allocation16_spill] sm:$0xff] %v10217_v10 }
 0x4e4   :  { %7243 = vmatprep.subr.bf16.mxu0 %v7242_v57  ;;  %v10129_v57 = vld [vmem:[#allocation6 + $0x38] sm:$0xff] }
 0x4e5   :  { %v10112_v33 = vshrl.u32 %v1867_v9, 7 }
 0x4e6   :  { %7049 = vmatpush1.bf16.msra.mxu1 %v7048_v14  ;;  %v10145_v14 = vld [vmem:[#allocation6 + $0x68] sm:$0xff] }
 0x4e7   :  { %7245 = vmatpush1.bf16.msra.mxu0 %v7244_v37  ;;  %7051 = vmatprep.subr.bf16.mxu1 %v7050_v35  ;;  %12998 = vst [vmem:[#allocation15_spill] sm:$0xff] %v10112_v33  ;;  %v1877_v42 = vsub.s32 2, %v10112_v33  ;;  %v10147_v37 = vld [vmem:[#allocation6 + $0x78] sm:$0xff] }
 0x4e8   :  { %7247 = vmatprep.subr.bf16.mxu0 %v7246_v40 }
 0x4ea   :  { %7053 = vmatpush1.bf16.msra.mxu1 %v7052_v12  ;;  %v10179_v12 = vld [vmem:[#allocation6 + $0xa0] sm:$0xff] }
 0x4eb   :  { %7249 = vmatpush1.bf16.msra.mxu0 %v7248_v38  ;;  %7055 = vmatprep.subr.bf16.mxu1 %v7054_v32  ;;  %v10181_v38 = vld [vmem:[#allocation6 + $0xb0] sm:$0xff] }
 0x4ec   :  { %7251 = vmatprep.subr.bf16.mxu0 %v7250_v11  ;;  %v10191_v11 = vld [vmem:[#allocation6 + $0xc8] sm:$0xff] }
 0x4ee   :  { %7057 = vmatpush1.bf16.msra.mxu1 %v7056_v44 }
 0x4ef   :  { %7253 = vmatpush1.bf16.msra.mxu0 %v7252_v47  ;;  %7059 = vmatprep.subr.bf16.mxu1 %v7058_v58  ;;  %v10205_v58 = vld [vmem:[#allocation6 + $0xd0] sm:$0xff] }
 0x4f0   :  { %7255 = vmatprep.subr.bf16.mxu0 %v7254_v43 }
 0x4f1   :  { %3126 = vmatmul.mubr.f32.vlgmr.msra.gmra.mrb[16].mxu1 %v9578_v46 }
 0x4f2   :  { %3578 = vmatmul.mubr.f32.vlgmr.msra.gmra.mrb[80].mxu0 %v9578_v46  ;;  %3131 = vmatprep.mubr.f32.mxu1 %v9618_v3  ;;  %v12772_v46 = vsub.s32 0, %v10112_v33 }
 0x4f3   :  { %7061 = vmatpush1.bf16.msra.mxu1 %v7060_v63  ;;  %3583 = vmatprep.mubr.f32.mxu0 %v9618_v3  ;;  %v1865_v3 = vld [vmem:[#allocation4] sm:$0xff]  ;;  %v10219_v63 = vld [vmem:[#allocation6 + $0xf0] sm:$0xff] }
 0x4f4   :  { %7257 = vmatpush1.bf16.msra.mxu0 %v7256_v7  ;;  %7259 = vmatprep.subr.bf16.mxu1 %v7258_v29  ;;  %v10152_v35 = vrot.slane %v1865_v3, %v12772_v46  ;;  %v10162_v40 = vrot.slane %v1865_v3, %v1877_v42  ;;  %13001 = vst [vmem:[#allocation22_spill] sm:$0xff] %v10219_v63  ;;  %v10221_v7 = vld [vmem:[#allocation6 + $0x108] sm:$0xff] }
 0x4f5   :  { %3132 = vmatmul.mubr.f32.gmra.mrb[18].mxu1 %v9605_v41  ;;  %13002 = vst [vmem:[#allocation18_spill] sm:$0xff] %v10221_v7  ;;  %v10247_v42 = vld [vmem:[#allocation6 + $0x128] sm:$0xff] }
 0x4f6   :  { %3584 = vmatmul.mubr.f32.gmra.mrb[82].mxu0 %v9605_v41  ;;  %3137 = vmatprep.mubr.f32.mxu1 %v12981_v60  ;;  %v12771_v41 = vsub.s32 1, %v10112_v33  ;;  %13006 = vst [vmem:[#allocation23_spill] sm:$0xff] %v10247_v42 }
 0x4f7   :  { %3589 = vmatprep.mubr.f32.mxu0 %v12981_v60  ;;  %v1881_v60 = vsub.s32 3, %v10112_v33 }
 0x4f8   :  { %v10166_v51 = vrot.slane %v1865_v3, %v12771_v41 }
 0x4f9   :  { %3138 = vmatmul.mubr.f32.gmra.mrb[20].mxu1 %v12982_v30  ;;  %v10175_v52 = vrot.slane %v1865_v3, %v1881_v60  ;;  %v10231_v60 = vld [vmem:[#allocation6 + $0x118] sm:$0xff] }
 0x4fa   :  { %3590 = vmatmul.mubr.f32.gmra.mrb[84].mxu0 %v12982_v30  ;;  %3143 = vmatprep.mubr.f32.mxu1 %v9688_v53  ;;  %v10127_v30 = vld [vmem:[#allocation6 + $0x28] sm:$0xff]  ;;  %13003 = vst [vmem:[#allocation13_spill] sm:$0xff] %v10231_v60  ;;  %v10249_v3 = vld [vmem:[#allocation6 + $0x138] sm:$0xff] }
 0x4fb   :  { %3595 = vmatprep.mubr.f32.mxu0 %v9688_v53  ;;  %v10131_v53 = vld [vmem:[#allocation6 + $0x20] sm:$0xff]  ;;  %13007 = vst [vmem:[#allocation25_spill] sm:$0xff] %v10249_v3 }
 0x4fd   :  { %3144 = vmatmul.mubr.f32.gmra.mrb[22].mxu1 %v9682_v16 }
 0x4fe   :  { %3596 = vmatmul.mubr.f32.gmra.mrb[86].mxu0 %v9682_v16  ;;  %3149 = vmatprep.mubr.f32.mxu1 %v9721_v19  ;;  %v10154_v16 = vld [vmem:[#allocation6 + $0x60] sm:$0xff] }
 0x4ff   :  { %3601 = vmatprep.mubr.f32.mxu0 %v9721_v19  ;;  %v10170_v19 = vld [vmem:[#allocation6 + $0x90] sm:$0xff] }
 0x501   :  { %3150 = vmatmul.mubr.f32.gmra.mrb[24].mxu1 %v9715_v55 }
 0x502   :  { %3602 = vmatmul.mubr.f32.gmra.mrb[88].mxu0 %v9715_v55  ;;  %3155 = vmatprep.mubr.f32.mxu1 %v9760_v24  ;;  %v2336_v32 = vpop.f32.mrb[0].mxu1 }
 0x503   :  { %3607 = vmatprep.mubr.f32.mxu0 %v9760_v24  ;;  %v7514_v55 = vadd.f32 %v2336_v32, %v10152_v35  ;;  %v2788_v22 = vpop.f32.mrb[64].mxu0  ;;  %v2338_v21 = vpop.f32.mrb[1].mxu1  ;;  %v10233_v32 = vld [vmem:[#allocation6 + $0x100] sm:$0xff] }
 0x504   :  { %v7530_v24 = vadd.f32 %v2788_v22, %v10162_v40  ;;  %v7515_v43 = vadd.f32 %v2338_v21, %v10166_v51  ;;  %v2790_v54 = vpop.f32.mrb[65].mxu0  ;;  %13004 = vst [vmem:[#allocation12_spill] sm:$0xff] %v10233_v32  ;;  %v10235_v22 = vld [vmem:[#allocation6 + $0x110] sm:$0xff] }
 0x505   :  { %v10223_v29 = vmul.f32 0.70710677, %v7514_v55  ;;  %3156 = vmatmul.mubr.f32.gmra.mrb[26].mxu1 %v9745_v62  ;;  %v7531_v9 = vadd.f32 %v2790_v54, %v10175_v52  ;;  %13005 = vst [vmem:[#allocation21_spill] sm:$0xff] %v10235_v22  ;;  %v10266_v15 = vmul.f32 0.5, %v7514_v55  ;;  %v10276_v55 = vld [vmem:[#allocation6 + $0x120] sm:$0xff] }
 0x506   :  { %v10237_v21 = vmul.f32 0.70710677, %v7530_v24  ;;  %3608 = vmatmul.mubr.f32.gmra.mrb[90].mxu0 %v9745_v62  ;;  %v10240_v41 = vmul.f32 0.70710677, %v7515_v43  ;;  %3161 = vmatprep.mubr.f32.mxu1 %v9787_v61  ;;  %v2342_v44 = vpop.f32.mrb[2].mxu1  ;;  %v10271_v33 = vmul.f32 0.5, %v7530_v24 }
 0x507   :  { %v3995_v49 = vand.u32 2147483647, %v10223_v29  ;;  %v10252_v59 = vmul.f32 0.70710677, %v7531_v9  ;;  %3613 = vmatprep.mubr.f32.mxu0 %v9787_v61  ;;  %13008 = vst [vmem:[#allocation29_spill] sm:$0xff] %v10266_v15  ;;  %v2794_v62 = vpop.f32.mrb[66].mxu0 }
 0x508   :  { %v3997_v54 = vand.u32 2147483647, %v10237_v21  ;;  %13009 = vst [vmem:[#allocation30_spill] sm:$0xff] %v10271_v33  ;;  %v3996_v10 = vand.u32 2147483647, %v10240_v41  ;;  %v10280_v32 = vmul.f32 0.5, %v7515_v43 }
 0x509   :  { %v4059_v61 = vmul.f32 0.3275911, %v3995_v49  ;;  %v4827_v26 = vsub.f32 0.0, %v3995_v49  ;;  %3162 = vmatmul.mubr.f32.gmra.mrb[28].mxu1 %v9781_v23  ;;  %v3998_v47 = vand.u32 2147483647, %v10252_v59  ;;  %v2344_v24 = vpop.f32.mrb[3].mxu1 }
 0x50a   :  { %v4061_v28 = vmul.f32 0.3275911, %v3997_v54  ;;  %v4829_v46 = vsub.f32 0.0, %v3997_v54  ;;  %3614 = vmatmul.mubr.f32.gmra.mrb[92].mxu0 %v9781_v23  ;;  %3167 = vmatprep.mubr.f32.mxu1 %v9821_v25  ;;  %13010 = vst [vmem:[#allocation31_spill] sm:$0xff] %v10280_v32  ;;  %v10283_v33 = vpop.f32.mrb[67].mxu0  ;;  %v4828_v22 = vsub.f32 0.0, %v3996_v10 }
 0x50b   :  { %v4123_v4 = vadd.f32 1.0, %v4059_v61  ;;  %v4891_v15 = vmul.f32 %v4827_v26, %v3995_v49  ;;  %3619 = vmatprep.mubr.f32.mxu0 %v9821_v25  ;;  %v4060_v23 = vmul.f32 0.3275911, %v3996_v10  ;;  %v10286_v7 = vpop.f32.mrb[4].mxu1  ;;  %v10288_v60 = vpop.f32.mrb[68].mxu0  ;;  %vm3867_vm1 = vcmp.ge.f32.partialorder %v10223_v29, 0.0 }
 0x50c   :  { %v4125_v42 = vadd.f32 1.0, %v4061_v28  ;;  %v4893_v3 = vmul.f32 %v4829_v46, %v3997_v54  ;;  %v10291_v26 = vmul.f32 0.5, %v7531_v9  ;;  %v4830_v43 = vsub.f32 0.0, %v3998_v47  ;;  %v10294_v49 = vpop.f32.mrb[5].mxu1  ;;  %v10298_v46 = vpop.f32.mrb[69].mxu0 }
 0x50d   :  { %7852 = vrcp.f32 %v4123_v4  ;;  %3168 = vmatmul.mubr.f32.gmra.mrb[30].mxu1 %v9815_v50  ;;  %v4955_v61 = vmul.f32 1.442695, %v4891_v15  ;;  %vm3869_vm2 = vcmp.ge.f32.partialorder %v10237_v21, 0.0  ;;  %v4892_v25 = vmul.f32 %v4828_v22, %v3996_v10 }
 0x50e   :  { %13011 = vst [vmem:[#allocation32_spill] sm:$0xff] %v10291_v26  ;;  %7854 = vrcp.f32 %v4125_v42  ;;  %3620 = vmatmul.mubr.f32.gmra.mrb[94].mxu0 %v9815_v50  ;;  %v13012_v28 = vmov 0.0   ;;  %v10301_v54 = vpop.f32.mrb[6].mxu1  ;;  %v4959_v4 = vmul.f32 1.442695, %v4893_v3  ;;  %v7516_v26 = vadd.f32 %v2342_v44, %v10152_v35 }
 0x50f   :  { %3238 = vmatprep.mubr.f32.mxu1 %v13012_v28  ;;  %v4062_v9 = vmul.f32 0.3275911, %v3998_v47  ;;  %3690 = vmatprep.mubr.f32.mxu0 %v13012_v28  ;;  %v10305_v32 = vpop.f32.mrb[70].mxu0  ;;  %v10307_v15 = vpop.f32.mrb[7].mxu1  ;;  %v12784_v50 = vmov -1.0   ;;  %v4124_v22 = vadd.f32 1.0, %v4060_v23  ;;  %v7532_v3 = vadd.f32 %v2794_v62, %v10162_v40 }
 0x510   :  { %13013 = vst [vmem:[#allocation33_spill] sm:$0xff] %v10305_v32  ;;  %13014 = vst [vmem:[#allocation34_spill] sm:$0xff] %v10307_v15  ;;  %v10314_v42 = vsel %vm3867_vm1, 1.0, %v12784_v50  ;;  %v7517_v44 = vadd.f32 %v2344_v24, %v10166_v51  ;;  %v10318_v63 = vpop.f32.mrb[71].mxu0  ;;  %vm3868_vm3 = vcmp.ge.f32.partialorder %v10240_v41, 0.0  ;;  %vm3870_vm4 = vcmp.ge.f32.partialorder %v10252_v59, 0.0 }
 0x511   :  { %v4894_v15 = vmul.f32 %v4830_v43, %v3998_v47  ;;  %v3811_v32 = vmul.f32 0.70710677, %v7516_v26  ;;  %6178 = vmatmul.mubr.msk.f32.vlgmr.msra.gmra.mrb[16].mxu1 %vm763_vm0, %v12983_v34  ;;  %7856 = vpow2.f32 %v4955_v61  ;;  %v10327_v29 = vsel %vm3869_vm2, 1.0, %v12784_v50 }
 0x512   :  { %v4957_v62 = vmul.f32 1.442695, %v4892_v25  ;;  %v10329_v23 = vmul.f32 0.70710677, %v7532_v3  ;;  %6186 = vmatmul.mubr.msk.f32.vlgmr.msra.gmra.mrb[80].mxu0 %vm763_vm0, %v12983_v34  ;;  %v13015_v24 = vpack.c.bf16 %v10125_v39, %v10123_v27  ;;  %v10336_v47 = vpop.f32.mrb[8].mxu1  ;;  %7858 = vpow2.f32 %v4959_v4  ;;  %3244 = vmatprep.mubr.f32.mxu1 %v13012_v28 }
 0x513   :  { %v4126_v43 = vadd.f32 1.0, %v4062_v9  ;;  %v4003_v61 = vand.u32 2147483647, %v3811_v32  ;;  %v10338_v10 = vmul.f32 0.70710677, %v7517_v44  ;;  %3696 = vmatprep.mubr.f32.mxu0 %v13012_v28  ;;  %v10342_v21 = vpop.f32.mrb[72].mxu0  ;;  %7860 = vrcp.f32 %v4124_v22 }
 0x514   :  { %7261 = vmatpush1.bf16.msra.mxu1 %v13015_v24  ;;  %v10347_v34 = vsel %vm3868_vm3, 1.0, %v12784_v50  ;;  %v10352_v27 = vsel %vm3870_vm4, 1.0, %v12784_v50  ;;  %v4005_v39 = vand.u32 2147483647, %v10329_v23  ;;  %v13018_v25 = vpack.c.bf16 %v10129_v57, %v10127_v30  ;;  %v10358_v4 = vpop.f32.mrb[9].mxu1  ;;  %v10360_v9 = vpop.f32.mrb[73].mxu0 }
 0x515   :  { %13016 = vst [vmem:[#allocation35_spill] sm:$0xff] %v10347_v34  ;;  %13017 = vst [vmem:[#allocation36_spill] sm:$0xff] %v10352_v27  ;;  %v4961_v24 = vmul.f32 1.442695, %v4894_v15  ;;  %vm3875_vm5 = vcmp.ge.f32.partialorder %v3811_v32, 0.0  ;;  %v4835_v34 = vsub.f32 0.0, %v4003_v61  ;;  %7862 = vpow2.f32 %v4957_v62 }
 0x516   :  { %7263 = vmatprep.subr.bf16.mxu1 %v13018_v25  ;;  %13019 = vst [vmem:[#allocation37_spill] sm:$0xff] %v10360_v9  ;;  %v4067_v41 = vmul.f32 0.3275911, %v4003_v61  ;;  %v13020_v22 = vld [vmem:[#allocation17_spill] sm:$0xff]  ;;  %v10364_v59 = vmul.f32 0.5, %v7516_v26  ;;  %v13022_v30 = vpack.c.bf16 %v10133_v5, %v10131_v53  ;;  %7864 = vrcp.f32 %v4126_v43  ;;  %v10380_v26 = vpop.f32.mrb[10].mxu1 }
 0x517   :  { %6179 = vmatmul.mubr.msk.f32.gmra.mrb[18].mxu1 %vm763_vm0, %v13020_v22  ;;  %v4069_v50 = vmul.f32 0.3275911, %v4005_v39  ;;  %v4004_v27 = vand.u32 2147483647, %v10338_v10  ;;  %6187 = vmatmul.mubr.msk.f32.gmra.mrb[82].mxu0 %vm763_vm0, %v13020_v22  ;;  %v10372_v57 = vpop.eup %7852  ;;  %v10374_v15 = vmul.f32 0.5, %v7532_v3  ;;  %v4837_v25 = vsub.f32 0.0, %v4005_v39 }
 0x518   :  { %13021 = vst [vmem:[#allocation17_spill] sm:$0xff] %v10364_v59  ;;  %7265 = vmatpush1.bf16.msra.mxu1 %v13022_v30  ;;  %v10376_v9 = vmul.f32 0.5, %v7517_v44  ;;  %3250 = vmatprep.mubr.f32.mxu1 %v13012_v28  ;;  %v10382_v62 = vpop.f32.mrb[74].mxu0  ;;  %v10384_v22 = vpop.eup %7854  ;;  %v4251_v53 = vmul.f32 1.0614054, %v10372_v57  ;;  %v13025_v5 = vmov -1.0   ;;  %v4899_v3 = vmul.f32 %v4835_v34, %v4003_v61 }
 0x519   :  { %13023 = vst [vmem:[#allocation38_spill] sm:$0xff] %v10374_v15  ;;  %3702 = vmatprep.mubr.f32.mxu0 %v13012_v28  ;;  %v10389_v43 = vsel %vm3875_vm5, 1.0, %v13025_v5  ;;  %v10393_v44 = vadd.f32 %v10283_v33, %v10175_v52  ;;  %v13027_v30 = vpack.c.bf16 %v10139_v8, %v10137_v1  ;;  %v10398_v15 = vpop.f32.mrb[11].mxu1  ;;  %v4253_v59 = vmul.f32 1.0614054, %v10384_v22  ;;  %v13029_v61 = vld [vmem:[#allocation24_spill] sm:$0xff] }
 0x51a   :  { %13024 = vst [vmem:[#allocation39_spill] sm:$0xff] %v10376_v9  ;;  %13026 = vst [vmem:[#allocation40_spill] sm:$0xff] %v10389_v43  ;;  %v4131_v9 = vadd.f32 1.0, %v4067_v41  ;;  %vm3877_vm6 = vcmp.ge.f32.partialorder %v10329_v23, 0.0  ;;  %v10404_v32 = vadd.f32 %v10286_v7, %v10152_v35  ;;  %v10408_v33 = vpop.f32.mrb[75].mxu0  ;;  %v4133_v43 = vadd.f32 1.0, %v4069_v50 }
 0x51b   :  { %7267 = vmatprep.subr.bf16.mxu1 %v13027_v30  ;;  %13028 = vst [vmem:[#allocation41_spill] sm:$0xff] %v10398_v15  ;;  %6180 = vmatmul.mubr.msk.f32.gmra.mrb[20].mxu1 %vm763_vm0, %v13029_v61  ;;  %13030 = vst [vmem:[#allocation24_spill] sm:$0xff] %v10408_v33  ;;  %v4315_v34 = vadd.f32 -1.4531521, %v4251_v53  ;;  %vm3876_vm7 = vcmp.ge.f32.partialorder %v10338_v10, 0.0  ;;  %v4836_v1 = vsub.f32 0.0, %v4004_v27  ;;  %v13031_v8 = vpack.c.bf16 %v10143_v0, %v10141_v36  ;;  %v10428_v36 = vpop.eup %7856 }
 0x51c   :  { %6188 = vmatmul.mubr.msk.f32.gmra.mrb[84].mxu0 %vm763_vm0, %v13029_v61  ;;  %v10416_v41 = vpop.f32.mrb[12].mxu1  ;;  %v10418_v7 = vld [vmem:[#allocation6 + $0x148] sm:$0xff]  ;;  %v10420_v30 = vld [vmem:[#allocation6 + $0x158] sm:$0xff]  ;;  %v4317_v15 = vadd.f32 -1.4531521, %v4253_v59  ;;  %7866 = vpow2.f32 %v4961_v24  ;;  %v4901_v53 = vmul.f32 %v4837_v25, %v4005_v39  ;;  %3256 = vmatprep.mubr.f32.mxu1 %v13012_v28  ;;  %v10424_v33 = vpop.f32.mrb[76].mxu0  ;;  %v13035_v24 = vpack.c.bf16 %v10147_v37, %v10145_v14 }
 0x51d   :  { %7269 = vmatpush1.bf16.msra.mxu1 %v13031_v8  ;;  %v4068_v50 = vmul.f32 0.3275911, %v4004_v27  ;;  %3708 = vmatprep.mubr.f32.mxu0 %v13012_v28  ;;  %13032 = vst [vmem:[#allocation42_spill] sm:$0xff] %v10424_v33  ;;  %v10426_v61 = vpop.f32.mrb[13].mxu1  ;;  %v4379_v0 = vmul.f32 %v10372_v57, %v4315_v34  ;;  %v4971_v8 = vmul.f32 1.442695, %v4899_v3  ;;  %7868 = vrcp.f32 %v4131_v9 }
 0x51e   :  { %13033 = vst [vmem:[#allocation43_spill] sm:$0xff] %v10426_v61  ;;  %v10434_v59 = vsel %vm3877_vm6, 1.0, %v13025_v5  ;;  %v10437_v39 = vmul.f32 0.70710677, %v10393_v44  ;;  %7271 = vmatprep.subr.bf16.mxu1 %v13035_v24  ;;  %v10442_v25 = vpop.f32.mrb[77].mxu0  ;;  %v10444_v61 = vpop.eup %7858  ;;  %v4381_v33 = vmul.f32 %v10384_v22, %v4317_v15  ;;  %v10450_v23 = vsel %vm3876_vm7, 1.0, %v13025_v5 }
 0x51f   :  { %13034 = vst [vmem:[#allocation44_spill] sm:$0xff] %v10434_v59  ;;  %13036 = vst [vmem:[#allocation45_spill] sm:$0xff] %v10450_v23  ;;  %v10453_v3 = vmul.f32 0.70710677, %v10404_v32  ;;  %v13037_v34 = vld [vmem:[#allocation19_spill] sm:$0xff]  ;;  %v10457_v14 = vpop.eup %7860  ;;  %v4900_v24 = vmul.f32 %v4836_v1, %v4004_v27  ;;  %v10462_v9 = vadd.f32 %v10288_v60, %v10162_v40  ;;  %v13039_v10 = vpack.c.bf16 %v10156_v56, %v10154_v16  ;;  %v10469_v15 = vpop.f32.mrb[14].mxu1 }
 0x520   :  { %6181 = vmatmul.mubr.msk.f32.gmra.mrb[22].mxu1 %vm763_vm0, %v13037_v34  ;;  %13038 = vst [vmem:[#allocation19_spill] sm:$0xff] %v10457_v14  ;;  %v4443_v37 = vadd.f32 1.4214138, %v4379_v0  ;;  %v4006_v59 = vand.u32 2147483647, %v10437_v39  ;;  %6189 = vmatmul.mubr.msk.f32.gmra.mrb[86].mxu0 %vm763_vm0, %v13037_v34  ;;  %7870 = vrcp.f32 %v4133_v43  ;;  %v10473_v27 = vpop.f32.mrb[78].mxu0  ;;  %v10479_v0 = vpop.eup %7862  ;;  %v13042_v43 = vpack.c.bf16 %v10160_v6, %v10158_v48 }
 0x521   :  { %7273 = vmatpush1.bf16.msra.mxu1 %v13039_v10  ;;  %v4445_v23 = vadd.f32 1.4214138, %v4381_v33  ;;  %v4975_v14 = vmul.f32 1.442695, %v4901_v53  ;;  %3262 = vmatprep.mubr.f32.mxu1 %v13012_v28  ;;  %v10475_v60 = vpop.f32.mrb[15].mxu1  ;;  %13041 = vst [vmem:[#allocation47_spill] sm:$0xff] %v10479_v0  ;;  %7872 = vpow2.f32 %v4971_v8  ;;  %v10487_v34 = vpop.eup %7864  ;;  %v10501_v6 = vadd.f32 %v10294_v49, %v10166_v51 }
 0x522   :  { %3714 = vmatprep.mubr.f32.mxu0 %v13012_v28  ;;  %13040 = vst [vmem:[#allocation46_spill] sm:$0xff] %v10475_v60  ;;  %v4507_v16 = vmul.f32 %v10372_v57, %v4443_v37  ;;  %v4132_v56 = vadd.f32 1.0, %v4068_v50  ;;  %v4838_v33 = vsub.f32 0.0, %v4006_v59  ;;  %7275 = vmatprep.subr.bf16.mxu1 %v13042_v43  ;;  %v10485_v53 = vpop.f32.mrb[79].mxu0  ;;  %13044 = vst [vmem:[#allocation49_spill] sm:$0xff] %v10487_v34  ;;  %v13045_v37 = vld [vmem:[#allocation20_spill] sm:$0xff] }
 0x523   :  { %13043 = vst [vmem:[#allocation48_spill] sm:$0xff] %v10485_v53  ;;  %v4509_v10 = vmul.f32 %v10384_v22, %v4445_v23  ;;  %v4070_v60 = vmul.f32 0.3275911, %v4006_v59  ;;  %v4011_v1 = vand.u32 2147483647, %v10453_v3  ;;  %v10497_v48 = vmul.f32 0.5, %v10393_v44 }
 0x524   :  { %v10492_v0 = vmul.f32 0.70710677, %v10462_v9  ;;  %6182 = vmatmul.mubr.msk.f32.gmra.mrb[24].mxu1 %vm763_vm0, %v13045_v37  ;;  %v4571_v50 = vadd.f32 -0.28449672, %v4507_v16  ;;  %v4973_v8 = vmul.f32 1.442695, %v4900_v24  ;;  %6190 = vmatmul.mubr.msk.f32.gmra.mrb[88].mxu0 %vm763_vm0, %v13045_v37  ;;  %v13047_v23 = vpack.c.bf16 %v10170_v19, %v10168_v17 }
 0x525   :  { %13046 = vst [vmem:[#allocation20_spill] sm:$0xff] %v10497_v48  ;;  %v4573_v43 = vadd.f32 -0.28449672, %v4509_v10  ;;  %7874 = vpow2.f32 %v4975_v14  ;;  %v4902_v34 = vmul.f32 %v4838_v33, %v4006_v59  ;;  %v4843_v53 = vsub.f32 0.0, %v4011_v1  ;;  %3268 = vmatprep.mubr.f32.mxu1 %v13012_v28  ;;  %3720 = vmatprep.mubr.f32.mxu0 %v13012_v28  ;;  %v13050_v33 = vld [vmem:[#allocation26_spill] sm:$0xff] }
 0x526   :  { %7277 = vmatpush1.bf16.msra.mxu1 %v13047_v23  ;;  %v4635_v44 = vmul.f32 %v10372_v57, %v4571_v50  ;;  %7876 = vrcp.f32 %v4132_v56  ;;  %vm3878_vm8 = vcmp.ge.f32.partialorder %v10437_v39, 0.0  ;;  %v10513_v49 = vmul.f32 0.5, %v10404_v32  ;;  %v10518_v19 = vpop.eup %7866 }
 0x527   :  { %v13048_v17 = vpack.c.bf16 %v10177_v18, %v10172_v31  ;;  %13049 = vst [vmem:[#allocation50_spill] sm:$0xff] %v10518_v19  ;;  %v4637_v59 = vmul.f32 %v10384_v22, %v4573_v43  ;;  %v4134_v14 = vadd.f32 1.0, %v4070_v60  ;;  %v4075_v24 = vmul.f32 0.3275911, %v4011_v1  ;;  %v10530_v18 = vpop.eup %7868  ;;  %v13055_v43 = vld [vmem:[#allocation27_spill] sm:$0xff] }
 0x528   :  { %v4013_v16 = vand.u32 2147483647, %v10492_v0  ;;  %6183 = vmatmul.mubr.msk.f32.gmra.mrb[26].mxu1 %vm763_vm0, %v13050_v33  ;;  %v4699_v56 = vadd.f32 0.2548296, %v4635_v44  ;;  %7878 = vpow2.f32 %v4973_v8  ;;  %v4907_v10 = vmul.f32 %v4843_v53, %v4011_v1  ;;  %6191 = vmatmul.mubr.msk.f32.gmra.mrb[90].mxu0 %vm763_vm0, %v13050_v33 }
 0x529   :  { %7279 = vmatprep.subr.bf16.mxu1 %v13048_v17  ;;  %v3820_v32 = vmul.f32 0.70710677, %v10501_v6  ;;  %v13051_v31 = vpack.c.bf16 %v10181_v38, %v10179_v12  ;;  %v4701_v60 = vadd.f32 0.2548296, %v4637_v59  ;;  %v10535_v37 = vsel %vm3878_vm8, 1.0, %v13025_v5  ;;  %3274 = vmatprep.mubr.f32.mxu1 %v13012_v28 }
 0x52a   :  { %13052 = vst [vmem:[#allocation26_spill] sm:$0xff] %v10535_v37  ;;  %v4977_v50 = vmul.f32 1.442695, %v4902_v34  ;;  %vm3883_vm9 = vcmp.ge.f32.partialorder %v10453_v3, 0.0  ;;  %3726 = vmatprep.mubr.f32.mxu0 %v13012_v28  ;;  %v4763_v1 = vmul.f32 %v10372_v57, %v4699_v56  ;;  %v4077_v53 = vmul.f32 0.3275911, %v4013_v16  ;;  %v10544_v23 = vpop.eup %7870 }
 0x52b   :  { %7281 = vmatpush1.bf16.msra.mxu1 %v13051_v31  ;;  %v4845_v12 = vsub.f32 0.0, %v4013_v16  ;;  %v4012_v38 = vand.u32 2147483647, %v3820_v32  ;;  %v13053_v8 = vpack.c.bf16 %v10193_v45, %v10191_v11  ;;  %13054 = vst [vmem:[#allocation51_spill] sm:$0xff] %v10544_v23  ;;  %v4765_v39 = vmul.f32 %v10384_v22, %v4701_v60  ;;  %v10550_v44 = vpop.eup %7872  ;;  %v13060_v60 = vld [vmem:[#allocation28_spill] sm:$0xff] }
 0x52c   :  { %7880 = vrcp.f32 %v4134_v14  ;;  %v4139_v34 = vadd.f32 1.0, %v4075_v24  ;;  %vm3885_vm10 = vcmp.ge.f32.partialorder %v10492_v0, 0.0  ;;  %6184 = vmatmul.mubr.msk.f32.gmra.mrb[28].mxu1 %vm763_vm0, %v13055_v43  ;;  %v5083_v57 = vmul.f32 %v10428_v36, %v4763_v1  ;;  %6192 = vmatmul.mubr.msk.f32.gmra.mrb[92].mxu0 %vm763_vm0, %v13055_v43  ;;  %v13062_v1 = vld [vmem:[#allocation22_spill] sm:$0xff] }
 0x52d   :  { %7283 = vmatprep.subr.bf16.mxu1 %v13053_v8  ;;  %v4987_v17 = vmul.f32 1.442695, %v4907_v10  ;;  %v4909_v59 = vmul.f32 %v4845_v12, %v4013_v16  ;;  %v4844_v33 = vsub.f32 0.0, %v4012_v38  ;;  %v13056_v11 = vpack.c.bf16 %v10205_v58, %v10195_v20  ;;  %3280 = vmatprep.mubr.f32.mxu1 %v13012_v28  ;;  %v13057_v20 = vld [vmem:[#allocation14_spill] sm:$0xff] }
 0x52e   :  { %v5085_v45 = vmul.f32 %v10444_v61, %v4765_v39  ;;  %v4076_v22 = vmul.f32 0.3275911, %v4012_v38  ;;  %v7535_v14 = vadd.f32 %v10298_v46, %v10175_v52  ;;  %v7520_v24 = vadd.f32 %v10301_v54, %v10152_v35  ;;  %3732 = vmatprep.mubr.f32.mxu0 %v13012_v28  ;;  %v13066_v39 = vld [vmem:[#allocation13_spill] sm:$0xff] }
 0x52f   :  { %7285 = vmatpush1.bf16.msra.mxu1 %v13056_v11  ;;  %v5147_v36 = vsub.f32 1.0, %v5083_v57  ;;  %7882 = vpow2.f32 %v4977_v50  ;;  %v4141_v16 = vadd.f32 1.0, %v4077_v53  ;;  %vm3884_vm11 = vcmp.ge.f32.partialorder %v3820_v32, 0.0  ;;  %v10568_v61 = vpop.eup %7874  ;;  %v13063_v53 = vld [vmem:[#allocation16_spill] sm:$0xff] }
 0x530   :  { %v13058_v58 = vpack.c.bf16 %v10209_v13, %v13057_v20  ;;  %13059 = vst [vmem:[#allocation27_spill] sm:$0xff] %v10568_v61  ;;  %v5149_v56 = vsub.f32 1.0, %v5085_v45  ;;  %v4991_v10 = vmul.f32 1.442695, %v4909_v59  ;;  %v4908_v46 = vmul.f32 %v4844_v33, %v4012_v38  ;;  %6185 = vmatmul.mubr.msk.f32.gmra.mrb[30].mxu1 %vm763_vm0, %v13060_v60  ;;  %v10572_v54 = vpop.eup %7876  ;;  %6193 = vmatmul.mubr.msk.f32.gmra.mrb[94].mxu0 %vm763_vm0, %v13060_v60  ;;  %v13069_v20 = vld [vmem:[#allocation33_spill] sm:$0xff] }
 0x531   :  { %v3822_v31 = vmul.f32 0.70710677, %v7535_v14  ;;  %v10577_v28 = vsel %vm3883_vm9, 1.0, %v13025_v5  ;;  %7884 = vrcp.f32 %v4139_v34  ;;  %v10580_v13 = vmul.f32 0.5, %v10462_v9  ;;  %v13067_v34 = vld [vmem:[#allocation18_spill] sm:$0xff] }
 0x532   :  { %7287 = vmatprep.subr.bf16.mxu1 %v13058_v58  ;;  %v3827_v50 = vmul.f32 0.70710677, %v7520_v24  ;;  %v13064_v12 = vpack.c.bf16 %v13062_v1, %v13063_v53  ;;  %7886 = vpow2.f32 %v4987_v17  ;;  %v10590_v38 = vsel %vm3885_vm10, 1.0, %v13025_v5  ;;  %v10595_v43 = vpop.eup %7878 }
 0x533   :  { %13061 = vst [vmem:[#allocation14_spill] sm:$0xff] %v10580_v13  ;;  %13065 = vst [vmem:[#allocation28_spill] sm:$0xff] %v10590_v38  ;;  %v4140_v3 = vadd.f32 1.0, %v4076_v22  ;;  %v4014_v8 = vand.u32 2147483647, %v3822_v31  ;;  %v13068_v9 = vpack.c.bf16 %v13066_v39, %v13067_v34  ;;  %v5211_v57 = vmul.f32 %v5147_v36, %v10314_v42  ;;  %v13070_v42 = vld [vmem:[#allocation34_spill] sm:$0xff] }
 0x534   :  { %7289 = vmatpush1.bf16.msra.mxu1 %v13064_v12  ;;  %7888 = vrcp.f32 %v4141_v16  ;;  %v10599_v59 = vmul.f32 0.5, %v10501_v6  ;;  %v10603_v17 = vsel %vm3884_vm11, 1.0, %v13025_v5  ;;  %v5213_v0 = vmul.f32 %v5149_v56, %v10327_v29  ;;  %v13071_v16 = vld [vmem:[#allocation21_spill] sm:$0xff]  ;;  %v13072_v6 = vld [vmem:[#allocation12_spill] sm:$0xff] }
 0x535   :  { %7291 = vmatprep.subr.bf16.mxu1 %v13068_v9  ;;  %7890 = vpow2.f32 %v4991_v10  ;;  %v4989_v33 = vmul.f32 1.442695, %v4908_v46  ;;  %v4846_v11 = vsub.f32 0.0, %v4014_v8  ;;  %v4078_v45 = vmul.f32 0.3275911, %v4014_v8  ;;  %v13077_v10 = vld [vmem:[#allocation25_spill] sm:$0xff] }
 0x536   :  { %v4019_v22 = vand.u32 2147483647, %v3827_v50  ;;  %v7536_v58 = vadd.f32 %v13069_v20, %v10162_v40  ;;  %v7521_v36 = vadd.f32 %v13070_v42, %v10166_v51  ;;  %v13073_v60 = vpack.c.bf16 %v13071_v16, %v13072_v6  ;;  %v10613_v32 = vpop.eup %7880  ;;  %v13078_v46 = vld [vmem:[#allocation23_spill] sm:$0xff] }
 0x537   :  { %13074 = vst [vmem:[#allocation22_spill] sm:$0xff] %v10613_v32  ;;  %7892 = vrcp.f32 %v4140_v3  ;;  %v10615_v1 = vmul.f32 0.5, %v7535_v14  ;;  %v4910_v29 = vmul.f32 %v4846_v11, %v4014_v8  ;;  %v10617_v56 = vmul.f32 0.5, %v7520_v24 }
 0x538   :  { %7293 = vmatpush1.bf16.msra.mxu1 %v13073_v60  ;;  %v13079_v53 = vpack.c.bf16 %v13077_v10, %v13078_v46  ;;  %v5275_v12 = vadd.f32 1.0, %v5211_v57  ;;  %vm3886_vm12 = vcmp.ge.f32.partialorder %v3822_v31, 0.0  ;;  %v4851_v39 = vsub.f32 0.0, %v4019_v22 }
 0x539   :  { %13075 = vst [vmem:[#allocation16_spill] sm:$0xff] %v10615_v1  ;;  %13076 = vst [vmem:[#allocation13_spill] sm:$0xff] %v10617_v56  ;;  %v3829_v34 = vmul.f32 0.70710677, %v7536_v58  ;;  %v5277_v9 = vadd.f32 1.0, %v5213_v0  ;;  %vm3891_vm13 = vcmp.ge.f32.partialorder %v3827_v50, 0.0  ;;  %v10622_v16 = vpop.eup %7882  ;;  %7894 = vpow2.f32 %v4989_v33 }
 0x53a   :  { %7295 = vmatprep.subr.bf16.mxu1 %v13079_v53  ;;  %v4083_v20 = vmul.f32 0.3275911, %v4019_v22  ;;  %v3828_v42 = vmul.f32 0.70710677, %v7521_v36  ;;  %13080 = vst [vmem:[#allocation18_spill] sm:$0xff] %v10622_v16  ;;  %v4142_v14 = vadd.f32 1.0, %v4078_v45  ;;  %v7537_v24 = vadd.f32 %v10318_v63, %v10175_v52 }
 0x53b   :  { %v4021_v3 = vand.u32 2147483647, %v3829_v34  ;;  %v13081_v8 = vpack.c.bf16 %v10278_v2, %v10276_v55  ;;  %v10630_v31 = vsel %vm3886_vm12, 1.0, %v13025_v5  ;;  %v4993_v57 = vmul.f32 1.442695, %v4910_v29  ;;  %v10635_v33 = vpop.eup %7884  ;;  %v13084_v45 = vld [vmem:[#allocation29_spill] sm:$0xff] }
 0x53c   :  { %13082 = vst [vmem:[#allocation33_spill] sm:$0xff] %v10630_v31  ;;  %v4915_v0 = vmul.f32 %v4851_v39, %v4019_v22  ;;  %v4020_v11 = vand.u32 2147483647, %v3828_v42  ;;  %v13083_v6 = vpack.c.bf16 %v10420_v30, %v10418_v7  ;;  %v10638_v60 = vmul.f32 %v5275_v12, %v13084_v45  ;;  %v10644_v10 = vpop.eup %7886  ;;  %v13085_v29 = vld [vmem:[#allocation30_spill] sm:$0xff] }
 0x53d   :  { %7297 = vmatpush1.bf16.msra.mxu1 %v13081_v8  ;;  %v10642_v63 = vsel %vm3891_vm13, 1.0, %v13025_v5  ;;  %v4085_v2 = vmul.f32 0.3275911, %v4021_v3  ;;  %v4853_v55 = vsub.f32 0.0, %v4021_v3  ;;  %v10647_v22 = vmul.f32 %v5277_v9, %v13085_v29 }
 0x53e   :  { %7299 = vmatprep.subr.bf16.mxu1 %v13083_v6  ;;  %v4147_v46 = vadd.f32 1.0, %v4083_v20  ;;  %v10649_v53 = vmul.f32 0.5, %v7536_v58  ;;  %v4084_v7 = vmul.f32 0.3275911, %v4020_v11  ;;  %v10651_v30 = vpop.eup %7888  ;;  %7896 = vrcp.f32 %v4142_v14 }
 0x53f   :  { %13086 = vst [vmem:[#allocation34_spill] sm:$0xff] %v10647_v22  ;;  %13088 = vst [vmem:[#allocation12_spill] sm:$0xff] %v10651_v30  ;;  %vm3893_vm14 = vcmp.ge.f32.partialorder %v3829_v34, 0.0  ;;  %v4852_v12 = vsub.f32 0.0, %v4020_v11  ;;  %v3830_v39 = vmul.f32 0.70710677, %v7537_v24  ;;  %v10653_v50 = vpop.eup %7890  ;;  %7898 = vpow2.f32 %v4993_v57 }
 0x540   :  { %13087 = vst [vmem:[#allocation21_spill] sm:$0xff] %v10649_v53  ;;  %13089 = vst [vmem:[#allocation25_spill] sm:$0xff] %v10653_v50  ;;  %v5003_v8 = vmul.f32 1.442695, %v4915_v0  ;;  %v7522_v6 = vadd.f32 %v10336_v47, %v10152_v35  ;;  %v7538_v9 = vadd.f32 %v10342_v21, %v10162_v40  ;;  %v4149_v20 = vadd.f32 1.0, %v4085_v2 }
 0x541   :  { %v4917_v58 = vmul.f32 %v4853_v55, %v4021_v3  ;;  %vm3892_vm15 = vcmp.ge.f32.partialorder %v3828_v42, 0.0  ;;  %v4022_v45 = vand.u32 2147483647, %v3830_v39  ;;  %v10659_v29 = vpop.eup %7892  ;;  %7900 = vrcp.f32 %v4147_v46 }
 0x542   :  { %v10662_v34 = vsel %vm3893_vm14, 1.0, %v13025_v5  ;;  %v10664_v14 = vmul.f32 0.5, %v7521_v36  ;;  %v4148_v57 = vadd.f32 1.0, %v4084_v7  ;;  %v4916_v0 = vmul.f32 %v4852_v12, %v4020_v11 }
 0x543   :  { %13090 = vst [vmem:[#allocation23_spill] sm:$0xff] %v10662_v34  ;;  %v4086_v53 = vmul.f32 0.3275911, %v4022_v45  ;;  %v4854_v13 = vsub.f32 0.0, %v4022_v45  ;;  %v3835_v47 = vmul.f32 0.70710677, %v7522_v6  ;;  %7902 = vpow2.f32 %v5003_v8  ;;  %v10671_v2 = vpop.eup %7894 }
 0x544   :  { %v10667_v21 = vsel %vm3892_vm15, 1.0, %v13025_v5  ;;  %v3837_v3 = vmul.f32 0.70710677, %v7538_v9  ;;  %v7523_v42 = vadd.f32 %v10358_v4, %v10166_v51  ;;  %7904 = vrcp.f32 %v4149_v20 }
 0x545   :  { %v5007_v55 = vmul.f32 1.442695, %v4917_v58  ;;  %v10673_v46 = vmul.f32 0.5, %v7537_v24  ;;  %v4027_v36 = vand.u32 2147483647, %v3835_v47  ;;  %7906 = vrcp.f32 %v4148_v57 }
 0x546   :  { %vm3894_vm0 = vcmp.ge.f32.partialorder %v3830_v39, 0.0  ;;  %v4918_v11 = vmul.f32 %v4854_v13, %v4022_v45  ;;  %v4029_v7 = vand.u32 2147483647, %v3837_v3  ;;  %v5005_v12 = vmul.f32 1.442695, %v4916_v0  ;;  %v13095_v39 = vld [vmem:[#allocation37_spill] sm:$0xff] }
 0x547   :  { %13091 = vst [vmem:[#allocation29_spill] sm:$0xff] %v10673_v46  ;;  %v4150_v8 = vadd.f32 1.0, %v4086_v53  ;;  %v4091_v1 = vmul.f32 0.3275911, %v4027_v36  ;;  %v4859_v34 = vsub.f32 0.0, %v4027_v36  ;;  %vm3899_vm1 = vcmp.ge.f32.partialorder %v3835_v47, 0.0 }
 0x548   :  { %v4093_v48 = vmul.f32 0.3275911, %v4029_v7  ;;  %v4861_v22 = vsub.f32 0.0, %v4029_v7  ;;  %v3836_v38 = vmul.f32 0.70710677, %v7523_v42  ;;  %v10675_v4 = vpop.eup %7896  ;;  %v10678_v20 = vsel %vm3894_vm0, 1.0, %v13025_v5 }
 0x549   :  { %13092 = vst [vmem:[#allocation30_spill] sm:$0xff] %v10675_v4  ;;  %13093 = vst [vmem:[#allocation52_spill] sm:$0xff] %v10678_v20  ;;  %v10680_v24 = vmul.f32 0.5, %v7522_v6  ;;  %v4923_v58 = vmul.f32 %v4859_v34, %v4027_v36  ;;  %v7539_v13 = vadd.f32 %v13095_v39, %v10175_v52  ;;  %v10684_v45 = vpop.eup %7898  ;;  %7908 = vpow2.f32 %v5007_v55 }
 0x54a   :  { %13096 = vst [vmem:[#allocation37_spill] sm:$0xff] %v10684_v45  ;;  %v5009_v53 = vmul.f32 1.442695, %v4918_v11  ;;  %v4925_v57 = vmul.f32 %v4861_v22, %v4029_v7  ;;  %v4028_v0 = vand.u32 2147483647, %v3836_v38  ;;  %7910 = vpow2.f32 %v5005_v12 }
 0x54b   :  { %13094 = vst [vmem:[#allocation53_spill] sm:$0xff] %v10680_v24  ;;  %v10687_v47 = vsel %vm3899_vm1, 1.0, %v13025_v5  ;;  %v4155_v46 = vadd.f32 1.0, %v4091_v1  ;;  %v10689_v31 = vmul.f32 0.5, %v7538_v9  ;;  %v10691_v20 = vpop.eup %7900  ;;  %7912 = vrcp.f32 %v4150_v8 }
 0x54c   :  { %13097 = vst [vmem:[#allocation54_spill] sm:$0xff] %v10687_v47  ;;  %vm3901_vm2 = vcmp.ge.f32.partialorder %v3837_v3, 0.0  ;;  %v4157_v6 = vadd.f32 1.0, %v4093_v48  ;;  %v4860_v34 = vsub.f32 0.0, %v4028_v0  ;;  %v5019_v36 = vmul.f32 1.442695, %v4923_v58 }
 0x54d   :  { %13098 = vst [vmem:[#allocation55_spill] sm:$0xff] %v10689_v31  ;;  %v4092_v39 = vmul.f32 0.3275911, %v4028_v0  ;;  %v3838_v37 = vmul.f32 0.70710677, %v7539_v13  ;;  %v7524_v22 = vadd.f32 %v10380_v26, %v10152_v35  ;;  %v10695_v55 = vpop.eup %7902  ;;  %7914 = vpow2.f32 %v5009_v53  ;;  %v13102_v53 = vld [vmem:[#allocation41_spill] sm:$0xff] }
 0x54e   :  { %v5023_v11 = vmul.f32 1.442695, %v4925_v57  ;;  %vm3900_vm3 = vcmp.ge.f32.partialorder %v3836_v38, 0.0  ;;  %v7540_v1 = vadd.f32 %v10382_v62, %v10162_v40  ;;  %v10699_v9 = vpop.eup %7904  ;;  %7916 = vrcp.f32 %v4155_v46  ;;  %v10871_v47 = vld [vmem:[#allocation6 + $0x1d0] sm:$0xff] }
 0x54f   :  { %13099 = vst [vmem:[#allocation56_spill] sm:$0xff] %v10699_v9  ;;  %v4924_v7 = vmul.f32 %v4860_v34, %v4028_v0  ;;  %v4030_v48 = vand.u32 2147483647, %v3838_v37  ;;  %v3843_v12 = vmul.f32 0.70710677, %v7524_v22  ;;  %v10701_v8 = vpop.eup %7906  ;;  %v10705_v58 = vsel %vm3901_vm2, 1.0, %v13025_v5 }
 0x550   :  { %13100 = vst [vmem:[#allocation57_spill] sm:$0xff] %v10705_v58  ;;  %7918 = vrcp.f32 %v4157_v6  ;;  %v10707_v26 = vmul.f32 0.5, %v7523_v42  ;;  %v7525_v57 = vadd.f32 %v13102_v53, %v10166_v51  ;;  %v4156_v62 = vadd.f32 1.0, %v4092_v39 }
 0x551   :  { %7920 = vpow2.f32 %v5019_v36  ;;  %v4862_v31 = vsub.f32 0.0, %v4030_v48  ;;  %v4035_v50 = vand.u32 2147483647, %v3843_v12  ;;  %v10713_v46 = vsel %vm3900_vm3, 1.0, %v13025_v5 }
 0x552   :  { %13101 = vst [vmem:[#allocation58_spill] sm:$0xff] %v10707_v26  ;;  %7922 = vpow2.f32 %v5023_v11  ;;  %13103 = vst [vmem:[#allocation41_spill] sm:$0xff] %v10713_v46  ;;  %v10715_v0 = vmul.f32 0.5, %v7539_v13  ;;  %v3845_v3 = vmul.f32 0.70710677, %v7540_v1  ;;  %vm3902_vm4 = vcmp.ge.f32.partialorder %v3838_v37, 0.0 }
 0x553   :  { %v5021_v34 = vmul.f32 1.442695, %v4924_v7  ;;  %v4094_v6 = vmul.f32 0.3275911, %v4030_v48  ;;  %v4867_v42 = vsub.f32 0.0, %v4035_v50  ;;  %v10717_v58 = vpop.eup %7908  ;;  %v4926_v45 = vmul.f32 %v4862_v31, %v4030_v48  ;;  %v13107_v13 = vld [vmem:[#allocation24_spill] sm:$0xff] }
 0x554   :  { %13104 = vst [vmem:[#allocation59_spill] sm:$0xff] %v10715_v0  ;;  %13105 = vst [vmem:[#allocation60_spill] sm:$0xff] %v10717_v58  ;;  %v10719_v53 = vmul.f32 0.5, %v7524_v22  ;;  %v4037_v36 = vand.u32 2147483647, %v3845_v3  ;;  %v10721_v61 = vpop.eup %7910  ;;  %7924 = vrcp.f32 %v4156_v62  ;;  %vm3907_vm5 = vcmp.ge.f32.partialorder %v3843_v12, 0.0 }
 0x555   :  { %v3844_v39 = vmul.f32 0.70710677, %v7525_v57  ;;  %v4099_v38 = vmul.f32 0.3275911, %v4035_v50  ;;  %v7541_v11 = vadd.f32 %v13107_v13, %v10175_v52  ;;  %v10725_v0 = vpop.eup %7912  ;;  %v10728_v37 = vsel %vm3902_vm4, 1.0, %v13025_v5 }
 0x556   :  { %13106 = vst [vmem:[#allocation61_spill] sm:$0xff] %v10719_v53  ;;  %13108 = vst [vmem:[#allocation24_spill] sm:$0xff] %v10725_v0  ;;  %v4931_v7 = vmul.f32 %v4867_v42, %v4035_v50  ;;  %v10730_v58 = vmul.f32 0.5, %v7540_v1  ;;  %v4869_v31 = vsub.f32 0.0, %v4037_v36  ;;  %7926 = vpow2.f32 %v5021_v34  ;;  %v13149_v53 = vld [vmem:[#allocation19_spill] sm:$0xff] }
 0x557   :  { %13109 = vst [vmem:[#allocation62_spill] sm:$0xff] %v10728_v37  ;;  %v4158_v22 = vadd.f32 1.0, %v4094_v6  ;;  %v4101_v48 = vmul.f32 0.3275911, %v4037_v36  ;;  %v4036_v16 = vand.u32 2147483647, %v3844_v39  ;;  %v10732_v9 = vpop.eup %7914  ;;  %v7526_v6 = vadd.f32 %v10416_v41, %v10152_v35 }
 0x558   :  { %13110 = vst [vmem:[#allocation63_spill] sm:$0xff] %v10730_v58  ;;  %13111 = vst [vmem:[#allocation64_spill] sm:$0xff] %v10732_v9  ;;  %v5025_v12 = vmul.f32 1.442695, %v4926_v45  ;;  %v10735_v62 = vsel %vm3907_vm5, 1.0, %v13025_v5  ;;  %v4933_v13 = vmul.f32 %v4869_v31, %v4037_v36  ;;  %v10737_v30 = vmul.f32 0.5, %v7525_v57  ;;  %v10739_v0 = vpop.eup %7916 }
 0x559   :  { %13112 = vst [vmem:[#allocation65_spill] sm:$0xff] %v10735_v62  ;;  %v4163_v37 = vadd.f32 1.0, %v4099_v38  ;;  %v4100_v50 = vmul.f32 0.3275911, %v4036_v16  ;;  %v4868_v1 = vsub.f32 0.0, %v4036_v16  ;;  %vm3909_vm6 = vcmp.ge.f32.partialorder %v3845_v3, 0.0 }
 0x55a   :  { %13113 = vst [vmem:[#allocation66_spill] sm:$0xff] %v10737_v30  ;;  %v3846_v42 = vmul.f32 0.70710677, %v7541_v11  ;;  %v10741_v58 = vpop.eup %7918  ;;  %v5035_v34 = vmul.f32 1.442695, %v4931_v7  ;;  %v13115_v45 = vld [vmem:[#allocation42_spill] sm:$0xff]  ;;  %7928 = vrcp.f32 %v4158_v22 }
 0x55b   :  { %13114 = vst [vmem:[#allocation67_spill] sm:$0xff] %v10741_v58  ;;  %v10747_v9 = vadd.f32 %v13115_v45, %v10162_v40  ;;  %v10749_v36 = vpop.eup %7920  ;;  %v4165_v57 = vadd.f32 1.0, %v4101_v48  ;;  %vm3908_vm7 = vcmp.ge.f32.partialorder %v3844_v39, 0.0  ;;  %7930 = vpow2.f32 %v5025_v12 }
 0x55c   :  { %13117 = vst [vmem:[#allocation68_spill] sm:$0xff] %v10749_v36  ;;  %v4038_v38 = vand.u32 2147483647, %v3846_v42  ;;  %v10751_v31 = vpop.eup %7922  ;;  %v5039_v4 = vmul.f32 1.442695, %v4933_v13  ;;  %v4932_v58 = vmul.f32 %v4868_v1, %v4036_v16  ;;  %7932 = vrcp.f32 %v4163_v37  ;;  %v10888_v36 = vld [vmem:[#allocation6 + $0x208] sm:$0xff] }
 0x55d   :  { %13116 = vst [vmem:[#allocation42_spill] sm:$0xff] %v10747_v9  ;;  %13118 = vst [vmem:[#allocation69_spill] sm:$0xff] %v10751_v31  ;;  %v3851_v7 = vmul.f32 0.70710677, %v7526_v6  ;;  %v10754_v3 = vsel %vm3909_vm6, 1.0, %v13025_v5  ;;  %v4164_v41 = vadd.f32 1.0, %v4100_v50  ;;  %7934 = vpow2.f32 %v5035_v34 }
 0x55e   :  { %13119 = vst [vmem:[#allocation70_spill] sm:$0xff] %v10754_v3  ;;  %v4870_v23 = vsub.f32 0.0, %v4038_v38  ;;  %v4102_v45 = vmul.f32 0.3275911, %v4038_v38  ;;  %v3853_v22 = vmul.f32 0.70710677, %v10747_v9  ;;  %v10757_v48 = vpop.eup %7924  ;;  %7936 = vrcp.f32 %v4165_v57 }
 0x55f   :  { %v4043_v19 = vand.u32 2147483647, %v3851_v7  ;;  %v10761_v12 = vsel %vm3908_vm7, 1.0, %v13025_v5  ;;  %v10763_v16 = vmul.f32 0.5, %v7541_v11  ;;  %7938 = vpow2.f32 %v5039_v4  ;;  %v13122_v9 = vld [vmem:[#allocation43_spill] sm:$0xff] }
 0x560   :  { %13120 = vst [vmem:[#allocation71_spill] sm:$0xff] %v10761_v12  ;;  %v4934_v37 = vmul.f32 %v4870_v23, %v4038_v38  ;;  %v5037_v13 = vmul.f32 1.442695, %v4932_v58  ;;  %v4045_v50 = vand.u32 2147483647, %v3853_v22  ;;  %v10765_v3 = vpop.eup %7926  ;;  %7940 = vrcp.f32 %v4164_v41 }
 0x561   :  { %13121 = vst [vmem:[#allocation72_spill] sm:$0xff] %v10763_v16  ;;  %v4875_v1 = vsub.f32 0.0, %v4043_v19  ;;  %vm3910_vm8 = vcmp.ge.f32.partialorder %v3846_v42, 0.0  ;;  %v4107_v34 = vmul.f32 0.3275911, %v4043_v19  ;;  %v7527_v31 = vadd.f32 %v13122_v9, %v10166_v51 }
 0x562   :  { %v4166_v57 = vadd.f32 1.0, %v4102_v45  ;;  %vm3915_vm9 = vcmp.ge.f32.partialorder %v3851_v7, 0.0  ;;  %vm3917_vm10 = vcmp.ge.f32.partialorder %v3853_v22, 0.0  ;;  %v4877_v39 = vsub.f32 0.0, %v4045_v50 }
 0x563   :  { %v5041_v32 = vmul.f32 1.442695, %v4934_v37  ;;  %v4939_v11 = vmul.f32 %v4875_v1, %v4043_v19  ;;  %v3852_v16 = vmul.f32 0.70710677, %v7527_v31  ;;  %v10771_v23 = vadd.f32 %v10442_v25, %v10175_v52 }
 0x564   :  { %7942 = vpow2.f32 %v5037_v13  ;;  %v10774_v4 = vsel %vm3910_vm8, 1.0, %v13025_v5  ;;  %v10776_v58 = vmul.f32 0.5, %v7526_v6  ;;  %v4109_v42 = vmul.f32 0.3275911, %v4045_v50  ;;  %v10778_v38 = vpop.eup %7928 }
 0x565   :  { %13123 = vst [vmem:[#allocation43_spill] sm:$0xff] %v10771_v23  ;;  %13124 = vst [vmem:[#allocation73_spill] sm:$0xff] %v10774_v4  ;;  %v10781_v9 = vsel %vm3915_vm9, 1.0, %v13025_v5  ;;  %v4171_v7 = vadd.f32 1.0, %v4107_v34  ;;  %v4044_v41 = vand.u32 2147483647, %v3852_v16  ;;  %v10784_v45 = vpop.eup %7930  ;;  %7944 = vrcp.f32 %v4166_v57 }
 0x566   :  { %13125 = vst [vmem:[#allocation74_spill] sm:$0xff] %v10776_v58  ;;  %13126 = vst [vmem:[#allocation75_spill] sm:$0xff] %v10778_v38  ;;  %v3854_v19 = vmul.f32 0.70710677, %v10771_v23  ;;  %v10788_v25 = vsel %vm3917_vm10, 1.0, %v13025_v5  ;;  %v4941_v37 = vmul.f32 %v4877_v39, %v4045_v50  ;;  %v7528_v6 = vadd.f32 %v10469_v15, %v10152_v35  ;;  %v10792_v13 = vpop.eup %7932 }
 0x567   :  { %13127 = vst [vmem:[#allocation76_spill] sm:$0xff] %v10781_v9  ;;  %13128 = vst [vmem:[#allocation77_spill] sm:$0xff] %v10784_v45  ;;  %7946 = vpow2.f32 %v5041_v32  ;;  %v5051_v1 = vmul.f32 1.442695, %v4939_v11  ;;  %v10794_v4 = vmul.f32 0.5, %v7527_v31  ;;  %v4876_v34 = vsub.f32 0.0, %v4044_v41  ;;  %v10796_v38 = vpop.eup %7934 }
 0x568   :  { %13129 = vst [vmem:[#allocation78_spill] sm:$0xff] %v10788_v25  ;;  %13130 = vst [vmem:[#allocation79_spill] sm:$0xff] %v10792_v13  ;;  %v4173_v23 = vadd.f32 1.0, %v4109_v42  ;;  %vm3916_vm11 = vcmp.ge.f32.partialorder %v3852_v16, 0.0  ;;  %v4108_v57 = vmul.f32 0.3275911, %v4044_v41  ;;  %v10798_v22 = vpop.eup %7936  ;;  %7948 = vrcp.f32 %v4171_v7 }
 0x569   :  { %13131 = vst [vmem:[#allocation80_spill] sm:$0xff] %v10794_v4  ;;  %13132 = vst [vmem:[#allocation81_spill] sm:$0xff] %v10796_v38  ;;  %v4046_v45 = vand.u32 2147483647, %v3854_v19  ;;  %v4940_v50 = vmul.f32 %v4876_v34, %v4044_v41  ;;  %v3859_v39 = vmul.f32 0.70710677, %v7528_v6  ;;  %v10802_v35 = vadd.f32 %v10473_v27, %v10162_v40  ;;  %v10804_v15 = vpop.eup %7938 }
 0x56a   :  { %13133 = vst [vmem:[#allocation82_spill] sm:$0xff] %v10798_v22  ;;  %13135 = vst [vmem:[#allocation84_spill] sm:$0xff] %v10804_v15  ;;  %v5055_v32 = vmul.f32 1.442695, %v4941_v37  ;;  %v13136_v25 = vld [vmem:[#allocation46_spill] sm:$0xff]  ;;  %v10808_v16 = vpop.eup %7940  ;;  %7950 = vpow2.f32 %v5051_v1  ;;  %v10811_v22 = vsel %vm3916_vm11, 1.0, %v13025_v5 }
 0x56b   :  { %13134 = vst [vmem:[#allocation83_spill] sm:$0xff] %v10802_v35  ;;  %v4110_v31 = vmul.f32 0.3275911, %v4046_v45  ;;  %v4878_v11 = vsub.f32 0.0, %v4046_v45  ;;  %v7529_v42 = vadd.f32 %v13136_v25, %v10166_v51  ;;  %13137 = vst [vmem:[#allocation46_spill] sm:$0xff] %v10811_v22  ;;  %vm3918_vm12 = vcmp.ge.f32.partialorder %v3854_v19, 0.0 }
 0x56c   :  { %v4051_v7 = vand.u32 2147483647, %v3859_v39  ;;  %7952 = vrcp.f32 %v4173_v23  ;;  %v4172_v41 = vadd.f32 1.0, %v4108_v57  ;;  %v5053_v40 = vmul.f32 1.442695, %v4940_v50  ;;  %v5454_v22 = vld [vmem:[#allocation6 + $0x198] sm:$0xff] }
 0x56d   :  { %v4942_v27 = vmul.f32 %v4878_v11, %v4046_v45  ;;  %vm3923_vm13 = vcmp.ge.f32.partialorder %v3859_v39, 0.0  ;;  %v10814_v15 = vmul.f32 0.70710677, %v10802_v35  ;;  %7954 = vpow2.f32 %v5055_v32  ;;  %v13141_v45 = vld [vmem:[#allocation48_spill] sm:$0xff]  ;;  %v10849_v38 = vld [vmem:[#allocation6 + $0x190] sm:$0xff] }
 0x56e   :  { %v4115_v34 = vmul.f32 0.3275911, %v4051_v7  ;;  %v4883_v37 = vsub.f32 0.0, %v4051_v7  ;;  %v10816_v58 = vpop.eup %7942  ;;  %v10819_v51 = vsel %vm3918_vm12, 1.0, %v13025_v5  ;;  %v4174_v25 = vadd.f32 1.0, %v4110_v31 }
 0x56f   :  { %13138 = vst [vmem:[#allocation85_spill] sm:$0xff] %v10814_v15  ;;  %13139 = vst [vmem:[#allocation86_spill] sm:$0xff] %v10816_v58  ;;  %v3860_v1 = vmul.f32 0.70710677, %v7529_v42  ;;  %v5057_v19 = vmul.f32 1.442695, %v4942_v27  ;;  %v10824_v57 = vadd.f32 %v13141_v45, %v10175_v52  ;;  %v10826_v50 = vpop.eup %7944  ;;  %7956 = vrcp.f32 %v4172_v41 }
 0x570   :  { %13140 = vst [vmem:[#allocation87_spill] sm:$0xff] %v10819_v51  ;;  %v4947_v4 = vmul.f32 %v4883_v37, %v4051_v7  ;;  %v4053_v23 = vand.u32 2147483647, %v10814_v15  ;;  %13143 = vst [vmem:[#allocation88_spill] sm:$0xff] %v10826_v50  ;;  %v10828_v11 = vmul.f32 0.5, %v7528_v6  ;;  %v10832_v32 = vsel %vm3923_vm13, 1.0, %v13025_v5 }
 0x571   :  { %13142 = vst [vmem:[#allocation48_spill] sm:$0xff] %v10824_v57  ;;  %13145 = vst [vmem:[#allocation90_spill] sm:$0xff] %v10832_v32  ;;  %v4052_v35 = vand.u32 2147483647, %v3860_v1  ;;  %v10834_v31 = vpop.eup %7946  ;;  %7958 = vpow2.f32 %v5053_v40  ;;  %v4179_v7 = vadd.f32 1.0, %v4115_v34  ;;  %v5443_v51 = vld [vmem:[#allocation6 + $0x140] sm:$0xff] }
 0x572   :  { %13144 = vst [vmem:[#allocation89_spill] sm:$0xff] %v10828_v11  ;;  %13146 = vst [vmem:[#allocation91_spill] sm:$0xff] %v10834_v31  ;;  %v4117_v27 = vmul.f32 0.3275911, %v4053_v23  ;;  %v4885_v37 = vsub.f32 0.0, %v4053_v23  ;;  %v5445_v15 = vld [vmem:[#allocation6 + $0x150] sm:$0xff]  ;;  %7960 = vrcp.f32 %v4174_v25  ;;  %v10836_v6 = vpop.eup %7948 }
 0x573   :  { %v5067_v52 = vmul.f32 1.442695, %v4947_v4  ;;  %v4116_v45 = vmul.f32 0.3275911, %v4052_v35  ;;  %v4884_v50 = vsub.f32 0.0, %v4052_v35  ;;  %v5448_v41 = vld [vmem:[#allocation6 + $0x168] sm:$0xff]  ;;  %7962 = vpow2.f32 %v5057_v19 }
 0x574   :  { %13147 = vst [vmem:[#allocation92_spill] sm:$0xff] %v10836_v6  ;;  %v4181_v39 = vadd.f32 1.0, %v4117_v27  ;;  %vm3924_vm14 = vcmp.ge.f32.partialorder %v3860_v1, 0.0  ;;  %v10839_v11 = vmul.f32 0.70710677, %v10824_v57  ;;  %v5450_v31 = vld [vmem:[#allocation6 + $0x178] sm:$0xff]  ;;  %v7300_v30 = vpack.c.bf16 %v5445_v15, %v5443_v51  ;;  %v10842_v62 = vpop.eup %7950 }
 0x575   :  { %v5447_v40 = vld [vmem:[#allocation6 + $0x160] sm:$0xff]  ;;  %v4180_v34 = vadd.f32 1.0, %v4116_v45  ;;  %v4948_v32 = vmul.f32 %v4884_v50, %v4052_v35  ;;  %v4252_v9 = vmul.f32 1.0614054, %v13149_v53  ;;  %v5449_v25 = vld [vmem:[#allocation6 + $0x170] sm:$0xff]  ;;  %v5452_v4 = vld [vmem:[#allocation6 + $0x188] sm:$0xff]  ;;  %7964 = vrcp.f32 %v4179_v7 }
 0x576   :  { %13148 = vst [vmem:[#allocation93_spill] sm:$0xff] %v10839_v11  ;;  %13150 = vst [vmem:[#allocation19_spill] sm:$0xff] %v10842_v62  ;;  %v4949_v12 = vmul.f32 %v4885_v37, %v4053_v23  ;;  %v10844_v19 = vmul.f32 0.5, %v7529_v42  ;;  %v4054_v27 = vand.u32 2147483647, %v10839_v11  ;;  %v10847_v57 = vld [vmem:[#allocation6 + $0x180] sm:$0xff]  ;;  %v10859_v50 = vpop.eup %7952  ;;  %7966 = vpow2.f32 %v5067_v52  ;;  %7301 = vmatpush1.bf16.msra.mxu1 %v7300_v30 }
 0x577   :  { %v10851_v45 = vld [vmem:[#allocation6 + $0x1a8] sm:$0xff]  ;;  %v10853_v35 = vld [vmem:[#allocation6 + $0x1b8] sm:$0xff]  ;;  %v10855_v15 = vld [vmem:[#allocation6 + $0x1a0] sm:$0xff]  ;;  %13152 = vst [vmem:[#allocation95_spill] sm:$0xff] %v10859_v50  ;;  %v10863_v42 = vsel %vm3924_vm14, 1.0, %v13025_v5  ;;  %7968 = vrcp.f32 %v4181_v39  ;;  %v7302_v24 = vpack.c.bf16 %v5450_v31, %v5448_v41  ;;  %v10875_v1 = vpop.eup %7954  ;;  %v7304_v30 = vpack.c.bf16 %v5449_v25, %v5447_v40 }
 0x578   :  { %13151 = vst [vmem:[#allocation94_spill] sm:$0xff] %v10844_v19  ;;  %v10857_v51 = vld [vmem:[#allocation6 + $0x1b0] sm:$0xff]  ;;  %13153 = vst [vmem:[#allocation96_spill] sm:$0xff] %v10863_v42  ;;  %v5069_v23 = vmul.f32 1.442695, %v4948_v32  ;;  %v10865_v37 = vld [vmem:[#allocation6 + $0x1c8] sm:$0xff]  ;;  %7970 = vrcp.f32 %v4180_v34  ;;  %v7306_v32 = vpack.c.bf16 %v5454_v22, %v5452_v4  ;;  %v7308_v25 = vpack.c.bf16 %v10849_v38, %v10847_v57 }
 0x579   :  { %v4316_v7 = vadd.f32 -1.4531521, %v4252_v9  ;;  %v10867_v11 = vld [vmem:[#allocation6 + $0x1d8] sm:$0xff]  ;;  %v4118_v19 = vmul.f32 0.3275911, %v4054_v27  ;;  %v4886_v62 = vsub.f32 0.0, %v4054_v27  ;;  %7303 = vmatprep.subr.bf16.mxu1 %v7302_v24  ;;  %v10894_v22 = vpop.eup %7956 }
 0x57a   :  { %v10869_v58 = vld [vmem:[#allocation6 + $0x1c0] sm:$0xff]  ;;  %v10873_v52 = vld [vmem:[#allocation6 + $0x1e8] sm:$0xff]  ;;  %13154 = vst [vmem:[#allocation97_spill] sm:$0xff] %v10875_v1  ;;  %v10878_v5 = vld [vmem:[#allocation6 + $0x1f8] sm:$0xff]  ;;  %v10884_v31 = vmul.f32 1.442695, %v4949_v12  ;;  %7972 = vpow2.f32 %v5069_v23  ;;  %7305 = vmatpush1.bf16.msra.mxu1 %v7304_v30  ;;  %v7310_v12 = vpack.c.bf16 %v10853_v35, %v10851_v45  ;;  %v7314_v23 = vpack.c.bf16 %v10867_v11, %v10865_v37 }
 0x57b   :  { %v4380_v9 = vmul.f32 %v13149_v53, %v4316_v7  ;;  %v10880_v50 = vld [vmem:[#allocation6 + $0x1e0] sm:$0xff]  ;;  %v10882_v39 = vld [vmem:[#allocation6 + $0x1f0] sm:$0xff]  ;;  %v4182_v41 = vadd.f32 1.0, %v4118_v19  ;;  %v10886_v42 = vmul.f32 %v4886_v62, %v4054_v27  ;;  %v10890_v34 = vld [vmem:[#allocation6 + $0x218] sm:$0xff]  ;;  %13157 = vst [vmem:[#allocation100_spill] sm:$0xff] %v10894_v22  ;;  %v7312_v62 = vpack.c.bf16 %v10857_v51, %v10855_v15  ;;  %v10908_v27 = vpop.eup %7958  ;;  %7307 = vmatprep.subr.bf16.mxu1 %v7306_v32 }
 0x57c   :  { %13155 = vst [vmem:[#allocation98_spill] sm:$0xff] %v10884_v31  ;;  %v10892_v7 = vld [vmem:[#allocation6 + $0x200] sm:$0xff]  ;;  %v10902_v24 = vld [vmem:[#allocation6 + $0x210] sm:$0xff]  ;;  %v10904_v4 = vld [vmem:[#allocation6 + $0x228] sm:$0xff]  ;;  %v10922_v51 = vpop.eup %7960  ;;  %v4260_v37 = vmul.f32 1.0614054, %v10572_v54 }
 0x57d   :  { %13156 = vst [vmem:[#allocation99_spill] sm:$0xff] %v10886_v42  ;;  %v4444_v40 = vadd.f32 1.4214138, %v4380_v9  ;;  %v10906_v19 = vld [vmem:[#allocation6 + $0x238] sm:$0xff]  ;;  %13158 = vst [vmem:[#allocation101_spill] sm:$0xff] %v10908_v27  ;;  %7974 = vrcp.f32 %v4182_v41  ;;  %v10916_v45 = vld [vmem:[#allocation6 + $0x220] sm:$0xff]  ;;  %v10936_v38 = vpop.eup %7962 }
 0x57e   :  { %v10918_v35 = vld [vmem:[#allocation6 + $0x230] sm:$0xff]  ;;  %v10920_v15 = vld [vmem:[#allocation6 + $0x248] sm:$0xff]  ;;  %13159 = vst [vmem:[#allocation102_spill] sm:$0xff] %v10922_v51  ;;  %v10930_v32 = vld [vmem:[#allocation6 + $0x258] sm:$0xff]  ;;  %v4268_v11 = vmul.f32 1.0614054, %v10659_v29  ;;  %7309 = vmatpush1.bf16.msra.mxu1 %v7308_v25 }
 0x57f   :  { %v4508_v9 = vmul.f32 %v13149_v53, %v4444_v40  ;;  %v10932_v41 = vld [vmem:[#allocation6 + $0x240] sm:$0xff]  ;;  %v10934_v57 = vld [vmem:[#allocation6 + $0x250] sm:$0xff]  ;;  %13161 = vst [vmem:[#allocation104_spill] sm:$0xff] %v10936_v38  ;;  %v4259_v40 = vmul.f32 1.0614054, %v10530_v18  ;;  %v10944_v31 = vld [vmem:[#allocation6 + $0x268] sm:$0xff]  ;;  %v10951_v1 = vpop.eup %7964  ;;  %7311 = vmatprep.subr.bf16.mxu1 %v7310_v12 }
 0x580   :  { %13160 = vst [vmem:[#allocation103_spill] sm:$0xff] %v10932_v41  ;;  %v10946_v51 = vld [vmem:[#allocation6 + $0x278] sm:$0xff]  ;;  %v4324_v27 = vadd.f32 -1.4531521, %v4260_v37  ;;  %v4267_v26 = vmul.f32 1.0614054, %v10635_v33  ;;  %v10956_v13 = vpop.eup %7966 }
 0x581   :  { %v4572_v42 = vadd.f32 -0.28449672, %v4508_v9  ;;  %13162 = vst [vmem:[#allocation105_spill] sm:$0xff] %v10951_v1  ;;  %v4323_v6 = vadd.f32 -1.4531521, %v4259_v40  ;;  %13163 = vst [vmem:[#allocation106_spill] sm:$0xff] %v10956_v13  ;;  %v10962_v46 = vpop.eup %7968 }
 0x582   :  { %v4332_v22 = vadd.f32 -1.4531521, %v4268_v11  ;;  %v4276_v56 = vmul.f32 1.0614054, %v10701_v8  ;;  %v4388_v9 = vmul.f32 %v10572_v54, %v4324_v27  ;;  %v4331_v37 = vadd.f32 -1.4531521, %v4267_v26  ;;  %v10967_v1 = vpop.eup %7970  ;;  %7313 = vmatpush1.bf16.msra.mxu1 %v7312_v62 }
 0x583   :  { %v4636_v25 = vmul.f32 %v13149_v53, %v4572_v42  ;;  %13164 = vst [vmem:[#allocation107_spill] sm:$0xff] %v10962_v46  ;;  %v4387_v12 = vmul.f32 %v10530_v18, %v4323_v6  ;;  %v4275_v30 = vmul.f32 1.0614054, %v10691_v20  ;;  %13165 = vst [vmem:[#allocation108_spill] sm:$0xff] %v10967_v1  ;;  %7315 = vmatprep.subr.bf16.mxu1 %v7314_v23  ;;  %v4284_v62 = vmul.f32 1.0614054, %v10757_v48 }
 0x584   :  { %v4396_v11 = vmul.f32 %v10659_v29, %v4332_v22  ;;  %v4340_v40 = vadd.f32 -1.4531521, %v4276_v56  ;;  %v4452_v42 = vadd.f32 1.4214138, %v4388_v9  ;;  %v4395_v27 = vmul.f32 %v10635_v33, %v4331_v37  ;;  %v10972_v38 = vpop.eup %7972 }
 0x585   :  { %v4700_v13 = vadd.f32 0.2548296, %v4636_v25  ;;  %13166 = vst [vmem:[#allocation109_spill] sm:$0xff] %v10972_v38  ;;  %v4451_v46 = vadd.f32 1.4214138, %v4387_v12  ;;  %v13167_v12 = vld [vmem:[#allocation47_spill] sm:$0xff] }
 0x586   :  { %v4460_v6 = vadd.f32 1.4214138, %v4396_v11  ;;  %v4404_v22 = vmul.f32 %v10701_v8, %v4340_v40  ;;  %v4339_v56 = vadd.f32 -1.4531521, %v4275_v30  ;;  %v4516_v1 = vmul.f32 %v10572_v54, %v4452_v42 }
 0x587   :  { %v4764_v41 = vmul.f32 %v13149_v53, %v4700_v13  ;;  %v4459_v25 = vadd.f32 1.4214138, %v4395_v27  ;;  %v10978_v9 = vpop.eup %7974  ;;  %v4515_v37 = vmul.f32 %v10530_v18, %v4451_v46  ;;  %v13168_v30 = vpack.c.bf16 %v10871_v47, %v10869_v58 }
 0x588   :  { %v4524_v26 = vmul.f32 %v10659_v29, %v4460_v6  ;;  %v4468_v38 = vadd.f32 1.4214138, %v4404_v22  ;;  %v4403_v23 = vmul.f32 %v10691_v20, %v4339_v56  ;;  %v4580_v53 = vadd.f32 -0.28449672, %v4516_v1 }
 0x589   :  { %v5084_v11 = vmul.f32 %v13167_v12, %v4764_v41  ;;  %7317 = vmatpush1.bf16.msra.mxu1 %v13168_v30  ;;  %v4523_v13 = vmul.f32 %v10635_v33, %v4459_v25  ;;  %v4348_v40 = vadd.f32 -1.4531521, %v4284_v62  ;;  %v13169_v42 = vpack.c.bf16 %v10878_v5, %v10873_v52  ;;  %v13170_v5 = vld [vmem:[#allocation35_spill] sm:$0xff] }
 0x58a   :  { %v4579_v46 = vadd.f32 -0.28449672, %v4515_v37  ;;  %v4588_v27 = vadd.f32 -0.28449672, %v4524_v26  ;;  %v4532_v6 = vmul.f32 %v10701_v8, %v4468_v38  ;;  %v4467_v22 = vadd.f32 1.4214138, %v4403_v23 }
 0x58b   :  { %7319 = vmatprep.subr.bf16.mxu1 %v13169_v42  ;;  %v5148_v56 = vsub.f32 1.0, %v5084_v11  ;;  %v4644_v41 = vmul.f32 %v10572_v54, %v4580_v53  ;;  %v4587_v12 = vadd.f32 -0.28449672, %v4523_v13  ;;  %v4412_v47 = vmul.f32 %v10757_v48, %v4348_v40 }
 0x58c   :  { %v4643_v58 = vmul.f32 %v10530_v18, %v4579_v46  ;;  %v4652_v1 = vmul.f32 %v10659_v29, %v4588_v27  ;;  %v4596_v25 = vadd.f32 -0.28449672, %v4532_v6  ;;  %v4531_v62 = vmul.f32 %v10691_v20, %v4467_v22 }
 0x58d   :  { %v5212_v52 = vmul.f32 %v5148_v56, %v13170_v5  ;;  %v13171_v26 = vpack.c.bf16 %v10882_v39, %v10880_v50  ;;  %v4708_v38 = vadd.f32 0.2548296, %v4644_v41  ;;  %v4651_v37 = vmul.f32 %v10635_v33, %v4587_v12  ;;  %v13173_v41 = vld [vmem:[#allocation31_spill] sm:$0xff] }
 0x58e   :  { %v4476_v23 = vadd.f32 1.4214138, %v4412_v47  ;;  %v13172_v11 = vpack.c.bf16 %v10890_v34, %v10888_v36  ;;  %v4707_v30 = vadd.f32 0.2548296, %v4643_v58  ;;  %v4716_v53 = vadd.f32 0.2548296, %v4652_v1 }
 0x58f   :  { %7321 = vmatpush1.bf16.msra.mxu1 %v13171_v26  ;;  %v4660_v13 = vmul.f32 %v10701_v8, %v4596_v25  ;;  %v4595_v40 = vadd.f32 -0.28449672, %v4531_v62  ;;  %v5276_v42 = vadd.f32 1.0, %v5212_v52  ;;  %v4772_v46 = vmul.f32 %v10572_v54, %v4708_v38  ;;  %v11011_v36 = vld [vmem:[#allocation6 + $0x260] sm:$0xff]  ;;  %v11013_v34 = vld [vmem:[#allocation6 + $0x270] sm:$0xff] }
 0x590   :  { %7323 = vmatprep.subr.bf16.mxu1 %v13172_v11  ;;  %v4715_v27 = vadd.f32 0.2548296, %v4651_v37  ;;  %v4540_v50 = vmul.f32 %v10757_v48, %v4476_v23  ;;  %v4771_v39 = vmul.f32 %v10530_v18, %v4707_v30  ;;  %v4780_v6 = vmul.f32 %v10659_v29, %v4716_v53  ;;  %v13174_v38 = vld [vmem:[#allocation45_spill] sm:$0xff]  ;;  %v13176_v30 = vld [vmem:[#allocation40_spill] sm:$0xff] }
 0x591   :  { %v4724_v22 = vadd.f32 0.2548296, %v4660_v13  ;;  %v4659_v56 = vmul.f32 %v10691_v20, %v4595_v40  ;;  %v5340_v12 = vmul.f32 %v5276_v42, %v13173_v41  ;;  %v5092_v47 = vmul.f32 %v10595_v43, %v4772_v46  ;;  %v11050_v41 = vld [vmem:[#allocation6 + $0x290] sm:$0xff] }
 0x592   :  { %v4779_v54 = vmul.f32 %v10635_v33, %v4715_v27  ;;  %v4604_v58 = vadd.f32 -0.28449672, %v4540_v50  ;;  %v5091_v1 = vmul.f32 %v10550_v44, %v4771_v39  ;;  %v5100_v18 = vmul.f32 %v10671_v2, %v4780_v6  ;;  %v5484_v6 = vld [vmem:[#allocation6 + $0x288] sm:$0xff] }
 0x593   :  { %v4788_v29 = vmul.f32 %v10701_v8, %v4724_v22  ;;  %v4723_v25 = vadd.f32 0.2548296, %v4659_v56  ;;  %5735 = vmatprep.mubr.f32.mxu1 %v5340_v12  ;;  %v5156_v62 = vsub.f32 1.0, %v5092_v47  ;;  %v7336_v26 = vpack.c.bf16 %v11013_v34, %v11011_v36  ;;  %v5486_v22 = vld [vmem:[#allocation6 + $0x298] sm:$0xff]  ;;  %v13180_v12 = vld [vmem:[#allocation17_spill] sm:$0xff] }
 0x594   :  { %v5099_v5 = vmul.f32 %v10644_v10, %v4779_v54  ;;  %v4668_v52 = vmul.f32 %v10757_v48, %v4604_v58  ;;  %5736 = vmatmul.mubr.f32.vlgmr.msra.gmra.mrb[32].mxu1 %v10638_v60  ;;  %v5155_v43 = vsub.f32 1.0, %v5091_v1  ;;  %v5164_v33 = vsub.f32 1.0, %v5100_v18 }
 0x595   :  { %v5108_v44 = vmul.f32 %v10721_v61, %v4788_v29  ;;  %v4787_v2 = vmul.f32 %v10691_v20, %v4723_v25  ;;  %v5220_v8 = vmul.f32 %v5156_v62, %v13174_v38  ;;  %v13175_v37 = vpack.c.bf16 %v10902_v24, %v10892_v7  ;;  %v11063_v62 = vld [vmem:[#allocation6 + $0x2a0] sm:$0xff] }
 0x596   :  { %v5163_v10 = vsub.f32 1.0, %v5099_v5  ;;  %v4732_v23 = vadd.f32 0.2548296, %v4668_v52  ;;  %v4283_v11 = vmul.f32 1.0614054, %v10739_v0  ;;  %v5219_v53 = vmul.f32 %v5155_v43, %v13176_v30  ;;  %v11071_v52 = vld [vmem:[#allocation6 + $0x2c8] sm:$0xff] }
 0x597   :  { %7325 = vmatpush1.bf16.msra.mxu1 %v13175_v37  ;;  %v13177_v60 = vpack.c.bf16 %v10906_v19, %v10904_v4  ;;  %v5228_v61 = vmul.f32 %v5164_v33, %v10603_v17  ;;  %v5172_v13 = vsub.f32 1.0, %v5108_v44  ;;  %v5107_v20 = vmul.f32 %v10695_v55, %v4787_v2  ;;  %v13178_v4 = vld [vmem:[#allocation39_spill] sm:$0xff]  ;;  %v13184_v44 = vld [vmem:[#allocation41_spill] sm:$0xff] }
 0x598   :  { %v5284_v40 = vadd.f32 1.0, %v5220_v8  ;;  %v5227_v42 = vmul.f32 %v5163_v10, %v10577_v28  ;;  %v4796_v7 = vmul.f32 %v10757_v48, %v4732_v23  ;;  %v4347_v24 = vadd.f32 -1.4531521, %v4283_v11  ;;  %v11048_v48 = vld [vmem:[#allocation6 + $0x280] sm:$0xff]  ;;  %v11073_v43 = vld [vmem:[#allocation6 + $0x2d8] sm:$0xff]  ;;  %v13186_v10 = vld [vmem:[#allocation13_spill] sm:$0xff] }
 0x599   :  { %7327 = vmatprep.subr.bf16.mxu1 %v13177_v60  ;;  %v5283_v46 = vadd.f32 1.0, %v5219_v53  ;;  %v5292_v27 = vadd.f32 1.0, %v5228_v61  ;;  %v5236_v50 = vmul.f32 %v5172_v13, %v10667_v21  ;;  %v5171_v39 = vsub.f32 1.0, %v5107_v20  ;;  %v13188_v53 = vld [vmem:[#allocation100_spill] sm:$0xff] }
 0x59a   :  { %v5348_v19 = vmul.f32 %v5284_v40, %v13178_v4  ;;  %v13179_v17 = vpack.c.bf16 %v10918_v35, %v10916_v45  ;;  %v5291_v55 = vadd.f32 1.0, %v5227_v42  ;;  %v5116_v56 = vmul.f32 %v10765_v3, %v4796_v7  ;;  %v11058_v35 = vld [vmem:[#allocation6 + $0x2a8] sm:$0xff]  ;;  %v11060_v3 = vld [vmem:[#allocation6 + $0x2b8] sm:$0xff]  ;;  %v11090_v61 = vld [vmem:[#allocation6 + $0x2c0] sm:$0xff] }
 0x59b   :  { %v4411_v28 = vmul.f32 %v10739_v0, %v4347_v24  ;;  %v5347_v21 = vmul.f32 %v5283_v46, %v13180_v12  ;;  %v5356_v47 = vmul.f32 %v5292_v27, %v10599_v59  ;;  %v13181_v54 = vpack.c.bf16 %v10930_v32, %v10920_v15  ;;  %v11065_v59 = vld [vmem:[#allocation6 + $0x2b0] sm:$0xff]  ;;  %v13189_v24 = vld [vmem:[#allocation92_spill] sm:$0xff] }
 0x59c   :  { %7329 = vmatpush1.bf16.msra.mxu1 %v13179_v17  ;;  %v5300_v58 = vadd.f32 1.0, %v5236_v50  ;;  %v5235_v45 = vmul.f32 %v5171_v39, %v10642_v63  ;;  %5741 = vmatprep.mubr.f32.mxu1 %v5348_v19  ;;  %v5355_v1 = vmul.f32 %v5291_v55, %v10513_v49  ;;  %v5180_v18 = vsub.f32 1.0, %v5116_v56  ;;  %v13182_v49 = vld [vmem:[#allocation103_spill] sm:$0xff]  ;;  %v11094_v7 = vld [vmem:[#allocation6 + $0x2d0] sm:$0xff]  ;;  %v13190_v27 = vld [vmem:[#allocation108_spill] sm:$0xff] }
 0x59d   :  { %7331 = vmatprep.subr.bf16.mxu1 %v13181_v54  ;;  %v4475_v29 = vadd.f32 1.4214138, %v4411_v28  ;;  %v7338_v25 = vpack.c.bf16 %v5486_v22, %v5484_v6  ;;  %5742 = vmatmul.mubr.f32.gmra.mrb[34].mxu1 %v5347_v21  ;;  %v4292_v63 = vmul.f32 1.0614054, %v10808_v16  ;;  %v7340_v5 = vpack.c.bf16 %v11050_v41, %v11048_v48  ;;  %v13191_v39 = vld [vmem:[#allocation58_spill] sm:$0xff]  ;;  %v13192_v19 = vld [vmem:[#allocation105_spill] sm:$0xff] }
 0x59e   :  { %v5364_v15 = vmul.f32 %v5300_v58, %v10664_v14  ;;  %v5299_v32 = vadd.f32 1.0, %v5235_v45  ;;  %5747 = vmatprep.mubr.f32.mxu1 %v5356_v47  ;;  %v13183_v33 = vpack.c.bf16 %v10934_v57, %v13182_v49  ;;  %v5244_v2 = vmul.f32 %v5180_v18, %v13184_v44  ;;  %v13185_v14 = vld [vmem:[#allocation79_spill] sm:$0xff]  ;;  %v5496_v58 = vld [vmem:[#allocation6 + $0x2e8] sm:$0xff] }
 0x59f   :  { %v4539_v38 = vmul.f32 %v10739_v0, %v4475_v29  ;;  %v4291_v8 = vmul.f32 1.0614054, %v13185_v14  ;;  %v7342_v37 = vpack.c.bf16 %v11060_v3, %v11058_v35  ;;  %v13187_v11 = vpack.c.bf16 %v10946_v51, %v10944_v31  ;;  %v5498_v45 = vld [vmem:[#allocation6 + $0x2f8] sm:$0xff]  ;;  %v11115_v18 = vld [vmem:[#allocation6 + $0x2e0] sm:$0xff]  ;;  %v11117_v29 = vld [vmem:[#allocation6 + $0x2f0] sm:$0xff] }
 0x5a0   :  { %7333 = vmatpush1.bf16.msra.mxu1 %v13183_v33  ;;  %v5363_v23 = vmul.f32 %v5299_v32, %v13186_v10  ;;  %v4356_v30 = vadd.f32 -1.4531521, %v4292_v63  ;;  %v4300_v60 = vmul.f32 1.0614054, %v13188_v53  ;;  %v7344_v57 = vpack.c.bf16 %v11065_v59, %v11063_v62 }
 0x5a1   :  { %7335 = vmatprep.subr.bf16.mxu1 %v13187_v11  ;;  %v5308_v13 = vadd.f32 1.0, %v5244_v2  ;;  %v4603_v20 = vadd.f32 -0.28449672, %v4539_v38  ;;  %v4355_v40 = vadd.f32 -1.4531521, %v4291_v8  ;;  %v7346_v42 = vpack.c.bf16 %v11073_v43, %v11071_v52  ;;  %5748 = vmatmul.mubr.f32.gmra.mrb[36].mxu1 %v5355_v1  ;;  %v13194_v52 = vld [vmem:[#allocation68_spill] sm:$0xff] }
 0x5a2   :  { %v4420_v31 = vmul.f32 %v10808_v16, %v4356_v30  ;;  %v4364_v51 = vadd.f32 -1.4531521, %v4300_v60  ;;  %v4299_v46 = vmul.f32 1.0614054, %v13189_v24  ;;  %v4308_v50 = vmul.f32 1.0614054, %v13190_v27  ;;  %5753 = vmatprep.mubr.f32.mxu1 %v5364_v15 }
 0x5a3   :  { %v5372_v6 = vmul.f32 %v5308_v13, %v13191_v39  ;;  %v4667_v22 = vmul.f32 %v10739_v0, %v4603_v20  ;;  %v4419_v4 = vmul.f32 %v13185_v14, %v4355_v40  ;;  %v4307_v17 = vmul.f32 1.0614054, %v13192_v19  ;;  %v13195_v13 = vld [vmem:[#allocation54_spill] sm:$0xff] }
 0x5a4   :  { %7337 = vmatpush1.bf16.msra.mxu1 %v7336_v26  ;;  %v4484_v55 = vadd.f32 1.4214138, %v4420_v31  ;;  %v4428_v56 = vmul.f32 %v13188_v53, %v4364_v51  ;;  %v4363_v28 = vadd.f32 -1.4531521, %v4299_v46  ;;  %v4372_v48 = vadd.f32 -1.4531521, %v4308_v50 }
 0x5a5   :  { %7339 = vmatprep.subr.bf16.mxu1 %v7338_v25  ;;  %v4731_v41 = vadd.f32 0.2548296, %v4667_v22  ;;  %v4483_v12 = vadd.f32 1.4214138, %v4419_v4  ;;  %v7348_v21 = vpack.c.bf16 %v11094_v7, %v11090_v61  ;;  %v4371_v47 = vadd.f32 -1.4531521, %v4307_v17  ;;  %5754 = vmatmul.mubr.f32.gmra.mrb[38].mxu1 %v5363_v23 }
 0x5a6   :  { %v4548_v36 = vmul.f32 %v10808_v16, %v4484_v55  ;;  %v4492_v34 = vadd.f32 1.4214138, %v4428_v56  ;;  %v4427_v26 = vmul.f32 %v13189_v24, %v4363_v28  ;;  %v4436_v54 = vmul.f32 %v13190_v27, %v4372_v48  ;;  %5759 = vmatprep.mubr.f32.mxu1 %v5372_v6  ;;  %v13193_v25 = vld [vmem:[#allocation49_spill] sm:$0xff]  ;;  %v13196_v4 = vld [vmem:[#allocation86_spill] sm:$0xff] }
 0x5a7   :  { %v4795_v35 = vmul.f32 %v10739_v0, %v4731_v41  ;;  %v4547_v3 = vmul.f32 %v13185_v14, %v4483_v12  ;;  %v4435_v1 = vmul.f32 %v13192_v19, %v4371_v47  ;;  %v4254_v62 = vmul.f32 1.0614054, %v13193_v25  ;;  %v5502_v48 = vld [vmem:[#allocation6 + $0x318] sm:$0xff]  ;;  %v13197_v41 = vld [vmem:[#allocation53_spill] sm:$0xff] }
 0x5a8   :  { %7341 = vmatpush1.bf16.msra.mxu1 %v7340_v5  ;;  %v4612_v59 = vadd.f32 -0.28449672, %v4548_v36  ;;  %v4556_v15 = vmul.f32 %v13188_v53, %v4492_v34  ;;  %v4491_v32 = vadd.f32 1.4214138, %v4427_v26  ;;  %v4500_v63 = vadd.f32 1.4214138, %v4436_v54 }
 0x5a9   :  { %7343 = vmatprep.subr.bf16.mxu1 %v7342_v37  ;;  %v5115_v43 = vmul.f32 %v13194_v52, %v4795_v35  ;;  %v4611_v0 = vadd.f32 -0.28449672, %v4547_v3  ;;  %v4499_v5 = vadd.f32 1.4214138, %v4435_v1  ;;  %v7350_v49 = vpack.c.bf16 %v5498_v45, %v5496_v58  ;;  %v13198_v47 = vld [vmem:[#allocation81_spill] sm:$0xff]  ;;  %v5499_v35 = vld [vmem:[#allocation6 + $0x300] sm:$0xff] }
 0x5aa   :  { %v4676_v33 = vmul.f32 %v10808_v16, %v4612_v59  ;;  %v4620_v44 = vadd.f32 -0.28449672, %v4556_v15  ;;  %v4555_v2 = vmul.f32 %v13189_v24, %v4491_v32  ;;  %v4564_v38 = vmul.f32 %v13190_v27, %v4500_v63  ;;  %v13199_v26 = vld [vmem:[#allocation101_spill] sm:$0xff]  ;;  %v13201_v32 = vld [vmem:[#allocation19_spill] sm:$0xff] }
 0x5ab   :  { %v5179_v8 = vsub.f32 1.0, %v5115_v43  ;;  %v4675_v10 = vmul.f32 %v13185_v14, %v4611_v0  ;;  %v4563_v37 = vmul.f32 %v13192_v19, %v4499_v5  ;;  %v7352_v23 = vpack.c.bf16 %v11117_v29, %v11115_v18  ;;  %v13202_v52 = vld [vmem:[#allocation109_spill] sm:$0xff]  ;;  %v5506_v0 = vld [vmem:[#allocation6 + $0x338] sm:$0xff] }
 0x5ac   :  { %7345 = vmatpush1.bf16.msra.mxu1 %v7344_v57  ;;  %v4740_v11 = vadd.f32 0.2548296, %v4676_v33  ;;  %v4684_v30 = vmul.f32 %v13188_v53, %v4620_v44  ;;  %v4619_v60 = vadd.f32 -0.28449672, %v4555_v2  ;;  %v4628_v61 = vadd.f32 -0.28449672, %v4564_v38 }
 0x5ad   :  { %7347 = vmatprep.subr.bf16.mxu1 %v7346_v42  ;;  %v5243_v20 = vmul.f32 %v5179_v8, %v13195_v13  ;;  %v4739_v40 = vadd.f32 0.2548296, %v4675_v10  ;;  %v4627_v7 = vadd.f32 -0.28449672, %v4563_v37  ;;  %v4318_v31 = vadd.f32 -1.4531521, %v4254_v62 }
 0x5ae   :  { %v4804_v51 = vmul.f32 %v10808_v16, %v4740_v11  ;;  %v4748_v46 = vadd.f32 0.2548296, %v4684_v30  ;;  %v4683_v57 = vmul.f32 %v13189_v24, %v4619_v60  ;;  %v4692_v50 = vmul.f32 %v13190_v27, %v4628_v61  ;;  %v5500_v16 = vld [vmem:[#allocation6 + $0x308] sm:$0xff]  ;;  %v13200_v62 = vld [vmem:[#allocation71_spill] sm:$0xff]  ;;  %v5505_v38 = vld [vmem:[#allocation6 + $0x330] sm:$0xff] }
 0x5af   :  { %v5307_v39 = vadd.f32 1.0, %v5243_v20  ;;  %v4803_v6 = vmul.f32 %v13185_v14, %v4739_v40  ;;  %v4691_v22 = vmul.f32 %v13192_v19, %v4627_v7  ;;  %v4382_v42 = vmul.f32 %v13193_v25, %v4318_v31  ;;  %v5503_v2 = vld [vmem:[#allocation6 + $0x320] sm:$0xff]  ;;  %v13205_v10 = vld [vmem:[#allocation46_spill] sm:$0xff]  ;;  %v5508_v60 = vld [vmem:[#allocation6 + $0x348] sm:$0xff] }
 0x5b0   :  { %7349 = vmatpush1.bf16.msra.mxu1 %v7348_v21  ;;  %v5124_v17 = vmul.f32 %v13196_v4, %v4804_v51  ;;  %v4812_v55 = vmul.f32 %v13188_v53, %v4748_v46  ;;  %v4747_v56 = vadd.f32 0.2548296, %v4683_v57  ;;  %v4756_v28 = vadd.f32 0.2548296, %v4692_v50  ;;  %v5501_v53 = vld [vmem:[#allocation6 + $0x310] sm:$0xff]  ;;  %v5510_v61 = vld [vmem:[#allocation6 + $0x358] sm:$0xff] }
 0x5b1   :  { %7351 = vmatprep.subr.bf16.mxu1 %v7350_v49  ;;  %v5371_v12 = vmul.f32 %v5307_v39, %v13197_v41  ;;  %v5123_v36 = vmul.f32 %v13198_v47, %v4803_v6  ;;  %v4755_v34 = vadd.f32 0.2548296, %v4691_v22  ;;  %v4446_v14 = vadd.f32 1.4214138, %v4382_v42  ;;  %v13204_v49 = vld [vmem:[#allocation106_spill] sm:$0xff]  ;;  %v11152_v13 = vld [vmem:[#allocation6 + $0x340] sm:$0xff] }
 0x5b2   :  { %v5188_v21 = vsub.f32 1.0, %v5124_v17  ;;  %v5132_v54 = vmul.f32 %v13199_v26, %v4812_v55  ;;  %v4811_v58 = vmul.f32 %v13189_v24, %v4747_v56  ;;  %v4820_v45 = vmul.f32 %v13190_v27, %v4756_v28  ;;  %v5504_v24 = vld [vmem:[#allocation6 + $0x328] sm:$0xff]  ;;  %v11155_v31 = vld [vmem:[#allocation6 + $0x350] sm:$0xff]  ;;  %v11159_v46 = vld [vmem:[#allocation6 + $0x378] sm:$0xff] }
 0x5b3   :  { %5760 = vmatmul.mubr.f32.gmra.mrb[40].mxu1 %v5371_v12  ;;  %v5187_v3 = vsub.f32 1.0, %v5123_v36  ;;  %v4819_v1 = vmul.f32 %v13192_v19, %v4755_v34  ;;  %v4510_v18 = vmul.f32 %v13193_v25, %v4446_v14  ;;  %v7354_v29 = vpack.c.bf16 %v5502_v48, %v5500_v16  ;;  %v13203_v27 = vld [vmem:[#allocation65_spill] sm:$0xff]  ;;  %v13206_v57 = vld [vmem:[#allocation66_spill] sm:$0xff]  ;;  %v13207_v6 = vld [vmem:[#allocation76_spill] sm:$0xff] }
 0x5b4   :  { %v5252_v59 = vmul.f32 %v5188_v21, %v13200_v62  ;;  %v5196_v15 = vsub.f32 1.0, %v5132_v54  ;;  %v5131_v63 = vmul.f32 %v13201_v32, %v4811_v58  ;;  %v5140_v43 = vmul.f32 %v13202_v52, %v4820_v45  ;;  %7353 = vmatpush1.bf16.msra.mxu1 %v7352_v23  ;;  %v11157_v51 = vld [vmem:[#allocation6 + $0x368] sm:$0xff]  ;;  %v11164_v17 = vld [vmem:[#allocation6 + $0x360] sm:$0xff]  ;;  %v11166_v55 = vld [vmem:[#allocation6 + $0x370] sm:$0xff] }
 0x5b5   :  { %v5251_v5 = vmul.f32 %v5187_v3, %v13203_v27  ;;  %v5139_v33 = vmul.f32 %v13204_v49, %v4819_v1  ;;  %v4574_v44 = vadd.f32 -0.28449672, %v4510_v18  ;;  %7355 = vmatprep.subr.bf16.mxu1 %v7354_v29  ;;  %v7356_v19 = vpack.c.bf16 %v5501_v53, %v5499_v35  ;;  %v13208_v42 = vld [vmem:[#allocation96_spill] sm:$0xff]  ;;  %v11170_v28 = vld [vmem:[#allocation6 + $0x398] sm:$0xff]  ;;  %v13209_v16 = vld [vmem:[#allocation61_spill] sm:$0xff] }
 0x5b6   :  { %v5316_v8 = vadd.f32 1.0, %v5252_v59  ;;  %v5260_v37 = vmul.f32 %v5196_v15, %v13205_v10  ;;  %v5195_v11 = vsub.f32 1.0, %v5131_v63  ;;  %v5204_v30 = vsub.f32 1.0, %v5140_v43  ;;  %v11168_v56 = vld [vmem:[#allocation6 + $0x388] sm:$0xff]  ;;  %v13210_v41 = vld [vmem:[#allocation90_spill] sm:$0xff]  ;;  %v11174_v34 = vld [vmem:[#allocation6 + $0x380] sm:$0xff] }
 0x5b7   :  { %v5315_v23 = vadd.f32 1.0, %v5251_v5  ;;  %v5203_v20 = vsub.f32 1.0, %v5139_v33  ;;  %v4638_v40 = vmul.f32 %v13193_v25, %v4574_v44  ;;  %v7358_v7 = vpack.c.bf16 %v5506_v0, %v5504_v24  ;;  %v11176_v14 = vld [vmem:[#allocation6 + $0x390] sm:$0xff]  ;;  %v11178_v21 = vld [vmem:[#allocation6 + $0x3a8] sm:$0xff]  ;;  %v11181_v53 = vld [vmem:[#allocation6 + $0x3b8] sm:$0xff] }
 0x5b8   :  { %v5380_v50 = vmul.f32 %v5316_v8, %v13206_v57  ;;  %v5324_v39 = vadd.f32 1.0, %v5260_v37  ;;  %v5259_v22 = vmul.f32 %v5195_v11, %v13207_v6  ;;  %v5268_v4 = vmul.f32 %v5204_v30, %v13208_v42  ;;  %7357 = vmatpush1.bf16.msra.mxu1 %v7356_v19  ;;  %v13211_v26 = vld [vmem:[#allocation80_spill] sm:$0xff]  ;;  %v11185_v1 = vld [vmem:[#allocation6 + $0x3b0] sm:$0xff]  ;;  %v13212_v18 = vld [vmem:[#allocation99_spill] sm:$0xff] }
 0x5b9   :  { %v5379_v48 = vmul.f32 %v5315_v23, %v13209_v16  ;;  %v5267_v12 = vmul.f32 %v5203_v20, %v13210_v41  ;;  %v4702_v47 = vadd.f32 0.2548296, %v4638_v40  ;;  %7359 = vmatprep.subr.bf16.mxu1 %v7358_v7  ;;  %v7360_v36 = vpack.c.bf16 %v5505_v38, %v5503_v2  ;;  %v11183_v3 = vld [vmem:[#allocation6 + $0x3a0] sm:$0xff]  ;;  %v11193_v32 = vld [vmem:[#allocation6 + $0x3c8] sm:$0xff]  ;;  %v11195_v63 = vld [vmem:[#allocation6 + $0x3d8] sm:$0xff] }
 0x5ba   :  { %5765 = vmatprep.mubr.f32.mxu1 %v5380_v50  ;;  %v5388_v54 = vmul.f32 %v5324_v39, %v13211_v26  ;;  %v5323_v58 = vadd.f32 1.0, %v5259_v22  ;;  %v5332_v45 = vadd.f32 1.0, %v5268_v4  ;;  %v7362_v35 = vpack.c.bf16 %v5510_v61, %v5508_v60  ;;  %v11197_v52 = vld [vmem:[#allocation6 + $0x3c0] sm:$0xff]  ;;  %v13213_v43 = vld [vmem:[#allocation74_spill] sm:$0xff]  ;;  %v13216_v2 = vld [vmem:[#allocation89_spill] sm:$0xff] }
 0x5bb   :  { %v11188_v29 = vmul.f32 1.442695, %v13212_v18  ;;  %5766 = vmatmul.mubr.f32.gmra.mrb[42].mxu1 %v5379_v48  ;;  %v5331_v62 = vadd.f32 1.0, %v5267_v12  ;;  %v4766_v59 = vmul.f32 %v13193_v25, %v4702_v47  ;;  %v7364_v15 = vpack.c.bf16 %v11155_v31, %v11152_v13  ;;  %v13214_v0 = vld [vmem:[#allocation94_spill] sm:$0xff]  ;;  %v11205_v25 = vld [vmem:[#allocation6 + $0x3e8] sm:$0xff]  ;;  %v11216_v30 = vld [vmem:[#allocation6 + $0x3e0] sm:$0xff] }
 0x5bc   :  { %5771 = vmatprep.mubr.f32.mxu1 %v5388_v54  ;;  %v5387_v24 = vmul.f32 %v5323_v58, %v13213_v43  ;;  %v5396_v27 = vmul.f32 %v5332_v45, %v13214_v0  ;;  %7361 = vmatpush1.bf16.msra.mxu1 %v7360_v36  ;;  %v7366_v5 = vpack.c.bf16 %v11159_v46, %v11157_v51  ;;  %v11203_v49 = vld [vmem:[#allocation6 + $0x3d0] sm:$0xff]  ;;  %v11207_v33 = vld [vmem:[#allocation6 + $0x3f8] sm:$0xff]  ;;  %v11228_v40 = vld [vmem:[#allocation6 + $0x408] sm:$0xff] }
 0x5bd   :  { %v13215_v44 = vld [vmem:[#allocation22_spill] sm:$0xff]  ;;  %v5395_v38 = vmul.f32 %v5331_v62, %v13216_v2  ;;  %7363 = vmatprep.subr.bf16.mxu1 %v7362_v35  ;;  %v7368_v37 = vpack.c.bf16 %v11166_v55, %v11164_v17  ;;  %v7370_v11 = vpack.c.bf16 %v11170_v28, %v11168_v56  ;;  %v7372_v61 = vpack.c.bf16 %v11176_v14, %v11174_v34  ;;  %v11236_v50 = vld [vmem:[#allocation6 + $0x400] sm:$0xff] }
 0x5be   :  { %v4262_v19 = vmul.f32 1.0614054, %v13215_v44  ;;  %v13217_v8 = vld [vmem:[#allocation50_spill] sm:$0xff]  ;;  %v7374_v13 = vpack.c.bf16 %v11181_v53, %v11178_v21  ;;  %v7376_v23 = vpack.c.bf16 %v11185_v1, %v11183_v3  ;;  %v7378_v20 = vpack.c.bf16 %v11195_v63, %v11193_v32  ;;  %v13218_v22 = vld [vmem:[#allocation51_spill] sm:$0xff]  ;;  %v13220_v55 = vld [vmem:[#allocation12_spill] sm:$0xff] }
 0x5bf   :  { %v5086_v10 = vmul.f32 %v13217_v8, %v4766_v59  ;;  %v11218_v60 = vld [vmem:[#allocation6 + $0x3f0] sm:$0xff]  ;;  %5772 = vmatmul.mubr.f32.gmra.mrb[44].mxu1 %v5387_v24  ;;  %v7380_v31 = vpack.c.bf16 %v11203_v49, %v11197_v52  ;;  %v7382_v51 = vpack.c.bf16 %v11207_v33, %v11205_v25  ;;  %v11234_v57 = vld [vmem:[#allocation6 + $0x418] sm:$0xff]  ;;  %v4261_v42 = vmul.f32 1.0614054, %v13218_v22  ;;  %v13221_v28 = vld [vmem:[#allocation36_spill] sm:$0xff] }
 0x5c0   :  { %v4326_v46 = vadd.f32 -1.4531521, %v4262_v19  ;;  %v11238_v39 = vld [vmem:[#allocation6 + $0x410] sm:$0xff]  ;;  %5777 = vmatprep.mubr.f32.mxu1 %v5396_v27  ;;  %7365 = vmatpush1.bf16.msra.mxu1 %v7364_v15  ;;  %v7384_v6 = vpack.c.bf16 %v11218_v60, %v11216_v30  ;;  %v4269_v56 = vmul.f32 1.0614054, %v13220_v55  ;;  %v13222_v41 = vld [vmem:[#allocation24_spill] sm:$0xff]  ;;  %v7386_v26 = vpack.c.bf16 %v11234_v57, %v11228_v40 }
 0x5c1   :  { %v5150_v7 = vsub.f32 1.0, %v5086_v10  ;;  %v13219_v4 = vld [vmem:[#allocation30_spill] sm:$0xff]  ;;  %7367 = vmatprep.subr.bf16.mxu1 %v7366_v5  ;;  %v4278_v12 = vmul.f32 1.0614054, %v13222_v41  ;;  %v13223_v47 = vld [vmem:[#allocation56_spill] sm:$0xff]  ;;  %v7388_v35 = vpack.c.bf16 %v11238_v39, %v11236_v50  ;;  %v13225_v19 = vld [vmem:[#allocation75_spill] sm:$0xff]  ;;  %7976 = vpow2.f32 %v11188_v29 }
 0x5c2   :  { %v4270_v17 = vmul.f32 1.0614054, %v13219_v4  ;;  %v4390_v48 = vmul.f32 %v13215_v44, %v4326_v46  ;;  %v4277_v36 = vmul.f32 1.0614054, %v13223_v47  ;;  %v4325_v34 = vadd.f32 -1.4531521, %v4261_v42 }
 0x5c3   :  { %v5214_v16 = vmul.f32 %v5150_v7, %v13221_v28  ;;  %v4333_v21 = vadd.f32 -1.4531521, %v4269_v56  ;;  %5778 = vmatmul.mubr.f32.gmra.mrb[46].mxu1 %v5395_v38  ;;  %v4342_v45 = vadd.f32 -1.4531521, %v4278_v12  ;;  %v11256_v15 = vld [vmem:[#allocation6 + $0x428] sm:$0xff]  ;;  %v11258_v43 = vld [vmem:[#allocation6 + $0x438] sm:$0xff] }
 0x5c4   :  { %v4334_v14 = vadd.f32 -1.4531521, %v4270_v17  ;;  %v4454_v58 = vadd.f32 1.4214138, %v4390_v48  ;;  %7369 = vmatpush1.bf16.msra.mxu1 %v7368_v37  ;;  %v4389_v53 = vmul.f32 %v13218_v22, %v4325_v34  ;;  %v4341_v59 = vadd.f32 -1.4531521, %v4277_v36 }
 0x5c5   :  { %v5278_v54 = vadd.f32 1.0, %v5214_v16  ;;  %v4397_v62 = vmul.f32 %v13220_v55, %v4333_v21  ;;  %v13224_v24 = vld [vmem:[#allocation32_spill] sm:$0xff]  ;;  %7371 = vmatprep.subr.bf16.mxu1 %v7370_v11  ;;  %v4406_v5 = vmul.f32 %v13222_v41, %v4342_v45  ;;  %v4286_v2 = vmul.f32 1.0614054, %v13225_v19  ;;  %v11272_v12 = vld [vmem:[#allocation6 + $0x430] sm:$0xff]  ;;  %v13226_v21 = vld [vmem:[#allocation67_spill] sm:$0xff] }
 0x5c6   :  { %v4398_v18 = vmul.f32 %v13219_v4, %v4334_v14  ;;  %v4518_v27 = vmul.f32 %v13215_v44, %v4454_v58  ;;  %v4453_v38 = vadd.f32 1.4214138, %v4389_v53  ;;  %v4405_v37 = vmul.f32 %v13223_v47, %v4341_v59  ;;  %v11270_v48 = vld [vmem:[#allocation6 + $0x420] sm:$0xff]  ;;  %v13229_v49 = vld [vmem:[#allocation37_spill] sm:$0xff]  ;;  %v5542_v40 = vld [vmem:[#allocation6 + $0x458] sm:$0xff] }
 0x5c7   :  { %v5342_v0 = vmul.f32 %v5278_v54, %v13224_v24  ;;  %v4461_v10 = vadd.f32 1.4214138, %v4397_v62  ;;  %v4470_v46 = vadd.f32 1.4214138, %v4406_v5  ;;  %v4350_v42 = vadd.f32 -1.4531521, %v4286_v2 }
 0x5c8   :  { %v4462_v8 = vadd.f32 1.4214138, %v4398_v18  ;;  %v4582_v7 = vadd.f32 -0.28449672, %v4518_v27  ;;  %v7390_v17 = vpack.c.bf16 %v11258_v43, %v11256_v15  ;;  %7373 = vmatpush1.bf16.msra.mxu1 %v7372_v61  ;;  %v4517_v11 = vmul.f32 %v13218_v22, %v4453_v38  ;;  %v13236_v30 = vld [vmem:[#allocation28_spill] sm:$0xff]  ;;  %v13246_v50 = vld [vmem:[#allocation62_spill] sm:$0xff] }
 0x5c9   :  { %5848 = vmatprep.mubr.f32.mxu1 %v5342_v0  ;;  %v4525_v28 = vmul.f32 %v13220_v55, %v4461_v10  ;;  %v4469_v16 = vadd.f32 1.4214138, %v4405_v37  ;;  %7375 = vmatprep.subr.bf16.mxu1 %v7374_v13  ;;  %v4534_v34 = vmul.f32 %v13222_v41, %v4470_v46  ;;  %v4414_v14 = vmul.f32 %v13225_v19, %v4350_v42  ;;  %v13248_v15 = vld [vmem:[#allocation29_spill] sm:$0xff] }
 0x5ca   :  { %v4526_v56 = vmul.f32 %v13219_v4, %v4462_v8  ;;  %v4646_v36 = vmul.f32 %v13215_v44, %v4582_v7  ;;  %v4285_v61 = vmul.f32 1.0614054, %v13226_v21  ;;  %v4581_v54 = vadd.f32 -0.28449672, %v4517_v11  ;;  %v13227_v7 = vld [vmem:[#allocation18_spill] sm:$0xff] }
 0x5cb   :  { %v4589_v45 = vadd.f32 -0.28449672, %v4525_v28  ;;  %v4533_v53 = vmul.f32 %v13223_v47, %v4469_v16  ;;  %v4598_v62 = vadd.f32 -0.28449672, %v4534_v34  ;;  %v4478_v59 = vadd.f32 1.4214138, %v4414_v14 }
 0x5cc   :  { %v4590_v58 = vadd.f32 -0.28449672, %v4526_v56  ;;  %v4710_v18 = vadd.f32 0.2548296, %v4646_v36  ;;  %v7392_v24 = vpack.c.bf16 %v11272_v12, %v11270_v48  ;;  %7377 = vmatpush1.bf16.msra.mxu1 %v7376_v23  ;;  %v4645_v13 = vmul.f32 %v13218_v22, %v4581_v54  ;;  %v13228_v14 = vld [vmem:[#allocation27_spill] sm:$0xff] }
 0x5cd   :  { %v4653_v27 = vmul.f32 %v13220_v55, %v4589_v45  ;;  %v4597_v5 = vadd.f32 -0.28449672, %v4533_v53  ;;  %7379 = vmatprep.subr.bf16.mxu1 %v7378_v20  ;;  %v4662_v38 = vmul.f32 %v13222_v41, %v4598_v62  ;;  %v4542_v8 = vmul.f32 %v13225_v19, %v4478_v59  ;;  %v13254_v48 = vld [vmem:[#allocation107_spill] sm:$0xff] }
 0x5ce   :  { %v4654_v0 = vmul.f32 %v13219_v4, %v4590_v58  ;;  %v4774_v2 = vmul.f32 %v13215_v44, %v4710_v18  ;;  %v4349_v10 = vadd.f32 -1.4531521, %v4285_v61  ;;  %v4709_v3 = vadd.f32 0.2548296, %v4645_v13  ;;  %v13232_v58 = vld [vmem:[#allocation64_spill] sm:$0xff] }
 0x5cf   :  { %v4717_v23 = vadd.f32 0.2548296, %v4653_v27  ;;  %v4661_v37 = vmul.f32 %v13223_v47, %v4597_v5  ;;  %v4726_v42 = vadd.f32 0.2548296, %v4662_v38  ;;  %v4606_v11 = vadd.f32 -0.28449672, %v4542_v8 }
 0x5d0   :  { %v4718_v1 = vadd.f32 0.2548296, %v4654_v0  ;;  %v5094_v46 = vmul.f32 %v13227_v7, %v4774_v2  ;;  %v4413_v56 = vmul.f32 %v13226_v21, %v4349_v10  ;;  %7381 = vmatpush1.bf16.msra.mxu1 %v7380_v31  ;;  %v4773_v32 = vmul.f32 %v13218_v22, %v4709_v3  ;;  %v13230_v22 = vld [vmem:[#allocation25_spill] sm:$0xff]  ;;  %v13233_v18 = vld [vmem:[#allocation60_spill] sm:$0xff]  ;;  %v13237_v8 = vld [vmem:[#allocation34_spill] sm:$0xff] }
 0x5d1   :  { %v4781_v44 = vmul.f32 %v13220_v55, %v4717_v23  ;;  %v4725_v20 = vadd.f32 0.2548296, %v4661_v37  ;;  %7383 = vmatprep.subr.bf16.mxu1 %v7382_v51  ;;  %v4790_v16 = vmul.f32 %v13222_v41, %v4726_v42  ;;  %v4670_v36 = vmul.f32 %v13225_v19, %v4606_v11  ;;  %v13231_v55 = vld [vmem:[#allocation26_spill] sm:$0xff]  ;;  %v13234_v27 = vld [vmem:[#allocation44_spill] sm:$0xff]  ;;  %v13235_v2 = vld [vmem:[#allocation33_spill] sm:$0xff] }
 0x5d2   :  { %v4782_v63 = vmul.f32 %v13219_v4, %v4718_v1  ;;  %v5158_v28 = vsub.f32 1.0, %v5094_v46  ;;  %v4477_v34 = vadd.f32 1.4214138, %v4413_v56  ;;  %v5093_v52 = vmul.f32 %v13228_v14, %v4773_v32  ;;  %v13238_v10 = vld [vmem:[#allocation20_spill] sm:$0xff]  ;;  %v13240_v37 = vld [vmem:[#allocation77_spill] sm:$0xff]  ;;  %v13241_v11 = vld [vmem:[#allocation23_spill] sm:$0xff] }
 0x5d3   :  { %v5101_v61 = vmul.f32 %v13230_v22, %v4781_v44  ;;  %v4789_v4 = vmul.f32 %v13223_v47, %v4725_v20  ;;  %v5110_v45 = vmul.f32 %v13232_v58, %v4790_v16  ;;  %v4734_v25 = vadd.f32 0.2548296, %v4670_v36  ;;  %v13239_v1 = vld [vmem:[#allocation52_spill] sm:$0xff]  ;;  %v13243_v16 = vld [vmem:[#allocation38_spill] sm:$0xff] }
 0x5d4   :  { %v5102_v31 = vmul.f32 %v13229_v49, %v4782_v63  ;;  %v5222_v54 = vmul.f32 %v5158_v28, %v13231_v55  ;;  %v4541_v33 = vmul.f32 %v13226_v21, %v4477_v34  ;;  %7385 = vmatpush1.bf16.msra.mxu1 %v7384_v6  ;;  %v5157_v51 = vsub.f32 1.0, %v5093_v52  ;;  %v5540_v46 = vld [vmem:[#allocation6 + $0x448] sm:$0xff]  ;;  %v5541_v55 = vld [vmem:[#allocation6 + $0x450] sm:$0xff] }
 0x5d5   :  { %v5165_v53 = vsub.f32 1.0, %v5101_v61  ;;  %v5109_v62 = vmul.f32 %v13233_v18, %v4789_v4  ;;  %v5174_v13 = vsub.f32 1.0, %v5110_v45  ;;  %v4798_v47 = vmul.f32 %v13225_v19, %v4734_v25  ;;  %7387 = vmatprep.subr.bf16.mxu1 %v7386_v26  ;;  %v13242_v20 = vld [vmem:[#allocation88_spill] sm:$0xff]  ;;  %v13250_v45 = vld [vmem:[#allocation102_spill] sm:$0xff]  ;;  %v13253_v18 = vld [vmem:[#allocation69_spill] sm:$0xff] }
 0x5d6   :  { %v5166_v41 = vsub.f32 1.0, %v5102_v31  ;;  %v5286_v59 = vadd.f32 1.0, %v5222_v54  ;;  %v4605_v0 = vadd.f32 -0.28449672, %v4541_v33  ;;  %v5221_v5 = vmul.f32 %v5157_v51, %v13234_v27  ;;  %v13244_v34 = vld [vmem:[#allocation16_spill] sm:$0xff]  ;;  %v13245_v31 = vld [vmem:[#allocation14_spill] sm:$0xff] }
 0x5d7   :  { %v5229_v60 = vmul.f32 %v5165_v53, %v13236_v30  ;;  %v5173_v6 = vsub.f32 1.0, %v5109_v62  ;;  %5849 = vmatmul.mubr.f32.vlgmr.msra.gmra.mrb[32].mxu1 %v13237_v8  ;;  %v5238_v23 = vmul.f32 %v5174_v13, %v13239_v1  ;;  %v5118_v19 = vmul.f32 %v13240_v37, %v4798_v47  ;;  %v5539_v4 = vld [vmem:[#allocation6 + $0x440] sm:$0xff]  ;;  %v13247_v54 = vld [vmem:[#allocation93_spill] sm:$0xff]  ;;  %v5546_v47 = vld [vmem:[#allocation6 + $0x478] sm:$0xff] }
 0x5d8   :  { %v5230_v38 = vmul.f32 %v5166_v41, %v13235_v2  ;;  %v5350_v3 = vmul.f32 %v5286_v59, %v13238_v10  ;;  %v4669_v7 = vmul.f32 %v13226_v21, %v4605_v0  ;;  %v5285_v57 = vadd.f32 1.0, %v5221_v5  ;;  %7389 = vmatpush1.bf16.msra.mxu1 %v7388_v35  ;;  %v13251_v33 = vld [vmem:[#allocation95_spill] sm:$0xff]  ;;  %v13252_v41 = vld [vmem:[#allocation21_spill] sm:$0xff] }
 0x5d9   :  { %v5293_v42 = vadd.f32 1.0, %v5229_v60  ;;  %v5237_v56 = vmul.f32 %v5173_v6, %v13241_v11  ;;  %v5302_v32 = vadd.f32 1.0, %v5238_v23  ;;  %v5182_v63 = vsub.f32 1.0, %v5118_v19  ;;  %7391 = vmatprep.subr.bf16.mxu1 %v7390_v17  ;;  %v13249_v17 = vld [vmem:[#allocation82_spill] sm:$0xff]  ;;  %v5544_v13 = vld [vmem:[#allocation6 + $0x468] sm:$0xff] }
 0x5da   :  { %v5294_v26 = vadd.f32 1.0, %v5230_v38  ;;  %5854 = vmatprep.mubr.f32.mxu1 %v5350_v3  ;;  %v4733_v44 = vadd.f32 0.2548296, %v4669_v7  ;;  %v4294_v28 = vmul.f32 1.0614054, %v13242_v20  ;;  %v5349_v36 = vmul.f32 %v5285_v57, %v13243_v16  ;;  %v13256_v57 = vld [vmem:[#allocation59_spill] sm:$0xff] }
 0x5db   :  { %v5301_v52 = vadd.f32 1.0, %v5237_v56  ;;  %v7394_v49 = vpack.c.bf16 %v5542_v40, %v5540_v46  ;;  %v5357_v22 = vmul.f32 %v5293_v42, %v13245_v31  ;;  %v5246_v39 = vmul.f32 %v5182_v63, %v13246_v50  ;;  %v5545_v16 = vld [vmem:[#allocation6 + $0x470] sm:$0xff] }
 0x5dc   :  { %v5358_v14 = vmul.f32 %v5294_v26, %v13244_v34  ;;  %v4797_v35 = vmul.f32 %v13226_v21, %v4733_v44  ;;  %v4358_v61 = vadd.f32 -1.4531521, %v4294_v28  ;;  %vm3926_vm15 = vcmp.ge.f32.partialorder %v13247_v54, 0.0  ;;  %5855 = vmatmul.mubr.f32.gmra.mrb[34].mxu1 %v5349_v36  ;;  %v5543_v28 = vld [vmem:[#allocation6 + $0x460] sm:$0xff] }
 0x5dd   :  { %v5366_v43 = vmul.f32 %v5302_v32, %v13248_v15  ;;  %v4293_v58 = vmul.f32 1.0614054, %v13249_v17  ;;  %v4302_v25 = vmul.f32 1.0614054, %v13250_v45  ;;  %v4301_v51 = vmul.f32 1.0614054, %v13251_v33  ;;  %7393 = vmatpush1.bf16.msra.mxu1 %v7392_v24 }
 0x5de   :  { %5860 = vmatprep.mubr.f32.mxu1 %v5358_v14  ;;  %v5365_v53 = vmul.f32 %v5301_v52, %v13252_v41  ;;  %v5117_v62 = vmul.f32 %v13253_v18, %v4797_v35  ;;  %v4422_v21 = vmul.f32 %v13242_v20, %v4358_v61  ;;  %v4310_v59 = vmul.f32 1.0614054, %v10978_v9  ;;  %7395 = vmatprep.subr.bf16.mxu1 %v7394_v49  ;;  %v13255_v24 = vld [vmem:[#allocation57_spill] sm:$0xff]  ;;  %v13257_v36 = vld [vmem:[#allocation55_spill] sm:$0xff]  ;;  %v13260_v18 = vld [vmem:[#allocation98_spill] sm:$0xff] }
 0x5df   :  { %v4357_v0 = vadd.f32 -1.4531521, %v4293_v58  ;;  %v4366_v27 = vadd.f32 -1.4531521, %v4302_v25  ;;  %v4365_v5 = vadd.f32 -1.4531521, %v4301_v51  ;;  %v7396_v2 = vpack.c.bf16 %v5541_v55, %v5539_v4 }
 0x5e0   :  { %v5310_v38 = vadd.f32 1.0, %v5246_v39  ;;  %v5181_v30 = vsub.f32 1.0, %v5117_v62  ;;  %v4486_v60 = vadd.f32 1.4214138, %v4422_v21  ;;  %v4374_v6 = vadd.f32 -1.4531521, %v4310_v59  ;;  %5861 = vmatmul.mubr.f32.gmra.mrb[36].mxu1 %v5357_v22 }
 0x5e1   :  { %v4421_v8 = vmul.f32 %v13249_v17, %v4357_v0  ;;  %v4430_v10 = vmul.f32 %v13250_v45, %v4366_v27  ;;  %v4429_v3 = vmul.f32 %v13251_v33, %v4365_v5  ;;  %v4309_v12 = vmul.f32 1.0614054, %v13254_v48  ;;  %5866 = vmatprep.mubr.f32.mxu1 %v5366_v43  ;;  %7397 = vmatpush1.bf16.msra.mxu1 %v7396_v2  ;;  %v13258_v49 = vld [vmem:[#allocation15_spill] sm:$0xff]  ;;  %v5549_v0 = vld [vmem:[#allocation6 + $0x490] sm:$0xff] }
 0x5e2   :  { %v5245_v1 = vmul.f32 %v5181_v30, %v13255_v24  ;;  %v4550_v23 = vmul.f32 %v13242_v20, %v4486_v60  ;;  %v4438_v37 = vmul.f32 %v10978_v9, %v4374_v6  ;;  %v7398_v40 = vpack.c.bf16 %v5546_v47, %v5544_v13  ;;  %v11383_v21 = vld [vmem:[#allocation4] sm:$0xff]  ;;  %v5547_v47 = vld [vmem:[#allocation6 + $0x480] sm:$0xff]  ;;  %v13261_v27 = vld [vmem:[#allocation85_spill] sm:$0xff]  ;;  %v7977_v60 = vpop.eup %7976 }
 0x5e3   :  { %v4485_v19 = vadd.f32 1.4214138, %v4421_v8  ;;  %v4494_v7 = vadd.f32 1.4214138, %v4430_v10  ;;  %v4493_v46 = vadd.f32 1.4214138, %v4429_v3  ;;  %v5374_v26 = vmul.f32 %v5310_v38, %v13256_v57 }
 0x5e4   :  { %v5309_v42 = vadd.f32 1.0, %v5245_v1  ;;  %v4614_v11 = vadd.f32 -0.28449672, %v4550_v23  ;;  %v4502_v56 = vadd.f32 1.4214138, %v4438_v37  ;;  %5867 = vmatmul.mubr.f32.gmra.mrb[38].mxu1 %v5365_v53  ;;  %7399 = vmatprep.subr.bf16.mxu1 %v7398_v40  ;;  %v1885_v31 = vsub.s32 4, %v13258_v49 }
 0x5e5   :  { %v4549_v29 = vmul.f32 %v13249_v17, %v4485_v19  ;;  %v4558_v32 = vmul.f32 %v13250_v45, %v4494_v7  ;;  %v4557_v63 = vmul.f32 %v13251_v33, %v4493_v46  ;;  %v4373_v44 = vadd.f32 -1.4531521, %v4309_v12  ;;  %5872 = vmatprep.mubr.f32.mxu1 %v5374_v26  ;;  %v5548_v53 = vld [vmem:[#allocation6 + $0x488] sm:$0xff]  ;;  %v5550_v13 = vld [vmem:[#allocation6 + $0x498] sm:$0xff] }
 0x5e6   :  { %v5373_v34 = vmul.f32 %v5309_v42, %v13257_v36  ;;  %v4678_v14 = vmul.f32 %v13242_v20, %v4614_v11  ;;  %v4566_v52 = vmul.f32 %v10978_v9, %v4502_v56  ;;  %v13259_v61 = vmov -1.0   ;;  %v5552_v37 = vld [vmem:[#allocation6 + $0x4a8] sm:$0xff]  ;;  %v5554_v19 = vld [vmem:[#allocation6 + $0x4b8] sm:$0xff] }
 0x5e7   :  { %v4613_v22 = vadd.f32 -0.28449672, %v4549_v29  ;;  %v4622_v50 = vadd.f32 -0.28449672, %v4558_v32  ;;  %v4621_v39 = vadd.f32 -0.28449672, %v4557_v63  ;;  %v4437_v35 = vmul.f32 %v13254_v48, %v4373_v44 }
 0x5e8   :  { %v11375_v4 = vsel %vm3926_vm15, 1.0, %v13259_v61  ;;  %v4742_v55 = vadd.f32 0.2548296, %v4678_v14  ;;  %v4630_v15 = vadd.f32 -0.28449672, %v4566_v52  ;;  %v7400_v43 = vpack.c.bf16 %v5545_v16, %v5543_v28  ;;  %5873 = vmatmul.mubr.f32.gmra.mrb[40].mxu1 %v5373_v34  ;;  %v13263_v26 = vld [vmem:[#allocation84_spill] sm:$0xff] }
 0x5e9   :  { %v4677_v58 = vmul.f32 %v13249_v17, %v4613_v22  ;;  %v4686_v25 = vmul.f32 %v13250_v45, %v4622_v50  ;;  %v4685_v51 = vmul.f32 %v13251_v33, %v4621_v39  ;;  %v4501_v41 = vadd.f32 1.4214138, %v4437_v35  ;;  %v13264_v11 = vld [vmem:[#allocation104_spill] sm:$0xff]  ;;  %v13265_v29 = vld [vmem:[#allocation97_spill] sm:$0xff]  ;;  %v3240_v63 = vpop.f32.mrb[16].mxu1  ;;  %v3692_v16 = vpop.f32.mrb[80].mxu0 }
 0x5ea   :  { %7978 = vpow2.f32 %v13260_v18  ;;  %v4806_v62 = vmul.f32 %v13242_v20, %v4742_v55  ;;  %v4694_v54 = vmul.f32 %v10978_v9, %v4630_v15  ;;  %v11386_v59 = vrot.slane %v11383_v21, %v1885_v31  ;;  %7401 = vmatpush1.bf16.msra.mxu1 %v7400_v43  ;;  %v13262_v20 = vld [vmem:[#allocation91_spill] sm:$0xff]  ;;  %v3242_v36 = vpop.f32.mrb[17].mxu1  ;;  %v3694_v22 = vpop.f32.mrb[81].mxu0  ;;  %v13267_v15 = vld [vmem:[#allocation70_spill] sm:$0xff] }
 0x5eb   :  { %vm3925_vm0 = vcmp.ge.f32.partialorder %v13261_v27, 0.0  ;;  %v4741_v5 = vadd.f32 0.2548296, %v4677_v58  ;;  %v4750_v2 = vadd.f32 0.2548296, %v4686_v25  ;;  %v4565_v30 = vmul.f32 %v13254_v48, %v4501_v41  ;;  %v13268_v58 = vld [vmem:[#allocation87_spill] sm:$0xff] }
 0x5ec   :  { %v4749_v38 = vadd.f32 0.2548296, %v4685_v51  ;;  %v5126_v6 = vmul.f32 %v13262_v20, %v4806_v62  ;;  %v4758_v8 = vadd.f32 0.2548296, %v4694_v54  ;;  %v1893_v10 = vsub.s32 6, %v13258_v49  ;;  %v13269_v51 = vld [vmem:[#allocation78_spill] sm:$0xff] }
 0x5ed   :  { %v1889_v3 = vsub.s32 5, %v13258_v49  ;;  %v4805_v12 = vmul.f32 %v13249_v17, %v4741_v5  ;;  %v4814_v24 = vmul.f32 %v13250_v45, %v4750_v2  ;;  %v4629_v23 = vadd.f32 -0.28449672, %v4565_v30  ;;  %v13266_v45 = vld [vmem:[#allocation73_spill] sm:$0xff]  ;;  %v3246_v18 = vpop.f32.mrb[18].mxu1  ;;  %v13270_v54 = vld [vmem:[#allocation72_spill] sm:$0xff] }
 0x5ee   :  { %v4813_v1 = vmul.f32 %v13251_v33, %v4749_v38  ;;  %v5190_v7 = vsub.f32 1.0, %v5126_v6  ;;  %v4822_v46 = vmul.f32 %v10978_v9, %v4758_v8  ;;  %v7402_v40 = vpack.c.bf16 %v5550_v13, %v5548_v53  ;;  %v11419_v2 = vpop.f32.mrb[82].mxu0  ;;  %v11421_v38 = vpop.f32.mrb[19].mxu1  ;;  %v13271_v8 = vld [vmem:[#allocation43_spill] sm:$0xff] }
 0x5ef   :  { %v7404_v57 = vpack.c.bf16 %v5549_v0, %v5547_v47  ;;  %v5125_v42 = vmul.f32 %v13263_v26, %v4805_v12  ;;  %v5134_v56 = vmul.f32 %v13264_v11, %v4814_v24  ;;  %v4693_v17 = vmul.f32 %v13254_v48, %v4629_v23  ;;  %v11426_v6 = vpop.f32.mrb[83].mxu0  ;;  %v13272_v24 = vld [vmem:[#allocation63_spill] sm:$0xff] }
 0x5f0   :  { %v5133_v32 = vmul.f32 %v13265_v29, %v4813_v1  ;;  %v5254_v44 = vmul.f32 %v5190_v7, %v13266_v45  ;;  %v5142_v33 = vmul.f32 %v7977_v60, %v4822_v46  ;;  %v11403_v28 = vadd.f32 %v3240_v63, %v11386_v59  ;;  %7403 = vmatprep.subr.bf16.mxu1 %v7402_v40  ;;  %v11436_v7 = vpop.f32.mrb[20].mxu1  ;;  %v11439_v26 = vpop.f32.mrb[84].mxu0 }
 0x5f1   :  { %v7406_v9 = vpack.c.bf16 %v5554_v19, %v5552_v37  ;;  %v5189_v34 = vsub.f32 1.0, %v5125_v42  ;;  %v5198_v14 = vsub.f32 1.0, %v5134_v56  ;;  %v4757_v31 = vadd.f32 0.2548296, %v4693_v17  ;;  %7405 = vmatpush1.bf16.msra.mxu1 %v7404_v57  ;;  %v11441_v27 = vpop.f32.mrb[21].mxu1  ;;  %v13273_v42 = vld [vmem:[#allocation42_spill] sm:$0xff] }
 0x5f2   :  { %v5197_v52 = vsub.f32 1.0, %v5133_v32  ;;  %v5318_v50 = vadd.f32 1.0, %v5254_v44  ;;  %v5206_v39 = vsub.f32 1.0, %v5142_v33  ;;  %v11406_v35 = vmul.f32 0.70710677, %v11403_v28  ;;  %v11445_v32 = vpop.f32.mrb[85].mxu0 }
 0x5f3   :  { %v1897_v55 = vsub.s32 7, %v13258_v49  ;;  %7407 = vmatprep.subr.bf16.mxu1 %v7406_v9  ;;  %v5253_v43 = vmul.f32 %v5189_v34, %v13267_v15  ;;  %v5262_v25 = vmul.f32 %v5198_v14, %v13268_v58  ;;  %v4821_v53 = vmul.f32 %v13254_v48, %v4757_v31  ;;  %v11452_v9 = vpop.f32.mrb[22].mxu1  ;;  %v13275_v31 = vld [vmem:[#allocation83_spill] sm:$0xff]  ;;  %v5553_v49 = vld [vmem:[#allocation6 + $0x4b0] sm:$0xff] }
 0x5f4   :  { %v5261_v41 = vmul.f32 %v5197_v52, %v13269_v51  ;;  %v7979_v62 = vpop.eup %7978  ;;  %v5382_v13 = vmul.f32 %v5318_v50, %v13270_v54  ;;  %v5270_v47 = vmul.f32 %v5206_v39, %v11375_v4  ;;  %v3999_v0 = vand.u32 2147483647, %v11406_v35  ;;  %v11456_v52 = vpop.f32.mrb[86].mxu0 }
 0x5f5   :  { %v11417_v5 = vrot.slane %v11383_v21, %v1893_v10  ;;  %v5317_v30 = vadd.f32 1.0, %v5253_v43  ;;  %v5326_v60 = vadd.f32 1.0, %v5262_v25  ;;  %v5141_v20 = vmul.f32 %v7979_v62, %v4821_v53  ;;  %v11459_v39 = vpop.f32.mrb[23].mxu1 }
 0x5f6   :  { %v11424_v48 = vrot.slane %v11383_v21, %v1889_v3  ;;  %v3790_v12 = vmul.f32 0.5, %v13271_v8  ;;  %v3989_v4 = vsel %vm3925_vm0, 1.0, %v13259_v61  ;;  %5878 = vmatprep.mubr.f32.mxu1 %v5382_v13  ;;  %v4063_v10 = vmul.f32 0.3275911, %v3999_v0 }
 0x5f7   :  { %v5381_v1 = vmul.f32 %v5317_v30, %v13272_v24  ;;  %v5325_v23 = vadd.f32 1.0, %v5261_v41  ;;  %v5205_v37 = vsub.f32 1.0, %v5141_v20  ;;  %v11434_v19 = vrot.slane %v11383_v21, %v1897_v55  ;;  %v13274_v21 = vld [vmem:[#allocation48_spill] sm:$0xff]  ;;  %v11461_v55 = vpop.f32.mrb[87].mxu0  ;;  %v11468_v53 = vpop.f32.mrb[24].mxu1 }
 0x5f8   :  { %v5390_v3 = vmul.f32 %v5326_v60, %v3790_v12  ;;  %v5334_v46 = vadd.f32 1.0, %v5270_v47  ;;  %v4127_v40 = vadd.f32 1.0, %v4063_v10  ;;  %v7562_v57 = vadd.f32 %v3692_v16, %v11417_v5  ;;  %v11470_v62 = vpop.f32.mrb[88].mxu0  ;;  %v11472_v54 = vpop.f32.mrb[25].mxu1 }
 0x5f9   :  { %v3789_v11 = vmul.f32 0.5, %v13273_v42  ;;  %5879 = vmatmul.mubr.f32.gmra.mrb[42].mxu1 %v5381_v1  ;;  %v5269_v56 = vmul.f32 %v5205_v37, %v3989_v4  ;;  %v7547_v29 = vadd.f32 %v3242_v36, %v11424_v48  ;;  %v3798_v17 = vmul.f32 0.5, %v13274_v21  ;;  %v11474_v13 = vpop.f32.mrb[89].mxu0 }
 0x5fa   :  { %5884 = vmatprep.mubr.f32.mxu1 %v5390_v3  ;;  %7980 = vrcp.f32 %v4127_v40  ;;  %v11448_v63 = vmul.f32 0.70710677, %v7562_v57  ;;  %v4831_v33 = vsub.f32 0.0, %v3999_v0  ;;  %v7563_v36 = vadd.f32 %v3694_v22, %v11434_v19 }
 0x5fb   :  { %v5389_v45 = vmul.f32 %v5325_v23, %v3789_v11  ;;  %v5333_v44 = vadd.f32 1.0, %v5269_v56  ;;  %v11450_v16 = vmul.f32 0.70710677, %v7547_v29  ;;  %v5398_v34 = vmul.f32 %v5334_v46, %v3798_v17  ;;  %v11484_v20 = vpop.f32.mrb[26].mxu1  ;;  %v11489_v10 = vpop.f32.mrb[90].mxu0 }
 0x5fc   :  { %v4001_v14 = vand.u32 2147483647, %v11448_v63  ;;  %v3797_v50 = vmul.f32 0.5, %v13275_v31  ;;  %v4895_v58 = vmul.f32 %v4831_v33, %v3999_v0  ;;  %vm3871_vm1 = vcmp.ge.f32.partialorder %v11406_v35, 0.0  ;;  %v11500_v3 = vpop.f32.mrb[91].mxu0 }
 0x5fd   :  { %5885 = vmatmul.mubr.f32.gmra.mrb[44].mxu1 %v5389_v45  ;;  %v4000_v25 = vand.u32 2147483647, %v11450_v16  ;;  %v3810_v41 = vmul.f32 0.70710677, %v7563_v36  ;;  %v11466_v22 = vadd.f32 %v3246_v18, %v11386_v59  ;;  %v11477_v47 = vmul.f32 0.5, %v11403_v28  ;;  %v11491_v28 = vpop.f32.mrb[27].mxu1 }
 0x5fe   :  { %5890 = vmatprep.mubr.f32.mxu1 %v5398_v34  ;;  %v4065_v15 = vmul.f32 0.3275911, %v4001_v14  ;;  %v5397_v43 = vmul.f32 %v5333_v44, %v3797_v50  ;;  %v4833_v0 = vsub.f32 0.0, %v4001_v14  ;;  %v11480_v35 = vsel %vm3871_vm1, 1.0, %v13259_v61 }
 0x5ff   :  { %v4963_v30 = vmul.f32 1.442695, %v4895_v58  ;;  %v11482_v18 = vmul.f32 0.5, %v7562_v57  ;;  %v4832_v60 = vsub.f32 0.0, %v4000_v25  ;;  %v4002_v12 = vand.u32 2147483647, %v3810_v41 }
 0x600   :  { %v4129_v51 = vadd.f32 1.0, %v4065_v15  ;;  %v3815_v4 = vmul.f32 0.70710677, %v11466_v22  ;;  %v11494_v1 = vmul.f32 0.5, %v7547_v29  ;;  %v4064_v23 = vmul.f32 0.3275911, %v4000_v25 }
 0x601   :  { %5891 = vmatmul.mubr.f32.gmra.mrb[46].mxu1 %v5397_v43  ;;  %v11498_v37 = vadd.f32 %v11419_v2, %v11417_v5  ;;  %vm3873_vm2 = vcmp.ge.f32.partialorder %v11448_v63, 0.0  ;;  %v4897_v46 = vmul.f32 %v4833_v0, %v4001_v14  ;;  %v11503_v40 = vmul.f32 0.5, %v7563_v36  ;;  %v11510_v56 = vpop.f32.mrb[28].mxu1  ;;  %v11512_v17 = vpop.f32.mrb[92].mxu0 }
 0x602   :  { %7982 = vrcp.f32 %v4129_v51  ;;  %13276 = vst [vmem:[#allocation47_spill] sm:$0xff] %v11494_v1  ;;  %v11507_v57 = vadd.f32 %v11421_v38, %v11424_v48  ;;  %vm3872_vm3 = vcmp.ge.f32.partialorder %v11450_v16, 0.0  ;;  %v4896_v11 = vmul.f32 %v4832_v60, %v4000_v25  ;;  %v11518_v38 = vpop.f32.mrb[29].mxu1  ;;  %v11520_v34 = vpop.f32.mrb[93].mxu0 }
 0x603   :  { %13277 = vst [vmem:[#allocation35_spill] sm:$0xff] %v11503_v40  ;;  %vm3874_vm4 = vcmp.ge.f32.partialorder %v3810_v41, 0.0  ;;  %v4066_v2 = vmul.f32 0.3275911, %v4002_v12  ;;  %v4834_v29 = vsub.f32 0.0, %v4002_v12  ;;  %7984 = vpow2.f32 %v4963_v30  ;;  %v11548_v41 = vpop.f32.mrb[30].mxu1 }
 0x604   :  { %v11486_v8 = vpop.eup %7980  ;;  %v4007_v21 = vand.u32 2147483647, %v3815_v4  ;;  %v4128_v44 = vadd.f32 1.0, %v4064_v23  ;;  %v11516_v33 = vmul.f32 0.70710677, %v11498_v37  ;;  %v11525_v14 = vsel %vm3873_vm2, 1.0, %v13259_v61 }
 0x605   :  { %v4255_v24 = vmul.f32 1.0614054, %v11486_v8  ;;  %v4967_v36 = vmul.f32 1.442695, %v4897_v46  ;;  %v11530_v31 = vsel %vm3872_vm3, 1.0, %v13259_v61  ;;  %v11537_v58 = vsel %vm3874_vm4, 1.0, %v13259_v61 }
 0x606   :  { %13278 = vst [vmem:[#allocation31_spill] sm:$0xff] %v11530_v31  ;;  %v11533_v50 = vmul.f32 0.70710677, %v11507_v57  ;;  %v4965_v43 = vmul.f32 1.442695, %v4896_v11  ;;  %13279 = vst [vmem:[#allocation45_spill] sm:$0xff] %v11537_v58  ;;  %v11541_v63 = vadd.f32 %v11426_v6, %v11434_v19  ;;  %v4898_v0 = vmul.f32 %v4834_v29, %v4002_v12 }
 0x607   :  { %v4319_v42 = vadd.f32 -1.4531521, %v4255_v24  ;;  %v4130_v51 = vadd.f32 1.0, %v4066_v2  ;;  %vm3879_vm5 = vcmp.ge.f32.partialorder %v3815_v4, 0.0  ;;  %v4839_v16 = vsub.f32 0.0, %v4007_v21  ;;  %v11550_v23 = vpop.f32.mrb[94].mxu0 }
 0x608   :  { %7986 = vrcp.f32 %v4128_v44  ;;  %v4009_v24 = vand.u32 2147483647, %v11516_v33  ;;  %v4071_v6 = vmul.f32 0.3275911, %v4007_v21  ;;  %v4008_v46 = vand.u32 2147483647, %v11533_v50 }
 0x609   :  { %v4383_v45 = vmul.f32 %v11486_v8, %v4319_v42  ;;  %7988 = vpow2.f32 %v4967_v36  ;;  %v11553_v42 = vpop.f32.mrb[31].mxu1  ;;  %v11555_v12 = vpop.f32.mrb[95].mxu0  ;;  %v11558_v29 = vmul.f32 0.70710677, %v11541_v63  ;;  %v11561_v44 = vmul.f32 0.5, %v11466_v22 }
 0x60a   :  { %13280 = vst [vmem:[#allocation40_spill] sm:$0xff] %v11553_v42  ;;  %13281 = vst [vmem:[#allocation39_spill] sm:$0xff] %v11555_v12  ;;  %7990 = vpow2.f32 %v4965_v43  ;;  %v11565_v36 = vsel %vm3879_vm5, 1.0, %v13259_v61  ;;  %v4841_v43 = vsub.f32 0.0, %v4009_v24  ;;  %v4135_v58 = vadd.f32 1.0, %v4071_v6 }
 0x60b   :  { %v4447_v15 = vadd.f32 1.4214138, %v4383_v45  ;;  %7992 = vrcp.f32 %v4130_v51  ;;  %v4969_v45 = vmul.f32 1.442695, %v4898_v0  ;;  %13282 = vst [vmem:[#allocation17_spill] sm:$0xff] %v11561_v44  ;;  %13283 = vst [vmem:[#allocation103_spill] sm:$0xff] %v11565_v36  ;;  %v7550_v51 = vadd.f32 %v11436_v7, %v11386_v59 }
 0x60c   :  { %v11543_v25 = vpop.eup %7982  ;;  %v4073_v1 = vmul.f32 0.3275911, %v4009_v24  ;;  %v4840_v31 = vsub.f32 0.0, %v4008_v46  ;;  %v4072_v44 = vmul.f32 0.3275911, %v4008_v46  ;;  %vm3881_vm6 = vcmp.ge.f32.partialorder %v11516_v33, 0.0 }
 0x60d   :  { %v4511_v30 = vmul.f32 %v11486_v8, %v4447_v15  ;;  %v4257_v60 = vmul.f32 1.0614054, %v11543_v25  ;;  %v5551_v15 = vld [vmem:[#allocation6 + $0x4a0] sm:$0xff]  ;;  %v7985_v22 = vpop.eup %7984  ;;  %v4010_v4 = vand.u32 2147483647, %v11558_v29  ;;  %7994 = vpow2.f32 %v4969_v45 }
 0x60e   :  { %v7408_v36 = vpack.c.bf16 %v5553_v49, %v5551_v15  ;;  %v11578_v42 = vmul.f32 0.70710677, %v7550_v51  ;;  %7996 = vrcp.f32 %v4135_v58  ;;  %v4137_v7 = vadd.f32 1.0, %v4073_v1 }
 0x60f   :  { %v4575_v11 = vadd.f32 -0.28449672, %v4511_v30  ;;  %v4321_v2 = vadd.f32 -1.4531521, %v4257_v60  ;;  %v4903_v60 = vmul.f32 %v4839_v16, %v4007_v21  ;;  %v7566_v21 = vadd.f32 %v11439_v26, %v11417_v5 }
 0x610   :  { %7409 = vmatpush1.bf16.msra.mxu1 %v7408_v36  ;;  %v4904_v49 = vmul.f32 %v4840_v31, %v4008_v46  ;;  %v4136_v45 = vadd.f32 1.0, %v4072_v44  ;;  %v4074_v26 = vmul.f32 0.3275911, %v4010_v4  ;;  %v11591_v1 = vadd.f32 %v11441_v27, %v11424_v48 }
 0x611   :  { %v4639_v40 = vmul.f32 %v11486_v8, %v4575_v11  ;;  %v4385_v30 = vmul.f32 %v11543_v25, %v4321_v2  ;;  %v11573_v11 = vmul.f32 0.5, %v11498_v37  ;;  %v4979_v6 = vmul.f32 1.442695, %v4903_v60 }
 0x612   :  { %v4905_v2 = vmul.f32 %v4841_v43, %v4009_v24  ;;  %v4842_v24 = vsub.f32 0.0, %v4010_v4  ;;  %v11587_v43 = vmul.f32 0.70710677, %v7566_v21  ;;  %v4015_v46 = vand.u32 2147483647, %v11578_v42 }
 0x613   :  { %v4449_v0 = vadd.f32 1.4214138, %v4385_v30  ;;  %v4703_v12 = vadd.f32 0.2548296, %v4639_v40  ;;  %13284 = vst [vmem:[#allocation41_spill] sm:$0xff] %v11573_v11  ;;  %v11581_v30 = vmul.f32 0.5, %v11507_v57  ;;  %v11583_v40 = vpop.eup %7986  ;;  %7998 = vpow2.f32 %v4979_v6 }
 0x614   :  { %v7989_v15 = vpop.eup %7988  ;;  %v4983_v58 = vmul.f32 1.442695, %v4905_v2  ;;  %8000 = vrcp.f32 %v4137_v7  ;;  %vm3880_vm7 = vcmp.ge.f32.partialorder %v11533_v50, 0.0  ;;  %vm3882_vm8 = vcmp.ge.f32.partialorder %v11558_v29, 0.0 }
 0x615   :  { %v4513_v16 = vmul.f32 %v11543_v25, %v4449_v0  ;;  %v4767_v60 = vmul.f32 %v11486_v8, %v4703_v12  ;;  %v11593_v57 = vpop.eup %7990  ;;  %v4981_v8 = vmul.f32 1.442695, %v4904_v49  ;;  %8002 = vrcp.f32 %v4136_v45  ;;  %v5556_v45 = vld [vmem:[#allocation6 + $0x4c8] sm:$0xff] }
 0x616   :  { %v11597_v44 = vpop.eup %7992  ;;  %v4138_v27 = vadd.f32 1.0, %v4074_v26  ;;  %v7567_v36 = vadd.f32 %v11445_v32, %v11434_v19  ;;  %v4017_v6 = vand.u32 2147483647, %v11587_v43  ;;  %v11605_v2 = vmul.f32 0.70710677, %v11591_v1  ;;  %v5558_v26 = vld [vmem:[#allocation6 + $0x4d8] sm:$0xff] }
 0x617   :  { %v4577_v37 = vadd.f32 -0.28449672, %v4513_v16  ;;  %13285 = vst [vmem:[#allocation79_spill] sm:$0xff] %v11597_v44  ;;  %v5087_v0 = vmul.f32 %v7985_v22, %v4767_v60  ;;  %v4906_v16 = vmul.f32 %v4842_v24, %v4010_v4  ;;  %v11610_v50 = vsel %vm3881_vm6, 1.0, %v13259_v61 }
 0x618   :  { %13286 = vst [vmem:[#allocation13_spill] sm:$0xff] %v11610_v50  ;;  %8004 = vpow2.f32 %v4983_v58  ;;  %v11613_v7 = vsel %vm3880_vm7, 1.0, %v13259_v61  ;;  %v4847_v49 = vsub.f32 0.0, %v4015_v46  ;;  %v11619_v22 = vmul.f32 0.5, %v11541_v63  ;;  %v5557_v58 = vld [vmem:[#allocation6 + $0x4d0] sm:$0xff] }
 0x619   :  { %v4641_v31 = vmul.f32 %v11543_v25, %v4577_v37  ;;  %v11615_v37 = vpop.eup %7994  ;;  %8006 = vpow2.f32 %v4981_v8  ;;  %v4079_v4 = vmul.f32 0.3275911, %v4015_v46  ;;  %v11624_v33 = vsel %vm3882_vm8, 1.0, %v13259_v61 }
 0x61a   :  { %13287 = vst [vmem:[#allocation100_spill] sm:$0xff] %v11615_v37  ;;  %13288 = vst [vmem:[#allocation92_spill] sm:$0xff] %v11619_v22  ;;  %8008 = vrcp.f32 %v4138_v27  ;;  %v11626_v60 = vmul.f32 0.5, %v7550_v51  ;;  %v11628_v24 = vmul.f32 0.70710677, %v7567_v36  ;;  %v5151_v8 = vsub.f32 1.0, %v5087_v0 }
 0x61b   :  { %v4705_v12 = vadd.f32 0.2548296, %v4641_v31  ;;  %13289 = vst [vmem:[#allocation108_spill] sm:$0xff] %v11624_v33  ;;  %v5555_v31 = vld [vmem:[#allocation6 + $0x4c0] sm:$0xff]  ;;  %v4985_v63 = vmul.f32 1.442695, %v4906_v16  ;;  %v4911_v22 = vmul.f32 %v4847_v49, %v4015_v46  ;;  %v7410_v50 = vpack.c.bf16 %v5558_v26, %v5556_v45 }
 0x61c   :  { %v4016_v11 = vand.u32 2147483647, %v11605_v2  ;;  %vm3887_vm9 = vcmp.ge.f32.partialorder %v11578_v42, 0.0  ;;  %v11634_v29 = vmul.f32 0.5, %v7566_v21  ;;  %v4143_v51 = vadd.f32 1.0, %v4079_v4 }
 0x61d   :  { %v4769_v32 = vmul.f32 %v11543_v25, %v4705_v12  ;;  %v11630_v25 = vpop.eup %7996  ;;  %v4849_v12 = vsub.f32 0.0, %v4017_v6  ;;  %vm3889_vm10 = vcmp.ge.f32.partialorder %v11587_v43, 0.0  ;;  %v7552_v33 = vadd.f32 %v11452_v9, %v11386_v59  ;;  %7411 = vmatprep.subr.bf16.mxu1 %v7410_v50 }
 0x61e   :  { %13290 = vst [vmem:[#allocation58_spill] sm:$0xff] %v11634_v29  ;;  %v11639_v37 = vpop.eup %7998  ;;  %v4081_v0 = vmul.f32 0.3275911, %v4017_v6  ;;  %v4018_v16 = vand.u32 2147483647, %v11628_v24  ;;  %v7568_v44 = vadd.f32 %v11456_v52, %v11417_v5  ;;  %v7412_v46 = vpack.c.bf16 %v5557_v58, %v5555_v31 }
 0x61f   :  { %v5089_v27 = vmul.f32 %v7989_v15, %v4769_v32  ;;  %v11644_v21 = vpop.eup %8000  ;;  %v5215_v15 = vmul.f32 %v5151_v8, %v11480_v35  ;;  %8010 = vpow2.f32 %v4985_v63  ;;  %v4913_v49 = vmul.f32 %v4849_v12, %v4017_v6 }
 0x620   :  { %13291 = vst [vmem:[#allocation105_spill] sm:$0xff] %v11644_v21  ;;  %v4848_v32 = vsub.f32 0.0, %v4016_v11  ;;  %v11647_v4 = vpop.eup %8002  ;;  %v11652_v9 = vsel %vm3887_vm9, 1.0, %v13259_v61  ;;  %v4995_v45 = vmul.f32 1.442695, %v4911_v22  ;;  %v11657_v52 = vsel %vm3889_vm10, 1.0, %v13259_v61  ;;  %7413 = vmatpush1.bf16.msra.mxu1 %v7412_v46 }
 0x621   :  { %13292 = vst [vmem:[#allocation49_spill] sm:$0xff] %v11657_v52  ;;  %v4080_v50 = vmul.f32 0.3275911, %v4016_v11  ;;  %v5153_v26 = vsub.f32 1.0, %v5089_v27  ;;  %v11660_v35 = vmul.f32 0.5, %v11591_v1  ;;  %v11662_v6 = vmul.f32 0.5, %v7567_v36 }
 0x622   :  { %v11664_v31 = vmul.f32 0.70710677, %v7552_v33  ;;  %v11666_v58 = vpop.eup %8004  ;;  %8012 = vrcp.f32 %v4143_v51  ;;  %v4145_v42 = vadd.f32 1.0, %v4081_v0  ;;  %v4850_v22 = vsub.f32 0.0, %v4018_v16  ;;  %v5560_v1 = vld [vmem:[#allocation6 + $0x4e8] sm:$0xff]  ;;  %v5562_v46 = vld [vmem:[#allocation6 + $0x4f8] sm:$0xff] }
 0x623   :  { %13293 = vst [vmem:[#allocation68_spill] sm:$0xff] %v11662_v6  ;;  %13294 = vst [vmem:[#allocation54_spill] sm:$0xff] %v11666_v58  ;;  %v3833_v8 = vmul.f32 0.70710677, %v7568_v44  ;;  %v11668_v63 = vpop.eup %8006  ;;  %v5279_v43 = vadd.f32 1.0, %v5215_v15  ;;  %v4912_v29 = vmul.f32 %v4848_v32, %v4016_v11  ;;  %v7553_v27 = vadd.f32 %v11459_v39, %v11424_v48  ;;  %v5561_v52 = vld [vmem:[#allocation6 + $0x4f0] sm:$0xff] }
 0x624   :  { %v4999_v12 = vmul.f32 1.442695, %v4913_v49  ;;  %v11672_v36 = vpop.eup %8008  ;;  %8014 = vpow2.f32 %v4995_v45  ;;  %vm3888_vm11 = vcmp.ge.f32.partialorder %v11605_v2, 0.0  ;;  %v4144_v6 = vadd.f32 1.0, %v4080_v50  ;;  %v5564_v58 = vld [vmem:[#allocation6 + $0x508] sm:$0xff] }
 0x625   :  { %13295 = vst [vmem:[#allocation86_spill] sm:$0xff] %v11672_v36  ;;  %v4082_v51 = vmul.f32 0.3275911, %v4018_v16  ;;  %v5217_v0 = vmul.f32 %v5153_v26, %v11525_v14  ;;  %vm3890_vm12 = vcmp.ge.f32.partialorder %v11628_v24, 0.0  ;;  %v4023_v15 = vand.u32 2147483647, %v11664_v31 }
 0x626   :  { %v7569_v11 = vadd.f32 %v11461_v55, %v11434_v19  ;;  %8016 = vrcp.f32 %v4145_v42  ;;  %v4914_v39 = vmul.f32 %v4850_v22, %v4018_v16  ;;  %v4025_v49 = vand.u32 2147483647, %v3833_v8 }
 0x627   :  { %v7414_v32 = vpack.c.bf16 %v5562_v46, %v5560_v1  ;;  %8018 = vpow2.f32 %v4999_v12  ;;  %v11681_v45 = vsel %vm3888_vm11, 1.0, %v13259_v61  ;;  %v4997_v2 = vmul.f32 1.442695, %v4912_v29 }
 0x628   :  { %v11683_v50 = vmul.f32 0.70710677, %v7553_v27  ;;  %v11686_v14 = vmul.f32 %v5279_v43, %v11477_v47  ;;  %8020 = vrcp.f32 %v4144_v6  ;;  %v11689_v24 = vsel %vm3890_vm12, 1.0, %v13259_v61 }
 0x629   :  { %13296 = vst [vmem:[#allocation53_spill] sm:$0xff] %v11689_v24  ;;  %v4146_v26 = vadd.f32 1.0, %v4082_v51  ;;  %7415 = vmatprep.subr.bf16.mxu1 %v7414_v32  ;;  %v11691_v55 = vpop.eup %8010  ;;  %v5281_v16 = vadd.f32 1.0, %v5217_v0  ;;  %v11693_v42 = vmul.f32 0.5, %v7552_v33  ;;  %v4855_v22 = vsub.f32 0.0, %v4023_v15 }
 0x62a   :  { %13297 = vst [vmem:[#allocation81_spill] sm:$0xff] %v11691_v55  ;;  %v11695_v12 = vmul.f32 0.70710677, %v7569_v11  ;;  %v5001_v29 = vmul.f32 1.442695, %v4914_v39  ;;  %v4857_v46 = vsub.f32 0.0, %v4025_v49  ;;  %v11699_v47 = vadd.f32 %v11468_v53, %v11386_v59 }
 0x62b   :  { %13298 = vst [vmem:[#allocation101_spill] sm:$0xff] %v11693_v42  ;;  %v4087_v1 = vmul.f32 0.3275911, %v4023_v15  ;;  %8022 = vpow2.f32 %v4997_v2  ;;  %v11701_v6 = vmul.f32 0.5, %v7568_v44  ;;  %v4024_v43 = vand.u32 2147483647, %v11683_v50 }
 0x62c   :  { %v11706_v51 = vadd.f32 %v11470_v62, %v11417_v5  ;;  %v11708_v33 = vpop.eup %8012  ;;  %vm3895_vm13 = vcmp.ge.f32.partialorder %v11664_v31, 0.0  ;;  %vm3897_vm14 = vcmp.ge.f32.partialorder %v3833_v8, 0.0  ;;  %v4089_v0 = vmul.f32 0.3275911, %v4025_v49  ;;  %v5559_v8 = vld [vmem:[#allocation6 + $0x4e0] sm:$0xff] }
 0x62d   :  { %13299 = vst [vmem:[#allocation71_spill] sm:$0xff] %v11701_v6  ;;  %v11712_v39 = vmul.f32 0.70710677, %v11699_v47  ;;  %8024 = vrcp.f32 %v4146_v26  ;;  %v4919_v53 = vmul.f32 %v4855_v22, %v4023_v15  ;;  %v4026_v44 = vand.u32 2147483647, %v11695_v12 }
 0x62e   :  { %v11716_v32 = vmul.f32 0.70710677, %v11706_v51  ;;  %v11718_v2 = vpop.eup %8014  ;;  %v11721_v62 = vmul.f32 %v5281_v16, %v11482_v18  ;;  %8026 = vpow2.f32 %v5001_v29  ;;  %v4151_v6 = vadd.f32 1.0, %v4087_v1  ;;  %v5566_v29 = vld [vmem:[#allocation6 + $0x518] sm:$0xff] }
 0x62f   :  { %v4921_v31 = vmul.f32 %v4857_v46, %v4025_v49  ;;  %v11724_v24 = vsel %vm3895_vm13, 1.0, %v13259_v61  ;;  %v11727_v15 = vsel %vm3897_vm14, 1.0, %v13259_v61  ;;  %v11729_v26 = vmul.f32 0.5, %v7553_v27 }
 0x630   :  { %13300 = vst [vmem:[#allocation19_spill] sm:$0xff] %v11721_v62  ;;  %13301 = vst [vmem:[#allocation109_spill] sm:$0xff] %v11727_v15  ;;  %v4088_v22 = vmul.f32 0.3275911, %v4024_v43  ;;  %v11731_v55 = vpop.eup %8016  ;;  %v4153_v21 = vadd.f32 1.0, %v4089_v0  ;;  %v4856_v18 = vsub.f32 0.0, %v4024_v43  ;;  %v7416_v15 = vpack.c.bf16 %v5561_v52, %v5559_v8 }
 0x631   :  { %13302 = vst [vmem:[#allocation65_spill] sm:$0xff] %v11731_v55  ;;  %v11733_v16 = vmul.f32 0.5, %v7569_v11  ;;  %v4031_v49 = vand.u32 2147483647, %v11712_v39  ;;  %v11736_v1 = vpop.eup %8018  ;;  %v5011_v46 = vmul.f32 1.442695, %v4919_v53  ;;  %8028 = vrcp.f32 %v4151_v6 }
 0x632   :  { %13304 = vst [vmem:[#allocation46_spill] sm:$0xff] %v11736_v1  ;;  %v4858_v62 = vsub.f32 0.0, %v4026_v44  ;;  %v4033_v36 = vand.u32 2147483647, %v11716_v32  ;;  %v11739_v27 = vpop.eup %8020  ;;  %v5015_v42 = vmul.f32 1.442695, %v4921_v31  ;;  %v11744_v11 = vadd.f32 %v11472_v54, %v11424_v48  ;;  %7417 = vmatpush1.bf16.msra.mxu1 %v7416_v15 }
 0x633   :  { %13303 = vst [vmem:[#allocation106_spill] sm:$0xff] %v11733_v16  ;;  %vm3896_vm15 = vcmp.ge.f32.partialorder %v11683_v50, 0.0  ;;  %v4152_v0 = vadd.f32 1.0, %v4088_v22  ;;  %vm3898_vm0 = vcmp.ge.f32.partialorder %v11695_v12, 0.0  ;;  %v11749_v53 = vadd.f32 %v11474_v13, %v11434_v19  ;;  %v5565_v15 = vld [vmem:[#allocation6 + $0x510] sm:$0xff] }
 0x634   :  { %v7418_v16 = vpack.c.bf16 %v5566_v29, %v5564_v58  ;;  %8030 = vrcp.f32 %v4153_v21  ;;  %v4920_v52 = vmul.f32 %v4856_v18, %v4024_v43  ;;  %v4090_v8 = vmul.f32 0.3275911, %v4026_v44 }
 0x635   :  { %13305 = vst [vmem:[#allocation66_spill] sm:$0xff] %v11749_v53  ;;  %v4863_v6 = vsub.f32 0.0, %v4031_v49  ;;  %v11751_v31 = vpop.eup %8022  ;;  %8032 = vpow2.f32 %v5011_v46  ;;  %v4922_v1 = vmul.f32 %v4858_v62, %v4026_v44  ;;  %v4865_v55 = vsub.f32 0.0, %v4033_v36  ;;  %v5563_v62 = vld [vmem:[#allocation6 + $0x500] sm:$0xff] }
 0x636   :  { %v11754_v54 = vmul.f32 0.70710677, %v11744_v11  ;;  %7419 = vmatprep.subr.bf16.mxu1 %v7418_v16  ;;  %8034 = vpow2.f32 %v5015_v42  ;;  %v11759_v13 = vsel %vm3896_vm15, 1.0, %v13259_v61  ;;  %v11762_v21 = vmul.f32 0.70710677, %v11749_v53 }
 0x637   :  { %v11766_v58 = vadd.f32 %v11484_v20, %v11386_v59  ;;  %v11768_v43 = vpop.eup %8024  ;;  %8036 = vrcp.f32 %v4152_v0  ;;  %v11773_v44 = vsel %vm3898_vm0, 1.0, %v13259_v61  ;;  %v11776_v42 = vmul.f32 0.5, %v11699_v47 }
 0x638   :  { %13306 = vst [vmem:[#allocation76_spill] sm:$0xff] %v11762_v21  ;;  %13307 = vst [vmem:[#allocation96_spill] sm:$0xff] %v11768_v43  ;;  %v4095_v50 = vmul.f32 0.3275911, %v4031_v49  ;;  %v11778_v22 = vpop.eup %8026  ;;  %v5013_v18 = vmul.f32 1.442695, %v4920_v52  ;;  %v4927_v20 = vmul.f32 %v4863_v6, %v4031_v49  ;;  %v4929_v53 = vmul.f32 %v4865_v55, %v4033_v36 }
 0x639   :  { %13308 = vst [vmem:[#allocation61_spill] sm:$0xff] %v11773_v44  ;;  %13309 = vst [vmem:[#allocation90_spill] sm:$0xff] %v11776_v42  ;;  %v4154_v16 = vadd.f32 1.0, %v4090_v8  ;;  %v4097_v29 = vmul.f32 0.3275911, %v4033_v36  ;;  %v11787_v47 = vadd.f32 %v11489_v10, %v11417_v5  ;;  %v7420_v43 = vpack.c.bf16 %v5565_v15, %v5563_v62 }
 0x63a   :  { %13310 = vst [vmem:[#allocation80_spill] sm:$0xff] %v11778_v22  ;;  %v5017_v46 = vmul.f32 1.442695, %v4922_v1  ;;  %v4032_v0 = vand.u32 2147483647, %v11754_v54  ;;  %v11791_v52 = vadd.f32 %v11491_v28, %v11424_v48  ;;  %vm3903_vm1 = vcmp.ge.f32.partialorder %v11712_v39, 0.0 }
 0x63b   :  { %v11782_v12 = vmul.f32 0.70710677, %v11766_v58  ;;  %v4034_v44 = vand.u32 2147483647, %v11762_v21  ;;  %13311 = vst [vmem:[#allocation99_spill] sm:$0xff] %v11787_v47  ;;  %v4159_v49 = vadd.f32 1.0, %v4095_v50  ;;  %v11798_v1 = vpop.eup %8028  ;;  %8038 = vpow2.f32 %v5013_v18  ;;  %7421 = vmatpush1.bf16.msra.mxu1 %v7420_v43 }
 0x63c   :  { %v11795_v36 = vmul.f32 0.5, %v11706_v51  ;;  %v5027_v8 = vmul.f32 1.442695, %v4927_v20  ;;  %vm3905_vm2 = vcmp.ge.f32.partialorder %v11716_v32, 0.0  ;;  %v4161_v10 = vadd.f32 1.0, %v4097_v29  ;;  %v5570_v22 = vld [vmem:[#allocation6 + $0x538] sm:$0xff] }
 0x63d   :  { %v4039_v55 = vand.u32 2147483647, %v11782_v12  ;;  %8040 = vrcp.f32 %v4154_v16  ;;  %v5031_v6 = vmul.f32 1.442695, %v4929_v53  ;;  %v4096_v28 = vmul.f32 0.3275911, %v4032_v0 }
 0x63e   :  { %13312 = vst [vmem:[#allocation74_spill] sm:$0xff] %v11795_v36  ;;  %v4864_v62 = vsub.f32 0.0, %v4032_v0  ;;  %v11801_v15 = vpop.eup %8030  ;;  %8042 = vpow2.f32 %v5017_v46  ;;  %v4866_v50 = vsub.f32 0.0, %v4034_v44  ;;  %v11804_v51 = vmul.f32 0.70710677, %v11787_v47  ;;  %v5568_v47 = vld [vmem:[#allocation6 + $0x528] sm:$0xff] }
 0x63f   :  { %13313 = vst [vmem:[#allocation94_spill] sm:$0xff] %v11801_v15  ;;  %v11807_v36 = vmul.f32 0.70710677, %v11791_v52  ;;  %v11809_v18 = vpop.eup %8032  ;;  %v11814_v43 = vsel %vm3903_vm1, 1.0, %v13259_v61  ;;  %8044 = vrcp.f32 %v4159_v49  ;;  %v4871_v53 = vsub.f32 0.0, %v4039_v55 }
 0x640   :  { %13314 = vst [vmem:[#allocation22_spill] sm:$0xff] %v11804_v51  ;;  %13315 = vst [vmem:[#allocation89_spill] sm:$0xff] %v11814_v43  ;;  %v11818_v16 = vadd.f32 %v11500_v3, %v11434_v19  ;;  %v11820_v20 = vpop.eup %8034  ;;  %v11825_v29 = vsel %vm3905_vm2, 1.0, %v13259_v61  ;;  %8046 = vrcp.f32 %v4161_v10  ;;  %v11828_v46 = vmul.f32 0.5, %v11744_v11 }
 0x641   :  { %13317 = vst [vmem:[#allocation51_spill] sm:$0xff] %v11820_v20  ;;  %13318 = vst [vmem:[#allocation30_spill] sm:$0xff] %v11825_v29  ;;  %v4098_v39 = vmul.f32 0.3275911, %v4034_v44  ;;  %v11830_v49 = vpop.eup %8036  ;;  %8048 = vpow2.f32 %v5027_v8  ;;  %vm3904_vm3 = vcmp.ge.f32.partialorder %v11754_v54, 0.0  ;;  %v4928_v3 = vmul.f32 %v4864_v62, %v4032_v0 }
 0x642   :  { %13316 = vst [vmem:[#allocation50_spill] sm:$0xff] %v11818_v16  ;;  %13319 = vst [vmem:[#allocation12_spill] sm:$0xff] %v11828_v46  ;;  %v4041_v20 = vand.u32 2147483647, %v11804_v51  ;;  %8050 = vpow2.f32 %v5031_v6  ;;  %v4160_v21 = vadd.f32 1.0, %v4096_v28  ;;  %v4930_v32 = vmul.f32 %v4866_v50, %v4034_v44  ;;  %v5569_v50 = vld [vmem:[#allocation6 + $0x530] sm:$0xff] }
 0x643   :  { %v4040_v29 = vand.u32 2147483647, %v11807_v36  ;;  %v4103_v10 = vmul.f32 0.3275911, %v4039_v55  ;;  %v4935_v15 = vmul.f32 %v4871_v53, %v4039_v55  ;;  %v11836_v11 = vmul.f32 0.70710677, %v11818_v16 }
 0x644   :  { %v7422_v42 = vpack.c.bf16 %v5570_v22, %v5568_v47  ;;  %v11839_v43 = vsel %vm3904_vm3, 1.0, %v13259_v61  ;;  %v4162_v8 = vadd.f32 1.0, %v4098_v39  ;;  %v11842_v54 = vmul.f32 0.5, %v11766_v58  ;;  %v5567_v22 = vld [vmem:[#allocation6 + $0x520] sm:$0xff] }
 0x645   :  { %13320 = vst [vmem:[#allocation36_spill] sm:$0xff] %v11836_v11  ;;  %vm3911_vm4 = vcmp.ge.f32.partialorder %v11782_v12, 0.0  ;;  %v5029_v0 = vmul.f32 1.442695, %v4928_v3  ;;  %v4873_v6 = vsub.f32 0.0, %v4041_v20  ;;  %v7558_v44 = vadd.f32 %v11510_v56, %v11386_v59  ;;  %v11851_v47 = vpop.eup %8038 }
 0x646   :  { %13321 = vst [vmem:[#allocation24_spill] sm:$0xff] %v11842_v54  ;;  %7423 = vmatprep.subr.bf16.mxu1 %v7422_v42  ;;  %v11849_v55 = vadd.f32 %v11512_v17, %v11417_v5  ;;  %8052 = vrcp.f32 %v4160_v21  ;;  %v5033_v28 = vmul.f32 1.442695, %v4930_v32  ;;  %v4872_v62 = vsub.f32 0.0, %v4040_v29 }
 0x647   :  { %v4042_v58 = vand.u32 2147483647, %v11836_v11  ;;  %v11854_v12 = vpop.eup %8040  ;;  %v11857_v42 = vsel %vm3911_vm4, 1.0, %v13259_v61  ;;  %v4167_v53 = vadd.f32 1.0, %v4103_v10  ;;  %v5043_v56 = vmul.f32 1.442695, %v4935_v15 }
 0x648   :  { %13322 = vst [vmem:[#allocation56_spill] sm:$0xff] %v11849_v55  ;;  %13323 = vst [vmem:[#allocation32_spill] sm:$0xff] %v11854_v12  ;;  %v4105_v39 = vmul.f32 0.3275911, %v4041_v20  ;;  %v11859_v3 = vpop.eup %8042  ;;  %8054 = vrcp.f32 %v4162_v8  ;;  %v4104_v17 = vmul.f32 0.3275911, %v4040_v29  ;;  %v4937_v11 = vmul.f32 %v4873_v6, %v4041_v20 }
 0x649   :  { %13324 = vst [vmem:[#allocation75_spill] sm:$0xff] %v11857_v42  ;;  %13325 = vst [vmem:[#allocation67_spill] sm:$0xff] %v11859_v3  ;;  %v3855_v16 = vmul.f32 0.70710677, %v7558_v44  ;;  %v11862_v21 = vmul.f32 0.70710677, %v11849_v55  ;;  %v11864_v32 = vpop.eup %8044  ;;  %8056 = vpow2.f32 %v5029_v0  ;;  %v7424_v51 = vpack.c.bf16 %v5569_v50, %v5567_v22 }
 0x64a   :  { %vm3912_vm5 = vcmp.ge.f32.partialorder %v11807_v36, 0.0  ;;  %v11867_v12 = vpop.eup %8046  ;;  %8058 = vpow2.f32 %v5033_v28  ;;  %v4936_v15 = vmul.f32 %v4872_v62, %v4040_v29  ;;  %v4874_v10 = vsub.f32 0.0, %v4042_v58  ;;  %v5572_v3 = vld [vmem:[#allocation6 + $0x548] sm:$0xff]  ;;  %v5574_v8 = vld [vmem:[#allocation6 + $0x558] sm:$0xff] }
 0x64b   :  { %13326 = vst [vmem:[#allocation18_spill] sm:$0xff] %v11862_v21  ;;  %13327 = vst [vmem:[#allocation27_spill] sm:$0xff] %v11867_v12  ;;  %v4047_v54 = vand.u32 2147483647, %v3855_v16  ;;  %v11869_v42 = vpop.eup %8048  ;;  %8060 = vrcp.f32 %v4167_v53  ;;  %v4169_v55 = vadd.f32 1.0, %v4105_v39  ;;  %v11872_v46 = vmul.f32 0.5, %v11791_v52  ;;  %7425 = vmatpush1.bf16.msra.mxu1 %v7424_v51 }
 0x64c   :  { %13328 = vst [vmem:[#allocation37_spill] sm:$0xff] %v11869_v42  ;;  %v4049_v20 = vand.u32 2147483647, %v11862_v21  ;;  %v11875_v0 = vpop.eup %8050  ;;  %8062 = vpow2.f32 %v5043_v56  ;;  %v11880_v29 = vsel %vm3912_vm5, 1.0, %v13259_v61  ;;  %v4168_v6 = vadd.f32 1.0, %v4104_v17  ;;  %v11981_v42 = vld [vmem:[#allocation6 + $0x5c0] sm:$0xff] }
 0x64d   :  { %13329 = vst [vmem:[#allocation25_spill] sm:$0xff] %v11872_v46  ;;  %13330 = vst [vmem:[#allocation26_spill] sm:$0xff] %v11875_v0  ;;  %v4106_v22 = vmul.f32 0.3275911, %v4042_v58  ;;  %v5047_v28 = vmul.f32 1.442695, %v4937_v11  ;;  %v7559_v62 = vadd.f32 %v11518_v38, %v11424_v48  ;;  %v11886_v52 = vadd.f32 %v11520_v34, %v11434_v19 }
 0x64e   :  { %13331 = vst [vmem:[#allocation64_spill] sm:$0xff] %v11880_v29  ;;  %v7426_v50 = vpack.c.bf16 %v5574_v8, %v5572_v3  ;;  %v5045_v51 = vmul.f32 1.442695, %v4936_v15  ;;  %v4938_v53 = vmul.f32 %v4874_v10, %v4042_v58  ;;  %v4111_v39 = vmul.f32 0.3275911, %v4047_v54 }
 0x64f   :  { %13332 = vst [vmem:[#allocation60_spill] sm:$0xff] %v11886_v52  ;;  %v4879_v56 = vsub.f32 0.0, %v4047_v54  ;;  %8064 = vrcp.f32 %v4169_v55  ;;  %v4881_v21 = vsub.f32 0.0, %v4049_v20  ;;  %v3856_v36 = vmul.f32 0.70710677, %v7559_v62 }
 0x650   :  { %v11889_v0 = vmul.f32 0.70710677, %v11886_v52  ;;  %7427 = vmatprep.subr.bf16.mxu1 %v7426_v50  ;;  %v11891_v11 = vpop.eup %8052  ;;  %8066 = vrcp.f32 %v4168_v6  ;;  %v4170_v38 = vadd.f32 1.0, %v4106_v22  ;;  %v11893_v17 = vmul.f32 0.5, %v7558_v44  ;;  %v5571_v50 = vld [vmem:[#allocation6 + $0x540] sm:$0xff]  ;;  %v5573_v52 = vld [vmem:[#allocation6 + $0x550] sm:$0xff] }
 0x651   :  { %v7560_v34 = vadd.f32 %v11548_v41, %v11386_v59  ;;  %8068 = vpow2.f32 %v5047_v28  ;;  %vm3919_vm6 = vcmp.ge.f32.partialorder %v3855_v16, 0.0  ;;  %v4113_v58 = vmul.f32 0.3275911, %v4049_v20 }
 0x652   :  { %13333 = vst [vmem:[#allocation44_spill] sm:$0xff] %v11889_v0  ;;  %13334 = vst [vmem:[#allocation33_spill] sm:$0xff] %v11893_v17  ;;  %v4048_v3 = vand.u32 2147483647, %v3856_v36  ;;  %v11897_v55 = vpop.eup %8054  ;;  %8070 = vpow2.f32 %v5045_v51  ;;  %v5049_v15 = vmul.f32 1.442695, %v4938_v53  ;;  %v4943_v10 = vmul.f32 %v4879_v56, %v4047_v54 }
 0x653   :  { %13335 = vst [vmem:[#allocation28_spill] sm:$0xff] %v11897_v55  ;;  %v4050_v8 = vand.u32 2147483647, %v11889_v0  ;;  %v11900_v6 = vpop.eup %8056  ;;  %v4175_v44 = vadd.f32 1.0, %v4111_v39  ;;  %v4945_v22 = vmul.f32 %v4881_v21, %v4049_v20  ;;  %8072 = vrcp.f32 %v4170_v38  ;;  %v13340_v20 = vld [vmem:[#allocation40_spill] sm:$0xff] }
 0x654   :  { %v4112_v12 = vmul.f32 0.3275911, %v4048_v3  ;;  %v4880_v17 = vsub.f32 0.0, %v4048_v3  ;;  %v11902_v59 = vpop.eup %8058  ;;  %v11906_v41 = vsel %vm3919_vm6, 1.0, %v13259_v61  ;;  %v11908_v51 = vmul.f32 0.70710677, %v7560_v34 }
 0x655   :  { %13336 = vst [vmem:[#allocation34_spill] sm:$0xff] %v11902_v59  ;;  %13337 = vst [vmem:[#allocation20_spill] sm:$0xff] %v11906_v41  ;;  %v4114_v28 = vmul.f32 0.3275911, %v4050_v8  ;;  %v11910_v54 = vpop.eup %8060  ;;  %v4177_v53 = vadd.f32 1.0, %v4113_v58  ;;  %v11914_v56 = vadd.f32 %v11550_v23, %v11417_v5  ;;  %v7428_v21 = vpack.c.bf16 %v5573_v52, %v5571_v50 }
 0x656   :  { %13338 = vst [vmem:[#allocation52_spill] sm:$0xff] %v11910_v54  ;;  %v11918_v39 = vadd.f32 %v13340_v20, %v11424_v48  ;;  %v11920_v38 = vpop.eup %8062  ;;  %8074 = vpow2.f32 %v5049_v15  ;;  %v5059_v16 = vmul.f32 1.442695, %v4943_v10  ;;  %v4944_v0 = vmul.f32 %v4880_v17, %v4048_v3  ;;  %v13346_v10 = vld [vmem:[#allocation39_spill] sm:$0xff] }
 0x657   :  { %13339 = vst [vmem:[#allocation77_spill] sm:$0xff] %v11914_v56  ;;  %13341 = vst [vmem:[#allocation23_spill] sm:$0xff] %v11920_v38  ;;  %v4055_v59 = vand.u32 2147483647, %v11908_v51  ;;  %8076 = vrcp.f32 %v4175_v44  ;;  %v11923_v55 = vmul.f32 1.442695, %v4945_v22  ;;  %7429 = vmatpush1.bf16.msra.mxu1 %v7428_v21  ;;  %v11939_v44 = vadd.f32 %v13346_v10, %v11434_v19 }
 0x658   :  { %v11925_v58 = vmul.f32 0.5, %v7559_v62  ;;  %v4176_v41 = vadd.f32 1.0, %v4112_v12  ;;  %vm3920_vm7 = vcmp.ge.f32.partialorder %v3856_v36, 0.0  ;;  %v4178_v5 = vadd.f32 1.0, %v4114_v28  ;;  %v5576_v22 = vld [vmem:[#allocation6 + $0x568] sm:$0xff]  ;;  %v5578_v28 = vld [vmem:[#allocation6 + $0x578] sm:$0xff] }
 0x659   :  { %13342 = vst [vmem:[#allocation88_spill] sm:$0xff] %v11923_v55  ;;  %v4882_v23 = vsub.f32 0.0, %v4050_v8  ;;  %v4887_v52 = vsub.f32 0.0, %v4055_v59  ;;  %v11927_v48 = vpop.eup %8064  ;;  %8078 = vrcp.f32 %v4177_v53  ;;  %v4119_v50 = vmul.f32 0.3275911, %v4055_v59  ;;  %13347 = vst [vmem:[#allocation62_spill] sm:$0xff] %v11939_v44 }
 0x65a   :  { %13343 = vst [vmem:[#allocation38_spill] sm:$0xff] %v11925_v58  ;;  %13344 = vst [vmem:[#allocation16_spill] sm:$0xff] %v11927_v48  ;;  %v11930_v15 = vmul.f32 0.70710677, %v11914_v56  ;;  %v11933_v17 = vmul.f32 0.70710677, %v11918_v39  ;;  %v11935_v3 = vpop.eup %8066  ;;  %8080 = vpow2.f32 %v5059_v16 }
 0x65b   :  { %v5061_v62 = vmul.f32 1.442695, %v4944_v0  ;;  %v4951_v12 = vmul.f32 %v4887_v52, %v4055_v59  ;;  %v11941_v21 = vpop.eup %8068  ;;  %v11945_v53 = vsel %vm3920_vm7, 1.0, %v13259_v61  ;;  %8082 = vrcp.f32 %v4176_v41  ;;  %v5575_v16 = vld [vmem:[#allocation6 + $0x560] sm:$0xff]  ;;  %v5577_v52 = vld [vmem:[#allocation6 + $0x570] sm:$0xff]  ;;  %v5580_v10 = vld [vmem:[#allocation6 + $0x588] sm:$0xff] }
 0x65c   :  { %13345 = vst [vmem:[#allocation14_spill] sm:$0xff] %v11930_v15  ;;  %13348 = vst [vmem:[#allocation93_spill] sm:$0xff] %v11941_v21  ;;  %v4057_v20 = vand.u32 2147483647, %v11930_v15  ;;  %v4056_v56 = vand.u32 2147483647, %v11933_v17  ;;  %v11949_v0 = vpop.eup %8070  ;;  %8084 = vrcp.f32 %v4178_v5  ;;  %v4946_v59 = vmul.f32 %v4882_v23, %v4050_v8 }
 0x65d   :  { %13349 = vst [vmem:[#allocation29_spill] sm:$0xff] %v11945_v53  ;;  %13350 = vst [vmem:[#allocation82_spill] sm:$0xff] %v11949_v0  ;;  %v11951_v19 = vmul.f32 0.5, %v7560_v34  ;;  %vm3927_vm8 = vcmp.ge.f32.partialorder %v11908_v51, 0.0  ;;  %v5582_v21 = vld [vmem:[#allocation6 + $0x598] sm:$0xff]  ;;  %v4183_v36 = vadd.f32 1.0, %v4119_v50  ;;  %v11958_v46 = vpop.eup %8072  ;;  %8086 = vpow2.f32 %v5061_v62 }
 0x65e   :  { %v4121_v48 = vmul.f32 0.3275911, %v4057_v20  ;;  %v4120_v55 = vmul.f32 0.3275911, %v4056_v56  ;;  %v4888_v41 = vsub.f32 0.0, %v4056_v56  ;;  %v11954_v58 = vld [vmem:[#allocation6 + $0x580] sm:$0xff]  ;;  %v7430_v8 = vpack.c.bf16 %v5578_v28, %v5576_v22 }
 0x65f   :  { %13351 = vst [vmem:[#allocation102_spill] sm:$0xff] %v11951_v19  ;;  %v11956_v15 = vld [vmem:[#allocation6 + $0x590] sm:$0xff]  ;;  %13352 = vst [vmem:[#allocation95_spill] sm:$0xff] %v11958_v46  ;;  %v5075_v5 = vmul.f32 1.442695, %v4951_v12  ;;  %v11963_v23 = vld [vmem:[#allocation6 + $0x5a8] sm:$0xff]  ;;  %v7432_v28 = vpack.c.bf16 %v5577_v52, %v5575_v16  ;;  %8088 = vrcp.f32 %v4183_v36 }
 0x660   :  { %v11961_v34 = vmul.f32 0.70710677, %v11939_v44  ;;  %v11965_v19 = vld [vmem:[#allocation6 + $0x5b8] sm:$0xff]  ;;  %v4185_v50 = vadd.f32 1.0, %v4121_v48  ;;  %v4889_v53 = vsub.f32 0.0, %v4057_v20  ;;  %vm3928_vm9 = vcmp.ge.f32.partialorder %v11933_v17, 0.0  ;;  %v11974_v62 = vpop.eup %8074  ;;  %7431 = vmatprep.subr.bf16.mxu1 %v7430_v8 }
 0x661   :  { %v4952_v29 = vmul.f32 %v4888_v41, %v4056_v56  ;;  %v11968_v38 = vld [vmem:[#allocation6 + $0x5a0] sm:$0xff]  ;;  %v11970_v0 = vld [vmem:[#allocation6 + $0x5b0] sm:$0xff]  ;;  %v11972_v46 = vld [vmem:[#allocation6 + $0x5c8] sm:$0xff]  ;;  %13354 = vst [vmem:[#allocation69_spill] sm:$0xff] %v11974_v62  ;;  %v4184_v12 = vadd.f32 1.0, %v4120_v55  ;;  %v7434_v44 = vpack.c.bf16 %v5582_v21, %v5580_v10  ;;  %v11985_v41 = vpop.eup %8076  ;;  %v11992_v55 = vsel %vm3927_vm8, 1.0, %v13259_v61  ;;  %7433 = vmatpush1.bf16.msra.mxu1 %v7432_v28 }
 0x662   :  { %13353 = vst [vmem:[#allocation21_spill] sm:$0xff] %v11961_v34  ;;  %v11977_v22 = vand.u32 2147483647, %v11961_v34  ;;  %v11979_v48 = vld [vmem:[#allocation6 + $0x5d8] sm:$0xff]  ;;  %v11983_v56 = vld [vmem:[#allocation6 + $0x5d0] sm:$0xff]  ;;  %13356 = vst [vmem:[#allocation57_spill] sm:$0xff] %v11985_v41  ;;  %8090 = vpow2.f32 %v5075_v5  ;;  %v12012_v62 = vmul.f32 %v4889_v53, %v4057_v20  ;;  %v7440_v17 = vpack.c.bf16 %v11970_v0, %v11968_v38 }
 0x663   :  { %v11987_v54 = vmul.f32 1.442695, %v4946_v59  ;;  %13358 = vst [vmem:[#allocation55_spill] sm:$0xff] %v11992_v55  ;;  %v5077_v34 = vmul.f32 1.442695, %v4952_v29  ;;  %v11994_v8 = vld [vmem:[#allocation6 + $0x5e8] sm:$0xff]  ;;  %v7436_v59 = vpack.c.bf16 %v11956_v15, %v11954_v58  ;;  %v12010_v29 = vpop.eup %8078  ;;  %8092 = vrcp.f32 %v4185_v50  ;;  %7435 = vmatprep.subr.bf16.mxu1 %v7434_v44 }
 0x664   :  { %13355 = vst [vmem:[#allocation107_spill] sm:$0xff] %v11977_v22  ;;  %v11996_v21 = vld [vmem:[#allocation6 + $0x5f8] sm:$0xff]  ;;  %v11999_v16 = vmul.f32 0.5, %v11918_v39  ;;  %v4122_v52 = vmul.f32 0.3275911, %v11977_v22  ;;  %v12004_v10 = vld [vmem:[#allocation6 + $0x5e0] sm:$0xff]  ;;  %v7438_v58 = vpack.c.bf16 %v11965_v19, %v11963_v23  ;;  %8094 = vrcp.f32 %v4184_v12 }
 0x665   :  { %13357 = vst [vmem:[#allocation59_spill] sm:$0xff] %v11987_v54  ;;  %v12006_v51 = vld [vmem:[#allocation6 + $0x5f0] sm:$0xff]  ;;  %v12008_v36 = vld [vmem:[#allocation6 + $0x608] sm:$0xff]  ;;  %13360 = vst [vmem:[#allocation85_spill] sm:$0xff] %v12010_v29  ;;  %v12017_v39 = vsel %vm3928_vm9, 1.0, %v13259_v61  ;;  %v12027_v54 = vpop.eup %8080  ;;  %v7442_v44 = vpack.c.bf16 %v11979_v48, %v11972_v46  ;;  %8096 = vpow2.f32 %v5077_v34  ;;  %v7444_v12 = vpack.c.bf16 %v11983_v56, %v11981_v42  ;;  %7437 = vmatpush1.bf16.msra.mxu1 %v7436_v59 }
 0x666   :  { %13359 = vst [vmem:[#allocation98_spill] sm:$0xff] %v11999_v16  ;;  %13361 = vst [vmem:[#allocation91_spill] sm:$0xff] %v12012_v62  ;;  %v12021_v15 = vld [vmem:[#allocation6 + $0x618] sm:$0xff]  ;;  %v12023_v5 = vld [vmem:[#allocation6 + $0x600] sm:$0xff]  ;;  %v12040_v50 = vpop.eup %8082  ;;  %v12042_v29 = vadd.f32 1.0, %v4122_v52  ;;  %v7446_v61 = vpack.c.bf16 %v11996_v21, %v11994_v8  ;;  %7439 = vmatprep.subr.bf16.mxu1 %v7438_v58 }
 0x667   :  { %13362 = vst [vmem:[#allocation84_spill] sm:$0xff] %v12017_v39  ;;  %v12025_v28 = vld [vmem:[#allocation6 + $0x610] sm:$0xff]  ;;  %13363 = vst [vmem:[#allocation104_spill] sm:$0xff] %v12027_v54  ;;  %v12034_v20 = vld [vmem:[#allocation6 + $0x628] sm:$0xff]  ;;  %v4256_v53 = vmul.f32 1.0614054, %v11583_v40  ;;  %v12053_v48 = vpop.eup %8084 }
 0x668   :  { %v12036_v19 = vld [vmem:[#allocation6 + $0x638] sm:$0xff]  ;;  %v12038_v23 = vld [vmem:[#allocation6 + $0x620] sm:$0xff]  ;;  %13365 = vst [vmem:[#allocation73_spill] sm:$0xff] %v12042_v29  ;;  %v12047_v38 = vld [vmem:[#allocation6 + $0x630] sm:$0xff]  ;;  %v4264_v56 = vmul.f32 1.0614054, %v11647_v4  ;;  %v12075_v42 = vpop.eup %8086 }
 0x669   :  { %13364 = vst [vmem:[#allocation97_spill] sm:$0xff] %v12038_v23  ;;  %v12049_v0 = vld [vmem:[#allocation6 + $0x648] sm:$0xff]  ;;  %v12051_v46 = vld [vmem:[#allocation6 + $0x658] sm:$0xff]  ;;  %13368 = vst [vmem:[#allocation78_spill] sm:$0xff] %v12053_v48  ;;  %v4320_v22 = vadd.f32 -1.4531521, %v4256_v53  ;;  %7441 = vmatpush1.bf16.msra.mxu1 %v7440_v17 }
 0x66a   :  { %13366 = vst [vmem:[#allocation70_spill] sm:$0xff] %v12049_v0  ;;  %13367 = vst [vmem:[#allocation87_spill] sm:$0xff] %v12051_v46  ;;  %v12062_v52 = vld [vmem:[#allocation6 + $0x640] sm:$0xff]  ;;  %v12064_v16 = vld [vmem:[#allocation6 + $0x650] sm:$0xff]  ;;  %v4263_v21 = vmul.f32 1.0614054, %v11630_v25  ;;  %7443 = vmatprep.subr.bf16.mxu1 %v7442_v44 }
 0x66b   :  { %13369 = vst [vmem:[#allocation72_spill] sm:$0xff] %v12062_v52  ;;  %13370 = vst [vmem:[#allocation43_spill] sm:$0xff] %v12064_v16  ;;  %v12071_v34 = vld [vmem:[#allocation6 + $0x668] sm:$0xff]  ;;  %v12073_v48 = vld [vmem:[#allocation6 + $0x678] sm:$0xff]  ;;  %v4328_v29 = vadd.f32 -1.4531521, %v4264_v56  ;;  %v4384_v59 = vmul.f32 %v11583_v40, %v4320_v22  ;;  %v12094_v22 = vpop.eup %8088 }
 0x66c   :  { %13371 = vst [vmem:[#allocation63_spill] sm:$0xff] %v12071_v34  ;;  %13372 = vst [vmem:[#allocation42_spill] sm:$0xff] %v12075_v42  ;;  %v4272_v58 = vmul.f32 1.0614054, %v11739_v27  ;;  %v4327_v8 = vadd.f32 -1.4531521, %v4263_v21  ;;  %v12098_v16 = vpop.eup %8090 }
 0x66d   :  { %v4271_v55 = vmul.f32 1.0614054, %v11708_v33  ;;  %v12086_v54 = vld [vmem:[#allocation6 + $0x660] sm:$0xff]  ;;  %v12088_v42 = vld [vmem:[#allocation6 + $0x670] sm:$0xff]  ;;  %v4392_v56 = vmul.f32 %v11647_v4, %v4328_v29  ;;  %v4280_v41 = vmul.f32 1.0614054, %v11830_v49  ;;  %v12103_v23 = vpop.eup %8092  ;;  %7445 = vmatpush1.bf16.msra.mxu1 %v7444_v12 }
 0x66e   :  { %13373 = vst [vmem:[#allocation48_spill] sm:$0xff] %v12086_v54  ;;  %13374 = vst [vmem:[#allocation83_spill] sm:$0xff] %v12088_v42  ;;  %v4336_v62 = vadd.f32 -1.4531521, %v4272_v58  ;;  %v4448_v21 = vadd.f32 1.4214138, %v4384_v59  ;;  %v4391_v0 = vmul.f32 %v11630_v25, %v4327_v8  ;;  %7447 = vmatprep.subr.bf16.mxu1 %v7446_v61  ;;  %v13377_v61 = vpack.c.bf16 %v12006_v51, %v12004_v10 }
 0x66f   :  { %v4335_v39 = vadd.f32 -1.4531521, %v4271_v55  ;;  %v4279_v52 = vmul.f32 1.0614054, %v11798_v1  ;;  %13375 = vst [vmem:[#allocation40_spill] sm:$0xff] %v12098_v16  ;;  %13376 = vst [vmem:[#allocation39_spill] sm:$0xff] %v12103_v23  ;;  %v12107_v55 = vpop.eup %8094 }
 0x670   :  { %v4456_v17 = vadd.f32 1.4214138, %v4392_v56  ;;  %v4400_v29 = vmul.f32 %v11739_v27, %v4336_v62  ;;  %v4344_v58 = vadd.f32 -1.4531521, %v4280_v41  ;;  %v4512_v53 = vmul.f32 %v11583_v40, %v4448_v21  ;;  %v12112_v34 = vpop.eup %8096 }
 0x671   :  { %v4455_v44 = vadd.f32 1.4214138, %v4391_v0  ;;  %v4399_v59 = vmul.f32 %v11708_v33, %v4335_v39  ;;  %v4343_v8 = vadd.f32 -1.4531521, %v4279_v52  ;;  %v4288_v41 = vmul.f32 1.0614054, %v11891_v11  ;;  %7449 = vmatpush1.bf16.msra.mxu1 %v13377_v61 }
 0x672   :  { %v4520_v16 = vmul.f32 %v11647_v4, %v4456_v17  ;;  %v4464_v56 = vadd.f32 1.4214138, %v4400_v29  ;;  %v4408_v62 = vmul.f32 %v11830_v49, %v4344_v58  ;;  %v4576_v46 = vadd.f32 -0.28449672, %v4512_v53 }
 0x673   :  { %v4519_v21 = vmul.f32 %v11630_v25, %v4455_v44  ;;  %v4463_v0 = vadd.f32 1.4214138, %v4399_v59  ;;  %v4407_v39 = vmul.f32 %v11798_v1, %v4343_v8  ;;  %v4352_v54 = vadd.f32 -1.4531521, %v4288_v41 }
 0x674   :  { %v4584_v52 = vadd.f32 -0.28449672, %v4520_v16  ;;  %v4528_v23 = vmul.f32 %v11739_v27, %v4464_v56  ;;  %v4472_v12 = vadd.f32 1.4214138, %v4408_v62  ;;  %v4640_v17 = vmul.f32 %v11583_v40, %v4576_v46 }
 0x675   :  { %v4583_v29 = vadd.f32 -0.28449672, %v4519_v21  ;;  %v4527_v58 = vmul.f32 %v11708_v33, %v4463_v0  ;;  %v4471_v42 = vadd.f32 1.4214138, %v4407_v39  ;;  %v4416_v16 = vmul.f32 %v11891_v11, %v4352_v54 }
 0x676   :  { %v4648_v53 = vmul.f32 %v11647_v4, %v4584_v52  ;;  %v4592_v44 = vadd.f32 -0.28449672, %v4528_v23  ;;  %v4536_v59 = vmul.f32 %v11830_v49, %v4472_v12  ;;  %v4704_v8 = vadd.f32 0.2548296, %v4640_v17 }
 0x677   :  { %v13378_v56 = vpack.c.bf16 %v12021_v15, %v12008_v36  ;;  %v4647_v46 = vmul.f32 %v11630_v25, %v4583_v29  ;;  %v4591_v62 = vadd.f32 -0.28449672, %v4527_v58  ;;  %v4535_v41 = vmul.f32 %v11798_v1, %v4471_v42 }
 0x678   :  { %v4712_v21 = vadd.f32 0.2548296, %v4648_v53  ;;  %v4656_v10 = vmul.f32 %v11739_v27, %v4592_v44  ;;  %v4600_v51 = vadd.f32 -0.28449672, %v4536_v59  ;;  %v4480_v0 = vadd.f32 1.4214138, %v4416_v16 }
 0x679   :  { %7451 = vmatprep.subr.bf16.mxu1 %v13378_v56  ;;  %v4768_v23 = vmul.f32 %v11583_v40, %v4704_v8  ;;  %v4711_v39 = vadd.f32 0.2548296, %v4647_v46  ;;  %v4655_v54 = vmul.f32 %v11708_v33, %v4591_v62  ;;  %v4599_v52 = vadd.f32 -0.28449672, %v4535_v41  ;;  %v13379_v41 = vld [vmem:[#allocation31_spill] sm:$0xff] }
 0x67a   :  { %v4776_v12 = vmul.f32 %v11647_v4, %v4712_v21  ;;  %v4720_v36 = vadd.f32 0.2548296, %v4656_v10  ;;  %v4664_v15 = vmul.f32 %v11830_v49, %v4600_v51  ;;  %v4544_v17 = vmul.f32 %v11891_v11, %v4480_v0 }
 0x67b   :  { %v5088_v42 = vmul.f32 %v11593_v57, %v4768_v23  ;;  %v4775_v29 = vmul.f32 %v11630_v25, %v4711_v39  ;;  %v4719_v58 = vadd.f32 0.2548296, %v4655_v54  ;;  %v4663_v61 = vmul.f32 %v11798_v1, %v4599_v52  ;;  %v13380_v39 = vld [vmem:[#allocation103_spill] sm:$0xff] }
 0x67c   :  { %v5096_v40 = vmul.f32 %v11668_v63, %v4776_v12  ;;  %v4784_v53 = vmul.f32 %v11739_v27, %v4720_v36  ;;  %v4728_v44 = vadd.f32 0.2548296, %v4664_v15  ;;  %v4608_v59 = vadd.f32 -0.28449672, %v4544_v17  ;;  %v12155_v15 = vld [vmem:[#allocation6 + $0x688] sm:$0xff] }
 0x67d   :  { %v5152_v16 = vsub.f32 1.0, %v5088_v42  ;;  %v5095_v4 = vmul.f32 %v11639_v37, %v4775_v29  ;;  %v4783_v8 = vmul.f32 %v11708_v33, %v4719_v58  ;;  %v4727_v56 = vadd.f32 0.2548296, %v4663_v61 }
 0x67e   :  { %v5160_v46 = vsub.f32 1.0, %v5096_v40  ;;  %v5104_v57 = vmul.f32 %v11751_v31, %v4784_v53  ;;  %v4792_v25 = vmul.f32 %v11830_v49, %v4728_v44  ;;  %v4672_v62 = vmul.f32 %v11891_v11, %v4608_v59  ;;  %v12164_v40 = vld [vmem:[#allocation6 + $0x680] sm:$0xff]  ;;  %v13382_v53 = vld [vmem:[#allocation17_spill] sm:$0xff] }
 0x67f   :  { %v5216_v21 = vmul.f32 %v5152_v16, %v13379_v41  ;;  %v5159_v63 = vsub.f32 1.0, %v5095_v4  ;;  %v5103_v27 = vmul.f32 %v11718_v2, %v4783_v8  ;;  %v4791_v10 = vmul.f32 %v11798_v1, %v4727_v56  ;;  %v12157_v1 = vld [vmem:[#allocation6 + $0x698] sm:$0xff]  ;;  %v12172_v4 = vld [vmem:[#allocation6 + $0x6a8] sm:$0xff] }
 0x680   :  { %v5224_v51 = vmul.f32 %v5160_v46, %v11613_v7  ;;  %v5168_v37 = vsub.f32 1.0, %v5104_v57  ;;  %v5112_v33 = vmul.f32 %v11851_v47, %v4792_v25  ;;  %v4736_v0 = vadd.f32 0.2548296, %v4672_v62  ;;  %v13381_v7 = vld [vmem:[#allocation47_spill] sm:$0xff]  ;;  %v12181_v57 = vld [vmem:[#allocation6 + $0x6b0] sm:$0xff]  ;;  %v12190_v41 = vld [vmem:[#allocation6 + $0x6c8] sm:$0xff] }
 0x681   :  { %v5280_v23 = vadd.f32 1.0, %v5216_v21  ;;  %v5223_v31 = vmul.f32 %v5159_v63, %v13380_v39  ;;  %v5167_v54 = vsub.f32 1.0, %v5103_v27  ;;  %v5111_v49 = vmul.f32 %v11809_v18, %v4791_v10  ;;  %v12179_v46 = vld [vmem:[#allocation6 + $0x6a0] sm:$0xff]  ;;  %v12192_v21 = vld [vmem:[#allocation6 + $0x6d8] sm:$0xff] }
 0x682   :  { %v5288_v52 = vadd.f32 1.0, %v5224_v51  ;;  %v5232_v12 = vmul.f32 %v5168_v37, %v11681_v45  ;;  %v5176_v36 = vsub.f32 1.0, %v5112_v33  ;;  %v4800_v2 = vmul.f32 %v11891_v11, %v4736_v0  ;;  %v12166_v11 = vld [vmem:[#allocation6 + $0x690] sm:$0xff]  ;;  %v12201_v10 = vld [vmem:[#allocation6 + $0x6c0] sm:$0xff] }
 0x683   :  { %v5344_v17 = vmul.f32 %v5280_v23, %v13381_v7  ;;  %v5287_v47 = vadd.f32 1.0, %v5223_v31  ;;  %v5231_v42 = vmul.f32 %v5167_v54, %v11652_v9  ;;  %v5175_v29 = vsub.f32 1.0, %v5111_v49  ;;  %v12203_v51 = vld [vmem:[#allocation6 + $0x6d0] sm:$0xff]  ;;  %v13386_v23 = vld [vmem:[#allocation52_spill] sm:$0xff]  ;;  %v12215_v49 = vld [vmem:[#allocation6 + $0x6f8] sm:$0xff] }
 0x684   :  { %v5352_v58 = vmul.f32 %v5288_v52, %v11581_v30  ;;  %v5296_v61 = vadd.f32 1.0, %v5232_v12  ;;  %v5240_v18 = vmul.f32 %v5176_v36, %v11759_v13  ;;  %v5120_v45 = vmul.f32 %v11900_v6, %v4800_v2  ;;  %v12174_v30 = vld [vmem:[#allocation6 + $0x6b8] sm:$0xff]  ;;  %v13385_v37 = vld [vmem:[#allocation101_spill] sm:$0xff] }
 0x685   :  { %5961 = vmatprep.mubr.f32.mxu1 %v5344_v17  ;;  %v5351_v44 = vmul.f32 %v5287_v47, %v13382_v53  ;;  %v5295_v59 = vadd.f32 1.0, %v5231_v42  ;;  %v5239_v16 = vmul.f32 %v5175_v29, %v11724_v24  ;;  %v7466_v9 = vpack.c.bf16 %v12157_v1, %v12155_v15  ;;  %v12213_v54 = vld [vmem:[#allocation6 + $0x6e8] sm:$0xff]  ;;  %v12224_v42 = vld [vmem:[#allocation6 + $0x6e0] sm:$0xff]  ;;  %v12226_v29 = vld [vmem:[#allocation6 + $0x6f0] sm:$0xff] }
 0x686   :  { %5962 = vmatmul.mubr.f32.vlgmr.msra.gmra.mrb[32].mxu1 %v11686_v14  ;;  %v5360_v13 = vmul.f32 %v5296_v61, %v11660_v35  ;;  %v5304_v6 = vadd.f32 1.0, %v5240_v18  ;;  %v5184_v8 = vsub.f32 1.0, %v5120_v45  ;;  %v4287_v56 = vmul.f32 1.0614054, %v11864_v32  ;;  %v13387_v52 = vld [vmem:[#allocation97_spill] sm:$0xff]  ;;  %v13391_v61 = vld [vmem:[#allocation70_spill] sm:$0xff] }
 0x687   :  { %v13383_v24 = vpack.c.bf16 %v12025_v28, %v12023_v5  ;;  %5967 = vmatprep.mubr.f32.mxu1 %v5352_v58  ;;  %v5359_v25 = vmul.f32 %v5295_v59, %v11626_v60  ;;  %v5303_v62 = vadd.f32 1.0, %v5239_v16  ;;  %v7468_v14 = vpack.c.bf16 %v12166_v11, %v12164_v40  ;;  %v13389_v7 = vld [vmem:[#allocation57_spill] sm:$0xff]  ;;  %v13390_v58 = vld [vmem:[#allocation87_spill] sm:$0xff]  ;;  %v13393_v45 = vld [vmem:[#allocation12_spill] sm:$0xff] }
 0x688   :  { %v4296_v35 = vmul.f32 1.0614054, %v11935_v3  ;;  %v13384_v63 = vpack.c.bf16 %v12036_v19, %v12034_v20  ;;  %v5368_v5 = vmul.f32 %v5304_v6, %v11729_v26  ;;  %v5248_v28 = vmul.f32 %v5184_v8, %v11839_v43 }
 0x689   :  { %7453 = vmatpush1.bf16.msra.mxu1 %v13383_v24  ;;  %v4351_v27 = vadd.f32 -1.4531521, %v4287_v56  ;;  %v7470_v60 = vpack.c.bf16 %v12174_v30, %v12172_v4  ;;  %v5367_v33 = vmul.f32 %v5303_v62, %v13385_v37  ;;  %v4295_v39 = vmul.f32 1.0614054, %v13386_v23  ;;  %v13405_v4 = vld [vmem:[#allocation23_spill] sm:$0xff] }
 0x68a   :  { %7455 = vmatprep.subr.bf16.mxu1 %v13384_v63  ;;  %v4360_v0 = vadd.f32 -1.4531521, %v4296_v35  ;;  %v7472_v20 = vpack.c.bf16 %v12181_v57, %v12179_v46  ;;  %5968 = vmatmul.mubr.f32.gmra.mrb[34].mxu1 %v5351_v44  ;;  %v5312_v26 = vadd.f32 1.0, %v5248_v28  ;;  %v4304_v19 = vmul.f32 1.0614054, %v12040_v50  ;;  %v13394_v63 = vld [vmem:[#allocation43_spill] sm:$0xff] }
 0x68b   :  { %v4415_v43 = vmul.f32 %v11864_v32, %v4351_v27  ;;  %v7474_v31 = vpack.c.bf16 %v12192_v21, %v12190_v41  ;;  %v13388_v12 = vpack.c.bf16 %v12047_v38, %v13387_v52  ;;  %5973 = vmatprep.mubr.f32.mxu1 %v5360_v13  ;;  %v4359_v2 = vadd.f32 -1.4531521, %v4295_v39  ;;  %v13395_v28 = vld [vmem:[#allocation72_spill] sm:$0xff]  ;;  %v13410_v41 = vld [vmem:[#allocation75_spill] sm:$0xff] }
 0x68c   :  { %v4424_v36 = vmul.f32 %v11935_v3, %v4360_v0  ;;  %v4303_v17 = vmul.f32 1.0614054, %v13389_v7  ;;  %v7476_v47 = vpack.c.bf16 %v12203_v51, %v12201_v10  ;;  %v13392_v18 = vpack.c.bf16 %v13390_v58, %v13391_v61  ;;  %v13399_v58 = vld [vmem:[#allocation79_spill] sm:$0xff] }
 0x68d   :  { %7457 = vmatpush1.bf16.msra.mxu1 %v13388_v12  ;;  %v5376_v38 = vmul.f32 %v5312_v26, %v13393_v45  ;;  %v4479_v53 = vadd.f32 1.4214138, %v4415_v43  ;;  %v4368_v44 = vadd.f32 -1.4531521, %v4304_v19  ;;  %v4312_v59 = vmul.f32 1.0614054, %v12107_v55 }
 0x68e   :  { %7459 = vmatprep.subr.bf16.mxu1 %v13392_v18  ;;  %v4488_v16 = vadd.f32 1.4214138, %v4424_v36  ;;  %v4423_v13 = vmul.f32 %v13386_v23, %v4359_v2  ;;  %v4367_v6 = vadd.f32 -1.4531521, %v4303_v17  ;;  %v7478_v8 = vpack.c.bf16 %v12215_v49, %v12213_v54  ;;  %5974 = vmatmul.mubr.f32.gmra.mrb[36].mxu1 %v5359_v25  ;;  %v13397_v26 = vld [vmem:[#allocation63_spill] sm:$0xff]  ;;  %v13416_v49 = vld [vmem:[#allocation84_spill] sm:$0xff] }
 0x68f   :  { %v4543_v56 = vmul.f32 %v11864_v32, %v4479_v53  ;;  %v4432_v24 = vmul.f32 %v12040_v50, %v4368_v44  ;;  %v4376_v62 = vadd.f32 -1.4531521, %v4312_v59  ;;  %v4311_v35 = vmul.f32 1.0614054, %v12094_v22  ;;  %5979 = vmatprep.mubr.f32.mxu1 %v5368_v5  ;;  %v13400_v44 = vld [vmem:[#allocation83_spill] sm:$0xff]  ;;  %v13401_v59 = vld [vmem:[#allocation48_spill] sm:$0xff] }
 0x690   :  { %v13396_v27 = vpack.c.bf16 %v13394_v63, %v13395_v28  ;;  %v4552_v37 = vmul.f32 %v11935_v3, %v4488_v16  ;;  %v4487_v0 = vadd.f32 1.4214138, %v4423_v13  ;;  %v4431_v39 = vmul.f32 %v13389_v7, %v4367_v6 }
 0x691   :  { %v7480_v25 = vpack.c.bf16 %v12226_v29, %v12224_v42  ;;  %v13398_v43 = vpack.c.bf16 %v12073_v48, %v13397_v26  ;;  %v4607_v19 = vadd.f32 -0.28449672, %v4543_v56  ;;  %v4496_v52 = vadd.f32 1.4214138, %v4432_v24  ;;  %v12341_v42 = vld [vmem:[#allocation6 + $0x788] sm:$0xff]  ;;  %v12343_v29 = vld [vmem:[#allocation6 + $0x798] sm:$0xff] }
 0x692   :  { %7461 = vmatpush1.bf16.msra.mxu1 %v13396_v27  ;;  %v4440_v12 = vmul.f32 %v12107_v55, %v4376_v62  ;;  %v4375_v36 = vadd.f32 -1.4531521, %v4311_v35  ;;  %v4616_v2 = vadd.f32 -0.28449672, %v4552_v37  ;;  %v4551_v5 = vmul.f32 %v13386_v23, %v4487_v0 }
 0x693   :  { %7463 = vmatprep.subr.bf16.mxu1 %v13398_v43  ;;  %v4495_v17 = vadd.f32 1.4214138, %v4431_v39  ;;  %v4258_v61 = vmul.f32 1.0614054, %v13399_v58  ;;  %5980 = vmatmul.mubr.f32.gmra.mrb[38].mxu1 %v5367_v33  ;;  %v4671_v18 = vmul.f32 %v11864_v32, %v4607_v19  ;;  %v4560_v45 = vmul.f32 %v12040_v50, %v4496_v52  ;;  %v13403_v52 = vld [vmem:[#allocation37_spill] sm:$0xff] }
 0x694   :  { %v4504_v53 = vadd.f32 1.4214138, %v4440_v12  ;;  %v4439_v48 = vmul.f32 %v12094_v22, %v4375_v36  ;;  %v13402_v16 = vpack.c.bf16 %v13400_v44, %v13401_v59  ;;  %5985 = vmatprep.mubr.f32.mxu1 %v5376_v38  ;;  %v4680_v13 = vmul.f32 %v11935_v3, %v4616_v2  ;;  %v13407_v59 = vld [vmem:[#allocation42_spill] sm:$0xff] }
 0x695   :  { %v4615_v6 = vadd.f32 -0.28449672, %v4551_v5  ;;  %v4559_v56 = vmul.f32 %v13389_v7, %v4495_v17  ;;  %v4322_v24 = vadd.f32 -1.4531521, %v4258_v61  ;;  %v4735_v33 = vadd.f32 0.2548296, %v4671_v18 }
 0x696   :  { %7465 = vmatpush1.bf16.msra.mxu1 %v13402_v16  ;;  %v4624_v62 = vadd.f32 -0.28449672, %v4560_v45  ;;  %v4568_v35 = vmul.f32 %v12107_v55, %v4504_v53  ;;  %v4503_v63 = vadd.f32 1.4214138, %v4439_v48  ;;  %v4744_v28 = vadd.f32 0.2548296, %v4680_v13 }
 0x697   :  { %7467 = vmatprep.subr.bf16.mxu1 %v7466_v9  ;;  %v4679_v27 = vmul.f32 %v13386_v23, %v4615_v6  ;;  %v4623_v37 = vadd.f32 -0.28449672, %v4559_v56  ;;  %v4386_v38 = vmul.f32 %v13399_v58, %v4322_v24  ;;  %v4799_v0 = vmul.f32 %v11864_v32, %v4735_v33  ;;  %v13404_v5 = vld [vmem:[#allocation82_spill] sm:$0xff]  ;;  %v13408_v6 = vld [vmem:[#allocation64_spill] sm:$0xff] }
 0x698   :  { %v4688_v39 = vmul.f32 %v12040_v50, %v4624_v62  ;;  %v4632_v26 = vadd.f32 -0.28449672, %v4568_v35  ;;  %v4567_v43 = vmul.f32 %v12094_v22, %v4503_v63  ;;  %v4808_v15 = vmul.f32 %v11935_v3, %v4744_v28  ;;  %v13409_v33 = vld [vmem:[#allocation104_spill] sm:$0xff] }
 0x699   :  { %v4743_v1 = vadd.f32 0.2548296, %v4679_v27  ;;  %v4687_v9 = vmul.f32 %v13389_v7, %v4623_v37  ;;  %v4450_v19 = vadd.f32 1.4214138, %v4386_v38  ;;  %v5119_v12 = vmul.f32 %v13403_v52, %v4799_v0  ;;  %v5628_v63 = vld [vmem:[#allocation6 + $0x708] sm:$0xff]  ;;  %v5630_v27 = vld [vmem:[#allocation6 + $0x718] sm:$0xff] }
 0x69a   :  { %7469 = vmatpush1.bf16.msra.mxu1 %v7468_v14  ;;  %v4752_v32 = vadd.f32 0.2548296, %v4688_v39  ;;  %v4696_v36 = vmul.f32 %v12107_v55, %v4632_v26  ;;  %v4631_v2 = vadd.f32 -0.28449672, %v4567_v43  ;;  %v5128_v17 = vmul.f32 %v13404_v5, %v4808_v15  ;;  %v5627_v37 = vld [vmem:[#allocation6 + $0x700] sm:$0xff]  ;;  %v13411_v38 = vld [vmem:[#allocation90_spill] sm:$0xff] }
 0x69b   :  { %7471 = vmatprep.subr.bf16.mxu1 %v7470_v60  ;;  %v4807_v40 = vmul.f32 %v13386_v23, %v4743_v1  ;;  %v4751_v11 = vadd.f32 0.2548296, %v4687_v9  ;;  %v4514_v3 = vmul.f32 %v13399_v58, %v4450_v19  ;;  %v5183_v14 = vsub.f32 1.0, %v5119_v12  ;;  %v13406_v23 = vld [vmem:[#allocation89_spill] sm:$0xff]  ;;  %v5634_v9 = vld [vmem:[#allocation6 + $0x738] sm:$0xff] }
 0x69c   :  { %v4816_v61 = vmul.f32 %v12040_v50, %v4752_v32  ;;  %v4760_v18 = vadd.f32 0.2548296, %v4696_v36  ;;  %v4695_v45 = vmul.f32 %v12094_v22, %v4631_v2  ;;  %v5192_v53 = vsub.f32 1.0, %v5128_v17  ;;  %v13412_v39 = vld [vmem:[#allocation29_spill] sm:$0xff]  ;;  %v12313_v32 = vld [vmem:[#allocation6 + $0x720] sm:$0xff] }
 0x69d   :  { %v5127_v30 = vmul.f32 %v13405_v4, %v4807_v40  ;;  %v4815_v60 = vmul.f32 %v13389_v7, %v4751_v11  ;;  %v4578_v48 = vadd.f32 -0.28449672, %v4514_v3  ;;  %v5247_v44 = vmul.f32 %v5183_v14, %v13406_v23  ;;  %v5629_v15 = vld [vmem:[#allocation6 + $0x710] sm:$0xff]  ;;  %v5632_v1 = vld [vmem:[#allocation6 + $0x728] sm:$0xff]  ;;  %v12320_v40 = vld [vmem:[#allocation6 + $0x758] sm:$0xff] }
 0x69e   :  { %7473 = vmatpush1.bf16.msra.mxu1 %v7472_v20  ;;  %v5136_v16 = vmul.f32 %v13407_v59, %v4816_v61  ;;  %v4824_v50 = vmul.f32 %v12107_v55, %v4760_v18  ;;  %v4759_v13 = vadd.f32 0.2548296, %v4695_v45  ;;  %v5256_v56 = vmul.f32 %v5192_v53, %v13408_v6  ;;  %v13414_v19 = vld [vmem:[#allocation25_spill] sm:$0xff]  ;;  %v12322_v11 = vld [vmem:[#allocation6 + $0x740] sm:$0xff] }
 0x69f   :  { %7475 = vmatprep.subr.bf16.mxu1 %v7474_v31  ;;  %v5191_v24 = vsub.f32 1.0, %v5127_v30  ;;  %v5135_v46 = vmul.f32 %v13409_v33, %v4815_v60  ;;  %v4642_v57 = vmul.f32 %v13399_v58, %v4578_v48  ;;  %v5311_v20 = vadd.f32 1.0, %v5247_v44  ;;  %v12315_v36 = vld [vmem:[#allocation6 + $0x730] sm:$0xff]  ;;  %v12317_v2 = vld [vmem:[#allocation6 + $0x748] sm:$0xff]  ;;  %v12333_v30 = vld [vmem:[#allocation6 + $0x778] sm:$0xff] }
 0x6a0   :  { %v5200_v7 = vsub.f32 1.0, %v5136_v16  ;;  %v5144_v62 = vmul.f32 %v12112_v34, %v4824_v50  ;;  %v4823_v35 = vmul.f32 %v12094_v22, %v4759_v13  ;;  %v5320_v28 = vadd.f32 1.0, %v5256_v56  ;;  %v13413_v34 = vld [vmem:[#allocation40_spill] sm:$0xff]  ;;  %v12324_v3 = vld [vmem:[#allocation6 + $0x750] sm:$0xff]  ;;  %v13420_v59 = vld [vmem:[#allocation55_spill] sm:$0xff] }
 0x6a1   :  { %v5255_v21 = vmul.f32 %v5191_v24, %v13410_v41  ;;  %v5199_v31 = vsub.f32 1.0, %v5135_v46  ;;  %v4706_v55 = vadd.f32 0.2548296, %v4642_v57  ;;  %v5375_v0 = vmul.f32 %v5311_v20, %v13411_v38  ;;  %v13418_v18 = vld [vmem:[#allocation100_spill] sm:$0xff]  ;;  %v13419_v48 = vld [vmem:[#allocation38_spill] sm:$0xff]  ;;  %v13422_v56 = vld [vmem:[#allocation73_spill] sm:$0xff] }
 0x6a2   :  { %7477 = vmatpush1.bf16.msra.mxu1 %v7476_v47  ;;  %v5264_v26 = vmul.f32 %v5200_v7, %v13412_v39  ;;  %v5208_v43 = vsub.f32 1.0, %v5144_v62  ;;  %v5143_v22 = vmul.f32 %v13413_v34, %v4823_v35  ;;  %v5384_v10 = vmul.f32 %v5320_v28, %v13414_v19  ;;  %v13415_v47 = vld [vmem:[#allocation20_spill] sm:$0xff]  ;;  %v12339_v13 = vld [vmem:[#allocation6 + $0x770] sm:$0xff]  ;;  %v13423_v24 = vld [vmem:[#allocation107_spill] sm:$0xff] }
 0x6a3   :  { %7479 = vmatprep.subr.bf16.mxu1 %v7478_v8  ;;  %v5319_v51 = vadd.f32 1.0, %v5255_v21  ;;  %v5263_v52 = vmul.f32 %v5199_v31, %v13415_v47  ;;  %v4770_v12 = vmul.f32 %v13399_v58, %v4706_v55  ;;  %5986 = vmatmul.mubr.f32.gmra.mrb[40].mxu1 %v5375_v0  ;;  %v7482_v17 = vpack.c.bf16 %v5630_v27, %v5628_v63  ;;  %v13417_v58 = vld [vmem:[#allocation24_spill] sm:$0xff]  ;;  %v12356_v7 = vld [vmem:[#allocation6 + $0x790] sm:$0xff]  ;;  %v12365_v31 = vld [vmem:[#allocation6 + $0x7b8] sm:$0xff] }
 0x6a4   :  { %v5328_v54 = vadd.f32 1.0, %v5264_v26  ;;  %v5272_v8 = vmul.f32 %v5208_v43, %v13416_v49  ;;  %v5207_v5 = vsub.f32 1.0, %v5143_v22  ;;  %5991 = vmatprep.mubr.f32.mxu1 %v5384_v10  ;;  %v7484_v53 = vpack.c.bf16 %v5629_v15, %v5627_v37  ;;  %v12331_v4 = vld [vmem:[#allocation6 + $0x768] sm:$0xff]  ;;  %v12335_v60 = vld [vmem:[#allocation6 + $0x760] sm:$0xff]  ;;  %v12369_v27 = vld [vmem:[#allocation6 + $0x7b0] sm:$0xff] }
 0x6a5   :  { %v5383_v14 = vmul.f32 %v5319_v51, %v13417_v58  ;;  %v5327_v61 = vadd.f32 1.0, %v5263_v52  ;;  %v5090_v45 = vmul.f32 %v13418_v18, %v4770_v12  ;;  %v7486_v50 = vpack.c.bf16 %v5634_v9, %v5632_v1  ;;  %v12354_v20 = vld [vmem:[#allocation6 + $0x780] sm:$0xff]  ;;  %v12358_v62 = vld [vmem:[#allocation6 + $0x7a8] sm:$0xff]  ;;  %v13426_v37 = vld [vmem:[#allocation98_spill] sm:$0xff] }
 0x6a6   :  { %7481 = vmatpush1.bf16.msra.mxu1 %v7480_v25  ;;  %v5392_v23 = vmul.f32 %v5328_v54, %v13419_v48  ;;  %v5336_v44 = vadd.f32 1.0, %v5272_v8  ;;  %v5271_v16 = vmul.f32 %v5207_v5, %v13420_v59  ;;  %v13421_v25 = vld [vmem:[#allocation91_spill] sm:$0xff]  ;;  %8098 = vrcp.f32 %v13422_v56  ;;  %v13425_v35 = vld [vmem:[#allocation33_spill] sm:$0xff]  ;;  %v13428_v22 = vld [vmem:[#allocation86_spill] sm:$0xff] }
 0x6a7   :  { %7483 = vmatprep.subr.bf16.mxu1 %v7482_v17  ;;  %v12346_v6 = vmul.f32 1.442695, %v13421_v25  ;;  %v13424_v33 = vsub.f32 0.0, %v13423_v24  ;;  %v5154_v57 = vsub.f32 1.0, %v5090_v45  ;;  %5992 = vmatmul.mubr.f32.gmra.mrb[42].mxu1 %v5383_v14  ;;  %v5391_v63 = vmul.f32 %v5327_v61, %v13425_v35  ;;  %v12367_v55 = vld [vmem:[#allocation6 + $0x7a0] sm:$0xff]  ;;  %v13427_v0 = vld [vmem:[#allocation45_spill] sm:$0xff] }
 0x6a8   :  { %v5335_v28 = vadd.f32 1.0, %v5271_v16  ;;  %v7488_v41 = vpack.c.bf16 %v12315_v36, %v12313_v32  ;;  %v7490_v21 = vpack.c.bf16 %v12320_v40, %v12317_v2  ;;  %5997 = vmatprep.mubr.f32.mxu1 %v5392_v23  ;;  %v5400_v38 = vmul.f32 %v5336_v44, %v13426_v37  ;;  %v12375_v43 = vld [vmem:[#allocation6 + $0x7c8] sm:$0xff]  ;;  %v12377_v34 = vld [vmem:[#allocation6 + $0x7d8] sm:$0xff]  ;;  %v12387_v47 = vld [vmem:[#allocation6 + $0x7c0] sm:$0xff] }
 0x6a9   :  { %v12352_v46 = vmul.f32 %v13424_v33, %v13423_v24  ;;  %v5218_v39 = vmul.f32 %v5154_v57, %v13427_v0  ;;  %v7492_v26 = vpack.c.bf16 %v12324_v3, %v12322_v11  ;;  %v4266_v15 = vmul.f32 1.0614054, %v13428_v22  ;;  %v13429_v1 = vld [vmem:[#allocation102_spill] sm:$0xff]  ;;  %v13430_v8 = vld [vmem:[#allocation105_spill] sm:$0xff]  ;;  %v13431_v17 = vld [vmem:[#allocation96_spill] sm:$0xff] }
 0x6aa   :  { %7485 = vmatpush1.bf16.msra.mxu1 %v7484_v53  ;;  %v5399_v9 = vmul.f32 %v5335_v28, %v13429_v1  ;;  %v7494_v19 = vpack.c.bf16 %v12333_v30, %v12331_v4  ;;  %v7496_v10 = vpack.c.bf16 %v12339_v13, %v12335_v60  ;;  %v7498_v51 = vpack.c.bf16 %v12343_v29, %v12341_v42  ;;  %v12389_v52 = vld [vmem:[#allocation6 + $0x7d0] sm:$0xff]  ;;  %v13433_v14 = vld [vmem:[#allocation32_spill] sm:$0xff]  ;;  %v13436_v23 = vld [vmem:[#allocation35_spill] sm:$0xff] }
 0x6ab   :  { %7487 = vmatprep.subr.bf16.mxu1 %v7486_v50  ;;  %v5282_v12 = vadd.f32 1.0, %v5218_v39  ;;  %v7500_v32 = vpack.c.bf16 %v12356_v7, %v12354_v20  ;;  %v7502_v36 = vpack.c.bf16 %v12365_v31, %v12358_v62  ;;  %v7504_v2 = vpack.c.bf16 %v12369_v27, %v12367_v55  ;;  %5998 = vmatmul.mubr.f32.gmra.mrb[44].mxu1 %v5391_v63  ;;  %v13432_v3 = vld [vmem:[#allocation65_spill] sm:$0xff]  ;;  %v13434_v18 = vld [vmem:[#allocation94_spill] sm:$0xff]  ;;  %v13435_v60 = vld [vmem:[#allocation28_spill] sm:$0xff] }
 0x6ac   :  { %v7506_v54 = vpack.c.bf16 %v12377_v34, %v12375_v43  ;;  %v4330_v49 = vadd.f32 -1.4531521, %v4266_v15  ;;  %v4265_v5 = vmul.f32 1.0614054, %v13430_v8  ;;  %v4274_v40 = vmul.f32 1.0614054, %v13431_v17  ;;  %6003 = vmatprep.mubr.f32.mxu1 %v5400_v38 }
 0x6ad   :  { %v7508_v11 = vpack.c.bf16 %v12389_v52, %v12387_v47  ;;  %v4273_v58 = vmul.f32 1.0614054, %v13432_v3  ;;  %v4282_v61 = vmul.f32 1.0614054, %v13433_v14  ;;  %v4281_v45 = vmul.f32 1.0614054, %v13434_v18 }
 0x6ae   :  { %7489 = vmatpush1.bf16.msra.mxu1 %v7488_v41  ;;  %v4394_v53 = vmul.f32 %v13428_v22, %v4330_v49  ;;  %v4329_v4 = vadd.f32 -1.4531521, %v4265_v5  ;;  %v4338_v30 = vadd.f32 -1.4531521, %v4274_v40  ;;  %v4290_v48 = vmul.f32 1.0614054, %v13435_v60 }
 0x6af   :  { %7491 = vmatprep.subr.bf16.mxu1 %v7490_v21  ;;  %v5346_v44 = vmul.f32 %v5282_v12, %v13436_v23  ;;  %v4337_v59 = vadd.f32 -1.4531521, %v4273_v58  ;;  %v4346_v16 = vadd.f32 -1.4531521, %v4282_v61  ;;  %v4345_v50 = vadd.f32 -1.4531521, %v4281_v45  ;;  %6004 = vmatmul.mubr.f32.gmra.mrb[46].mxu1 %v5399_v9 }
 0x6b0   :  { %v12409_v13 = vld [vmem:[#allocation6 + $0x7e8] sm:$0xff]  ;;  %v12411_v42 = vld [vmem:[#allocation6 + $0x7f8] sm:$0xff]  ;;  %v4458_v29 = vadd.f32 1.4214138, %v4394_v53  ;;  %v4393_v25 = vmul.f32 %v13430_v8, %v4329_v4  ;;  %v4402_v56 = vmul.f32 %v13431_v17, %v4338_v30  ;;  %v4354_v24 = vadd.f32 -1.4531521, %v4290_v48  ;;  %v12415_v33 = vpop.eup %8098 }
 0x6b1   :  { %6074 = vmatprep.mubr.f32.mxu1 %v5346_v44  ;;  %v4401_v57 = vmul.f32 %v13432_v3, %v4337_v59  ;;  %v4410_v35 = vmul.f32 %v13433_v14, %v4346_v16  ;;  %v4409_v63 = vmul.f32 %v13434_v18, %v4345_v50  ;;  %v13437_v28 = vld [vmem:[#allocation27_spill] sm:$0xff]  ;;  %v7510_v39 = vpack.c.bf16 %v12411_v42, %v12409_v13  ;;  %v5657_v31 = vld [vmem:[#allocation6 + $0x7f0] sm:$0xff] }
 0x6b2   :  { %7493 = vmatpush1.bf16.msra.mxu1 %v7492_v26  ;;  %v4289_v41 = vmul.f32 1.0614054, %v13437_v28  ;;  %v4522_v21 = vmul.f32 %v13428_v22, %v4458_v29  ;;  %v4457_v37 = vadd.f32 1.4214138, %v4393_v25  ;;  %v4466_v38 = vadd.f32 1.4214138, %v4402_v56 }
 0x6b3   :  { %7495 = vmatprep.subr.bf16.mxu1 %v7494_v19  ;;  %v4418_v0 = vmul.f32 %v13435_v60, %v4354_v24  ;;  %v4465_v15 = vadd.f32 1.4214138, %v4401_v57  ;;  %v4474_v26 = vadd.f32 1.4214138, %v4410_v35  ;;  %v4473_v1 = vadd.f32 1.4214138, %v4409_v63 }
 0x6b4   :  { %v4586_v9 = vadd.f32 -0.28449672, %v4522_v21  ;;  %v4521_v12 = vmul.f32 %v13430_v8, %v4457_v37  ;;  %v4530_v49 = vmul.f32 %v13431_v17, %v4466_v38  ;;  %v4353_v61 = vadd.f32 -1.4531521, %v4289_v41  ;;  %v13438_v25 = vld [vmem:[#allocation76_spill] sm:$0xff]  ;;  %v13439_v35 = vld [vmem:[#allocation22_spill] sm:$0xff] }
 0x6b5   :  { %v4482_v5 = vadd.f32 1.4214138, %v4418_v0  ;;  %v4529_v19 = vmul.f32 %v13432_v3, %v4465_v15  ;;  %v4538_v40 = vmul.f32 %v13433_v14, %v4474_v26  ;;  %v4537_v58 = vmul.f32 %v13434_v18, %v4473_v1  ;;  %v13440_v0 = vld [vmem:[#allocation81_spill] sm:$0xff]  ;;  %v5655_v62 = vld [vmem:[#allocation6 + $0x7e0] sm:$0xff]  ;;  %v13443_v27 = vld [vmem:[#allocation46_spill] sm:$0xff] }
 0x6b6   :  { %7497 = vmatpush1.bf16.msra.mxu1 %v7496_v10  ;;  %v4650_v45 = vmul.f32 %v13428_v22, %v4586_v9  ;;  %v4585_v53 = vadd.f32 -0.28449672, %v4521_v12  ;;  %v4594_v4 = vadd.f32 -0.28449672, %v4530_v49  ;;  %v4417_v59 = vmul.f32 %v13437_v28, %v4353_v61  ;;  %v13445_v61 = vld [vmem:[#allocation51_spill] sm:$0xff]  ;;  %v13452_v52 = vld [vmem:[#allocation61_spill] sm:$0xff] }
 0x6b7   :  { %7499 = vmatprep.subr.bf16.mxu1 %v7498_v51  ;;  %v4546_v30 = vmul.f32 %v13435_v60, %v4482_v5  ;;  %v4593_v48 = vadd.f32 -0.28449672, %v4529_v19  ;;  %v4602_v23 = vadd.f32 -0.28449672, %v4538_v40  ;;  %v4601_v44 = vadd.f32 -0.28449672, %v4537_v58 }
 0x6b8   :  { %v4714_v10 = vadd.f32 0.2548296, %v4650_v45  ;;  %v4649_v16 = vmul.f32 %v13430_v8, %v4585_v53  ;;  %v4658_v50 = vmul.f32 %v13431_v17, %v4594_v4  ;;  %vm3906_vm10 = vcmp.ge.f32.partialorder %v13438_v25, 0.0  ;;  %v13442_v19 = vld [vmem:[#allocation80_spill] sm:$0xff]  ;;  %v13444_v58 = vld [vmem:[#allocation67_spill] sm:$0xff]  ;;  %v13458_v25 = vld [vmem:[#allocation109_spill] sm:$0xff] }
 0x6b9   :  { %v4610_v29 = vadd.f32 -0.28449672, %v4546_v30  ;;  %v4657_v51 = vmul.f32 %v13432_v3, %v4593_v48  ;;  %v4666_v56 = vmul.f32 %v13433_v14, %v4602_v23  ;;  %v4665_v24 = vmul.f32 %v13434_v18, %v4601_v44  ;;  %v13446_v53 = vld [vmem:[#allocation108_spill] sm:$0xff]  ;;  %v13455_v42 = vld [vmem:[#allocation59_spill] sm:$0xff] }
 0x6ba   :  { %7501 = vmatpush1.bf16.msra.mxu1 %v7500_v32  ;;  %v4481_v57 = vadd.f32 1.4214138, %v4417_v59  ;;  %vm3913_vm11 = vcmp.ge.f32.partialorder %v13439_v35, 0.0  ;;  %v4778_v63 = vmul.f32 %v13428_v22, %v4714_v10  ;;  %v4713_v41 = vadd.f32 0.2548296, %v4649_v16  ;;  %v13448_v44 = vld [vmem:[#allocation88_spill] sm:$0xff] }
 0x6bb   :  { %7503 = vmatprep.subr.bf16.mxu1 %v7502_v36  ;;  %v4722_v21 = vadd.f32 0.2548296, %v4658_v50  ;;  %v4674_v20 = vmul.f32 %v13435_v60, %v4610_v29  ;;  %v4721_v7 = vadd.f32 0.2548296, %v4657_v51  ;;  %v4730_v32 = vadd.f32 0.2548296, %v4666_v56 }
 0x6bc   :  { %v4729_v37 = vadd.f32 0.2548296, %v4665_v24  ;;  %v4545_v38 = vmul.f32 %v13437_v28, %v4481_v57  ;;  %v5098_v15 = vmul.f32 %v13440_v0, %v4778_v63  ;;  %v4777_v26 = vmul.f32 %v13430_v8, %v4713_v41  ;;  %v13449_v10 = vld [vmem:[#allocation13_spill] sm:$0xff]  ;;  %v13453_v57 = vld [vmem:[#allocation66_spill] sm:$0xff]  ;;  %v13460_v35 = vld [vmem:[#allocation19_spill] sm:$0xff] }
 0x6bd   :  { %v4786_v1 = vmul.f32 %v13431_v17, %v4722_v21  ;;  %v4738_v9 = vadd.f32 0.2548296, %v4674_v20  ;;  %v4785_v22 = vmul.f32 %v13432_v3, %v4721_v7  ;;  %v4794_v36 = vmul.f32 %v13433_v14, %v4730_v32  ;;  %v13441_v17 = vld [vmem:[#allocation54_spill] sm:$0xff]  ;;  %v13450_v29 = vld [vmem:[#allocation53_spill] sm:$0xff]  ;;  %v13457_v32 = vld [vmem:[#allocation92_spill] sm:$0xff] }
 0x6be   :  { %7505 = vmatpush1.bf16.msra.mxu1 %v7504_v2  ;;  %v4793_v12 = vmul.f32 %v13434_v18, %v4729_v37  ;;  %v4609_v49 = vadd.f32 -0.28449672, %v4545_v38  ;;  %v5162_v8 = vsub.f32 1.0, %v5098_v15  ;;  %v5097_v5 = vmul.f32 %v13441_v17, %v4777_v26  ;;  %v13451_v56 = vld [vmem:[#allocation49_spill] sm:$0xff]  ;;  %v13456_v20 = vld [vmem:[#allocation26_spill] sm:$0xff]  ;;  %v13459_v15 = vld [vmem:[#allocation95_spill] sm:$0xff] }
 0x6bf   :  { %7507 = vmatprep.subr.bf16.mxu1 %v7506_v54  ;;  %v5106_v40 = vmul.f32 %v13442_v19, %v4786_v1  ;;  %v4802_v55 = vmul.f32 %v13435_v60, %v4738_v9  ;;  %v5105_v2 = vmul.f32 %v13443_v27, %v4785_v22  ;;  %v5114_v3 = vmul.f32 %v13444_v58, %v4794_v36  ;;  %v13447_v60 = vld [vmem:[#allocation34_spill] sm:$0xff]  ;;  %v13464_v19 = vld [vmem:[#allocation39_spill] sm:$0xff] }
 0x6c0   :  { %v5113_v14 = vmul.f32 %v13445_v61, %v4793_v12  ;;  %v4673_v18 = vmul.f32 %v13437_v28, %v4609_v49  ;;  %v7512_v45 = vpack.c.bf16 %v5657_v31, %v5655_v62  ;;  %v5226_v4 = vmul.f32 %v5162_v8, %v13446_v53  ;;  %v13462_v36 = vld [vmem:[#allocation78_spill] sm:$0xff]  ;;  %v13463_v8 = vld [vmem:[#allocation85_spill] sm:$0xff]  ;;  %v13466_v61 = vld [vmem:[#allocation68_spill] sm:$0xff] }
 0x6c1   :  { %v5161_v43 = vsub.f32 1.0, %v5097_v5  ;;  %v5170_v34 = vsub.f32 1.0, %v5106_v40  ;;  %v5169_v54 = vsub.f32 1.0, %v5105_v2  ;;  %v5178_v30 = vsub.f32 1.0, %v5114_v3 }
 0x6c2   :  { %7509 = vmatpush1.bf16.msra.mxu1 %v7508_v11  ;;  %v5122_v48 = vmul.f32 %v13447_v60, %v4802_v55  ;;  %v4737_v23 = vadd.f32 0.2548296, %v4673_v18  ;;  %8100 = vpow2.f32 %v13448_v44  ;;  %v5290_v59 = vadd.f32 1.0, %v5226_v4  ;;  %v13465_v55 = vld [vmem:[#allocation41_spill] sm:$0xff]  ;;  %v13467_v60 = vld [vmem:[#allocation58_spill] sm:$0xff] }
 0x6c3   :  { %7511 = vmatprep.subr.bf16.mxu1 %v7510_v39  ;;  %v5225_v16 = vmul.f32 %v5161_v43, %v13449_v10  ;;  %v5177_v50 = vsub.f32 1.0, %v5113_v14  ;;  %v5234_v51 = vmul.f32 %v5170_v34, %v13450_v29  ;;  %v5233_v47 = vmul.f32 %v5169_v54, %v13451_v56 }
 0x6c4   :  { %v5242_v11 = vmul.f32 %v5178_v30, %v13452_v52  ;;  %v4801_v24 = vmul.f32 %v13437_v28, %v4737_v23  ;;  %v12483_v63 = vmul.f32 0.5, %v13453_v57  ;;  %v13454_v41 = vmov -1.0   ;;  %v13468_v23 = vld [vmem:[#allocation30_spill] sm:$0xff] }
 0x6c5   :  { %v3970_v13 = vsel %vm3906_vm10, 1.0, %v13454_v41  ;;  %8102 = vpow2.f32 %v13455_v42  ;;  %v5081_v39 = vmul.f32 1.442695, %v12352_v46  ;;  %v12493_v21 = vsel %vm3913_vm11, 1.0, %v13454_v41  ;;  %v13469_v52 = vld [vmem:[#allocation106_spill] sm:$0xff] }
 0x6c6   :  { %8104 = vpow2.f32 %v12346_v6  ;;  %7513 = vmatpush1.bf16.msra.mxu1 %v7512_v45  ;;  %v5186_v28 = vsub.f32 1.0, %v5122_v48  ;;  %v5121_v7 = vmul.f32 %v13456_v20, %v4801_v24  ;;  %v5354_v37 = vmul.f32 %v5290_v59, %v13457_v32  ;;  %v13461_v6 = vld [vmem:[#allocation16_spill] sm:$0xff] }
 0x6c7   :  { %v5289_v38 = vadd.f32 1.0, %v5225_v16  ;;  %v5241_v0 = vmul.f32 %v5177_v50, %v13458_v25  ;;  %v4298_v26 = vmul.f32 1.0614054, %v13459_v15  ;;  %v5298_v1 = vadd.f32 1.0, %v5234_v51 }
 0x6c8   :  { %v5297_v46 = vadd.f32 1.0, %v5233_v47  ;;  %v5306_v9 = vadd.f32 1.0, %v5242_v11  ;;  %v5185_v62 = vsub.f32 1.0, %v5121_v7  ;;  %8106 = vpow2.f32 %v5081_v39  ;;  %v13470_v7 = vld [vmem:[#allocation71_spill] sm:$0xff] }
 0x6c9   :  { %6075 = vmatmul.mubr.f32.vlgmr.msra.gmra.mrb[32].mxu1 %v13460_v35  ;;  %v4362_v31 = vadd.f32 -1.4531521, %v4298_v26  ;;  %v4297_v22 = vmul.f32 1.0614054, %v13461_v6  ;;  %v4306_v12 = vmul.f32 1.0614054, %v13462_v36  ;;  %v5250_v49 = vmul.f32 %v5186_v28, %v3970_v13 }
 0x6ca   :  { %6080 = vmatprep.mubr.f32.mxu1 %v5354_v37  ;;  %v4305_v17 = vmul.f32 1.0614054, %v13463_v8  ;;  %v4314_v5 = vmul.f32 1.0614054, %v12415_v33  ;;  %v4313_v40 = vmul.f32 1.0614054, %v13464_v19  ;;  %v5353_v27 = vmul.f32 %v5289_v38, %v13465_v55 }
 0x6cb   :  { %v4426_v2 = vmul.f32 %v13459_v15, %v4362_v31  ;;  %v4361_v58 = vadd.f32 -1.4531521, %v4297_v22  ;;  %v4370_v3 = vadd.f32 -1.4531521, %v4306_v12  ;;  %v5362_v14 = vmul.f32 %v5298_v1, %v13466_v61  ;;  %v13472_v55 = vld [vmem:[#allocation36_spill] sm:$0xff] }
 0x6cc   :  { %v5305_v18 = vadd.f32 1.0, %v5241_v0  ;;  %v4369_v45 = vadd.f32 -1.4531521, %v4305_v17  ;;  %v4378_v53 = vadd.f32 -1.4531521, %v4314_v5  ;;  %v12509_v4 = vpop.eup %8100  ;;  %v5361_v48 = vmul.f32 %v5297_v46, %v13467_v60 }
 0x6cd   :  { %6081 = vmatmul.mubr.f32.gmra.mrb[34].mxu1 %v5353_v27  ;;  %v4490_v43 = vadd.f32 1.4214138, %v4426_v2  ;;  %v4425_v34 = vmul.f32 %v13461_v6, %v4361_v58  ;;  %v4434_v54 = vmul.f32 %v13462_v36, %v4370_v3  ;;  %v4377_v30 = vadd.f32 -1.4531521, %v4313_v40  ;;  %v13473_v27 = vld [vmem:[#allocation74_spill] sm:$0xff] }
 0x6ce   :  { %6086 = vmatprep.mubr.f32.mxu1 %v5362_v14  ;;  %v5249_v44 = vmul.f32 %v5185_v62, %v13468_v23  ;;  %v4433_v59 = vmul.f32 %v13463_v8, %v4369_v45  ;;  %v4442_v10 = vmul.f32 %v12415_v33, %v4378_v53  ;;  %v5370_v11 = vmul.f32 %v5306_v9, %v13469_v52  ;;  %v13471_v62 = vld [vmem:[#allocation50_spill] sm:$0xff]  ;;  %v13475_v53 = vld [vmem:[#allocation44_spill] sm:$0xff] }
 0x6cf   :  { %v8103_v16 = vpop.eup %8102  ;;  %v4554_v50 = vmul.f32 %v13459_v15, %v4490_v43  ;;  %v4489_v29 = vadd.f32 1.4214138, %v4425_v34  ;;  %v4498_v51 = vadd.f32 1.4214138, %v4434_v54  ;;  %v4441_v56 = vmul.f32 %v13464_v19, %v4377_v30  ;;  %v13474_v45 = vld [vmem:[#allocation18_spill] sm:$0xff]  ;;  %v13476_v54 = vld [vmem:[#allocation69_spill] sm:$0xff] }
 0x6d0   :  { %v8105_v47 = vpop.eup %8104  ;;  %v5314_v24 = vadd.f32 1.0, %v5250_v49  ;;  %v4497_v57 = vadd.f32 1.4214138, %v4433_v59  ;;  %v4506_v13 = vadd.f32 1.4214138, %v4442_v10  ;;  %v5369_v32 = vmul.f32 %v5305_v18, %v13470_v7 }
 0x6d1   :  { %6087 = vmatmul.mubr.f32.gmra.mrb[36].mxu1 %v5361_v48  ;;  %v4618_v42 = vadd.f32 -0.28449672, %v4554_v50  ;;  %v4553_v39 = vmul.f32 %v13461_v6, %v4489_v29  ;;  %v4562_v28 = vmul.f32 %v13462_v36, %v4498_v51  ;;  %v4505_v20 = vadd.f32 1.4214138, %v4441_v56  ;;  %v13478_v29 = vld [vmem:[#allocation93_spill] sm:$0xff] }
 0x6d2   :  { %6092 = vmatprep.mubr.f32.mxu1 %v5370_v11  ;;  %v5313_v37 = vadd.f32 1.0, %v5249_v44  ;;  %v4561_v38 = vmul.f32 %v13463_v8, %v4497_v57  ;;  %v4570_v25 = vmul.f32 %v12415_v33, %v4506_v13  ;;  %v8107_v0 = vpop.eup %8106  ;;  %v3786_v35 = vmul.f32 0.5, %v13471_v62  ;;  %v13477_v44 = vld [vmem:[#allocation21_spill] sm:$0xff] }
 0x6d3   :  { %v4682_v26 = vmul.f32 %v13459_v15, %v4618_v42  ;;  %v4617_v1 = vadd.f32 -0.28449672, %v4553_v39  ;;  %v4626_v46 = vadd.f32 -0.28449672, %v4562_v28  ;;  %v4569_v9 = vmul.f32 %v13464_v19, %v4505_v20  ;;  %v13479_v42 = vld [vmem:[#allocation14_spill] sm:$0xff] }
 0x6d4   :  { %v5378_v31 = vmul.f32 %v5314_v24, %v12483_v63  ;;  %v4625_v22 = vadd.f32 -0.28449672, %v4561_v38  ;;  %v4634_v12 = vadd.f32 -0.28449672, %v4570_v25  ;;  %vm3914_vm12 = vcmp.ge.f32.partialorder %v13472_v55, 0.0  ;;  %v13480_v38 = vld [vmem:[#allocation99_spill] sm:$0xff] }
 0x6d5   :  { %6093 = vmatmul.mubr.f32.gmra.mrb[38].mxu1 %v5369_v32  ;;  %v4746_v49 = vadd.f32 0.2548296, %v4682_v26  ;;  %v4681_v17 = vmul.f32 %v13461_v6, %v4617_v1  ;;  %v4690_v5 = vmul.f32 %v13462_v36, %v4626_v46  ;;  %v4633_v40 = vadd.f32 -0.28449672, %v4569_v9  ;;  %v13481_v1 = vld [vmem:[#allocation60_spill] sm:$0xff] }
 0x6d6   :  { %6098 = vmatprep.mubr.f32.mxu1 %v5378_v31  ;;  %v5377_v2 = vmul.f32 %v5313_v37, %v13473_v27  ;;  %v4689_v58 = vmul.f32 %v13463_v8, %v4625_v22  ;;  %v4698_v3 = vmul.f32 %v12415_v33, %v4634_v12  ;;  %vm3921_vm13 = vcmp.ge.f32.partialorder %v13474_v45, 0.0 }
 0x6d7   :  { %v4810_v63 = vmul.f32 %v13459_v15, %v4746_v49  ;;  %v4745_v61 = vadd.f32 0.2548296, %v4681_v17  ;;  %v4754_v14 = vadd.f32 0.2548296, %v4690_v5  ;;  %v4697_v18 = vmul.f32 %v13464_v19, %v4633_v40  ;;  %v13483_v5 = vld [vmem:[#allocation62_spill] sm:$0xff] }
 0x6d8   :  { %vm3922_vm14 = vcmp.ge.f32.partialorder %v13475_v53, 0.0  ;;  %v4753_v43 = vadd.f32 0.2548296, %v4689_v58  ;;  %v4762_v34 = vadd.f32 0.2548296, %v4698_v3  ;;  %v3978_v15 = vsel %vm3914_vm12, 1.0, %v13454_v41 }
 0x6d9   :  { %6099 = vmatmul.mubr.f32.gmra.mrb[40].mxu1 %v5377_v2  ;;  %v5130_v30 = vmul.f32 %v13476_v54, %v4810_v63  ;;  %v4809_v60 = vmul.f32 %v13461_v6, %v4745_v61  ;;  %v4818_v48 = vmul.f32 %v13462_v36, %v4754_v14  ;;  %v4761_v23 = vadd.f32 0.2548296, %v4697_v18  ;;  %v13484_v2 = vld [vmem:[#allocation77_spill] sm:$0xff]  ;;  %v5659_v3 = vld [vmem:[#allocation7] sm:$0x3] }
 0x6da   :  { %vm3930_vm15 = vcmp.ge.f32.partialorder %v13477_v44, 0.0  ;;  %v4817_v59 = vmul.f32 %v13463_v8, %v4753_v43  ;;  %v4826_v10 = vmul.f32 %v12415_v33, %v4762_v34  ;;  %v3985_v6 = vsel %vm3921_vm13, 1.0, %v13454_v41  ;;  %v13485_v63 = vld [vmem:[#allocation15_spill] sm:$0xff] }
 0x6db   :  { %v5194_v50 = vsub.f32 1.0, %v5130_v30  ;;  %v5129_v51 = vmul.f32 %v13478_v29, %v4809_v60  ;;  %v5138_v56 = vmul.f32 %v8103_v16, %v4818_v48  ;;  %v4825_v52 = vmul.f32 %v13464_v19, %v4761_v23  ;;  %v8109_v30 = vld [vmem:[%s12688_s0] sm:$0xff]  ;;  %v8110_v48 = vld [vmem:[%s12688_s0 + $0x8] sm:$0xff] }
 0x6dc   :  { %v3986_v36 = vsel %vm3922_vm14, 1.0, %v13454_v41  ;;  %v5137_v11 = vmul.f32 %v12509_v4, %v4817_v59  ;;  %v5146_v24 = vmul.f32 %v8107_v0, %v4826_v10  ;;  %vm3929_vm0 = vcmp.ge.f32.partialorder %v13479_v42, 0.0 }
 0x6dd   :  { %v5258_v8 = vmul.f32 %v5194_v50, %v3978_v15  ;;  %v5193_v57 = vsub.f32 1.0, %v5129_v51  ;;  %v5202_v33 = vsub.f32 1.0, %v5138_v56  ;;  %v5145_v13 = vmul.f32 %v8105_v47, %v4825_v52  ;;  %v8111_v50 = vld [vmem:[%s12688_s0 + $0x10] sm:$0xff]  ;;  %v8112_v51 = vld [vmem:[%s12688_s0 + $0x18] sm:$0xff] }
 0x6de   :  { %v3994_v19 = vsel %vm3930_vm15, 1.0, %v13454_v41  ;;  %v5201_v16 = vsub.f32 1.0, %v5137_v11  ;;  %v5210_v39 = vsub.f32 1.0, %v5146_v24  ;;  %v3785_v25 = vmul.f32 0.5, %v13480_v38  ;;  %v8113_v24 = vld [vmem:[%s12688_s0 + $0x20] sm:$0xff] }
 0x6df   :  { %v5322_v28 = vadd.f32 1.0, %v5258_v8  ;;  %v5257_v20 = vmul.f32 %v5193_v57, %v12493_v21  ;;  %v5266_v7 = vmul.f32 %v5202_v33, %v3986_v36  ;;  %v5209_v32 = vsub.f32 1.0, %v5145_v13  ;;  %v13482_v21 = vld [vmem:[#allocation56_spill] sm:$0xff] }
 0x6e0   :  { %v5265_v37 = vmul.f32 %v5201_v16, %v3985_v6  ;;  %v5274_v4 = vmul.f32 %v5210_v39, %v3994_v19  ;;  %v3794_v46 = vmul.f32 0.5, %v13481_v1  ;;  %v3993_v9 = vsel %vm3929_vm0, 1.0, %v13454_v41  ;;  %v8114_v57 = vld [vmem:[%s12688_s0 + $0x28] sm:$0xff]  ;;  %v8115_v39 = vld [vmem:[%s12688_s0 + $0x30] sm:$0xff] }
 0x6e1   :  { %v5386_v0 = vmul.f32 %v5322_v28, %v3786_v35  ;;  %v5321_v26 = vadd.f32 1.0, %v5257_v20  ;;  %v5330_v47 = vadd.f32 1.0, %v5266_v7  ;;  %v5273_v22 = vmul.f32 %v5209_v32, %v3993_v9  ;;  %v8116_v20 = vld [vmem:[%s12688_s0 + $0x38] sm:$0xff] }
 0x6e2   :  { %v5329_v31 = vadd.f32 1.0, %v5265_v37  ;;  %v5338_v49 = vadd.f32 1.0, %v5274_v4  ;;  %v3793_v17 = vmul.f32 0.5, %v13482_v21  ;;  %v3802_v40 = vmul.f32 0.5, %v13483_v5 }
 0x6e3   :  { %6104 = vmatprep.mubr.f32.mxu1 %v5386_v0  ;;  %v5385_v62 = vmul.f32 %v5321_v26, %v3785_v25  ;;  %v5394_v12 = vmul.f32 %v5330_v47, %v3794_v46  ;;  %v5337_v35 = vadd.f32 1.0, %v5273_v22  ;;  %v3801_v58 = vmul.f32 0.5, %v13484_v2  ;;  %v8117_v25 = vld [vmem:[%s12688_s0 + $0x40] sm:$0xff]  ;;  %v8118_v26 = vld [vmem:[%s12688_s0 + $0x48] sm:$0xff] }
 0x6e4   :  { %v5393_v55 = vmul.f32 %v5329_v31, %v3793_v17  ;;  %v5402_v27 = vmul.f32 %v5338_v49, %v3802_v40  ;;  %v13486_v61 = vsub.s32 0, %v13485_v63  ;;  %v13487_v18 = vsub.s32 1, %v13485_v63  ;;  %v8119_v31 = vld [vmem:[%s12688_s0 + $0x50] sm:$0xff] }
 0x6e5   :  { %6105 = vmatmul.mubr.f32.gmra.mrb[42].mxu1 %v5385_v62  ;;  %v5401_v41 = vmul.f32 %v5337_v35, %v3801_v58 }
 0x6e6   :  { %6110 = vmatprep.mubr.f32.mxu1 %v5394_v12  ;;  %v12570_v14 = vrot.slane %v5659_v3, %v13486_v61  ;;  %v12574_v45 = vrot.slane %v5659_v3, %v13487_v18  ;;  %v8120_v12 = vld [vmem:[%s12688_s0 + $0x58] sm:$0xff]  ;;  %v8123_v61 = vld [vmem:[%s12688_s0 + $0x70] sm:$0xff] }
 0x6e9   :  { %6111 = vmatmul.mubr.f32.gmra.mrb[44].mxu1 %v5393_v55  ;;  %v8121_v55 = vld [vmem:[%s12688_s0 + $0x60] sm:$0xff] }
 0x6ea   :  { %6116 = vmatprep.mubr.f32.mxu1 %v5402_v27  ;;  %v8122_v27 = vld [vmem:[%s12688_s0 + $0x68] sm:$0xff] }
 0x6ed   :  { %6117 = vmatmul.mubr.f32.gmra.mrb[46].mxu1 %v5401_v41 }
 0x79c   :  { %v6076_v53 = vpop.f32.mrb[32].mxu1 }
 0x79d   :  { %v7578_v43 = vadd.f32 %v6076_v53, %v12570_v14  ;;  %v6078_v34 = vpop.f32.mrb[33].mxu1  ;;  %v8124_v53 = vld [vmem:[%s12688_s0 + $0x78] sm:$0xff] }
 0x79e   :  { %v7579_v54 = vadd.f32 %v6078_v34, %v12574_v45 }
 0x79f   :  { %v6123_v60 = vadd.f32 %v8109_v30, %v7578_v43 }
 0x7a0   :  { %v6124_v23 = vadd.f32 %v8110_v48, %v7579_v54  ;;  %v6082_v15 = vpop.f32.mrb[34].mxu1 }
 0x7a1   :  { %6139 = vst [vmem:[%s12694_s6] sm:$0xff] %v6123_v60  ;;  %v7580_v44 = vadd.f32 %v6082_v15, %v12570_v14  ;;  %v6084_v59 = vpop.f32.mrb[35].mxu1 }
 0x7a2   :  { %6140 = vst [vmem:[%s12694_s6 + $0x8] sm:$0xff] %v6124_v23  ;;  %v7581_v10 = vadd.f32 %v6084_v59, %v12574_v45 }
 0x7a3   :  { %v6125_v29 = vadd.f32 %v8111_v50, %v7580_v44 }
 0x7a4   :  { %v6126_v56 = vadd.f32 %v8112_v51, %v7581_v10  ;;  %v6088_v52 = vpop.f32.mrb[36].mxu1 }
 0x7a5   :  { %6141 = vst [vmem:[%s12694_s6 + $0x10] sm:$0xff] %v6125_v29  ;;  %v7582_v6 = vadd.f32 %v6088_v52, %v12570_v14  ;;  %v6090_v36 = vpop.f32.mrb[37].mxu1 }
 0x7a6   :  { %6142 = vst [vmem:[%s12694_s6 + $0x18] sm:$0xff] %v6126_v56  ;;  %v7583_v11 = vadd.f32 %v6090_v36, %v12574_v45 }
 0x7a7   :  { %v6127_v8 = vadd.f32 %v8113_v24, %v7582_v6 }
 0x7a8   :  { %v6128_v33 = vadd.f32 %v8114_v57, %v7583_v11  ;;  %v6094_v13 = vpop.f32.mrb[38].mxu1 }
 0x7a9   :  { %6143 = vst [vmem:[%s12694_s6 + $0x20] sm:$0xff] %v6127_v8  ;;  %v7584_v42 = vadd.f32 %v6094_v13, %v12570_v14  ;;  %v6096_v19 = vpop.f32.mrb[39].mxu1 }
 0x7aa   :  { %6144 = vst [vmem:[%s12694_s6 + $0x28] sm:$0xff] %v6128_v33  ;;  %v7585_v16 = vadd.f32 %v6096_v19, %v12574_v45 }
 0x7ab   :  { %v6129_v28 = vadd.f32 %v8115_v39, %v7584_v42 }
 0x7ac   :  { %v6130_v7 = vadd.f32 %v8116_v20, %v7585_v16  ;;  %v6100_v32 = vpop.f32.mrb[40].mxu1 }
 0x7ad   :  { %6145 = vst [vmem:[%s12694_s6 + $0x30] sm:$0xff] %v6129_v28  ;;  %v7586_v37 = vadd.f32 %v6100_v32, %v12570_v14  ;;  %v6102_v4 = vpop.f32.mrb[41].mxu1 }
 0x7ae   :  { %6146 = vst [vmem:[%s12694_s6 + $0x38] sm:$0xff] %v6130_v7  ;;  %v7587_v38 = vadd.f32 %v6102_v4, %v12574_v45 }
 0x7af   :  { %v6131_v0 = vadd.f32 %v8117_v25, %v7586_v37 }
 0x7b0   :  { %v6132_v47 = vadd.f32 %v8118_v26, %v7587_v38 }
 0x7b1   :  { %6147 = vst [vmem:[%s12694_s6 + $0x40] sm:$0xff] %v6131_v0 }
 0x7b2   :  { %6148 = vst [vmem:[%s12694_s6 + $0x48] sm:$0xff] %v6132_v47 }
 0x7b8   :  { %v6106_v1 = vpop.f32.mrb[42].mxu1 }
 0x7b9   :  { %v7588_v46 = vadd.f32 %v6106_v1, %v12570_v14  ;;  %v6108_v9 = vpop.f32.mrb[43].mxu1 }
 0x7ba   :  { %v7589_v62 = vadd.f32 %v6108_v9, %v12574_v45 }
 0x7bb   :  { %v6133_v22 = vadd.f32 %v8119_v31, %v7588_v46 }
 0x7bc   :  { %v6134_v49 = vadd.f32 %v8120_v12, %v7589_v62  ;;  %v6112_v21 = vpop.f32.mrb[44].mxu1 }
 0x7bd   :  { %6149 = vst [vmem:[%s12694_s6 + $0x50] sm:$0xff] %v6133_v22  ;;  %v7590_v17 = vadd.f32 %v6112_v21, %v12570_v14  ;;  %v6114_v5 = vpop.f32.mrb[45].mxu1 }
 0x7be   :  { %6150 = vst [vmem:[%s12694_s6 + $0x58] sm:$0xff] %v6134_v49  ;;  %v7591_v40 = vadd.f32 %v6114_v5, %v12574_v45 }
 0x7bf   :  { %v6135_v35 = vadd.f32 %v8121_v55, %v7590_v17 }
 0x7c0   :  { %v6136_v2 = vadd.f32 %v8122_v27, %v7591_v40  ;;  %v6118_v58 = vpop.f32.mrb[46].mxu1 }
 0x7c1   :  { %6151 = vst [vmem:[%s12694_s6 + $0x60] sm:$0xff] %v6135_v35  ;;  %v7592_v41 = vadd.f32 %v6118_v58, %v12570_v14  ;;  %v6120_v3 = vpop.f32.mrb[47].mxu1 }
 0x7c2   :  { %6152 = vst [vmem:[%s12694_s6 + $0x68] sm:$0xff] %v6136_v2  ;;  %v7593_v63 = vadd.f32 %v6120_v3, %v12574_v45 }
 0x7c3   :  { %v6137_v18 = vadd.f32 %v8123_v61, %v7592_v41 }
 0x7c4   :  { %v6138_v43 = vadd.f32 %v8124_v53, %v7593_v63 }
 0x7c5   :  { %6153 = vst [vmem:[%s12694_s6 + $0x70] sm:$0xff] %v6137_v18 }
 0x7c6   :  { %6154 = vst [vmem:[%s12694_s6 + $0x78] sm:$0xff] %v6138_v43 }
 0x7c7   :  { %6159 = vsyncpa [#allocation3], 1 }
 0x7c8   :  { %6160 = vsyncpa [#allocation5], 1 }
 0x7c9   :  { %6161 = vsyncpa [#allocation8], 1 }

</bundles_post_ra>
